<compile_context>
chip_gen: v5e
topology: v5e:2x2
jax: 0.10.0
libtpu: 0.0.40
codegen_flags: <defaults>
</compile_context>

<pallas_src>
import functools

import jax
import jax.numpy as jnp
from jax.experimental import pallas as pl
from jax.experimental.pallas import tpu as pltpu


def _round_up(x, m):
    return ((x + m - 1) // m) * m


# ----------------------------------------------------------------------------
# Pallas kernels: one (TM, TN) output tile = full-K matmul (+bias) (+LeakyReLU)
# ----------------------------------------------------------------------------
def _matmul_act_kernel(p_ref, w_ref, o_ref, *, slope):
    acc = jnp.dot(p_ref[...], w_ref[...], preferred_element_type=jnp.float32)
    if slope is not None:                      # LeakyReLU: single VPU max
        acc = jnp.maximum(acc, slope * acc)
    o_ref[...] = acc.astype(o_ref.dtype)


def _matmul_bias_act_kernel(p_ref, w_ref, b_ref, o_ref, *, slope):
    acc = jnp.dot(p_ref[...], w_ref[...], preferred_element_type=jnp.float32)
    acc = acc + b_ref[...]                     # (1, TN) broadcast over rows
    if slope is not None:
        acc = jnp.maximum(acc, slope * acc)
    o_ref[...] = acc.astype(o_ref.dtype)


def _matmul_bias_act(patches, w2d_pad, bias_pad, slope, out_dtype):
    """(M, K) @ (K_pad, OC_pad) (+bias) (+LeakyReLU), tiled over (M, OC)."""
    M, K = patches.shape
    K_pad, N_pad = w2d_pad.shape

    M_pad = _round_up(M, 16)                   # bf16 packed-sublane multiple
    TM = M_pad if M_pad <= 256 else 256
    M_pad = _round_up(M_pad, TM)
    TN = 128                                   # lane-dense; v5e MXU / v7x megacore

    p_b = jnp.pad(patches, ((0, M_pad - M), (0, K_pad - K)))

    if bias_pad is not None:
        kernel = functools.partial(_matmul_bias_act_kernel, slope=slope)
        in_specs = [
            pl.BlockSpec((TM, K_pad), lambda i, j: (i, 0)),
            pl.BlockSpec((K_pad, TN), lambda i, j: (0, j)),
            pl.BlockSpec((1, TN), lambda i, j: (0, j)),
        ]
        args = (p_b, w2d_pad, bias_pad)
    else:
        kernel = functools.partial(_matmul_act_kernel, slope=slope)
        in_specs = [
            pl.BlockSpec((TM, K_pad), lambda i, j: (i, 0)),
            pl.BlockSpec((K_pad, TN), lambda i, j: (0, j)),
        ]
        args = (p_b, w2d_pad)

    out = pl.pallas_call(
        kernel,
        out_shape=jax.ShapeDtypeStruct((M_pad, N_pad), out_dtype),
        grid_spec=pltpu.PrefetchScalarGridSpec(
            num_scalar_prefetch=0,
            grid=(M_pad // TM, N_pad // TN),
            in_specs=in_specs,
            out_specs=pl.BlockSpec((TM, TN), lambda i, j: (i, j)),
        ),
        compiler_params=pltpu.CompilerParams(
            dimension_semantics=("parallel", "parallel"),
            vmem_limit_bytes=16 * 1024 * 1024,   # actual need < 8 MiB, margin left
        ),
    )(*args)
    return out


def conv2d_pallas(x_nhwc, layer):
    """Conv2d (PyTorch semantics) via im2col + the fused Pallas matmul."""
    N, H, W, C = x_nhwc.shape
    KH, KW = layer["kh"], layer["kw"]
    stride, padding = layer["stride"], layer["padding"]
    OC = layer["oc"]

    xp = jnp.pad(x_nhwc, ((0, 0), (padding, padding), (padding, padding), (0, 0)))
    OH = (H + 2 * padding - KH) // stride + 1
    OW = (W + 2 * padding - KW) // stride + 1

    # im2col (XLA glue, fused under jit): (kh, kw, c)-ordered patches.
    # TODO(synk): pull this tap gather in-kernel via an untiled VMEM block once
    # the in-kernel strided-slice/reshape lowering is validated.
    taps = []
    for kh in range(KH):
        for kw in range(KW):
            taps.append(xp[:, kh: kh + stride * OH: stride,
                              kw: kw + stride * OW: stride, :])
    patches = jnp.stack(taps, axis=3).reshape(N * OH * OW, KH * KW * C)

    out = _matmul_bias_act(patches, layer["w2d"], layer["bias"],
                           layer["slope"], layer["out_dtype"])
    return out[: N * OH * OW, :OC].reshape(N, OH, OW, OC)


# ----------------------------------------------------------------------------
# Parameter setup (deterministic, in-script)
# ----------------------------------------------------------------------------
def _kaiming_normal(key, shape):
    # nn.init.kaiming_normal_ default: fan_in, gain = sqrt(2)
    fan_in = shape[1] * shape[2] * shape[3]
    std = (2.0 / fan_in) ** 0.5
    return std * jax.random.normal(key, shape, dtype=jnp.float32)


def _spectral_normalize(w, key, n_iter=50):
    # TODO(synk): torch spectral_norm does one power iteration per forward with
    # a torch-RNG u; here we use a converged power iteration at init (same
    # normalization semantics: W / sigma_max), so values differ from torch.
    oc = w.shape[0]
    wm = w.reshape(oc, -1)
    u = jax.random.normal(key, (oc,), dtype=jnp.float32)
    u = u / (jnp.linalg.norm(u) + 1e-12)
    v = None
    for _ in range(n_iter):
        v = wm.T @ u
        v = v / (jnp.linalg.norm(v) + 1e-12)
        u = wm @ v
        u = u / (jnp.linalg.norm(u) + 1e-12)
    sigma = u @ (wm @ v)
    return w / sigma


def init_discriminator_params(seed=0):
    key = jax.random.PRNGKey(seed)
    ks = jax.random.split(key, 10)
    # (OC, IC, KH, KW) — mirrors nn.Conv2d weight shapes in the module.
    w1 = _spectral_normalize(_kaiming_normal(ks[0], (64, 3, 4, 4)), ks[5])
    w2 = _spectral_normalize(_kaiming_normal(ks[1], (128, 64, 4, 4)), ks[6])
    w3 = _spectral_normalize(_kaiming_normal(ks[2], (256, 128, 4, 4)), ks[7])
    w4 = _spectral_normalize(_kaiming_normal(ks[3], (512, 256, 4, 4)), ks[8])
    w5 = _kaiming_normal(ks[4], (1, 512, 4, 4))
    # Layers 1-4 are bias=False; layer 5 has bias=True, init_weights -> 0.01.
    b5 = jnp.full((1,), 0.01, dtype=jnp.float32)
    return dict(w1=w1, w2=w2, w3=w3, w4=w4, w5=w5, b5=b5)


def prepare_params(raw):
    """Hoisted weight prep: OIHW -> (K, OC), bf16 cast, zero-pad to 128-dense."""
    def prep(w_oihw, bias, slope, stride, padding, out_dtype):
        OC, IC, KH, KW = w_oihw.shape
        w2d = jnp.transpose(w_oihw, (2, 3, 1, 0)).reshape(KH * KW * IC, OC)
        K = w2d.shape[0]
        K_pad, OC_pad = _round_up(K, 128), _round_up(OC, 128)
        w2d = jnp.pad(w2d, ((0, K_pad - K), (0, OC_pad - OC))).astype(jnp.bfloat16)
        b = None
        if bias is not None:
            b = jnp.pad(bias.reshape(1, OC).astype(jnp.float32),
                        ((0, 0), (0, OC_pad - OC)))
        return dict(w2d=w2d, bias=b, oc=OC, kh=KH, kw=KW, stride=stride,
                    padding=padding, slope=slope, out_dtype=out_dtype)

    return [
        prep(raw["w1"], None,      0.2,  2, 1, jnp.bfloat16),
        prep(raw["w2"], None,      0.2,  2, 1, jnp.bfloat16),
        prep(raw["w3"], None,      0.2,  2, 1, jnp.bfloat16),
        prep(raw["w4"], None,      0.2,  1, 1, jnp.bfloat16),
        prep(raw["w5"], raw["b5"], None, 1, 1, jnp.float32),
    ]


# ----------------------------------------------------------------------------
# Forward pass (matches Discriminator.forward)
# ----------------------------------------------------------------------------
def make_discriminator(layers):
    @jax.jit
    def forward(x_nchw):
        x = jnp.transpose(x_nchw, (0, 2, 3, 1)).astype(jnp.bfloat16)  # NCHW->NHWC
        for layer in layers:
            x = conv2d_pallas(x, layer)
        return jnp.transpose(x, (0, 3, 1, 2))                         # NHWC->NCHW
    return forward


if __name__ == "__main__":
    raw = init_discriminator_params(seed=0)
    layers = prepare_params(raw)
    forward = make_discriminator(layers)

    key = jax.random.PRNGKey(0)
    # Small input consistent with the module: batch=2, 3 channels, 32x32
    # (spatial sizes through the net: 32 -> 16 -> 8 -> 4 -> 3 -> 2).
    x = jax.random.normal(key, (2, 3, 32, 32), dtype=jnp.float32)

    feat = forward(x)
    feat = jax.block_until_ready(feat)

    assert feat.shape == (2, 1, 2, 2), feat.shape
    assert bool(jnp.all(jnp.isfinite(feat)))
    print("KERNEL_OK")
</pallas_src>

<mosaic_0001>
module attributes {stable_mosaic.version = 11 : i64} {
  func.func @_matmul_act_kernel(%arg0: i32, %arg1: i32, %arg2: memref<256x128xbf16, #tpu.memory_space<vmem>>, %arg3: memref<128x128xbf16, #tpu.memory_space<vmem>>, %arg4: memref<256x128xbf16, #tpu.memory_space<vmem>>) attributes {dimension_semantics = [#tpu.dimension_semantics<parallel>, #tpu.dimension_semantics<parallel>], iteration_bounds = array<i64: 2, 1>, scalar_prefetch = 0 : i64, scratch_operands = 0 : i64, tpu.core_type = #tpu.core_type<tc>, window_params = [{transform_indices = @transform_0, window_bounds = array<i64: 256, 128>}, {transform_indices = @transform_1, window_bounds = array<i64: 128, 128>}, {transform_indices = @transform_2, window_bounds = array<i64: 256, 128>}]} {
    %c0 = arith.constant 0 : index
    %c0_0 = arith.constant 0 : index
    %0 = vector.load %arg2[%c0, %c0_0] : memref<256x128xbf16, #tpu.memory_space<vmem>>, vector<256x128xbf16>
    %c0_1 = arith.constant 0 : index
    %c0_2 = arith.constant 0 : index
    %1 = vector.load %arg3[%c0_1, %c0_2] : memref<128x128xbf16, #tpu.memory_space<vmem>>, vector<128x128xbf16>
    %cst = arith.constant dense<0.000000e+00> : vector<256x128xf32>
    %2 = tpu.matmul %0, %1, %cst {dimension_numbers = #tpu.dot_dimension_numbers<[1], [0], [0], [1], [0, 0, 1, 1], [], []>} : vector<256x128xbf16>, vector<128x128xbf16>, vector<256x128xf32> -> vector<256x128xf32>
    %cst_3 = arith.constant 2.000000e-01 : f32
    %3 = vector.broadcast %cst_3 : f32 to vector<256x128xf32>
    %4 = arith.mulf %3, %2 : vector<256x128xf32>
    %5 = arith.maximumf %2, %4 : vector<256x128xf32>
    %6 = arith.truncf %5 : vector<256x128xf32> to vector<256x128xbf16>
    %c0_4 = arith.constant 0 : index
    %c0_5 = arith.constant 0 : index
    %7 = vector.load %arg4[%c0_4, %c0_5] : memref<256x128xbf16, #tpu.memory_space<vmem>>, vector<256x128xbf16>
    tpu.vector_store %arg4[%c0_4, %c0_5], %6 {strides = array<i32>} : memref<256x128xbf16, #tpu.memory_space<vmem>>, vector<256x128xbf16>,
    return
  }
  func.func @transform_0(%arg0: i32, %arg1: i32) -> (i32, i32) {
    %c0_i32 = arith.constant 0 : i32
    %c0_i32_0 = arith.constant 0 : i32
    return %arg0, %c0_i32 : i32, i32
  }
  func.func @transform_1(%arg0: i32, %arg1: i32) -> (i32, i32) {
    %c0_i32 = arith.constant 0 : i32
    %c0_i32_0 = arith.constant 0 : i32
    return %c0_i32, %arg1 : i32, i32
  }
  func.func @transform_2(%arg0: i32, %arg1: i32) -> (i32, i32) {
    %c0_i32 = arith.constant 0 : i32
    return %arg0, %arg1 : i32, i32
  }
}

module attributes {stable_mosaic.version = 11 : i64} {
  func.func @_matmul_act_kernel(%arg0: i32, %arg1: i32, %arg2: memref<128x1024xbf16, #tpu.memory_space<vmem>>, %arg3: memref<1024x128xbf16, #tpu.memory_space<vmem>>, %arg4: memref<128x128xbf16, #tpu.memory_space<vmem>>) attributes {dimension_semantics = [#tpu.dimension_semantics<parallel>, #tpu.dimension_semantics<parallel>], iteration_bounds = array<i64: 1, 1>, scalar_prefetch = 0 : i64, scratch_operands = 0 : i64, tpu.core_type = #tpu.core_type<tc>, window_params = [{transform_indices = @transform_0, window_bounds = array<i64: 128, 1024>}, {transform_indices = @transform_1, window_bounds = array<i64: 1024, 128>}, {transform_indices = @transform_2, window_bounds = array<i64: 128, 128>}]} {
    %c0 = arith.constant 0 : index
    %c0_0 = arith.constant 0 : index
    %0 = vector.load %arg2[%c0, %c0_0] : memref<128x1024xbf16, #tpu.memory_space<vmem>>, vector<128x1024xbf16>
    %c0_1 = arith.constant 0 : index
    %c0_2 = arith.constant 0 : index
    %1 = vector.load %arg3[%c0_1, %c0_2] : memref<1024x128xbf16, #tpu.memory_space<vmem>>, vector<1024x128xbf16>
    %cst = arith.constant dense<0.000000e+00> : vector<128x128xf32>
    %2 = tpu.matmul %0, %1, %cst {dimension_numbers = #tpu.dot_dimension_numbers<[1], [0], [0], [1], [0, 0, 1, 1], [], []>} : vector<128x1024xbf16>, vector<1024x128xbf16>, vector<128x128xf32> -> vector<128x128xf32>
    %cst_3 = arith.constant 2.000000e-01 : f32
    %3 = vector.broadcast %cst_3 : f32 to vector<128x128xf32>
    %4 = arith.mulf %3, %2 : vector<128x128xf32>
    %5 = arith.maximumf %2, %4 : vector<128x128xf32>
    %6 = arith.truncf %5 : vector<128x128xf32> to vector<128x128xbf16>
    %c0_4 = arith.constant 0 : index
    %c0_5 = arith.constant 0 : index
    %7 = vector.load %arg4[%c0_4, %c0_5] : memref<128x128xbf16, #tpu.memory_space<vmem>>, vector<128x128xbf16>
    tpu.vector_store %arg4[%c0_4, %c0_5], %6 {strides = array<i32>} : memref<128x128xbf16, #tpu.memory_space<vmem>>, vector<128x128xbf16>,
    return
  }
  func.func @transform_0(%arg0: i32, %arg1: i32) -> (i32, i32) {
    %c0_i32 = arith.constant 0 : i32
    %c0_i32_0 = arith.constant 0 : i32
    return %arg0, %c0_i32 : i32, i32
  }
  func.func @transform_1(%arg0: i32, %arg1: i32) -> (i32, i32) {
    %c0_i32 = arith.constant 0 : i32
    %c0_i32_0 = arith.constant 0 : i32
    return %c0_i32, %arg1 : i32, i32
  }
  func.func @transform_2(%arg0: i32, %arg1: i32) -> (i32, i32) {
    %c0_i32 = arith.constant 0 : i32
    return %arg0, %arg1 : i32, i32
  }
}

module attributes {stable_mosaic.version = 11 : i64} {
  func.func @_matmul_act_kernel(%arg0: i32, %arg1: i32, %arg2: memref<32x2048xbf16, #tpu.memory_space<vmem>>, %arg3: memref<2048x128xbf16, #tpu.memory_space<vmem>>, %arg4: memref<32x128xbf16, #tpu.memory_space<vmem>>) attributes {dimension_semantics = [#tpu.dimension_semantics<parallel>, #tpu.dimension_semantics<parallel>], iteration_bounds = array<i64: 1, 2>, scalar_prefetch = 0 : i64, scratch_operands = 0 : i64, tpu.core_type = #tpu.core_type<tc>, window_params = [{transform_indices = @transform_0, window_bounds = array<i64: 32, 2048>}, {transform_indices = @transform_1, window_bounds = array<i64: 2048, 128>}, {transform_indices = @transform_2, window_bounds = array<i64: 32, 128>}]} {
    %c0 = arith.constant 0 : index
    %c0_0 = arith.constant 0 : index
    %0 = vector.load %arg2[%c0, %c0_0] : memref<32x2048xbf16, #tpu.memory_space<vmem>>, vector<32x2048xbf16>
    %c0_1 = arith.constant 0 : index
    %c0_2 = arith.constant 0 : index
    %1 = vector.load %arg3[%c0_1, %c0_2] : memref<2048x128xbf16, #tpu.memory_space<vmem>>, vector<2048x128xbf16>
    %cst = arith.constant dense<0.000000e+00> : vector<32x128xf32>
    %2 = tpu.matmul %0, %1, %cst {dimension_numbers = #tpu.dot_dimension_numbers<[1], [0], [0], [1], [0, 0, 1, 1], [], []>} : vector<32x2048xbf16>, vector<2048x128xbf16>, vector<32x128xf32> -> vector<32x128xf32>
    %cst_3 = arith.constant 2.000000e-01 : f32
    %3 = vector.broadcast %cst_3 : f32 to vector<32x128xf32>
    %4 = arith.mulf %3, %2 : vector<32x128xf32>
    %5 = arith.maximumf %2, %4 : vector<32x128xf32>
    %6 = arith.truncf %5 : vector<32x128xf32> to vector<32x128xbf16>
    %c0_4 = arith.constant 0 : index
    %c0_5 = arith.constant 0 : index
    %7 = vector.load %arg4[%c0_4, %c0_5] : memref<32x128xbf16, #tpu.memory_space<vmem>>, vector<32x128xbf16>
    tpu.vector_store %arg4[%c0_4, %c0_5], %6 {strides = array<i32>} : memref<32x128xbf16, #tpu.memory_space<vmem>>, vector<32x128xbf16>,
    return
  }
  func.func @transform_0(%arg0: i32, %arg1: i32) -> (i32, i32) {
    %c0_i32 = arith.constant 0 : i32
    %c0_i32_0 = arith.constant 0 : i32
    return %arg0, %c0_i32 : i32, i32
  }
  func.func @transform_1(%arg0: i32, %arg1: i32) -> (i32, i32) {
    %c0_i32 = arith.constant 0 : i32
    %c0_i32_0 = arith.constant 0 : i32
    return %c0_i32, %arg1 : i32, i32
  }
  func.func @transform_2(%arg0: i32, %arg1: i32) -> (i32, i32) {
    %c0_i32 = arith.constant 0 : i32
    return %arg0, %arg1 : i32, i32
  }
}

module attributes {stable_mosaic.version = 11 : i64} {
  func.func @_matmul_act_kernel(%arg0: i32, %arg1: i32, %arg2: memref<32x4096xbf16, #tpu.memory_space<vmem>>, %arg3: memref<4096x128xbf16, #tpu.memory_space<vmem>>, %arg4: memref<32x128xbf16, #tpu.memory_space<vmem>>) attributes {dimension_semantics = [#tpu.dimension_semantics<parallel>, #tpu.dimension_semantics<parallel>], iteration_bounds = array<i64: 1, 4>, scalar_prefetch = 0 : i64, scratch_operands = 0 : i64, tpu.core_type = #tpu.core_type<tc>, window_params = [{transform_indices = @transform_0, window_bounds = array<i64: 32, 4096>}, {transform_indices = @transform_1, window_bounds = array<i64: 4096, 128>}, {transform_indices = @transform_2, window_bounds = array<i64: 32, 128>}]} {
    %c0 = arith.constant 0 : index
    %c0_0 = arith.constant 0 : index
    %0 = vector.load %arg2[%c0, %c0_0] : memref<32x4096xbf16, #tpu.memory_space<vmem>>, vector<32x4096xbf16>
    %c0_1 = arith.constant 0 : index
    %c0_2 = arith.constant 0 : index
    %1 = vector.load %arg3[%c0_1, %c0_2] : memref<4096x128xbf16, #tpu.memory_space<vmem>>, vector<4096x128xbf16>
    %cst = arith.constant dense<0.000000e+00> : vector<32x128xf32>
    %2 = tpu.matmul %0, %1, %cst {dimension_numbers = #tpu.dot_dimension_numbers<[1], [0], [0], [1], [0, 0, 1, 1], [], []>} : vector<32x4096xbf16>, vector<4096x128xbf16>, vector<32x128xf32> -> vector<32x128xf32>
    %cst_3 = arith.constant 2.000000e-01 : f32
    %3 = vector.broadcast %cst_3 : f32 to vector<32x128xf32>
    %4 = arith.mulf %3, %2 : vector<32x128xf32>
    %5 = arith.maximumf %2, %4 : vector<32x128xf32>
    %6 = arith.truncf %5 : vector<32x128xf32> to vector<32x128xbf16>
    %c0_4 = arith.constant 0 : index
    %c0_5 = arith.constant 0 : index
    %7 = vector.load %arg4[%c0_4, %c0_5] : memref<32x128xbf16, #tpu.memory_space<vmem>>, vector<32x128xbf16>
    tpu.vector_store %arg4[%c0_4, %c0_5], %6 {strides = array<i32>} : memref<32x128xbf16, #tpu.memory_space<vmem>>, vector<32x128xbf16>,
    return
  }
  func.func @transform_0(%arg0: i32, %arg1: i32) -> (i32, i32) {
    %c0_i32 = arith.constant 0 : i32
    %c0_i32_0 = arith.constant 0 : i32
    return %arg0, %c0_i32 : i32, i32
  }
  func.func @transform_1(%arg0: i32, %arg1: i32) -> (i32, i32) {
    %c0_i32 = arith.constant 0 : i32
    %c0_i32_0 = arith.constant 0 : i32
    return %c0_i32, %arg1 : i32, i32
  }
  func.func @transform_2(%arg0: i32, %arg1: i32) -> (i32, i32) {
    %c0_i32 = arith.constant 0 : i32
    return %arg0, %arg1 : i32, i32
  }
}

module attributes {stable_mosaic.version = 11 : i64} {
  func.func @_matmul_bias_act_kernel(%arg0: i32, %arg1: i32, %arg2: memref<16x8192xbf16, #tpu.memory_space<vmem>>, %arg3: memref<8192x128xbf16, #tpu.memory_space<vmem>>, %arg4: memref<1x128xf32, #tpu.memory_space<vmem>>, %arg5: memref<16x128xf32, #tpu.memory_space<vmem>>) attributes {dimension_semantics = [#tpu.dimension_semantics<parallel>, #tpu.dimension_semantics<parallel>], iteration_bounds = array<i64: 1, 1>, scalar_prefetch = 0 : i64, scratch_operands = 0 : i64, tpu.core_type = #tpu.core_type<tc>, window_params = [{transform_indices = @transform_0, window_bounds = array<i64: 16, 8192>}, {transform_indices = @transform_1, window_bounds = array<i64: 8192, 128>}, {transform_indices = @transform_2, window_bounds = array<i64: 1, 128>}, {transform_indices = @transform_3, window_bounds = array<i64: 16, 128>}]} {
    %c0 = arith.constant 0 : index
    %c0_0 = arith.constant 0 : index
    %0 = vector.load %arg2[%c0, %c0_0] : memref<16x8192xbf16, #tpu.memory_space<vmem>>, vector<16x8192xbf16>
    %c0_1 = arith.constant 0 : index
    %c0_2 = arith.constant 0 : index
    %1 = vector.load %arg3[%c0_1, %c0_2] : memref<8192x128xbf16, #tpu.memory_space<vmem>>, vector<8192x128xbf16>
    %cst = arith.constant dense<0.000000e+00> : vector<16x128xf32>
    %2 = tpu.matmul %0, %1, %cst {dimension_numbers = #tpu.dot_dimension_numbers<[1], [0], [0], [1], [0, 0, 1, 1], [], []>} : vector<16x8192xbf16>, vector<8192x128xbf16>, vector<16x128xf32> -> vector<16x128xf32>
    %c0_3 = arith.constant 0 : index
    %c0_4 = arith.constant 0 : index
    %3 = vector.load %arg4[%c0_3, %c0_4] : memref<1x128xf32, #tpu.memory_space<vmem>>, vector<1x128xf32>
    %4 = vector.broadcast %3 : vector<1x128xf32> to vector<16x128xf32>
    %5 = arith.addf %2, %4 : vector<16x128xf32>
    %c0_5 = arith.constant 0 : index
    %c0_6 = arith.constant 0 : index
    %6 = vector.load %arg5[%c0_5, %c0_6] : memref<16x128xf32, #tpu.memory_space<vmem>>, vector<16x128xf32>
    tpu.vector_store %arg5[%c0_5, %c0_6], %5 {strides = array<i32>} : memref<16x128xf32, #tpu.memory_space<vmem>>, vector<16x128xf32>,
    return
  }
  func.func @transform_0(%arg0: i32, %arg1: i32) -> (i32, i32) {
    %c0_i32 = arith.constant 0 : i32
    %c0_i32_0 = arith.constant 0 : i32
    return %arg0, %c0_i32 : i32, i32
  }
  func.func @transform_1(%arg0: i32, %arg1: i32) -> (i32, i32) {
    %c0_i32 = arith.constant 0 : i32
    %c0_i32_0 = arith.constant 0 : i32
    return %c0_i32, %arg1 : i32, i32
  }
  func.func @transform_2(%arg0: i32, %arg1: i32) -> (i32, i32) {
    %c0_i32 = arith.constant 0 : i32
    %c0_i32_0 = arith.constant 0 : i32
    return %c0_i32, %arg1 : i32, i32
  }
  func.func @transform_3(%arg0: i32, %arg1: i32) -> (i32, i32) {
    %c0_i32 = arith.constant 0 : i32
    return %arg0, %arg1 : i32, i32
  }
}

</mosaic_0001>

<bundles_post_ra>
// kernel: forward.5
= control target key start
LH: loop header
LB: loop body
LE: loop exit
PB: predicated region body
PF: predicated region fallthrough
CT: control target
= control target key end

     0   :  { %7 = vsyncpa [#allocation3], 0  ;;  %s1054_s9 = smov 0   ;;  %s1056_s10 = smov 0   ;;  %s1137_s0 = inlined_call_operand.vmem [shape: bf16[512,128], index: 0, kind: input, shape index: {}]   ;;  %s1138_s1 = inlined_call_operand.hbm [shape: bf16[128,128], index: 1, kind: input, shape index: {}]   ;;  %s1139_s2 = inlined_call_operand.vmem [shape: bf16[512,128], index: 2, kind: output, shape index: {}]  }
   0x1   :  { %s1058_s11 = smov 0  }
   0x2 LB: > { %s689_s12 = sadd.s32 4294967295, %s1034_s11   ;;  %s25_s13 = sadd.s32 1, %s1030_s10  ;;  %s1034_s11 = sphi %s1058_s11, %s13_s11   ;;  %s1030_s10 = sphi %s1056_s10, %s1141_s10   ;;  %s1026_s9 = sphi %s1054_s9, %s1140_s9  }
   0x3   : > { %p27_p0 = scmp.ge.s32.totalorder %s25_s13, 2  ;;  %p691_p1 = scmp.ge.s32.totalorder %s1034_s11, 1 }
   0x4   : > { %p110_p2 = scmp.lt.s32.totalorder %s1034_s11, 3  ;;  %p949_p4 = scmp.eq.s32.totalorder %s689_s12, 0 }
   0x5   : > { %s1143_s13 = smov (%p27_p0, %s25_s13), 0  ;;  %s123_s16 = sshll.u32 %s1138_s1, 4  ;;  %s124_s16 = int_to_ptr.hbm [resolvable:$true] %s123_s16 }
   0x6   : > { %p111_p3 = pnand %p691_p1, %p110_p2  ;;  %s1036_s17 = smov [#allocation2]  }
   0x7   : > { %s125_s18 = sshll.u32 %s1036_s17, 4  ;;  %s1037_s19 = smov 64   ;;  %s126_s18 = int_to_ptr.vmem [resolvable:$true] %s125_s18 }
   0x8   : > { %p945_p5 = pneg %p111_p3  ;;  %s1038_s20 = smov 4  }
   0x9   : > { %150 = sbr.rel (%p111_p3) target bundleno = 244 (0xf4), region = 28 }
   0xa   : > { %p946_p6 = pnand %p949_p4, %p945_p5 }
   0xc   : > { %948 = dma.hbm_to_vmem [thread:$0]  (!%p946_p6), %s124_s16, 1024, %s126_s18, [#allocation3], %s1037_s19, %s1037_s19, %s1038_s20  }
   0xe   : > { %1021 = dma.done.wait (%p949_p4), [#allocation3], 1024  }
   0xf   : > { %1023 = vsyncadd (%p949_p4), [#allocation3], 4294966272  ;;  %v821_v0 = vld [vmem:[#allocation2 + $0x38] sm:$0xff]  ;;  %v820_v1 = vld [vmem:[#allocation2 + $0x30] sm:$0xff]  ;;  %s696_s21 = sshll.u32 %s1026_s9, 5 }
  0x10   : > { %383 = vmatpush.bf16.msra.mxu0 %v821_v0  ;;  %917 = vmatpush.bf16.msra.mxu1 %v821_v0  ;;  %v819_v2 = vld [vmem:[#allocation2 + $0x28] sm:$0xff]  ;;  %v818_v3 = vld [vmem:[#allocation2 + $0x20] sm:$0xff]  ;;  %v817_v4 = vld [vmem:[#allocation2 + $0x18] sm:$0xff]  ;;  %p177_p7 = scmp.lt.s32.totalorder %s696_s21, 63 }
  0x11   : > { %918 = vmatpush.bf16.msra.mxu2 %v821_v0  ;;  %919 = vmatpush.bf16.msra.mxu3 %v821_v0  ;;  %v816_v5 = vld [vmem:[#allocation2 + $0x10] sm:$0xff]  ;;  %v815_v6 = vld [vmem:[#allocation2 + $0x8] sm:$0xff]  ;;  %v814_v7 = vld [vmem:[#allocation2] sm:$0xff] }
  0x12   : > { %s1145_s21 = smov (!%p177_p7, %s696_s21), 63 }
  0x13   : > { %s697_s22 = sshll.u32 %s1145_s21, 2 }
  0x14   : > { %384 = vmatpush.bf16.msra.mxu0 %v820_v1  ;;  %920 = vmatpush.bf16.msra.mxu1 %v820_v1  ;;  %s1087_s25 = scalar_lea.vmem %s1137_s0, %s697_s22  ;;  %s1110_s28 = scalar_lea.vmem %s1139_s2, %s697_s22 }
  0x15   : > { %921 = vmatpush.bf16.msra.mxu2 %v820_v1  ;;  %922 = vmatpush.bf16.msra.mxu3 %v820_v1  ;;  %v798_v8 = vld [vmem:[%s1087_s25] sm:$0xff]  ;;  %v799_v12 = vld [vmem:[%s1087_s25 + $0x8] sm:$0xff]  ;;  %v800_v16 = vld [vmem:[%s1087_s25 + $0x10] sm:$0xff] }
  0x16   : > { %v802_v9 = vld [vmem:[%s1087_s25 + $0x20] sm:$0xff]  ;;  %v803_v13 = vld [vmem:[%s1087_s25 + $0x28] sm:$0xff]  ;;  %v804_v17 = vld [vmem:[%s1087_s25 + $0x30] sm:$0xff] }
  0x17   : > { %v806_v10 = vld [vmem:[%s1087_s25 + $0x40] sm:$0xff]  ;;  %v807_v14 = vld [vmem:[%s1087_s25 + $0x48] sm:$0xff]  ;;  %v808_v18 = vld [vmem:[%s1087_s25 + $0x50] sm:$0xff] }
  0x18   : > { %385 = vmatpush.bf16.msra.mxu0 %v819_v2  ;;  %923 = vmatpush.bf16.msra.mxu1 %v819_v2  ;;  %v810_v11 = vld [vmem:[%s1087_s25 + $0x60] sm:$0xff]  ;;  %v811_v15 = vld [vmem:[%s1087_s25 + $0x68] sm:$0xff]  ;;  %v812_v19 = vld [vmem:[%s1087_s25 + $0x70] sm:$0xff] }
  0x19   : > { %924 = vmatpush.bf16.msra.mxu2 %v819_v2  ;;  %925 = vmatpush.bf16.msra.mxu3 %v819_v2  ;;  %v801_v20 = vld [vmem:[%s1087_s25 + $0x18] sm:$0xff] }
  0x1a   : > { %v805_v21 = vld [vmem:[%s1087_s25 + $0x38] sm:$0xff] }
  0x1b   : > { %v809_v22 = vld [vmem:[%s1087_s25 + $0x58] sm:$0xff] }
  0x1c   : > { %386 = vmatpush.bf16.msra.mxu0 %v818_v3  ;;  %926 = vmatpush.bf16.msra.mxu1 %v818_v3  ;;  %v813_v23 = vld [vmem:[%s1087_s25 + $0x78] sm:$0xff] }
  0x1d   : > { %927 = vmatpush.bf16.msra.mxu2 %v818_v3  ;;  %928 = vmatpush.bf16.msra.mxu3 %v818_v3 }
  0x20   : > { %387 = vmatpush.bf16.msra.mxu0 %v817_v4  ;;  %929 = vmatpush.bf16.msra.mxu1 %v817_v4 }
  0x21   : > { %930 = vmatpush.bf16.msra.mxu2 %v817_v4  ;;  %931 = vmatpush.bf16.msra.mxu3 %v817_v4 }
  0x24   : > { %388 = vmatpush.bf16.msra.mxu0 %v816_v5  ;;  %932 = vmatpush.bf16.msra.mxu1 %v816_v5 }
  0x25   : > { %933 = vmatpush.bf16.msra.mxu2 %v816_v5  ;;  %934 = vmatpush.bf16.msra.mxu3 %v816_v5 }
  0x28   : > { %389 = vmatpush.bf16.msra.mxu0 %v815_v6  ;;  %935 = vmatpush.bf16.msra.mxu1 %v815_v6 }
  0x29   : > { %936 = vmatpush.bf16.msra.mxu2 %v815_v6  ;;  %937 = vmatpush.bf16.msra.mxu3 %v815_v6 }
  0x2c   : > { %390 = vmatpush.bf16.msra.mxu0 %v814_v7  ;;  %938 = vmatpush.bf16.msra.mxu1 %v814_v7 }
  0x2d   : > { %939 = vmatpush.bf16.msra.mxu2 %v814_v7  ;;  %940 = vmatpush.bf16.msra.mxu3 %v814_v7 }
  0x2f   : > { %391 = vmatmul.bf16.vlgmr.msra.gmra.mxu0 %v798_v8  ;;  %411 = vmatmul.bf16.vlgmr.msra.gmra.mxu1 %v802_v9 }
  0x30   : > { %431 = vmatmul.bf16.vlgmr.msra.gmra.mxu2 %v806_v10  ;;  %451 = vmatmul.bf16.vlgmr.msra.gmra.mxu3 %v810_v11 }
  0x3f   : > { %396 = vmatmul.bf16.gmra.mxu0 %v799_v12  ;;  %416 = vmatmul.bf16.gmra.mxu1 %v803_v13 }
  0x40   : > { %436 = vmatmul.bf16.gmra.mxu2 %v807_v14  ;;  %456 = vmatmul.bf16.gmra.mxu3 %v811_v15 }
  0x4f   : > { %401 = vmatmul.bf16.gmra.mxu0 %v800_v16  ;;  %421 = vmatmul.bf16.gmra.mxu1 %v804_v17 }
  0x50   : > { %441 = vmatmul.bf16.gmra.mxu2 %v808_v18  ;;  %461 = vmatmul.bf16.gmra.mxu3 %v812_v19 }
  0x5f   : > { %406 = vmatmul.bf16.gmra.mxu0 %v801_v20  ;;  %426 = vmatmul.bf16.gmra.mxu1 %v805_v21 }
  0x60   : > { %446 = vmatmul.bf16.gmra.mxu2 %v809_v22  ;;  %466 = vmatmul.bf16.gmra.mxu3 %v813_v23 }
  0xac   : > { %v392_v24 = vpop.f32.mrf.mxu0  ;;  %v412_v25 = vpop.f32.mrf.mxu1 }
  0xad   : > { %v472_v26 = vmul.f32 0.2, %v392_v24  ;;  %v480_v27 = vmul.f32 0.2, %v412_v25 }
  0xaf   : > { %v504_v34 = vmax.f32 %v392_v24, %v472_v26  ;;  %v512_v35 = vmax.f32 %v412_v25, %v480_v27 }
  0xb3   : > { %v432_v28 = vpop.f32.mrf.mxu2  ;;  %v452_v29 = vpop.f32.mrf.mxu3 }
  0xb4   : > { %v394_v30 = vpop.f32.mrf.mxu0  ;;  %v414_v31 = vpop.f32.mrf.mxu1  ;;  %v488_v40 = vmul.f32 0.2, %v432_v28  ;;  %v496_v41 = vmul.f32 0.2, %v452_v29 }
  0xb5   : > { %v473_v32 = vmul.f32 0.2, %v394_v30  ;;  %v481_v33 = vmul.f32 0.2, %v414_v31 }
  0xb6   : > { %v520_v48 = vmax.f32 %v432_v28, %v488_v40  ;;  %v528_v49 = vmax.f32 %v452_v29, %v496_v41 }
  0xb7   : > { %v505_v36 = vmax.f32 %v394_v30, %v473_v32  ;;  %v513_v37 = vmax.f32 %v414_v31, %v481_v33 }
  0xb9   : > { %v825_v38 = vpack.c.bf16 %v505_v36, %v504_v34  ;;  %v845_v39 = vpack.c.bf16 %v513_v37, %v512_v35 }
  0xbb   : > { %826 = vst [vmem:[%s1110_s28] sm:$0xff] %v825_v38   ;;  %v434_v42 = vpop.f32.mrf.mxu2  ;;  %v454_v43 = vpop.f32.mrf.mxu3 }
  0xbc   : > { %905 = vst [vmem:[%s1110_s28 + $0x20] sm:$0xff] %v845_v39   ;;  %v489_v44 = vmul.f32 0.2, %v434_v42  ;;  %v497_v45 = vmul.f32 0.2, %v454_v43  ;;  %v397_v46 = vpop.f32.mrf.mxu0  ;;  %v417_v47 = vpop.f32.mrf.mxu1 }
  0xbd   : > { %v474_v54 = vmul.f32 0.2, %v397_v46  ;;  %v482_v55 = vmul.f32 0.2, %v417_v47 }
  0xbe   : > { %v521_v50 = vmax.f32 %v434_v42, %v489_v44  ;;  %v529_v51 = vmax.f32 %v454_v43, %v497_v45 }
  0xbf   : > { %v506_v62 = vmax.f32 %v397_v46, %v474_v54  ;;  %v514_v63 = vmax.f32 %v417_v47, %v482_v55 }
  0xc0   : > { %v865_v52 = vpack.c.bf16 %v521_v50, %v520_v48  ;;  %v885_v53 = vpack.c.bf16 %v529_v51, %v528_v49 }
  0xc2   : > { %909 = vst [vmem:[%s1110_s28 + $0x40] sm:$0xff] %v865_v52  }
  0xc3   : > { %913 = vst [vmem:[%s1110_s28 + $0x60] sm:$0xff] %v885_v53   ;;  %v437_v56 = vpop.f32.mrf.mxu2  ;;  %v457_v57 = vpop.f32.mrf.mxu3 }
  0xc4   : > { %v399_v58 = vpop.f32.mrf.mxu0  ;;  %v419_v59 = vpop.f32.mrf.mxu1  ;;  %v490_v4 = vmul.f32 0.2, %v437_v56  ;;  %v498_v5 = vmul.f32 0.2, %v457_v57 }
  0xc5   : > { %v475_v60 = vmul.f32 0.2, %v399_v58  ;;  %v483_v61 = vmul.f32 0.2, %v419_v59 }
  0xc6   : > { %v522_v12 = vmax.f32 %v437_v56, %v490_v4  ;;  %v530_v13 = vmax.f32 %v457_v57, %v498_v5 }
  0xc7   : > { %v507_v0 = vmax.f32 %v399_v58, %v475_v60  ;;  %v515_v1 = vmax.f32 %v419_v59, %v483_v61 }
  0xc9   : > { %v830_v2 = vpack.c.bf16 %v507_v0, %v506_v62  ;;  %v850_v3 = vpack.c.bf16 %v515_v1, %v514_v63 }
  0xcb   : > { %902 = vst [vmem:[%s1110_s28 + $0x8] sm:$0xff] %v830_v2   ;;  %v439_v6 = vpop.f32.mrf.mxu2  ;;  %v459_v7 = vpop.f32.mrf.mxu3 }
  0xcc   : > { %906 = vst [vmem:[%s1110_s28 + $0x28] sm:$0xff] %v850_v3   ;;  %v491_v8 = vmul.f32 0.2, %v439_v6  ;;  %v499_v9 = vmul.f32 0.2, %v459_v7  ;;  %v402_v10 = vpop.f32.mrf.mxu0  ;;  %v422_v11 = vpop.f32.mrf.mxu1 }
  0xcd   : > { %v476_v18 = vmul.f32 0.2, %v402_v10  ;;  %v484_v19 = vmul.f32 0.2, %v422_v11 }
  0xce   : > { %v523_v14 = vmax.f32 %v439_v6, %v491_v8  ;;  %v531_v15 = vmax.f32 %v459_v7, %v499_v9 }
  0xcf   : > { %v508_v26 = vmax.f32 %v402_v10, %v476_v18  ;;  %v516_v27 = vmax.f32 %v422_v11, %v484_v19 }
  0xd0   : > { %v870_v16 = vpack.c.bf16 %v523_v14, %v522_v12  ;;  %v890_v17 = vpack.c.bf16 %v531_v15, %v530_v13 }
  0xd2   : > { %910 = vst [vmem:[%s1110_s28 + $0x48] sm:$0xff] %v870_v16  }
  0xd3   : > { %914 = vst [vmem:[%s1110_s28 + $0x68] sm:$0xff] %v890_v17   ;;  %v442_v20 = vpop.f32.mrf.mxu2  ;;  %v462_v21 = vpop.f32.mrf.mxu3 }
  0xd4   : > { %v404_v22 = vpop.f32.mrf.mxu0  ;;  %v424_v23 = vpop.f32.mrf.mxu1  ;;  %v492_v32 = vmul.f32 0.2, %v442_v20  ;;  %v500_v33 = vmul.f32 0.2, %v462_v21 }
  0xd5   : > { %v477_v24 = vmul.f32 0.2, %v404_v22  ;;  %v485_v25 = vmul.f32 0.2, %v424_v23 }
  0xd6   : > { %v524_v40 = vmax.f32 %v442_v20, %v492_v32  ;;  %v532_v41 = vmax.f32 %v462_v21, %v500_v33 }
  0xd7   : > { %v509_v28 = vmax.f32 %v404_v22, %v477_v24  ;;  %v517_v29 = vmax.f32 %v424_v23, %v485_v25 }
  0xd9   : > { %v835_v30 = vpack.c.bf16 %v509_v28, %v508_v26  ;;  %v855_v31 = vpack.c.bf16 %v517_v29, %v516_v27 }
  0xdb   : > { %903 = vst [vmem:[%s1110_s28 + $0x10] sm:$0xff] %v835_v30   ;;  %v444_v34 = vpop.f32.mrf.mxu2  ;;  %v464_v35 = vpop.f32.mrf.mxu3 }
  0xdc   : > { %907 = vst [vmem:[%s1110_s28 + $0x30] sm:$0xff] %v855_v31   ;;  %v493_v36 = vmul.f32 0.2, %v444_v34  ;;  %v501_v37 = vmul.f32 0.2, %v464_v35  ;;  %v407_v38 = vpop.f32.mrf.mxu0  ;;  %v427_v39 = vpop.f32.mrf.mxu1 }
  0xdd   : > { %v478_v46 = vmul.f32 0.2, %v407_v38  ;;  %v486_v47 = vmul.f32 0.2, %v427_v39 }
  0xde   : > { %v525_v42 = vmax.f32 %v444_v34, %v493_v36  ;;  %v533_v43 = vmax.f32 %v464_v35, %v501_v37 }
  0xdf   : > { %v510_v54 = vmax.f32 %v407_v38, %v478_v46  ;;  %v518_v55 = vmax.f32 %v427_v39, %v486_v47 }
  0xe0   : > { %v875_v44 = vpack.c.bf16 %v525_v42, %v524_v40  ;;  %v895_v45 = vpack.c.bf16 %v533_v43, %v532_v41 }
  0xe2   : > { %911 = vst [vmem:[%s1110_s28 + $0x50] sm:$0xff] %v875_v44  }
  0xe3   : > { %915 = vst [vmem:[%s1110_s28 + $0x70] sm:$0xff] %v895_v45   ;;  %v447_v48 = vpop.f32.mrf.mxu2  ;;  %v467_v49 = vpop.f32.mrf.mxu3 }
  0xe4   : > { %v409_v50 = vpop.f32.mrf.mxu0  ;;  %v429_v51 = vpop.f32.mrf.mxu1  ;;  %v494_v60 = vmul.f32 0.2, %v447_v48  ;;  %v502_v61 = vmul.f32 0.2, %v467_v49 }
  0xe5   : > { %v479_v52 = vmul.f32 0.2, %v409_v50  ;;  %v487_v53 = vmul.f32 0.2, %v429_v51 }
  0xe6   : > { %v526_v2 = vmax.f32 %v447_v48, %v494_v60  ;;  %v534_v3 = vmax.f32 %v467_v49, %v502_v61 }
  0xe7   : > { %v511_v56 = vmax.f32 %v409_v50, %v479_v52  ;;  %v519_v57 = vmax.f32 %v429_v51, %v487_v53 }
  0xe9   : > { %v840_v58 = vpack.c.bf16 %v511_v56, %v510_v54  ;;  %v860_v59 = vpack.c.bf16 %v519_v57, %v518_v55 }
  0xeb   : > { %904 = vst [vmem:[%s1110_s28 + $0x18] sm:$0xff] %v840_v58   ;;  %v449_v62 = vpop.f32.mrf.mxu2  ;;  %v469_v63 = vpop.f32.mrf.mxu3 }
  0xec   : > { %908 = vst [vmem:[%s1110_s28 + $0x38] sm:$0xff] %v860_v59   ;;  %v495_v0 = vmul.f32 0.2, %v449_v62  ;;  %v503_v1 = vmul.f32 0.2, %v469_v63 }
  0xee   : > { %v527_v4 = vmax.f32 %v449_v62, %v495_v0  ;;  %v535_v5 = vmax.f32 %v469_v63, %v503_v1 }
  0xf0   : > { %v880_v6 = vpack.c.bf16 %v527_v4, %v526_v2  ;;  %v900_v7 = vpack.c.bf16 %v535_v5, %v534_v3 }
  0xf2   : > { %912 = vst [vmem:[%s1110_s28 + $0x58] sm:$0xff] %v880_v6  }
  0xf3   : > { %916 = vst [vmem:[%s1110_s28 + $0x78] sm:$0xff] %v900_v7  }
  0xf4 PF: > { %s13_s11 = sadd.s32 1, %s1034_s11   ;;  %s1140_s9 = smov %s1030_s10 }
  0xf5   : > { %p10_p8 = scmp.ge.s32.totalorder %s13_s11, 4   ;;  %s1141_s10 = smov %s1143_s13 }
  0xf7   :  { %12 = sbr.rel (!%p10_p8) target bundleno = 2 (0x2), region = 64 }
  0xfc   :  { %628 = vsyncpa [#allocation3], 1 }
  0xfd   :  { %630 = vsyncpa [#allocation3 + $0x1], 1 }

// kernel: forward.6
= control target key start
LH: loop header
LB: loop body
LE: loop exit
PB: predicated region body
PF: predicated region fallthrough
CT: control target
= control target key end

     0   :  { %s2717_s1 = inlined_call_operand.vmem [shape: bf16[1024,128], index: 1, kind: input, shape index: {}]   ;;  %s2718_s0 = inlined_call_operand.vmem [shape: bf16[128,1024], index: 0, kind: input, shape index: {}]   ;;  %s2719_s2 = inlined_call_operand.vmem [shape: bf16[128,128], index: 2, kind: output, shape index: {}]  }
   0x1   :  { %v1950_v0 = vld [vmem:[%s2717_s1 + $0x38] sm:$0xff]  ;;  %v1949_v4 = vld [vmem:[%s2717_s1 + $0x30] sm:$0xff]  ;;  %v1948_v8 = vld [vmem:[%s2717_s1 + $0x28] sm:$0xff] }
   0x2   :  { %v1958_v1 = vld [vmem:[%s2717_s1 + $0x78] sm:$0xff]  ;;  %907 = vmatpush.bf16.msra.mxu0 %v1950_v0  ;;  %v1957_v5 = vld [vmem:[%s2717_s1 + $0x70] sm:$0xff]  ;;  %v1956_v9 = vld [vmem:[%s2717_s1 + $0x68] sm:$0xff] }
   0x3   :  { %v1966_v2 = vld [vmem:[%s2717_s1 + $0xb8] sm:$0xff]  ;;  %956 = vmatpush.bf16.msra.mxu1 %v1958_v1  ;;  %v1965_v6 = vld [vmem:[%s2717_s1 + $0xb0] sm:$0xff]  ;;  %v1964_v10 = vld [vmem:[%s2717_s1 + $0xa8] sm:$0xff] }
   0x4   :  { %v1974_v3 = vld [vmem:[%s2717_s1 + $0xf8] sm:$0xff]  ;;  %1005 = vmatpush.bf16.msra.mxu2 %v1966_v2  ;;  %v1973_v7 = vld [vmem:[%s2717_s1 + $0xf0] sm:$0xff]  ;;  %v1972_v11 = vld [vmem:[%s2717_s1 + $0xe8] sm:$0xff] }
   0x5   :  { %1054 = vmatpush.bf16.msra.mxu3 %v1974_v3  ;;  %v1947_v12 = vld [vmem:[%s2717_s1 + $0x20] sm:$0xff]  ;;  %v1946_v16 = vld [vmem:[%s2717_s1 + $0x18] sm:$0xff]  ;;  %v1945_v20 = vld [vmem:[%s2717_s1 + $0x10] sm:$0xff] }
   0x6   :  { %908 = vmatpush.bf16.msra.mxu0 %v1949_v4  ;;  %v1955_v13 = vld [vmem:[%s2717_s1 + $0x60] sm:$0xff]  ;;  %v1954_v17 = vld [vmem:[%s2717_s1 + $0x58] sm:$0xff]  ;;  %v1953_v21 = vld [vmem:[%s2717_s1 + $0x50] sm:$0xff] }
   0x7   :  { %957 = vmatpush.bf16.msra.mxu1 %v1957_v5  ;;  %v1963_v14 = vld [vmem:[%s2717_s1 + $0xa0] sm:$0xff]  ;;  %v1962_v18 = vld [vmem:[%s2717_s1 + $0x98] sm:$0xff]  ;;  %v1961_v22 = vld [vmem:[%s2717_s1 + $0x90] sm:$0xff] }
   0x8   :  { %1006 = vmatpush.bf16.msra.mxu2 %v1965_v6  ;;  %v1971_v15 = vld [vmem:[%s2717_s1 + $0xe0] sm:$0xff]  ;;  %v1970_v19 = vld [vmem:[%s2717_s1 + $0xd8] sm:$0xff]  ;;  %v1969_v23 = vld [vmem:[%s2717_s1 + $0xd0] sm:$0xff] }
   0x9   :  { %1055 = vmatpush.bf16.msra.mxu3 %v1973_v7  ;;  %v1944_v24 = vld [vmem:[%s2717_s1 + $0x8] sm:$0xff]  ;;  %v1943_v28 = vld [vmem:[%s2717_s1] sm:$0xff]  ;;  %v1998_v40 = vld [vmem:[%s2717_s1 + $0x1b8] sm:$0xff] }
   0xa   :  { %909 = vmatpush.bf16.msra.mxu0 %v1948_v8  ;;  %v1952_v25 = vld [vmem:[%s2717_s1 + $0x48] sm:$0xff]  ;;  %v1951_v29 = vld [vmem:[%s2717_s1 + $0x40] sm:$0xff]  ;;  %v1982_v41 = vld [vmem:[%s2717_s1 + $0x138] sm:$0xff] }
   0xb   :  { %958 = vmatpush.bf16.msra.mxu1 %v1956_v9  ;;  %v1960_v26 = vld [vmem:[%s2717_s1 + $0x88] sm:$0xff]  ;;  %v1959_v30 = vld [vmem:[%s2717_s1 + $0x80] sm:$0xff]  ;;  %v2006_v46 = vld [vmem:[%s2717_s1 + $0x1f8] sm:$0xff] }
   0xc   :  { %1007 = vmatpush.bf16.msra.mxu2 %v1964_v10  ;;  %v1968_v27 = vld [vmem:[%s2717_s1 + $0xc8] sm:$0xff]  ;;  %v1967_v31 = vld [vmem:[%s2717_s1 + $0xc0] sm:$0xff]  ;;  %v1990_v47 = vld [vmem:[%s2717_s1 + $0x178] sm:$0xff] }
   0xd   :  { %1056 = vmatpush.bf16.msra.mxu3 %v1972_v11  ;;  %v1369_v32 = vld [vmem:[%s2718_s0] sm:$0xf]  ;;  %v1879_v34 = vld [vmem:[%s2718_s0 + $0x4] sm:$0xf]  ;;  %v1377_v36 = vld [vmem:[%s2718_s0 + $0x8] sm:$0xf] }
   0xe   :  { %910 = vmatpush.bf16.msra.mxu0 %v1947_v12  ;;  %v1883_v33 = vld [vmem:[%s2718_s0 + $0x1c] sm:$0xf0]  ;;  %v1371_v35 = vld [vmem:[%s2718_s0 + $0x20] sm:$0xf0]  ;;  %v1884_v37 = vld [vmem:[%s2718_s0 + $0x24] sm:$0xf0] }
   0xf   :  { %959 = vmatpush.bf16.msra.mxu1 %v1955_v13  ;;  %v1880_v38 = vld [vmem:[%s2718_s0 + $0xc] sm:$0xf]  ;;  %v1370_v42 = vor.u32 %v1883_v33, %v1369_v32  ;;  %v1374_v43 = vor.u32 %v1879_v34, %v1371_v35  ;;  %v1378_v44 = vor.u32 %v1884_v37, %v1377_v36  ;;  %v1997_v48 = vld [vmem:[%s2717_s1 + $0x1b0] sm:$0xff]  ;;  %v1401_v56 = vld [vmem:[%s2718_s0 + $0x40] sm:$0xf] }
  0x10   :  { %1008 = vmatpush.bf16.msra.mxu2 %v1963_v14  ;;  %v1379_v39 = vld [vmem:[%s2718_s0 + $0x28] sm:$0xf0]  ;;  %v1981_v49 = vld [vmem:[%s2717_s1 + $0x130] sm:$0xff]  ;;  %v1891_v57 = vld [vmem:[%s2718_s0 + $0x5c] sm:$0xf0] }
  0x11   :  { %1057 = vmatpush.bf16.msra.mxu3 %v1971_v15  ;;  %v1382_v45 = vor.u32 %v1880_v38, %v1379_v39  ;;  %v2005_v50 = vld [vmem:[%s2717_s1 + $0x1f0] sm:$0xff]  ;;  %v1996_v52 = vld [vmem:[%s2717_s1 + $0x1a8] sm:$0xff]  ;;  %v1887_v58 = vld [vmem:[%s2718_s0 + $0x44] sm:$0xf]  ;;  %v1402_v0 = vor.u32 %v1891_v57, %v1401_v56 }
  0x12   :  { %911 = vmatpush.bf16.msra.mxu0 %v1946_v16  ;;  %v1989_v51 = vld [vmem:[%s2717_s1 + $0x170] sm:$0xff]  ;;  %v1980_v53 = vld [vmem:[%s2717_s1 + $0x128] sm:$0xff]  ;;  %v1403_v59 = vld [vmem:[%s2718_s0 + $0x60] sm:$0xf0] }
  0x13   :  { %960 = vmatpush.bf16.msra.mxu1 %v1954_v17  ;;  %v2004_v54 = vld [vmem:[%s2717_s1 + $0x1e8] sm:$0xff]  ;;  %v1406_v1 = vor.u32 %v1887_v58, %v1403_v59  ;;  %v1995_v4 = vld [vmem:[%s2717_s1 + $0x1a0] sm:$0xff]  ;;  %v1993_v36 = vld [vmem:[%s2717_s1 + $0x190] sm:$0xff] }
  0x14   :  { %1009 = vmatpush.bf16.msra.mxu2 %v1962_v18  ;;  %v1988_v55 = vld [vmem:[%s2717_s1 + $0x168] sm:$0xff]  ;;  %v1979_v5 = vld [vmem:[%s2717_s1 + $0x120] sm:$0xff]  ;;  %v1977_v37 = vld [vmem:[%s2717_s1 + $0x110] sm:$0xff] }
  0x15   :  { %1058 = vmatpush.bf16.msra.mxu3 %v1970_v19  ;;  %v1409_v60 = vld [vmem:[%s2718_s0 + $0x48] sm:$0xf]  ;;  %v1888_v62 = vld [vmem:[%s2718_s0 + $0x4c] sm:$0xf]  ;;  %v2003_v6 = vld [vmem:[%s2717_s1 + $0x1e0] sm:$0xff] }
  0x16   :  { %912 = vmatpush.bf16.msra.mxu0 %v1945_v20  ;;  %v1892_v61 = vld [vmem:[%s2718_s0 + $0x64] sm:$0xf0]  ;;  %v1411_v63 = vld [vmem:[%s2718_s0 + $0x68] sm:$0xf0]  ;;  %v1987_v7 = vld [vmem:[%s2717_s1 + $0x160] sm:$0xff] }
  0x17   :  { %961 = vmatpush.bf16.msra.mxu1 %v1953_v21  ;;  %v1410_v2 = vor.u32 %v1892_v61, %v1409_v60  ;;  %v1414_v3 = vor.u32 %v1888_v62, %v1411_v63  ;;  %v1433_v8 = vld [vmem:[%s2718_s0 + $0x80] sm:$0xf]  ;;  %v1895_v10 = vld [vmem:[%s2718_s0 + $0x84] sm:$0xf]  ;;  %v1441_v12 = vld [vmem:[%s2718_s0 + $0x88] sm:$0xf] }
  0x18   :  { %1010 = vmatpush.bf16.msra.mxu2 %v1961_v22  ;;  %v1899_v9 = vld [vmem:[%s2718_s0 + $0x9c] sm:$0xf0]  ;;  %v1435_v11 = vld [vmem:[%s2718_s0 + $0xa0] sm:$0xf0]  ;;  %v1900_v13 = vld [vmem:[%s2718_s0 + $0xa4] sm:$0xf0] }
  0x19   :  { %1059 = vmatpush.bf16.msra.mxu3 %v1969_v23  ;;  %v1896_v14 = vld [vmem:[%s2718_s0 + $0x8c] sm:$0xf]  ;;  %v1434_v16 = vor.u32 %v1899_v9, %v1433_v8  ;;  %v1438_v17 = vor.u32 %v1895_v10, %v1435_v11  ;;  %v1442_v18 = vor.u32 %v1900_v13, %v1441_v12  ;;  %v1994_v20 = vld [vmem:[%s2717_s1 + $0x198] sm:$0xff]  ;;  %v2001_v38 = vld [vmem:[%s2717_s1 + $0x1d0] sm:$0xff] }
  0x1a   :  { %913 = vmatpush.bf16.msra.mxu0 %v1944_v24  ;;  %v1443_v15 = vld [vmem:[%s2718_s0 + $0xa8] sm:$0xf0]  ;;  %v1978_v21 = vld [vmem:[%s2717_s1 + $0x118] sm:$0xff]  ;;  %v1465_v24 = vld [vmem:[%s2718_s0 + $0xc0] sm:$0xf] }
  0x1b   :  { %962 = vmatpush.bf16.msra.mxu1 %v1952_v25  ;;  %v1446_v19 = vor.u32 %v1896_v14, %v1443_v15  ;;  %v2002_v22 = vld [vmem:[%s2717_s1 + $0x1d8] sm:$0xff]  ;;  %v1907_v25 = vld [vmem:[%s2718_s0 + $0xdc] sm:$0xf0]  ;;  %v1985_v39 = vld [vmem:[%s2717_s1 + $0x150] sm:$0xff] }
  0x1c   :  { %1011 = vmatpush.bf16.msra.mxu2 %v1960_v26  ;;  %v1986_v23 = vld [vmem:[%s2717_s1 + $0x158] sm:$0xff]  ;;  %v1903_v26 = vld [vmem:[%s2718_s0 + $0xc4] sm:$0xf]  ;;  %v1466_v32 = vor.u32 %v1907_v25, %v1465_v24  ;;  %v1529_v56 = vld [vmem:[%s2718_s0 + $0x140] sm:$0xf] }
  0x1d   :  { %1060 = vmatpush.bf16.msra.mxu3 %v1968_v27  ;;  %v1467_v27 = vld [vmem:[%s2718_s0 + $0xe0] sm:$0xf0]  ;;  %v1923_v57 = vld [vmem:[%s2718_s0 + $0x15c] sm:$0xf0]  ;;  %v1537_v60 = vld [vmem:[%s2718_s0 + $0x148] sm:$0xf] }
  0x1e   :  { %914 = vmatpush.bf16.msra.mxu0 %v1943_v28  ;;  %v1473_v28 = vld [vmem:[%s2718_s0 + $0xc8] sm:$0xf]  ;;  %v1470_v33 = vor.u32 %v1903_v26, %v1467_v27  ;;  %v1919_v58 = vld [vmem:[%s2718_s0 + $0x144] sm:$0xf]  ;;  %v1920_v62 = vld [vmem:[%s2718_s0 + $0x14c] sm:$0xf] }
  0x1f   :  { %963 = vmatpush.bf16.msra.mxu1 %v1951_v29  ;;  %v1908_v29 = vld [vmem:[%s2718_s0 + $0xe4] sm:$0xf0]  ;;  %v1531_v59 = vld [vmem:[%s2718_s0 + $0x160] sm:$0xf0]  ;;  %v1539_v63 = vld [vmem:[%s2718_s0 + $0x168] sm:$0xf0] }
  0x20   :  { %1012 = vmatpush.bf16.msra.mxu2 %v1959_v30  ;;  %v1904_v30 = vld [vmem:[%s2718_s0 + $0xcc] sm:$0xf]  ;;  %v1474_v34 = vor.u32 %v1908_v29, %v1473_v28  ;;  %v1924_v61 = vld [vmem:[%s2718_s0 + $0x164] sm:$0xf0]  ;;  %v1561_v8 = vld [vmem:[%s2718_s0 + $0x180] sm:$0xf] }
  0x21   :  { %1061 = vmatpush.bf16.msra.mxu3 %v1967_v31  ;;  %915 = vmatmul.bf16.vlgmr.msra.gmra.mxu0 %v1370_v42  ;;  %v1475_v31 = vld [vmem:[%s2718_s0 + $0xe8] sm:$0xf0]  ;;  %v1911_v42 = vld [vmem:[%s2718_s0 + $0x104] sm:$0xf]  ;;  %v1931_v9 = vld [vmem:[%s2718_s0 + $0x19c] sm:$0xf0] }
  0x22   :  { %1103 = vmatpush.bf16.msrb.mxu0 %v1982_v41  ;;  %964 = vmatmul.bf16.vlgmr.msra.gmra.mxu1 %v1374_v43  ;;  %v1478_v35 = vor.u32 %v1904_v30, %v1475_v31  ;;  %v1915_v41 = vld [vmem:[%s2718_s0 + $0x11c] sm:$0xf0]  ;;  %v1499_v43 = vld [vmem:[%s2718_s0 + $0x120] sm:$0xf0]  ;;  %v1569_v12 = vld [vmem:[%s2718_s0 + $0x188] sm:$0xf] }
  0x23   :  { %1013 = vmatmul.bf16.vlgmr.msra.gmra.mxu2 %v1378_v44  ;;  %1152 = vmatpush.bf16.msrb.mxu1 %v1990_v47  ;;  %v1505_v44 = vld [vmem:[%s2718_s0 + $0x108] sm:$0xf]  ;;  %v1507_v47 = vld [vmem:[%s2718_s0 + $0x128] sm:$0xf0]  ;;  %v1927_v10 = vld [vmem:[%s2718_s0 + $0x184] sm:$0xf] }
  0x24   :  { %1201 = vmatpush.bf16.msrb.mxu2 %v1998_v40  ;;  %1062 = vmatmul.bf16.vlgmr.msra.gmra.mxu3 %v1382_v45  ;;  %v1497_v40 = vld [vmem:[%s2718_s0 + $0x100] sm:$0xf]  ;;  %v1916_v45 = vld [vmem:[%s2718_s0 + $0x124] sm:$0xf0]  ;;  %v1563_v11 = vld [vmem:[%s2718_s0 + $0x1a0] sm:$0xf0] }
  0x25   :  { %1250 = vmatpush.bf16.msrb.mxu3 %v2006_v46  ;;  %v1912_v46 = vld [vmem:[%s2718_s0 + $0x10c] sm:$0xf]  ;;  %v1932_v13 = vld [vmem:[%s2718_s0 + $0x1a4] sm:$0xf0] }
  0x26   :  { %1104 = vmatpush.bf16.msrb.mxu0 %v1981_v49  ;;  %v1502_v49 = vor.u32 %v1911_v42, %v1499_v43  ;;  %v1928_v14 = vld [vmem:[%s2718_s0 + $0x18c] sm:$0xf]  ;;  %v1601_v24 = vld [vmem:[%s2718_s0 + $0x1c8] sm:$0xf] }
  0x27   :  { %1153 = vmatpush.bf16.msrb.mxu1 %v1989_v51  ;;  %v1510_v51 = vor.u32 %v1912_v46, %v1507_v47  ;;  %v1571_v15 = vld [vmem:[%s2718_s0 + $0x1a8] sm:$0xf0]  ;;  %v1940_v25 = vld [vmem:[%s2718_s0 + $0x1e4] sm:$0xf0] }
  0x28   :  { %1202 = vmatpush.bf16.msrb.mxu2 %v1997_v48  ;;  %v1498_v48 = vor.u32 %v1915_v41, %v1497_v40  ;;  %v1936_v26 = vld [vmem:[%s2718_s0 + $0x1cc] sm:$0xf]  ;;  %v1602_v30 = vor.u32 %v1940_v25, %v1601_v24 }
  0x29   :  { %1251 = vmatpush.bf16.msrb.mxu3 %v2005_v50  ;;  %v1506_v50 = vor.u32 %v1916_v45, %v1505_v44  ;;  %v1603_v27 = vld [vmem:[%s2718_s0 + $0x1e8] sm:$0xf0] }
  0x2a   :  { %1105 = vmatpush.bf16.msrb.mxu0 %v1980_v53  ;;  %v1976_v53 = vld [vmem:[%s2717_s1 + $0x108] sm:$0xff]  ;;  %v1606_v31 = vor.u32 %v1936_v26, %v1603_v27 }
  0x2b   :  { %1154 = vmatpush.bf16.msrb.mxu1 %v1988_v55  ;;  %v1984_v55 = vld [vmem:[%s2717_s1 + $0x148] sm:$0xff] }
  0x2c   :  { %1203 = vmatpush.bf16.msrb.mxu2 %v1996_v52  ;;  %v1992_v52 = vld [vmem:[%s2717_s1 + $0x188] sm:$0xff] }
  0x2d   :  { %1252 = vmatpush.bf16.msrb.mxu3 %v2004_v54  ;;  %v2000_v54 = vld [vmem:[%s2717_s1 + $0x1c8] sm:$0xff] }
  0x2e   :  { %1106 = vmatpush.bf16.msrb.mxu0 %v1979_v5  ;;  %v1975_v5 = vld [vmem:[%s2717_s1 + $0x100] sm:$0xff] }
  0x2f   :  { %1155 = vmatpush.bf16.msrb.mxu1 %v1987_v7  ;;  %v1983_v7 = vld [vmem:[%s2717_s1 + $0x140] sm:$0xff] }
  0x30   :  { %1204 = vmatpush.bf16.msrb.mxu2 %v1995_v4  ;;  %v1991_v4 = vld [vmem:[%s2717_s1 + $0x180] sm:$0xff] }
  0x31   :  { %920 = vmatmul.bf16.gmra.mxu0 %v1402_v0  ;;  %1253 = vmatpush.bf16.msrb.mxu3 %v2003_v6  ;;  %v1530_v0 = vor.u32 %v1923_v57, %v1529_v56  ;;  %v1999_v6 = vld [vmem:[%s2717_s1 + $0x1c0] sm:$0xff]  ;;  %v1889_v56 = vld [vmem:[%s2718_s0 + $0x54] sm:$0xf] }
  0x32   :  { %969 = vmatmul.bf16.gmra.mxu1 %v1406_v1  ;;  %1107 = vmatpush.bf16.msrb.mxu0 %v1978_v21  ;;  %v1534_v1 = vor.u32 %v1919_v58, %v1531_v59  ;;  %v1939_v21 = vld [vmem:[%s2718_s0 + $0x1dc] sm:$0xf0]  ;;  %v1419_v57 = vld [vmem:[%s2718_s0 + $0x70] sm:$0xf0]  ;;  %v1425_v58 = vld [vmem:[%s2718_s0 + $0x58] sm:$0xf] }
  0x33   :  { %1018 = vmatmul.bf16.gmra.mxu2 %v1410_v2  ;;  %1156 = vmatpush.bf16.msrb.mxu1 %v1986_v23  ;;  %v1538_v2 = vor.u32 %v1924_v61, %v1537_v60  ;;  %v1595_v23 = vld [vmem:[%s2718_s0 + $0x1e0] sm:$0xf0]  ;;  %v1894_v59 = vld [vmem:[%s2718_s0 + $0x74] sm:$0xf0]  ;;  %v1890_v60 = vld [vmem:[%s2718_s0 + $0x5c] sm:$0xf] }
  0x34   :  { %1067 = vmatmul.bf16.gmra.mxu3 %v1414_v3  ;;  %1205 = vmatpush.bf16.msrb.mxu2 %v1994_v20  ;;  %v1542_v3 = vor.u32 %v1920_v62, %v1539_v63  ;;  %v1593_v20 = vld [vmem:[%s2718_s0 + $0x1c0] sm:$0xf]  ;;  %v1427_v61 = vld [vmem:[%s2718_s0 + $0x78] sm:$0xf0] }
  0x35   :  { %1254 = vmatpush.bf16.msrb.mxu3 %v2002_v22  ;;  %v1935_v22 = vld [vmem:[%s2718_s0 + $0x1c4] sm:$0xf]  ;;  %v1594_v28 = vor.u32 %v1939_v21, %v1593_v20  ;;  %v1457_v20 = vld [vmem:[%s2718_s0 + $0x98] sm:$0xf] }
  0x36   :  { %1108 = vmatpush.bf16.msrb.mxu0 %v1977_v37  ;;  %v1598_v29 = vor.u32 %v1935_v22, %v1595_v23  ;;  %v1886_v37 = vld [vmem:[%s2718_s0 + $0x34] sm:$0xf0]  ;;  %v1898_v22 = vld [vmem:[%s2718_s0 + $0x9c] sm:$0xf] }
  0x37   :  { %1157 = vmatpush.bf16.msrb.mxu1 %v1985_v39  ;;  %v1395_v39 = vld [vmem:[%s2718_s0 + $0x38] sm:$0xf0]  ;;  %v1902_v21 = vld [vmem:[%s2718_s0 + $0xb4] sm:$0xf0] }
  0x38   :  { %1206 = vmatpush.bf16.msrb.mxu2 %v1993_v36  ;;  %v1393_v36 = vld [vmem:[%s2718_s0 + $0x18] sm:$0xf]  ;;  %v1459_v23 = vld [vmem:[%s2718_s0 + $0xb8] sm:$0xf0] }
  0x39   :  { %1255 = vmatpush.bf16.msrb.mxu3 %v2001_v38  ;;  %v1882_v38 = vld [vmem:[%s2718_s0 + $0x1c] sm:$0xf]  ;;  %v1394_v44 = vor.u32 %v1886_v37, %v1393_v36 }
  0x3a   :  { %1109 = vmatpush.bf16.msrb.mxu0 %v1976_v53  ;;  %v1398_v45 = vor.u32 %v1882_v38, %v1395_v39 }
  0x3b   :  { %1158 = vmatpush.bf16.msrb.mxu1 %v1984_v55  ;;  %v1893_v55 = vld [vmem:[%s2718_s0 + $0x6c] sm:$0xf0] }
  0x3c   :  { %1207 = vmatpush.bf16.msrb.mxu2 %v1992_v52 }
  0x3d   :  { %1256 = vmatpush.bf16.msrb.mxu3 %v2000_v54  ;;  %v1417_v54 = vld [vmem:[%s2718_s0 + $0x50] sm:$0xf] }
  0x3e   :  { %1110 = vmatpush.bf16.msrb.mxu0 %v1975_v5  ;;  %v1426_v5 = vor.u32 %v1894_v59, %v1425_v58 }
  0x3f   :  { %1159 = vmatpush.bf16.msrb.mxu1 %v1983_v7 }
  0x40   :  { %1208 = vmatpush.bf16.msrb.mxu2 %v1991_v4 }
  0x41   :  { %925 = vmatmul.bf16.gmra.mxu0 %v1434_v16  ;;  %1257 = vmatpush.bf16.msrb.mxu3 %v1999_v6  ;;  %v1562_v16 = vor.u32 %v1931_v9, %v1561_v8  ;;  %v1430_v6 = vor.u32 %v1890_v60, %v1427_v61 }
  0x42   :  { %974 = vmatmul.bf16.gmra.mxu1 %v1438_v17  ;;  %v1566_v17 = vor.u32 %v1927_v10, %v1563_v11 }
  0x43   :  { %1023 = vmatmul.bf16.gmra.mxu2 %v1442_v18  ;;  %v1570_v18 = vor.u32 %v1932_v13, %v1569_v12 }
  0x44   :  { %1072 = vmatmul.bf16.gmra.mxu3 %v1446_v19  ;;  %v1574_v19 = vor.u32 %v1928_v14, %v1571_v15 }
  0x51   :  { %930 = vmatmul.bf16.gmra.mxu0 %v1466_v32  ;;  %v1385_v32 = vld [vmem:[%s2718_s0 + $0x10] sm:$0xf] }
  0x52   :  { %979 = vmatmul.bf16.gmra.mxu1 %v1470_v33  ;;  %v1885_v33 = vld [vmem:[%s2718_s0 + $0x2c] sm:$0xf0] }
  0x53   :  { %1028 = vmatmul.bf16.gmra.mxu2 %v1474_v34  ;;  %v1881_v34 = vld [vmem:[%s2718_s0 + $0x14] sm:$0xf]  ;;  %v1386_v40 = vor.u32 %v1885_v33, %v1385_v32  ;;  %v1462_v32 = vor.u32 %v1898_v22, %v1459_v23 }
  0x54   :  { %1077 = vmatmul.bf16.gmra.mxu3 %v1478_v35  ;;  %v1387_v35 = vld [vmem:[%s2718_s0 + $0x30] sm:$0xf0] }
  0x55   :  { %v1390_v41 = vor.u32 %v1881_v34, %v1387_v35 }
  0x61   :  { %935 = vmatmul.bf16.gmra.mxu0 %v1498_v48 }
  0x62   :  { %984 = vmatmul.bf16.gmra.mxu1 %v1502_v49 }
  0x63   :  { %1033 = vmatmul.bf16.gmra.mxu2 %v1506_v50 }
  0x64   :  { %1082 = vmatmul.bf16.gmra.mxu3 %v1510_v51 }
  0x71   :  { %940 = vmatmul.bf16.gmra.mxu0 %v1530_v0  ;;  %v1418_v0 = vor.u32 %v1893_v55, %v1417_v54 }
  0x72   :  { %989 = vmatmul.bf16.gmra.mxu1 %v1534_v1  ;;  %v1422_v1 = vor.u32 %v1889_v56, %v1419_v57 }
  0x73   :  { %1038 = vmatmul.bf16.gmra.mxu2 %v1538_v2 }
  0x74   :  { %1087 = vmatmul.bf16.gmra.mxu3 %v1542_v3 }
  0x81   :  { %945 = vmatmul.bf16.gmra.mxu0 %v1562_v16  ;;  %v1449_v16 = vld [vmem:[%s2718_s0 + $0x90] sm:$0xf] }
  0x82   :  { %994 = vmatmul.bf16.gmra.mxu1 %v1566_v17  ;;  %v1901_v17 = vld [vmem:[%s2718_s0 + $0xac] sm:$0xf0] }
  0x83   :  { %1043 = vmatmul.bf16.gmra.mxu2 %v1570_v18  ;;  %v1897_v18 = vld [vmem:[%s2718_s0 + $0x94] sm:$0xf]  ;;  %v1450_v26 = vor.u32 %v1901_v17, %v1449_v16 }
  0x84   :  { %1092 = vmatmul.bf16.gmra.mxu3 %v1574_v19  ;;  %v1451_v19 = vld [vmem:[%s2718_s0 + $0xb0] sm:$0xf0] }
  0x85   :  { %v1454_v27 = vor.u32 %v1897_v18, %v1451_v19 }
  0x91   :  { %950 = vmatmul.bf16.gmra.mxu0 %v1594_v28 }
  0x92   :  { %999 = vmatmul.bf16.gmra.mxu1 %v1598_v29 }
  0x93   :  { %1048 = vmatmul.bf16.gmra.mxu2 %v1602_v30 }
  0x94   :  { %1097 = vmatmul.bf16.gmra.mxu3 %v1606_v31  ;;  %v1458_v31 = vor.u32 %v1902_v21, %v1457_v20 }
  0x9e   :  { %v916_v42 = vpop.f32.mrf.mxu0 }
  0x9f   :  { %v965_v43 = vpop.f32.mrf.mxu1 }
  0xa0   :  { %v966_v46 = vadd.f32 %v965_v43, %v916_v42  ;;  %v1481_v42 = vld [vmem:[%s2718_s0 + $0xd0] sm:$0xf] }
  0xa1   :  { %1111 = vmatmul.bf16.vlgmr.msrb.gmra.mxu0 %v1386_v40  ;;  %v1909_v43 = vld [vmem:[%s2718_s0 + $0xec] sm:$0xf0] }
  0xa2   :  { %1160 = vmatmul.bf16.vlgmr.msrb.gmra.mxu1 %v1390_v41 }
  0xa3   :  { %1209 = vmatmul.bf16.vlgmr.msrb.gmra.mxu2 %v1394_v44  ;;  %v1905_v44 = vld [vmem:[%s2718_s0 + $0xd4] sm:$0xf] }
  0xa4   :  { %1258 = vmatmul.bf16.vlgmr.msrb.gmra.mxu3 %v1398_v45  ;;  %v1483_v45 = vld [vmem:[%s2718_s0 + $0xf0] sm:$0xf0] }
  0xa5   :  { %v1486_v54 = vor.u32 %v1905_v44, %v1483_v45 }
  0xa6   :  { %v1014_v47 = vpop.f32.mrf.mxu2  ;;  %v918_v50 = vpop.f32.mrf.mxu0 }
  0xa7   :  { %v1063_v48 = vpop.f32.mrf.mxu3  ;;  %v1015_v49 = vadd.f32 %v1014_v47, %v966_v46  ;;  %v967_v51 = vpop.f32.mrf.mxu1  ;;  %v1489_v46 = vld [vmem:[%s2718_s0 + $0xd8] sm:$0xf] }
  0xa8   :  { %v968_v52 = vadd.f32 %v967_v51, %v918_v50  ;;  %v1910_v47 = vld [vmem:[%s2718_s0 + $0xf4] sm:$0xf0] }
  0xa9   :  { %v2477_v53 = vadd.f32 %v1063_v48, %v1015_v49  ;;  %v1906_v48 = vld [vmem:[%s2718_s0 + $0xdc] sm:$0xf]  ;;  %v1490_v58 = vor.u32 %v1910_v47, %v1489_v46 }
  0xaa   :  { %v1491_v49 = vld [vmem:[%s2718_s0 + $0xf8] sm:$0xf0] }
  0xab   :  { %v1494_v59 = vor.u32 %v1906_v48, %v1491_v49 }
  0xae   :  { %v1016_v62 = vpop.f32.mrf.mxu2  ;;  %v921_v3 = vpop.f32.mrf.mxu0 }
  0xaf   :  { %v1065_v63 = vpop.f32.mrf.mxu3  ;;  %v1017_v2 = vadd.f32 %v1016_v62, %v968_v52  ;;  %v970_v4 = vpop.f32.mrf.mxu1  ;;  %v1482_v52 = vor.u32 %v1909_v43, %v1481_v42  ;;  %v1555_v42 = vld [vmem:[%s2718_s0 + $0x178] sm:$0xf0] }
  0xb0   :  { %v971_v7 = vadd.f32 %v970_v4, %v921_v3 }
  0xb1   :  { %v2503_v8 = vadd.f32 %v1065_v63, %v1017_v2  ;;  %1116 = vmatmul.bf16.gmra.mxu0 %v1418_v0 }
  0xb2   :  { %1165 = vmatmul.bf16.gmra.mxu1 %v1422_v1 }
  0xb3   :  { %1214 = vmatmul.bf16.gmra.mxu2 %v1426_v5  ;;  %v1513_v5 = vld [vmem:[%s2718_s0 + $0x110] sm:$0xf] }
  0xb4   :  { %1263 = vmatmul.bf16.gmra.mxu3 %v1430_v6  ;;  %v1917_v6 = vld [vmem:[%s2718_s0 + $0x12c] sm:$0xf0] }
  0xb5   :  { %v1514_v17 = vor.u32 %v1917_v6, %v1513_v5  ;;  %v1934_v5 = vld [vmem:[%s2718_s0 + $0x1b4] sm:$0xf0]  ;;  %v1930_v6 = vld [vmem:[%s2718_s0 + $0x19c] sm:$0xf] }
  0xb6   :  { %v1019_v9 = vpop.f32.mrf.mxu2  ;;  %v923_v12 = vpop.f32.mrf.mxu0 }
  0xb7   :  { %v1068_v10 = vpop.f32.mrf.mxu3  ;;  %v1020_v11 = vadd.f32 %v1019_v9, %v971_v7  ;;  %v972_v13 = vpop.f32.mrf.mxu1  ;;  %v1913_v7 = vld [vmem:[%s2718_s0 + $0x114] sm:$0xf] }
  0xb8   :  { %v973_v14 = vadd.f32 %v972_v13, %v923_v12  ;;  %v1515_v9 = vld [vmem:[%s2718_s0 + $0x130] sm:$0xf0]  ;;  %v1914_v12 = vld [vmem:[%s2718_s0 + $0x11c] sm:$0xf] }
  0xb9   :  { %v2505_v15 = vadd.f32 %v1068_v10, %v1020_v11  ;;  %v1521_v10 = vld [vmem:[%s2718_s0 + $0x118] sm:$0xf]  ;;  %v1523_v13 = vld [vmem:[%s2718_s0 + $0x138] sm:$0xf0]  ;;  %v1518_v18 = vor.u32 %v1913_v7, %v1515_v9 }
  0xba   :  { %v1918_v11 = vld [vmem:[%s2718_s0 + $0x134] sm:$0xf0]  ;;  %v1526_v23 = vor.u32 %v1914_v12, %v1523_v13  ;;  %v1587_v7 = vld [vmem:[%s2718_s0 + $0x1b8] sm:$0xf0] }
  0xbb   :  { %v1522_v22 = vor.u32 %v1918_v11, %v1521_v10 }
  0xbe   :  { %v1021_v24 = vpop.f32.mrf.mxu2  ;;  %v926_v29 = vpop.f32.mrf.mxu0 }
  0xbf   :  { %v1070_v25 = vpop.f32.mrf.mxu3  ;;  %v1022_v28 = vadd.f32 %v1021_v24, %v973_v14  ;;  %v975_v30 = vpop.f32.mrf.mxu1 }
  0xc0   :  { %v976_v33 = vadd.f32 %v975_v30, %v926_v29 }
  0xc1   :  { %v2531_v34 = vadd.f32 %v1070_v25, %v1022_v28  ;;  %1121 = vmatmul.bf16.gmra.mxu0 %v1450_v26 }
  0xc2   :  { %1170 = vmatmul.bf16.gmra.mxu1 %v1454_v27 }
  0xc3   :  { %1219 = vmatmul.bf16.gmra.mxu2 %v1458_v31 }
  0xc4   :  { %1268 = vmatmul.bf16.gmra.mxu3 %v1462_v32 }
  0xc6   :  { %v1024_v35 = vpop.f32.mrf.mxu2  ;;  %v928_v38 = vpop.f32.mrf.mxu0 }
  0xc7   :  { %v1073_v36 = vpop.f32.mrf.mxu3  ;;  %v1025_v37 = vadd.f32 %v1024_v35, %v976_v33  ;;  %v977_v39 = vpop.f32.mrf.mxu1  ;;  %v1545_v33 = vld [vmem:[%s2718_s0 + $0x150] sm:$0xf] }
  0xc8   :  { %v978_v40 = vadd.f32 %v977_v39, %v928_v38  ;;  %v1925_v35 = vld [vmem:[%s2718_s0 + $0x16c] sm:$0xf0]  ;;  %v1553_v38 = vld [vmem:[%s2718_s0 + $0x158] sm:$0xf] }
  0xc9   :  { %v2533_v41 = vadd.f32 %v1073_v36, %v1025_v37  ;;  %v1921_v36 = vld [vmem:[%s2718_s0 + $0x154] sm:$0xf]  ;;  %v1926_v39 = vld [vmem:[%s2718_s0 + $0x174] sm:$0xf0]  ;;  %v1546_v45 = vor.u32 %v1925_v35, %v1545_v33 }
  0xca   :  { %v1547_v37 = vld [vmem:[%s2718_s0 + $0x170] sm:$0xf0]  ;;  %v1617_v35 = vld [vmem:[%s2718_s0 + $0x1d8] sm:$0xf] }
  0xcb   :  { %v1550_v46 = vor.u32 %v1921_v36, %v1547_v37  ;;  %v1611_v33 = vld [vmem:[%s2718_s0 + $0x1f0] sm:$0xf0]  ;;  %v1942_v36 = vld [vmem:[%s2718_s0 + $0x1f4] sm:$0xf0]  ;;  %v1938_v37 = vld [vmem:[%s2718_s0 + $0x1dc] sm:$0xf] }
  0xce   :  { %v1026_v50 = vpop.f32.mrf.mxu2  ;;  %v931_v56 = vpop.f32.mrf.mxu0 }
  0xcf   :  { %v1075_v51 = vpop.f32.mrf.mxu3  ;;  %v1027_v55 = vadd.f32 %v1026_v50, %v978_v40  ;;  %v980_v57 = vpop.f32.mrf.mxu1  ;;  %v1922_v40 = vld [vmem:[%s2718_s0 + $0x15c] sm:$0xf]  ;;  %v1554_v50 = vor.u32 %v1926_v39, %v1553_v38 }
  0xd0   :  { %v981_v60 = vadd.f32 %v980_v57, %v931_v56  ;;  %v1619_v38 = vld [vmem:[%s2718_s0 + $0x1f8] sm:$0xf0] }
  0xd1   :  { %v2559_v61 = vadd.f32 %v1075_v51, %v1027_v55  ;;  %1126 = vmatmul.bf16.gmra.mxu0 %v1482_v52  ;;  %v1558_v51 = vor.u32 %v1922_v40, %v1555_v42 }
  0xd2   :  { %1175 = vmatmul.bf16.gmra.mxu1 %v1486_v54 }
  0xd3   :  { %1224 = vmatmul.bf16.gmra.mxu2 %v1490_v58 }
  0xd4   :  { %1273 = vmatmul.bf16.gmra.mxu3 %v1494_v59 }
  0xd6   :  { %v1029_v62 = vpop.f32.mrf.mxu2  ;;  %v933_v1 = vpop.f32.mrf.mxu0 }
  0xd7   :  { %v1078_v63 = vpop.f32.mrf.mxu3  ;;  %v1030_v0 = vadd.f32 %v1029_v62, %v981_v60  ;;  %v982_v2 = vpop.f32.mrf.mxu1 }
  0xd8   :  { %v983_v3 = vadd.f32 %v982_v2, %v933_v1  ;;  %v1929_v1 = vld [vmem:[%s2718_s0 + $0x194] sm:$0xf] }
  0xd9   :  { %v2561_v4 = vadd.f32 %v1078_v63, %v1030_v0  ;;  %v1577_v63 = vld [vmem:[%s2718_s0 + $0x190] sm:$0xf]  ;;  %v1579_v2 = vld [vmem:[%s2718_s0 + $0x1b0] sm:$0xf0] }
  0xda   :  { %v1933_v0 = vld [vmem:[%s2718_s0 + $0x1ac] sm:$0xf0]  ;;  %v1582_v12 = vor.u32 %v1929_v1, %v1579_v2 }
  0xdb   :  { %v1578_v11 = vor.u32 %v1933_v0, %v1577_v63 }
  0xde   :  { %v1031_v14 = vpop.f32.mrf.mxu2  ;;  %v936_v20 = vpop.f32.mrf.mxu0 }
  0xdf   :  { %v1080_v16 = vpop.f32.mrf.mxu3  ;;  %v1032_v19 = vadd.f32 %v1031_v14, %v983_v3  ;;  %v985_v21 = vpop.f32.mrf.mxu1  ;;  %v1585_v3 = vld [vmem:[%s2718_s0 + $0x198] sm:$0xf] }
  0xe0   :  { %v986_v24 = vadd.f32 %v985_v21, %v936_v20 }
  0xe1   :  { %v2587_v25 = vadd.f32 %v1080_v16, %v1032_v19  ;;  %1131 = vmatmul.bf16.gmra.mxu0 %v1514_v17  ;;  %v1586_v17 = vor.u32 %v1934_v5, %v1585_v3 }
  0xe2   :  { %1180 = vmatmul.bf16.gmra.mxu1 %v1518_v18  ;;  %v1590_v18 = vor.u32 %v1930_v6, %v1587_v7 }
  0xe3   :  { %1229 = vmatmul.bf16.gmra.mxu2 %v1522_v22 }
  0xe4   :  { %1278 = vmatmul.bf16.gmra.mxu3 %v1526_v23 }
  0xe6   :  { %v1034_v26 = vpop.f32.mrf.mxu2  ;;  %v938_v29 = vpop.f32.mrf.mxu0 }
  0xe7   :  { %v1083_v27 = vpop.f32.mrf.mxu3  ;;  %v1035_v28 = vadd.f32 %v1034_v26, %v986_v24  ;;  %v987_v30 = vpop.f32.mrf.mxu1 }
  0xe8   :  { %v988_v31 = vadd.f32 %v987_v30, %v938_v29  ;;  %v1609_v29 = vld [vmem:[%s2718_s0 + $0x1d0] sm:$0xf] }
  0xe9   :  { %v2589_v32 = vadd.f32 %v1083_v27, %v1035_v28  ;;  %v1941_v30 = vld [vmem:[%s2718_s0 + $0x1ec] sm:$0xf0] }
  0xea   :  { %v1610_v42 = vor.u32 %v1941_v30, %v1609_v29 }
  0xee   :  { %v1036_v43 = vpop.f32.mrf.mxu2  ;;  %v941_v48 = vpop.f32.mrf.mxu0 }
  0xef   :  { %v1085_v44 = vpop.f32.mrf.mxu3  ;;  %v1037_v47 = vadd.f32 %v1036_v43, %v988_v31  ;;  %v990_v49 = vpop.f32.mrf.mxu1  ;;  %v1937_v31 = vld [vmem:[%s2718_s0 + $0x1d4] sm:$0xf] }
  0xf0   :  { %v991_v52 = vadd.f32 %v990_v49, %v941_v48  ;;  %v1614_v43 = vor.u32 %v1937_v31, %v1611_v33  ;;  %v1622_v48 = vor.u32 %v1938_v37, %v1619_v38 }
  0xf1   :  { %v2615_v54 = vadd.f32 %v1085_v44, %v1037_v47  ;;  %1136 = vmatmul.bf16.gmra.mxu0 %v1546_v45  ;;  %v1618_v47 = vor.u32 %v1942_v36, %v1617_v35 }
  0xf2   :  { %1185 = vmatmul.bf16.gmra.mxu1 %v1550_v46 }
  0xf3   :  { %1234 = vmatmul.bf16.gmra.mxu2 %v1554_v50 }
  0xf4   :  { %1283 = vmatmul.bf16.gmra.mxu3 %v1558_v51 }
  0xf6   :  { %v1039_v55 = vpop.f32.mrf.mxu2  ;;  %v943_v58 = vpop.f32.mrf.mxu0 }
  0xf7   :  { %v1088_v56 = vpop.f32.mrf.mxu3  ;;  %v1040_v57 = vadd.f32 %v1039_v55, %v991_v52  ;;  %v992_v59 = vpop.f32.mrf.mxu1 }
  0xf8   :  { %v993_v60 = vadd.f32 %v992_v59, %v943_v58 }
  0xf9   :  { %v2617_v62 = vadd.f32 %v1088_v56, %v1040_v57 }
  0xfe   :  { %v1041_v9 = vpop.f32.mrf.mxu2  ;;  %v946_v14 = vpop.f32.mrf.mxu0 }
  0xff   :  { %v1090_v10 = vpop.f32.mrf.mxu3  ;;  %v1042_v13 = vadd.f32 %v1041_v9, %v993_v60  ;;  %v995_v16 = vpop.f32.mrf.mxu1 }
 0x100   :  { %v996_v19 = vadd.f32 %v995_v16, %v946_v14 }
 0x101   :  { %v2643_v20 = vadd.f32 %v1090_v10, %v1042_v13  ;;  %1141 = vmatmul.bf16.gmra.mxu0 %v1578_v11 }
 0x102   :  { %1190 = vmatmul.bf16.gmra.mxu1 %v1582_v12 }
 0x103   :  { %1239 = vmatmul.bf16.gmra.mxu2 %v1586_v17 }
 0x104   :  { %1288 = vmatmul.bf16.gmra.mxu3 %v1590_v18 }
 0x106   :  { %v1044_v21 = vpop.f32.mrf.mxu2  ;;  %v948_v24 = vpop.f32.mrf.mxu0 }
 0x107   :  { %v1093_v22 = vpop.f32.mrf.mxu3  ;;  %v1045_v23 = vadd.f32 %v1044_v21, %v996_v19  ;;  %v997_v26 = vpop.f32.mrf.mxu1 }
 0x108   :  { %v998_v27 = vadd.f32 %v997_v26, %v948_v24 }
 0x109   :  { %v2645_v28 = vadd.f32 %v1093_v22, %v1045_v23 }
 0x10e   :  { %v1046_v39 = vpop.f32.mrf.mxu2  ;;  %v951_v45 = vpop.f32.mrf.mxu0 }
 0x10f   :  { %v1095_v40 = vpop.f32.mrf.mxu3  ;;  %v1047_v44 = vadd.f32 %v1046_v39, %v998_v27  ;;  %v1000_v46 = vpop.f32.mrf.mxu1 }
 0x110   :  { %v1001_v49 = vadd.f32 %v1000_v46, %v951_v45 }
 0x111   :  { %v2671_v50 = vadd.f32 %v1095_v40, %v1047_v44  ;;  %1146 = vmatmul.bf16.gmra.mxu0 %v1610_v42 }
 0x112   :  { %1195 = vmatmul.bf16.gmra.mxu1 %v1614_v43 }
 0x113   :  { %1244 = vmatmul.bf16.gmra.mxu2 %v1618_v47 }
 0x114   :  { %1293 = vmatmul.bf16.gmra.mxu3 %v1622_v48 }
 0x116   :  { %v1049_v51 = vpop.f32.mrf.mxu2  ;;  %v953_v56 = vpop.f32.mrf.mxu0 }
 0x117   :  { %v1098_v52 = vpop.f32.mrf.mxu3  ;;  %v1050_v55 = vadd.f32 %v1049_v51, %v1001_v49  ;;  %v1002_v57 = vpop.f32.mrf.mxu1 }
 0x118   :  { %v1003_v58 = vadd.f32 %v1002_v57, %v953_v56 }
 0x119   :  { %v2673_v59 = vadd.f32 %v1098_v52, %v1050_v55 }
 0x11e   :  { %v1051_v60 = vpop.f32.mrf.mxu2  ;;  %v1112_v1 = vpop.f32.mrf.mxu0 }
 0x11f   :  { %v1100_v63 = vpop.f32.mrf.mxu3  ;;  %v1052_v0 = vadd.f32 %v1051_v60, %v1003_v58  ;;  %v1161_v2 = vpop.f32.mrf.mxu1  ;;  %v1113_v5 = vadd.f32 %v1112_v1, %v2477_v53 }
 0x121   :  { %v2675_v3 = vadd.f32 %v1100_v63, %v1052_v0  ;;  %v1162_v9 = vadd.f32 %v1161_v2, %v1113_v5 }
 0x126   :  { %v1210_v6 = vpop.f32.mrf.mxu2  ;;  %v1114_v10 = vpop.f32.mrf.mxu0 }
 0x127   :  { %v1259_v7 = vpop.f32.mrf.mxu3  ;;  %v1163_v11 = vpop.f32.mrf.mxu1  ;;  %v1211_v12 = vadd.f32 %v1210_v6, %v1162_v9  ;;  %v1115_v13 = vadd.f32 %v1114_v10, %v2503_v8 }
 0x129   :  { %v1260_v14 = vadd.f32 %v1259_v7, %v1211_v12  ;;  %v1164_v16 = vadd.f32 %v1163_v11, %v1115_v13 }
 0x12b   :  { %v1299_v23 = vmul.f32 0.2, %v1260_v14 }
 0x12d   :  { %v1315_v27 = vmax.f32 %v1260_v14, %v1299_v23 }
 0x12e   :  { %v1212_v17 = vpop.f32.mrf.mxu2  ;;  %v1117_v21 = vpop.f32.mrf.mxu0 }
 0x12f   :  { %v1261_v18 = vpop.f32.mrf.mxu3  ;;  %v1213_v19 = vadd.f32 %v1212_v17, %v1164_v16  ;;  %v1166_v22 = vpop.f32.mrf.mxu1  ;;  %v1118_v53 = vadd.f32 %v1117_v21, %v2505_v15 }
 0x131   :  { %v1262_v24 = vadd.f32 %v1261_v18, %v1213_v19  ;;  %v1167_v35 = vadd.f32 %v1166_v22, %v1118_v53 }
 0x133   :  { %v1300_v26 = vmul.f32 0.2, %v1262_v24 }
 0x135   :  { %v1316_v29 = vmax.f32 %v1262_v24, %v1300_v26 }
 0x136   :  { %v1215_v30 = vpop.f32.mrf.mxu2  ;;  %v1119_v36 = vpop.f32.mrf.mxu0 }
 0x137   :  { %v1264_v31 = vpop.f32.mrf.mxu3  ;;  %v2010_v33 = vpack.c.bf16 %v1316_v29, %v1315_v27  ;;  %v1168_v8 = vpop.f32.mrf.mxu1  ;;  %v1216_v37 = vadd.f32 %v1215_v30, %v1167_v35  ;;  %v1120_v38 = vadd.f32 %v1119_v36, %v2531_v34 }
 0x139   :  { %2011 = vst [vmem:[%s2719_s2] sm:$0xff] %v2010_v33   ;;  %v1265_v39 = vadd.f32 %v1264_v31, %v1216_v37  ;;  %v1169_v40 = vadd.f32 %v1168_v8, %v1120_v38 }
 0x13b   :  { %v1301_v46 = vmul.f32 0.2, %v1265_v39 }
 0x13d   :  { %v1317_v51 = vmax.f32 %v1265_v39, %v1301_v46 }
 0x13e   :  { %v1217_v42 = vpop.f32.mrf.mxu2  ;;  %v1122_v44 = vpop.f32.mrf.mxu0 }
 0x13f   :  { %v1266_v43 = vpop.f32.mrf.mxu3  ;;  %v1218_v15 = vadd.f32 %v1217_v42, %v1169_v40  ;;  %v1171_v45 = vpop.f32.mrf.mxu1  ;;  %v1123_v49 = vadd.f32 %v1122_v44, %v2533_v41 }
 0x141   :  { %v1267_v47 = vadd.f32 %v1266_v43, %v1218_v15  ;;  %v1172_v58 = vadd.f32 %v1171_v45, %v1123_v49 }
 0x143   :  { %v1302_v48 = vmul.f32 0.2, %v1267_v47 }
 0x145   :  { %v1318_v52 = vmax.f32 %v1267_v47, %v1302_v48 }
 0x146   :  { %v1220_v55 = vpop.f32.mrf.mxu2  ;;  %v1124_v60 = vpop.f32.mrf.mxu0 }
 0x147   :  { %v1269_v56 = vpop.f32.mrf.mxu3  ;;  %v2015_v57 = vpack.c.bf16 %v1318_v52, %v1317_v51  ;;  %v1173_v34 = vpop.f32.mrf.mxu1  ;;  %v1221_v63 = vadd.f32 %v1220_v55, %v1172_v58  ;;  %v1125_v0 = vadd.f32 %v1124_v60, %v2559_v61 }
 0x149   :  { %2047 = vst [vmem:[%s2719_s2 + $0x8] sm:$0xff] %v2015_v57   ;;  %v1270_v1 = vadd.f32 %v1269_v56, %v1221_v63  ;;  %v1174_v2 = vadd.f32 %v1173_v34, %v1125_v0 }
 0x14b   :  { %v1303_v10 = vmul.f32 0.2, %v1270_v1 }
 0x14d   :  { %v1319_v14 = vmax.f32 %v1270_v1, %v1303_v10 }
 0x14e   :  { %v1222_v5 = vpop.f32.mrf.mxu2  ;;  %v1127_v7 = vpop.f32.mrf.mxu0 }
 0x14f   :  { %v1271_v6 = vpop.f32.mrf.mxu3  ;;  %v1223_v41 = vadd.f32 %v1222_v5, %v1174_v2  ;;  %v1176_v9 = vpop.f32.mrf.mxu1  ;;  %v1128_v13 = vadd.f32 %v1127_v7, %v2561_v4 }
 0x151   :  { %v1272_v11 = vadd.f32 %v1271_v6, %v1223_v41  ;;  %v1177_v21 = vadd.f32 %v1176_v9, %v1128_v13 }
 0x153   :  { %v1304_v12 = vmul.f32 0.2, %v1272_v11 }
 0x155   :  { %v1320_v16 = vmax.f32 %v1272_v11, %v1304_v12 }
 0x156   :  { %v1225_v17 = vpop.f32.mrf.mxu2  ;;  %v1129_v22 = vpop.f32.mrf.mxu0 }
 0x157   :  { %v1274_v18 = vpop.f32.mrf.mxu3  ;;  %v2020_v19 = vpack.c.bf16 %v1320_v16, %v1319_v14  ;;  %v1178_v61 = vpop.f32.mrf.mxu1  ;;  %v1226_v23 = vadd.f32 %v1225_v17, %v1177_v21  ;;  %v1130_v24 = vadd.f32 %v1129_v22, %v2587_v25 }
 0x159   :  { %2048 = vst [vmem:[%s2719_s2 + $0x10] sm:$0xff] %v2020_v19   ;;  %v1275_v26 = vadd.f32 %v1274_v18, %v1226_v23  ;;  %v1179_v53 = vadd.f32 %v1178_v61, %v1130_v24 }
 0x15b   :  { %v1305_v33 = vmul.f32 0.2, %v1275_v26 }
 0x15d   :  { %v1321_v37 = vmax.f32 %v1275_v26, %v1305_v33 }
 0x15e   :  { %v1227_v27 = vpop.f32.mrf.mxu2  ;;  %v1132_v30 = vpop.f32.mrf.mxu0 }
 0x15f   :  { %v1276_v29 = vpop.f32.mrf.mxu3  ;;  %v1228_v4 = vadd.f32 %v1227_v27, %v1179_v53  ;;  %v1181_v31 = vpop.f32.mrf.mxu1  ;;  %v1133_v8 = vadd.f32 %v1132_v30, %v2589_v32 }
 0x161   :  { %v1277_v35 = vadd.f32 %v1276_v29, %v1228_v4  ;;  %v1182_v43 = vadd.f32 %v1181_v31, %v1133_v8 }
 0x163   :  { %v1306_v36 = vmul.f32 0.2, %v1277_v35 }
 0x165   :  { %v1322_v38 = vmax.f32 %v1277_v35, %v1306_v36 }
 0x166   :  { %v1230_v39 = vpop.f32.mrf.mxu2  ;;  %v1134_v15 = vpop.f32.mrf.mxu0 }
 0x167   :  { %v1279_v40 = vpop.f32.mrf.mxu3  ;;  %v2025_v42 = vpack.c.bf16 %v1322_v38, %v1321_v37  ;;  %v1183_v25 = vpop.f32.mrf.mxu1  ;;  %v1231_v44 = vadd.f32 %v1230_v39, %v1182_v43  ;;  %v1135_v45 = vadd.f32 %v1134_v15, %v2615_v54 }
 0x169   :  { %2049 = vst [vmem:[%s2719_s2 + $0x18] sm:$0xff] %v2025_v42   ;;  %v1280_v46 = vadd.f32 %v1279_v40, %v1231_v44  ;;  %v1184_v47 = vadd.f32 %v1183_v25, %v1135_v45 }
 0x16b   :  { %v1307_v55 = vmul.f32 0.2, %v1280_v46 }
 0x16d   :  { %v1323_v60 = vmax.f32 %v1280_v46, %v1307_v55 }
 0x16e   :  { %v1232_v48 = vpop.f32.mrf.mxu2  ;;  %v1137_v51 = vpop.f32.mrf.mxu0 }
 0x16f   :  { %v1281_v49 = vpop.f32.mrf.mxu3  ;;  %v1233_v32 = vadd.f32 %v1232_v48, %v1184_v47  ;;  %v1186_v52 = vpop.f32.mrf.mxu1  ;;  %v1138_v58 = vadd.f32 %v1137_v51, %v2617_v62 }
 0x171   :  { %v1282_v56 = vadd.f32 %v1281_v49, %v1233_v32  ;;  %v1187_v2 = vadd.f32 %v1186_v52, %v1138_v58 }
 0x173   :  { %v1308_v57 = vmul.f32 0.2, %v1282_v56 }
 0x175   :  { %v1324_v34 = vmax.f32 %v1282_v56, %v1308_v57 }
 0x176   :  { %v1235_v63 = vpop.f32.mrf.mxu2  ;;  %v1139_v5 = vpop.f32.mrf.mxu0 }
 0x177   :  { %v1284_v0 = vpop.f32.mrf.mxu3  ;;  %v2030_v1 = vpack.c.bf16 %v1324_v34, %v1323_v60  ;;  %v1188_v54 = vpop.f32.mrf.mxu1  ;;  %v1236_v6 = vadd.f32 %v1235_v63, %v1187_v2  ;;  %v1140_v41 = vadd.f32 %v1139_v5, %v2643_v20 }
 0x179   :  { %2050 = vst [vmem:[%s2719_s2 + $0x20] sm:$0xff] %v2030_v1   ;;  %v1285_v7 = vadd.f32 %v1284_v0, %v1236_v6  ;;  %v1189_v9 = vadd.f32 %v1188_v54, %v1140_v41 }
 0x17b   :  { %v1309_v14 = vmul.f32 0.2, %v1285_v7 }
 0x17d   :  { %v1325_v19 = vmax.f32 %v1285_v7, %v1309_v14 }
 0x17e   :  { %v1237_v10 = vpop.f32.mrf.mxu2  ;;  %v1142_v12 = vpop.f32.mrf.mxu0 }
 0x17f   :  { %v1286_v11 = vpop.f32.mrf.mxu3  ;;  %v1238_v62 = vadd.f32 %v1237_v10, %v1189_v9  ;;  %v1191_v13 = vpop.f32.mrf.mxu1  ;;  %v1143_v18 = vadd.f32 %v1142_v12, %v2645_v28 }
 0x181   :  { %v1287_v16 = vadd.f32 %v1286_v11, %v1238_v62  ;;  %v1192_v24 = vadd.f32 %v1191_v13, %v1143_v18 }
 0x183   :  { %v1310_v17 = vmul.f32 0.2, %v1287_v16 }
 0x185   :  { %v1326_v21 = vmax.f32 %v1287_v16, %v1310_v17 }
 0x186   :  { %v1240_v22 = vpop.f32.mrf.mxu2  ;;  %v1144_v26 = vpop.f32.mrf.mxu0 }
 0x187   :  { %v1289_v61 = vpop.f32.mrf.mxu3  ;;  %v2035_v23 = vpack.c.bf16 %v1326_v21, %v1325_v19  ;;  %v1193_v20 = vpop.f32.mrf.mxu1  ;;  %v1241_v53 = vadd.f32 %v1240_v22, %v1192_v24  ;;  %v1145_v27 = vadd.f32 %v1144_v26, %v2671_v50 }
 0x189   :  { %2051 = vst [vmem:[%s2719_s2 + $0x28] sm:$0xff] %v2035_v23   ;;  %v1290_v29 = vadd.f32 %v1289_v61, %v1241_v53  ;;  %v1194_v4 = vadd.f32 %v1193_v20, %v1145_v27 }
 0x18b   :  { %v1311_v35 = vmul.f32 0.2, %v1290_v29 }
 0x18d   :  { %v1327_v39 = vmax.f32 %v1290_v29, %v1311_v35 }
 0x18e   :  { %v1242_v30 = vpop.f32.mrf.mxu2  ;;  %v1147_v33 = vpop.f32.mrf.mxu0 }
 0x18f   :  { %v1291_v31 = vpop.f32.mrf.mxu3  ;;  %v1243_v28 = vadd.f32 %v1242_v30, %v1194_v4  ;;  %v1196_v8 = vpop.f32.mrf.mxu1  ;;  %v1148_v38 = vadd.f32 %v1147_v33, %v2673_v59 }
 0x191   :  { %v1292_v36 = vadd.f32 %v1291_v31, %v1243_v28  ;;  %v1197_v25 = vadd.f32 %v1196_v8, %v1148_v38 }
 0x193   :  { %v1312_v37 = vmul.f32 0.2, %v1292_v36 }
 0x195   :  { %v1328_v40 = vmax.f32 %v1292_v36, %v1312_v37 }
 0x196   :  { %v1245_v42 = vpop.f32.mrf.mxu2  ;;  %v1149_v44 = vpop.f32.mrf.mxu0 }
 0x197   :  { %v1294_v43 = vpop.f32.mrf.mxu3  ;;  %v2040_v15 = vpack.c.bf16 %v1328_v40, %v1327_v39  ;;  %v1246_v50 = vadd.f32 %v1245_v42, %v1197_v25  ;;  %v1150_v45 = vadd.f32 %v1149_v44, %v2675_v3  ;;  %v1198_v46 = vpop.f32.mrf.mxu1 }
 0x199   :  { %2052 = vst [vmem:[%s2719_s2 + $0x30] sm:$0xff] %v2040_v15   ;;  %v1295_v47 = vadd.f32 %v1294_v43, %v1246_v50  ;;  %v1199_v48 = vadd.f32 %v1198_v46, %v1150_v45 }
 0x19b   :  { %v1313_v51 = vmul.f32 0.2, %v1295_v47 }
 0x19d   :  { %v1329_v56 = vmax.f32 %v1295_v47, %v1313_v51 }
 0x19e   :  { %v1247_v49 = vpop.f32.mrf.mxu2 }
 0x19f   :  { %v1248_v32 = vadd.f32 %v1247_v49, %v1199_v48  ;;  %v1296_v59 = vpop.f32.mrf.mxu3 }
 0x1a1   :  { %v1297_v52 = vadd.f32 %v1296_v59, %v1248_v32 }
 0x1a3   :  { %v1314_v55 = vmul.f32 0.2, %v1297_v52 }
 0x1a5   :  { %v1330_v57 = vmax.f32 %v1297_v52, %v1314_v55 }
 0x1a7   :  { %v2045_v58 = vpack.c.bf16 %v1330_v57, %v1329_v56 }
 0x1a9   :  { %2053 = vst [vmem:[%s2719_s2 + $0x38] sm:$0xff] %v2045_v58  }

// kernel: forward.7
= control target key start
LH: loop header
LB: loop body
LE: loop exit
PB: predicated region body
PF: predicated region fallthrough
CT: control target
= control target key end

     0   :  { %s4902_s9 = smov 0   ;;  %s4904_s10 = smov 0   ;;  %s5816_s0 = inlined_call_operand.vmem [shape: bf16[32,2048], index: 0, kind: input, shape index: {}]   ;;  %s5817_s1 = inlined_call_operand.vmem [shape: bf16[2048,256], index: 1, kind: input, shape index: {}]   ;;  %s5818_s2 = inlined_call_operand.vmem [shape: bf16[32,256], index: 2, kind: output, shape index: {}]  }
   0x1   :  { %s4906_s11 = smov 0   ;;  %s4908_s12 = smov 0  }
   0x2   :  { %s4910_s13 = smov 0  }
   0x3 LB: > { %s21_s14 = sadd.s32 1, %s4881_s12  ;;  %s3982_s15 = sadd.s32 4294967295, %s4885_s13   ;;  %s4885_s13 = sphi %s4910_s13, %s12_s13   ;;  %s4881_s12 = sphi %s4908_s12, %s5823_s12   ;;  %s4877_s11 = sphi %s4906_s11, %s5822_s11   ;;  %s4873_s10 = sphi %s4904_s10, %s5821_s10   ;;  %s4869_s9 = sphi %s4902_s9, %s5820_s9  }
   0x4   : > { %p22_p0 = scmp.ge.s32.totalorder %s21_s14, 2  ;;  %p64_p1 = scmp.ne.s32.totalorder %s4873_s10, %s4869_s9 }
   0x5   : > { %p65_p2 = scmp.eq.s32.totalorder %s4885_s13, 0  ;;  %p96_p4 = scmp.eq.s32.totalorder %s3982_s15, 1 }
   0x6   : > { %s5825_s14 = smov (%p22_p0, %s21_s14), 0  ;;  %s57_s17 = sadd.s32 1, %s4873_s10 }
   0x7   : > { %p66_p3 = por %p65_p2, %p64_p1  ;;  %s54_s16 = ssub.s32 %s4881_s12, %s5825_s14 }
   0x8   : > { %p55_p5 = scmp.eq.s32.totalorder %s54_s16, 0  ;;  %p4937_p6 = por %p96_p4, %p64_p1 }
   0x9   : > { %p3986_p7 = scmp.ge.s32.totalorder %s4885_s13, 2 }
   0xa   : > { %s4942_s19 = scalar_select %p55_p5, %s4873_s10, %s57_s17  }
   0xb   : > { %128 = sbr.rel (%p3986_p7) target bundleno = 276 (0x114), region = 20 }
  0x10   : > { %131 = sbr.rel (!%p66_p3) target bundleno = 276 (0x114), region = 24  ;;  %s133_s20 = sand.u32 (%p66_p3), 1, %s4873_s10  }
  0x11   : > { %s3988_s21 = sshll.u32 (%p66_p3), %s4881_s12, 2  ;;  %s3987_s22 = sshll.u32 (%p66_p3), %s133_s20, 10 }
  0x12   : > { %s4950_s25 = scalar_lea.vmem (%p66_p3), %s5817_s1, %s3988_s21  ;;  %s4954_s26 = scalar_lea.vmem (%p66_p3), [#allocation2], %s3987_s22 }
  0x13   : > { %v154_v0 = vld [vmem:[%s4950_s25] sm:$0xf] (%p66_p3)  ;;  %v156_v1 = vld [vmem:[%s4950_s25 + $0x8] sm:$0xf] (%p66_p3)  ;;  %v158_v2 = vld [vmem:[%s4950_s25 + $0x10] sm:$0xf] (%p66_p3) }
  0x14   : > { %155 = vst [vmem:[%s4954_s26] sm:$0xf] (%p66_p3), %v154_v0  ;;  %v160_v3 = vld [vmem:[%s4950_s25 + $0x18] sm:$0xf] (%p66_p3)  ;;  %v162_v4 = vld [vmem:[%s4950_s25 + $0x20] sm:$0xf] (%p66_p3) }
  0x15   : > { %157 = vst [vmem:[%s4954_s26 + $0x4] sm:$0xf] %v156_v1  ;;  %v164_v5 = vld [vmem:[%s4950_s25 + $0x28] sm:$0xf]  ;;  %v166_v6 = vld [vmem:[%s4950_s25 + $0x30] sm:$0xf] }
  0x16   : > { %159 = vst [vmem:[%s4954_s26 + $0x8] sm:$0xf] %v158_v2  ;;  %v168_v7 = vld [vmem:[%s4950_s25 + $0x38] sm:$0xf]  ;;  %v170_v8 = vld [vmem:[%s4950_s25 + $0x40] sm:$0xf] }
  0x17   : > { %161 = vst [vmem:[%s4954_s26 + $0xc] sm:$0xf] %v160_v3  ;;  %v172_v9 = vld [vmem:[%s4950_s25 + $0x48] sm:$0xf]  ;;  %v174_v10 = vld [vmem:[%s4950_s25 + $0x50] sm:$0xf] }
  0x18   : > { %163 = vst [vmem:[%s4954_s26 + $0x10] sm:$0xf] %v162_v4  ;;  %v176_v11 = vld [vmem:[%s4950_s25 + $0x58] sm:$0xf]  ;;  %v178_v12 = vld [vmem:[%s4950_s25 + $0x60] sm:$0xf] }
  0x19   : > { %165 = vst [vmem:[%s4954_s26 + $0x14] sm:$0xf] %v164_v5  ;;  %v180_v13 = vld [vmem:[%s4950_s25 + $0x68] sm:$0xf]  ;;  %v182_v14 = vld [vmem:[%s4950_s25 + $0x70] sm:$0xf] }
  0x1a   : > { %167 = vst [vmem:[%s4954_s26 + $0x18] sm:$0xf] %v166_v6  ;;  %v184_v15 = vld [vmem:[%s4950_s25 + $0x78] sm:$0xf]  ;;  %v186_v16 = vld [vmem:[%s4950_s25 + $0x80] sm:$0xf] }
  0x1b   : > { %169 = vst [vmem:[%s4954_s26 + $0x1c] sm:$0xf] %v168_v7  ;;  %v188_v17 = vld [vmem:[%s4950_s25 + $0x88] sm:$0xf]  ;;  %v190_v18 = vld [vmem:[%s4950_s25 + $0x90] sm:$0xf] }
  0x1c   : > { %171 = vst [vmem:[%s4954_s26 + $0x20] sm:$0xf] %v170_v8  ;;  %v192_v19 = vld [vmem:[%s4950_s25 + $0x98] sm:$0xf]  ;;  %v194_v20 = vld [vmem:[%s4950_s25 + $0xa0] sm:$0xf] }
  0x1d   : > { %173 = vst [vmem:[%s4954_s26 + $0x24] sm:$0xf] %v172_v9  ;;  %v196_v21 = vld [vmem:[%s4950_s25 + $0xa8] sm:$0xf]  ;;  %v198_v22 = vld [vmem:[%s4950_s25 + $0xb0] sm:$0xf] }
  0x1e   : > { %175 = vst [vmem:[%s4954_s26 + $0x28] sm:$0xf] %v174_v10  ;;  %v200_v23 = vld [vmem:[%s4950_s25 + $0xb8] sm:$0xf]  ;;  %v202_v24 = vld [vmem:[%s4950_s25 + $0xc0] sm:$0xf] }
  0x1f   : > { %177 = vst [vmem:[%s4954_s26 + $0x2c] sm:$0xf] %v176_v11  ;;  %v204_v25 = vld [vmem:[%s4950_s25 + $0xc8] sm:$0xf]  ;;  %v206_v26 = vld [vmem:[%s4950_s25 + $0xd0] sm:$0xf] }
  0x20   : > { %179 = vst [vmem:[%s4954_s26 + $0x30] sm:$0xf] %v178_v12  ;;  %v208_v27 = vld [vmem:[%s4950_s25 + $0xd8] sm:$0xf]  ;;  %v210_v28 = vld [vmem:[%s4950_s25 + $0xe0] sm:$0xf] }
  0x21   : > { %181 = vst [vmem:[%s4954_s26 + $0x34] sm:$0xf] %v180_v13  ;;  %v212_v29 = vld [vmem:[%s4950_s25 + $0xe8] sm:$0xf]  ;;  %v214_v30 = vld [vmem:[%s4950_s25 + $0xf0] sm:$0xf] }
  0x22   : > { %183 = vst [vmem:[%s4954_s26 + $0x38] sm:$0xf] %v182_v14  ;;  %v216_v31 = vld [vmem:[%s4950_s25 + $0xf8] sm:$0xf]  ;;  %v218_v32 = vld [vmem:[%s4950_s25 + $0x100] sm:$0xf] }
  0x23   : > { %185 = vst [vmem:[%s4954_s26 + $0x3c] sm:$0xf] %v184_v15  ;;  %v220_v33 = vld [vmem:[%s4950_s25 + $0x108] sm:$0xf]  ;;  %v222_v34 = vld [vmem:[%s4950_s25 + $0x110] sm:$0xf] }
  0x24   : > { %187 = vst [vmem:[%s4954_s26 + $0x40] sm:$0xf] %v186_v16  ;;  %v224_v35 = vld [vmem:[%s4950_s25 + $0x118] sm:$0xf]  ;;  %v226_v36 = vld [vmem:[%s4950_s25 + $0x120] sm:$0xf] }
  0x25   : > { %189 = vst [vmem:[%s4954_s26 + $0x44] sm:$0xf] %v188_v17  ;;  %v228_v37 = vld [vmem:[%s4950_s25 + $0x128] sm:$0xf]  ;;  %v230_v38 = vld [vmem:[%s4950_s25 + $0x130] sm:$0xf] }
  0x26   : > { %191 = vst [vmem:[%s4954_s26 + $0x48] sm:$0xf] %v190_v18  ;;  %v232_v39 = vld [vmem:[%s4950_s25 + $0x138] sm:$0xf]  ;;  %v234_v40 = vld [vmem:[%s4950_s25 + $0x140] sm:$0xf] }
  0x27   : > { %193 = vst [vmem:[%s4954_s26 + $0x4c] sm:$0xf] %v192_v19  ;;  %v236_v41 = vld [vmem:[%s4950_s25 + $0x148] sm:$0xf]  ;;  %v238_v42 = vld [vmem:[%s4950_s25 + $0x150] sm:$0xf] }
  0x28   : > { %195 = vst [vmem:[%s4954_s26 + $0x50] sm:$0xf] %v194_v20  ;;  %v240_v43 = vld [vmem:[%s4950_s25 + $0x158] sm:$0xf]  ;;  %v242_v44 = vld [vmem:[%s4950_s25 + $0x160] sm:$0xf] }
  0x29   : > { %197 = vst [vmem:[%s4954_s26 + $0x54] sm:$0xf] %v196_v21  ;;  %v244_v45 = vld [vmem:[%s4950_s25 + $0x168] sm:$0xf]  ;;  %v246_v46 = vld [vmem:[%s4950_s25 + $0x170] sm:$0xf] }
  0x2a   : > { %199 = vst [vmem:[%s4954_s26 + $0x58] sm:$0xf] %v198_v22  ;;  %v248_v47 = vld [vmem:[%s4950_s25 + $0x178] sm:$0xf]  ;;  %v250_v48 = vld [vmem:[%s4950_s25 + $0x180] sm:$0xf] }
  0x2b   : > { %201 = vst [vmem:[%s4954_s26 + $0x5c] sm:$0xf] %v200_v23  ;;  %v252_v49 = vld [vmem:[%s4950_s25 + $0x188] sm:$0xf]  ;;  %v254_v50 = vld [vmem:[%s4950_s25 + $0x190] sm:$0xf] }
  0x2c   : > { %203 = vst [vmem:[%s4954_s26 + $0x60] sm:$0xf] %v202_v24  ;;  %v256_v51 = vld [vmem:[%s4950_s25 + $0x198] sm:$0xf]  ;;  %v258_v52 = vld [vmem:[%s4950_s25 + $0x1a0] sm:$0xf] }
  0x2d   : > { %205 = vst [vmem:[%s4954_s26 + $0x64] sm:$0xf] %v204_v25  ;;  %v260_v53 = vld [vmem:[%s4950_s25 + $0x1a8] sm:$0xf]  ;;  %v262_v54 = vld [vmem:[%s4950_s25 + $0x1b0] sm:$0xf] }
  0x2e   : > { %207 = vst [vmem:[%s4954_s26 + $0x68] sm:$0xf] %v206_v26  ;;  %v264_v55 = vld [vmem:[%s4950_s25 + $0x1b8] sm:$0xf]  ;;  %v266_v56 = vld [vmem:[%s4950_s25 + $0x1c0] sm:$0xf] }
  0x2f   : > { %209 = vst [vmem:[%s4954_s26 + $0x6c] sm:$0xf] %v208_v27  ;;  %v268_v57 = vld [vmem:[%s4950_s25 + $0x1c8] sm:$0xf]  ;;  %v270_v58 = vld [vmem:[%s4950_s25 + $0x1d0] sm:$0xf] }
  0x30   : > { %211 = vst [vmem:[%s4954_s26 + $0x70] sm:$0xf] %v210_v28  ;;  %v272_v59 = vld [vmem:[%s4950_s25 + $0x1d8] sm:$0xf]  ;;  %v274_v60 = vld [vmem:[%s4950_s25 + $0x1e0] sm:$0xf] }
  0x31   : > { %213 = vst [vmem:[%s4954_s26 + $0x74] sm:$0xf] %v212_v29  ;;  %v276_v61 = vld [vmem:[%s4950_s25 + $0x1e8] sm:$0xf]  ;;  %v278_v62 = vld [vmem:[%s4950_s25 + $0x1f0] sm:$0xf] }
  0x32   : > { %215 = vst [vmem:[%s4954_s26 + $0x78] sm:$0xf] %v214_v30  ;;  %v280_v63 = vld [vmem:[%s4950_s25 + $0x1f8] sm:$0xf]  ;;  %v282_v0 = vld [vmem:[%s4950_s25 + $0x200] sm:$0xf] }
  0x33   : > { %217 = vst [vmem:[%s4954_s26 + $0x7c] sm:$0xf] %v216_v31  ;;  %v284_v1 = vld [vmem:[%s4950_s25 + $0x208] sm:$0xf]  ;;  %v286_v2 = vld [vmem:[%s4950_s25 + $0x210] sm:$0xf] }
  0x34   : > { %219 = vst [vmem:[%s4954_s26 + $0x80] sm:$0xf] %v218_v32  ;;  %v288_v3 = vld [vmem:[%s4950_s25 + $0x218] sm:$0xf]  ;;  %v290_v4 = vld [vmem:[%s4950_s25 + $0x220] sm:$0xf] }
  0x35   : > { %221 = vst [vmem:[%s4954_s26 + $0x84] sm:$0xf] %v220_v33  ;;  %v292_v5 = vld [vmem:[%s4950_s25 + $0x228] sm:$0xf]  ;;  %v294_v6 = vld [vmem:[%s4950_s25 + $0x230] sm:$0xf] }
  0x36   : > { %223 = vst [vmem:[%s4954_s26 + $0x88] sm:$0xf] %v222_v34  ;;  %v296_v7 = vld [vmem:[%s4950_s25 + $0x238] sm:$0xf]  ;;  %v298_v8 = vld [vmem:[%s4950_s25 + $0x240] sm:$0xf] }
  0x37   : > { %225 = vst [vmem:[%s4954_s26 + $0x8c] sm:$0xf] %v224_v35  ;;  %v300_v9 = vld [vmem:[%s4950_s25 + $0x248] sm:$0xf]  ;;  %v302_v10 = vld [vmem:[%s4950_s25 + $0x250] sm:$0xf] }
  0x38   : > { %227 = vst [vmem:[%s4954_s26 + $0x90] sm:$0xf] %v226_v36  ;;  %v304_v11 = vld [vmem:[%s4950_s25 + $0x258] sm:$0xf]  ;;  %v306_v12 = vld [vmem:[%s4950_s25 + $0x260] sm:$0xf] }
  0x39   : > { %229 = vst [vmem:[%s4954_s26 + $0x94] sm:$0xf] %v228_v37  ;;  %v308_v13 = vld [vmem:[%s4950_s25 + $0x268] sm:$0xf]  ;;  %v310_v14 = vld [vmem:[%s4950_s25 + $0x270] sm:$0xf] }
  0x3a   : > { %231 = vst [vmem:[%s4954_s26 + $0x98] sm:$0xf] %v230_v38  ;;  %v312_v15 = vld [vmem:[%s4950_s25 + $0x278] sm:$0xf]  ;;  %v314_v16 = vld [vmem:[%s4950_s25 + $0x280] sm:$0xf] }
  0x3b   : > { %233 = vst [vmem:[%s4954_s26 + $0x9c] sm:$0xf] %v232_v39  ;;  %v316_v17 = vld [vmem:[%s4950_s25 + $0x288] sm:$0xf]  ;;  %v318_v18 = vld [vmem:[%s4950_s25 + $0x290] sm:$0xf] }
  0x3c   : > { %235 = vst [vmem:[%s4954_s26 + $0xa0] sm:$0xf] %v234_v40  ;;  %v320_v19 = vld [vmem:[%s4950_s25 + $0x298] sm:$0xf]  ;;  %v322_v20 = vld [vmem:[%s4950_s25 + $0x2a0] sm:$0xf] }
  0x3d   : > { %237 = vst [vmem:[%s4954_s26 + $0xa4] sm:$0xf] %v236_v41  ;;  %v324_v21 = vld [vmem:[%s4950_s25 + $0x2a8] sm:$0xf]  ;;  %v326_v22 = vld [vmem:[%s4950_s25 + $0x2b0] sm:$0xf] }
  0x3e   : > { %239 = vst [vmem:[%s4954_s26 + $0xa8] sm:$0xf] %v238_v42  ;;  %v328_v23 = vld [vmem:[%s4950_s25 + $0x2b8] sm:$0xf]  ;;  %v330_v24 = vld [vmem:[%s4950_s25 + $0x2c0] sm:$0xf] }
  0x3f   : > { %241 = vst [vmem:[%s4954_s26 + $0xac] sm:$0xf] %v240_v43  ;;  %v332_v25 = vld [vmem:[%s4950_s25 + $0x2c8] sm:$0xf]  ;;  %v334_v26 = vld [vmem:[%s4950_s25 + $0x2d0] sm:$0xf] }
  0x40   : > { %243 = vst [vmem:[%s4954_s26 + $0xb0] sm:$0xf] %v242_v44  ;;  %v336_v27 = vld [vmem:[%s4950_s25 + $0x2d8] sm:$0xf]  ;;  %v338_v28 = vld [vmem:[%s4950_s25 + $0x2e0] sm:$0xf] }
  0x41   : > { %245 = vst [vmem:[%s4954_s26 + $0xb4] sm:$0xf] %v244_v45  ;;  %v340_v29 = vld [vmem:[%s4950_s25 + $0x2e8] sm:$0xf]  ;;  %v342_v30 = vld [vmem:[%s4950_s25 + $0x2f0] sm:$0xf] }
  0x42   : > { %247 = vst [vmem:[%s4954_s26 + $0xb8] sm:$0xf] %v246_v46  ;;  %v344_v31 = vld [vmem:[%s4950_s25 + $0x2f8] sm:$0xf]  ;;  %v346_v32 = vld [vmem:[%s4950_s25 + $0x300] sm:$0xf] }
  0x43   : > { %249 = vst [vmem:[%s4954_s26 + $0xbc] sm:$0xf] %v248_v47  ;;  %v348_v33 = vld [vmem:[%s4950_s25 + $0x308] sm:$0xf]  ;;  %v350_v34 = vld [vmem:[%s4950_s25 + $0x310] sm:$0xf] }
  0x44   : > { %251 = vst [vmem:[%s4954_s26 + $0xc0] sm:$0xf] %v250_v48  ;;  %v352_v35 = vld [vmem:[%s4950_s25 + $0x318] sm:$0xf]  ;;  %v354_v36 = vld [vmem:[%s4950_s25 + $0x320] sm:$0xf] }
  0x45   : > { %253 = vst [vmem:[%s4954_s26 + $0xc4] sm:$0xf] %v252_v49  ;;  %v356_v37 = vld [vmem:[%s4950_s25 + $0x328] sm:$0xf]  ;;  %v358_v38 = vld [vmem:[%s4950_s25 + $0x330] sm:$0xf] }
  0x46   : > { %255 = vst [vmem:[%s4954_s26 + $0xc8] sm:$0xf] %v254_v50  ;;  %v360_v39 = vld [vmem:[%s4950_s25 + $0x338] sm:$0xf]  ;;  %v362_v40 = vld [vmem:[%s4950_s25 + $0x340] sm:$0xf] }
  0x47   : > { %257 = vst [vmem:[%s4954_s26 + $0xcc] sm:$0xf] %v256_v51  ;;  %v364_v41 = vld [vmem:[%s4950_s25 + $0x348] sm:$0xf]  ;;  %v366_v42 = vld [vmem:[%s4950_s25 + $0x350] sm:$0xf] }
  0x48   : > { %259 = vst [vmem:[%s4954_s26 + $0xd0] sm:$0xf] %v258_v52  ;;  %v368_v43 = vld [vmem:[%s4950_s25 + $0x358] sm:$0xf]  ;;  %v370_v44 = vld [vmem:[%s4950_s25 + $0x360] sm:$0xf] }
  0x49   : > { %261 = vst [vmem:[%s4954_s26 + $0xd4] sm:$0xf] %v260_v53  ;;  %v372_v45 = vld [vmem:[%s4950_s25 + $0x368] sm:$0xf]  ;;  %v374_v46 = vld [vmem:[%s4950_s25 + $0x370] sm:$0xf] }
  0x4a   : > { %263 = vst [vmem:[%s4954_s26 + $0xd8] sm:$0xf] %v262_v54  ;;  %v376_v47 = vld [vmem:[%s4950_s25 + $0x378] sm:$0xf]  ;;  %v378_v48 = vld [vmem:[%s4950_s25 + $0x380] sm:$0xf] }
  0x4b   : > { %265 = vst [vmem:[%s4954_s26 + $0xdc] sm:$0xf] %v264_v55  ;;  %v380_v49 = vld [vmem:[%s4950_s25 + $0x388] sm:$0xf]  ;;  %v382_v50 = vld [vmem:[%s4950_s25 + $0x390] sm:$0xf] }
  0x4c   : > { %267 = vst [vmem:[%s4954_s26 + $0xe0] sm:$0xf] %v266_v56  ;;  %v384_v51 = vld [vmem:[%s4950_s25 + $0x398] sm:$0xf]  ;;  %v386_v52 = vld [vmem:[%s4950_s25 + $0x3a0] sm:$0xf] }
  0x4d   : > { %269 = vst [vmem:[%s4954_s26 + $0xe4] sm:$0xf] %v268_v57  ;;  %v388_v53 = vld [vmem:[%s4950_s25 + $0x3a8] sm:$0xf]  ;;  %v390_v54 = vld [vmem:[%s4950_s25 + $0x3b0] sm:$0xf] }
  0x4e   : > { %271 = vst [vmem:[%s4954_s26 + $0xe8] sm:$0xf] %v270_v58  ;;  %v392_v55 = vld [vmem:[%s4950_s25 + $0x3b8] sm:$0xf]  ;;  %v394_v56 = vld [vmem:[%s4950_s25 + $0x3c0] sm:$0xf] }
  0x4f   : > { %273 = vst [vmem:[%s4954_s26 + $0xec] sm:$0xf] %v272_v59  ;;  %v396_v57 = vld [vmem:[%s4950_s25 + $0x3c8] sm:$0xf]  ;;  %v398_v58 = vld [vmem:[%s4950_s25 + $0x3d0] sm:$0xf] }
  0x50   : > { %275 = vst [vmem:[%s4954_s26 + $0xf0] sm:$0xf] %v274_v60  ;;  %v400_v59 = vld [vmem:[%s4950_s25 + $0x3d8] sm:$0xf]  ;;  %v402_v60 = vld [vmem:[%s4950_s25 + $0x3e0] sm:$0xf] }
  0x51   : > { %277 = vst [vmem:[%s4954_s26 + $0xf4] sm:$0xf] %v276_v61  ;;  %v404_v61 = vld [vmem:[%s4950_s25 + $0x3e8] sm:$0xf] }
  0x52   : > { %279 = vst [vmem:[%s4954_s26 + $0xf8] sm:$0xf] %v278_v62  ;;  %v406_v62 = vld [vmem:[%s4950_s25 + $0x3f0] sm:$0xf] }
  0x53   : > { %281 = vst [vmem:[%s4954_s26 + $0xfc] sm:$0xf] %v280_v63  ;;  %v408_v63 = vld [vmem:[%s4950_s25 + $0x3f8] sm:$0xf] }
  0x54   : > { %283 = vst [vmem:[%s4954_s26 + $0x100] sm:$0xf] %v282_v0  ;;  %v410_v0 = vld [vmem:[%s4950_s25 + $0x400] sm:$0xf] }
  0x55   : > { %285 = vst [vmem:[%s4954_s26 + $0x104] sm:$0xf] %v284_v1  ;;  %v412_v1 = vld [vmem:[%s4950_s25 + $0x408] sm:$0xf] }
  0x56   : > { %287 = vst [vmem:[%s4954_s26 + $0x108] sm:$0xf] %v286_v2  ;;  %v414_v2 = vld [vmem:[%s4950_s25 + $0x410] sm:$0xf] }
  0x57   : > { %289 = vst [vmem:[%s4954_s26 + $0x10c] sm:$0xf] %v288_v3  ;;  %v416_v3 = vld [vmem:[%s4950_s25 + $0x418] sm:$0xf] }
  0x58   : > { %291 = vst [vmem:[%s4954_s26 + $0x110] sm:$0xf] %v290_v4  ;;  %v418_v4 = vld [vmem:[%s4950_s25 + $0x420] sm:$0xf] }
  0x59   : > { %293 = vst [vmem:[%s4954_s26 + $0x114] sm:$0xf] %v292_v5  ;;  %v420_v5 = vld [vmem:[%s4950_s25 + $0x428] sm:$0xf] }
  0x5a   : > { %295 = vst [vmem:[%s4954_s26 + $0x118] sm:$0xf] %v294_v6  ;;  %v422_v6 = vld [vmem:[%s4950_s25 + $0x430] sm:$0xf] }
  0x5b   : > { %297 = vst [vmem:[%s4954_s26 + $0x11c] sm:$0xf] %v296_v7  ;;  %v424_v7 = vld [vmem:[%s4950_s25 + $0x438] sm:$0xf] }
  0x5c   : > { %299 = vst [vmem:[%s4954_s26 + $0x120] sm:$0xf] %v298_v8  ;;  %v426_v8 = vld [vmem:[%s4950_s25 + $0x440] sm:$0xf] }
  0x5d   : > { %301 = vst [vmem:[%s4954_s26 + $0x124] sm:$0xf] %v300_v9  ;;  %v428_v9 = vld [vmem:[%s4950_s25 + $0x448] sm:$0xf] }
  0x5e   : > { %303 = vst [vmem:[%s4954_s26 + $0x128] sm:$0xf] %v302_v10  ;;  %v430_v10 = vld [vmem:[%s4950_s25 + $0x450] sm:$0xf] }
  0x5f   : > { %305 = vst [vmem:[%s4954_s26 + $0x12c] sm:$0xf] %v304_v11  ;;  %v432_v11 = vld [vmem:[%s4950_s25 + $0x458] sm:$0xf] }
  0x60   : > { %307 = vst [vmem:[%s4954_s26 + $0x130] sm:$0xf] %v306_v12  ;;  %v434_v12 = vld [vmem:[%s4950_s25 + $0x460] sm:$0xf] }
  0x61   : > { %309 = vst [vmem:[%s4954_s26 + $0x134] sm:$0xf] %v308_v13  ;;  %v436_v13 = vld [vmem:[%s4950_s25 + $0x468] sm:$0xf] }
  0x62   : > { %311 = vst [vmem:[%s4954_s26 + $0x138] sm:$0xf] %v310_v14  ;;  %v438_v14 = vld [vmem:[%s4950_s25 + $0x470] sm:$0xf] }
  0x63   : > { %313 = vst [vmem:[%s4954_s26 + $0x13c] sm:$0xf] %v312_v15  ;;  %v440_v15 = vld [vmem:[%s4950_s25 + $0x478] sm:$0xf] }
  0x64   : > { %315 = vst [vmem:[%s4954_s26 + $0x140] sm:$0xf] %v314_v16  ;;  %v442_v16 = vld [vmem:[%s4950_s25 + $0x480] sm:$0xf] }
  0x65   : > { %317 = vst [vmem:[%s4954_s26 + $0x144] sm:$0xf] %v316_v17  ;;  %v444_v17 = vld [vmem:[%s4950_s25 + $0x488] sm:$0xf] }
  0x66   : > { %319 = vst [vmem:[%s4954_s26 + $0x148] sm:$0xf] %v318_v18  ;;  %v446_v18 = vld [vmem:[%s4950_s25 + $0x490] sm:$0xf] }
  0x67   : > { %321 = vst [vmem:[%s4954_s26 + $0x14c] sm:$0xf] %v320_v19  ;;  %v448_v19 = vld [vmem:[%s4950_s25 + $0x498] sm:$0xf] }
  0x68   : > { %323 = vst [vmem:[%s4954_s26 + $0x150] sm:$0xf] %v322_v20  ;;  %v450_v20 = vld [vmem:[%s4950_s25 + $0x4a0] sm:$0xf] }
  0x69   : > { %325 = vst [vmem:[%s4954_s26 + $0x154] sm:$0xf] %v324_v21  ;;  %v452_v21 = vld [vmem:[%s4950_s25 + $0x4a8] sm:$0xf] }
  0x6a   : > { %327 = vst [vmem:[%s4954_s26 + $0x158] sm:$0xf] %v326_v22  ;;  %v454_v22 = vld [vmem:[%s4950_s25 + $0x4b0] sm:$0xf] }
  0x6b   : > { %329 = vst [vmem:[%s4954_s26 + $0x15c] sm:$0xf] %v328_v23  ;;  %v456_v23 = vld [vmem:[%s4950_s25 + $0x4b8] sm:$0xf] }
  0x6c   : > { %331 = vst [vmem:[%s4954_s26 + $0x160] sm:$0xf] %v330_v24  ;;  %v458_v24 = vld [vmem:[%s4950_s25 + $0x4c0] sm:$0xf] }
  0x6d   : > { %333 = vst [vmem:[%s4954_s26 + $0x164] sm:$0xf] %v332_v25  ;;  %v460_v25 = vld [vmem:[%s4950_s25 + $0x4c8] sm:$0xf] }
  0x6e   : > { %335 = vst [vmem:[%s4954_s26 + $0x168] sm:$0xf] %v334_v26  ;;  %v462_v26 = vld [vmem:[%s4950_s25 + $0x4d0] sm:$0xf] }
  0x6f   : > { %337 = vst [vmem:[%s4954_s26 + $0x16c] sm:$0xf] %v336_v27  ;;  %v464_v27 = vld [vmem:[%s4950_s25 + $0x4d8] sm:$0xf] }
  0x70   : > { %339 = vst [vmem:[%s4954_s26 + $0x170] sm:$0xf] %v338_v28  ;;  %v466_v28 = vld [vmem:[%s4950_s25 + $0x4e0] sm:$0xf] }
  0x71   : > { %341 = vst [vmem:[%s4954_s26 + $0x174] sm:$0xf] %v340_v29  ;;  %v468_v29 = vld [vmem:[%s4950_s25 + $0x4e8] sm:$0xf] }
  0x72   : > { %343 = vst [vmem:[%s4954_s26 + $0x178] sm:$0xf] %v342_v30  ;;  %v470_v30 = vld [vmem:[%s4950_s25 + $0x4f0] sm:$0xf] }
  0x73   : > { %345 = vst [vmem:[%s4954_s26 + $0x17c] sm:$0xf] %v344_v31  ;;  %v472_v31 = vld [vmem:[%s4950_s25 + $0x4f8] sm:$0xf] }
  0x74   : > { %347 = vst [vmem:[%s4954_s26 + $0x180] sm:$0xf] %v346_v32  ;;  %v474_v32 = vld [vmem:[%s4950_s25 + $0x500] sm:$0xf] }
  0x75   : > { %349 = vst [vmem:[%s4954_s26 + $0x184] sm:$0xf] %v348_v33  ;;  %v476_v33 = vld [vmem:[%s4950_s25 + $0x508] sm:$0xf] }
  0x76   : > { %351 = vst [vmem:[%s4954_s26 + $0x188] sm:$0xf] %v350_v34  ;;  %v478_v34 = vld [vmem:[%s4950_s25 + $0x510] sm:$0xf] }
  0x77   : > { %353 = vst [vmem:[%s4954_s26 + $0x18c] sm:$0xf] %v352_v35  ;;  %v480_v35 = vld [vmem:[%s4950_s25 + $0x518] sm:$0xf] }
  0x78   : > { %355 = vst [vmem:[%s4954_s26 + $0x190] sm:$0xf] %v354_v36  ;;  %v482_v36 = vld [vmem:[%s4950_s25 + $0x520] sm:$0xf] }
  0x79   : > { %357 = vst [vmem:[%s4954_s26 + $0x194] sm:$0xf] %v356_v37  ;;  %v484_v37 = vld [vmem:[%s4950_s25 + $0x528] sm:$0xf] }
  0x7a   : > { %359 = vst [vmem:[%s4954_s26 + $0x198] sm:$0xf] %v358_v38  ;;  %v486_v38 = vld [vmem:[%s4950_s25 + $0x530] sm:$0xf] }
  0x7b   : > { %361 = vst [vmem:[%s4954_s26 + $0x19c] sm:$0xf] %v360_v39  ;;  %v488_v39 = vld [vmem:[%s4950_s25 + $0x538] sm:$0xf] }
  0x7c   : > { %363 = vst [vmem:[%s4954_s26 + $0x1a0] sm:$0xf] %v362_v40  ;;  %v490_v40 = vld [vmem:[%s4950_s25 + $0x540] sm:$0xf] }
  0x7d   : > { %365 = vst [vmem:[%s4954_s26 + $0x1a4] sm:$0xf] %v364_v41  ;;  %v492_v41 = vld [vmem:[%s4950_s25 + $0x548] sm:$0xf] }
  0x7e   : > { %367 = vst [vmem:[%s4954_s26 + $0x1a8] sm:$0xf] %v366_v42  ;;  %v494_v42 = vld [vmem:[%s4950_s25 + $0x550] sm:$0xf] }
  0x7f   : > { %369 = vst [vmem:[%s4954_s26 + $0x1ac] sm:$0xf] %v368_v43  ;;  %v496_v43 = vld [vmem:[%s4950_s25 + $0x558] sm:$0xf] }
  0x80   : > { %371 = vst [vmem:[%s4954_s26 + $0x1b0] sm:$0xf] %v370_v44  ;;  %v498_v44 = vld [vmem:[%s4950_s25 + $0x560] sm:$0xf] }
  0x81   : > { %373 = vst [vmem:[%s4954_s26 + $0x1b4] sm:$0xf] %v372_v45  ;;  %v500_v45 = vld [vmem:[%s4950_s25 + $0x568] sm:$0xf] }
  0x82   : > { %375 = vst [vmem:[%s4954_s26 + $0x1b8] sm:$0xf] %v374_v46  ;;  %v502_v46 = vld [vmem:[%s4950_s25 + $0x570] sm:$0xf] }
  0x83   : > { %377 = vst [vmem:[%s4954_s26 + $0x1bc] sm:$0xf] %v376_v47  ;;  %v504_v47 = vld [vmem:[%s4950_s25 + $0x578] sm:$0xf] }
  0x84   : > { %379 = vst [vmem:[%s4954_s26 + $0x1c0] sm:$0xf] %v378_v48  ;;  %v506_v48 = vld [vmem:[%s4950_s25 + $0x580] sm:$0xf] }
  0x85   : > { %381 = vst [vmem:[%s4954_s26 + $0x1c4] sm:$0xf] %v380_v49  ;;  %v508_v49 = vld [vmem:[%s4950_s25 + $0x588] sm:$0xf] }
  0x86   : > { %383 = vst [vmem:[%s4954_s26 + $0x1c8] sm:$0xf] %v382_v50  ;;  %v510_v50 = vld [vmem:[%s4950_s25 + $0x590] sm:$0xf] }
  0x87   : > { %385 = vst [vmem:[%s4954_s26 + $0x1cc] sm:$0xf] %v384_v51  ;;  %v512_v51 = vld [vmem:[%s4950_s25 + $0x598] sm:$0xf] }
  0x88   : > { %387 = vst [vmem:[%s4954_s26 + $0x1d0] sm:$0xf] %v386_v52  ;;  %v514_v52 = vld [vmem:[%s4950_s25 + $0x5a0] sm:$0xf] }
  0x89   : > { %389 = vst [vmem:[%s4954_s26 + $0x1d4] sm:$0xf] %v388_v53  ;;  %v516_v53 = vld [vmem:[%s4950_s25 + $0x5a8] sm:$0xf] }
  0x8a   : > { %391 = vst [vmem:[%s4954_s26 + $0x1d8] sm:$0xf] %v390_v54  ;;  %v518_v54 = vld [vmem:[%s4950_s25 + $0x5b0] sm:$0xf] }
  0x8b   : > { %393 = vst [vmem:[%s4954_s26 + $0x1dc] sm:$0xf] %v392_v55  ;;  %v520_v55 = vld [vmem:[%s4950_s25 + $0x5b8] sm:$0xf] }
  0x8c   : > { %395 = vst [vmem:[%s4954_s26 + $0x1e0] sm:$0xf] %v394_v56  ;;  %v522_v56 = vld [vmem:[%s4950_s25 + $0x5c0] sm:$0xf] }
  0x8d   : > { %397 = vst [vmem:[%s4954_s26 + $0x1e4] sm:$0xf] %v396_v57  ;;  %v524_v57 = vld [vmem:[%s4950_s25 + $0x5c8] sm:$0xf] }
  0x8e   : > { %399 = vst [vmem:[%s4954_s26 + $0x1e8] sm:$0xf] %v398_v58  ;;  %v526_v58 = vld [vmem:[%s4950_s25 + $0x5d0] sm:$0xf] }
  0x8f   : > { %401 = vst [vmem:[%s4954_s26 + $0x1ec] sm:$0xf] %v400_v59  ;;  %v528_v59 = vld [vmem:[%s4950_s25 + $0x5d8] sm:$0xf] }
  0x90   : > { %403 = vst [vmem:[%s4954_s26 + $0x1f0] sm:$0xf] %v402_v60  ;;  %v530_v60 = vld [vmem:[%s4950_s25 + $0x5e0] sm:$0xf] }
  0x91   : > { %405 = vst [vmem:[%s4954_s26 + $0x1f4] sm:$0xf] %v404_v61  ;;  %v532_v61 = vld [vmem:[%s4950_s25 + $0x5e8] sm:$0xf] }
  0x92   : > { %407 = vst [vmem:[%s4954_s26 + $0x1f8] sm:$0xf] %v406_v62  ;;  %v534_v62 = vld [vmem:[%s4950_s25 + $0x5f0] sm:$0xf] }
  0x93   : > { %409 = vst [vmem:[%s4954_s26 + $0x1fc] sm:$0xf] %v408_v63  ;;  %v536_v63 = vld [vmem:[%s4950_s25 + $0x5f8] sm:$0xf] }
  0x94   : > { %411 = vst [vmem:[%s4954_s26 + $0x200] sm:$0xf] %v410_v0  ;;  %v538_v0 = vld [vmem:[%s4950_s25 + $0x600] sm:$0xf] }
  0x95   : > { %413 = vst [vmem:[%s4954_s26 + $0x204] sm:$0xf] %v412_v1  ;;  %v540_v1 = vld [vmem:[%s4950_s25 + $0x608] sm:$0xf] }
  0x96   : > { %415 = vst [vmem:[%s4954_s26 + $0x208] sm:$0xf] %v414_v2  ;;  %v542_v2 = vld [vmem:[%s4950_s25 + $0x610] sm:$0xf] }
  0x97   : > { %417 = vst [vmem:[%s4954_s26 + $0x20c] sm:$0xf] %v416_v3  ;;  %v544_v3 = vld [vmem:[%s4950_s25 + $0x618] sm:$0xf] }
  0x98   : > { %419 = vst [vmem:[%s4954_s26 + $0x210] sm:$0xf] %v418_v4  ;;  %v546_v4 = vld [vmem:[%s4950_s25 + $0x620] sm:$0xf] }
  0x99   : > { %421 = vst [vmem:[%s4954_s26 + $0x214] sm:$0xf] %v420_v5  ;;  %v548_v5 = vld [vmem:[%s4950_s25 + $0x628] sm:$0xf] }
  0x9a   : > { %423 = vst [vmem:[%s4954_s26 + $0x218] sm:$0xf] %v422_v6  ;;  %v550_v6 = vld [vmem:[%s4950_s25 + $0x630] sm:$0xf] }
  0x9b   : > { %425 = vst [vmem:[%s4954_s26 + $0x21c] sm:$0xf] %v424_v7  ;;  %v552_v7 = vld [vmem:[%s4950_s25 + $0x638] sm:$0xf] }
  0x9c   : > { %427 = vst [vmem:[%s4954_s26 + $0x220] sm:$0xf] %v426_v8  ;;  %v554_v8 = vld [vmem:[%s4950_s25 + $0x640] sm:$0xf] }
  0x9d   : > { %429 = vst [vmem:[%s4954_s26 + $0x224] sm:$0xf] %v428_v9  ;;  %v556_v9 = vld [vmem:[%s4950_s25 + $0x648] sm:$0xf] }
  0x9e   : > { %431 = vst [vmem:[%s4954_s26 + $0x228] sm:$0xf] %v430_v10  ;;  %v558_v10 = vld [vmem:[%s4950_s25 + $0x650] sm:$0xf] }
  0x9f   : > { %433 = vst [vmem:[%s4954_s26 + $0x22c] sm:$0xf] %v432_v11  ;;  %v560_v11 = vld [vmem:[%s4950_s25 + $0x658] sm:$0xf] }
  0xa0   : > { %435 = vst [vmem:[%s4954_s26 + $0x230] sm:$0xf] %v434_v12  ;;  %v562_v12 = vld [vmem:[%s4950_s25 + $0x660] sm:$0xf] }
  0xa1   : > { %437 = vst [vmem:[%s4954_s26 + $0x234] sm:$0xf] %v436_v13  ;;  %v564_v13 = vld [vmem:[%s4950_s25 + $0x668] sm:$0xf] }
  0xa2   : > { %439 = vst [vmem:[%s4954_s26 + $0x238] sm:$0xf] %v438_v14  ;;  %v566_v14 = vld [vmem:[%s4950_s25 + $0x670] sm:$0xf] }
  0xa3   : > { %441 = vst [vmem:[%s4954_s26 + $0x23c] sm:$0xf] %v440_v15  ;;  %v568_v15 = vld [vmem:[%s4950_s25 + $0x678] sm:$0xf] }
  0xa4   : > { %443 = vst [vmem:[%s4954_s26 + $0x240] sm:$0xf] %v442_v16  ;;  %v570_v16 = vld [vmem:[%s4950_s25 + $0x680] sm:$0xf] }
  0xa5   : > { %445 = vst [vmem:[%s4954_s26 + $0x244] sm:$0xf] %v444_v17  ;;  %v572_v17 = vld [vmem:[%s4950_s25 + $0x688] sm:$0xf] }
  0xa6   : > { %447 = vst [vmem:[%s4954_s26 + $0x248] sm:$0xf] %v446_v18  ;;  %v574_v18 = vld [vmem:[%s4950_s25 + $0x690] sm:$0xf] }
  0xa7   : > { %449 = vst [vmem:[%s4954_s26 + $0x24c] sm:$0xf] %v448_v19  ;;  %v576_v19 = vld [vmem:[%s4950_s25 + $0x698] sm:$0xf] }
  0xa8   : > { %451 = vst [vmem:[%s4954_s26 + $0x250] sm:$0xf] %v450_v20  ;;  %v578_v20 = vld [vmem:[%s4950_s25 + $0x6a0] sm:$0xf] }
  0xa9   : > { %453 = vst [vmem:[%s4954_s26 + $0x254] sm:$0xf] %v452_v21  ;;  %v580_v21 = vld [vmem:[%s4950_s25 + $0x6a8] sm:$0xf] }
  0xaa   : > { %455 = vst [vmem:[%s4954_s26 + $0x258] sm:$0xf] %v454_v22  ;;  %v582_v22 = vld [vmem:[%s4950_s25 + $0x6b0] sm:$0xf] }
  0xab   : > { %457 = vst [vmem:[%s4954_s26 + $0x25c] sm:$0xf] %v456_v23  ;;  %v584_v23 = vld [vmem:[%s4950_s25 + $0x6b8] sm:$0xf] }
  0xac   : > { %459 = vst [vmem:[%s4954_s26 + $0x260] sm:$0xf] %v458_v24  ;;  %v586_v24 = vld [vmem:[%s4950_s25 + $0x6c0] sm:$0xf] }
  0xad   : > { %461 = vst [vmem:[%s4954_s26 + $0x264] sm:$0xf] %v460_v25  ;;  %v588_v25 = vld [vmem:[%s4950_s25 + $0x6c8] sm:$0xf] }
  0xae   : > { %463 = vst [vmem:[%s4954_s26 + $0x268] sm:$0xf] %v462_v26  ;;  %v590_v26 = vld [vmem:[%s4950_s25 + $0x6d0] sm:$0xf] }
  0xaf   : > { %465 = vst [vmem:[%s4954_s26 + $0x26c] sm:$0xf] %v464_v27  ;;  %v592_v27 = vld [vmem:[%s4950_s25 + $0x6d8] sm:$0xf] }
  0xb0   : > { %467 = vst [vmem:[%s4954_s26 + $0x270] sm:$0xf] %v466_v28  ;;  %v594_v28 = vld [vmem:[%s4950_s25 + $0x6e0] sm:$0xf] }
  0xb1   : > { %469 = vst [vmem:[%s4954_s26 + $0x274] sm:$0xf] %v468_v29  ;;  %v596_v29 = vld [vmem:[%s4950_s25 + $0x6e8] sm:$0xf] }
  0xb2   : > { %471 = vst [vmem:[%s4954_s26 + $0x278] sm:$0xf] %v470_v30  ;;  %v598_v30 = vld [vmem:[%s4950_s25 + $0x6f0] sm:$0xf] }
  0xb3   : > { %473 = vst [vmem:[%s4954_s26 + $0x27c] sm:$0xf] %v472_v31  ;;  %v600_v31 = vld [vmem:[%s4950_s25 + $0x6f8] sm:$0xf] }
  0xb4   : > { %475 = vst [vmem:[%s4954_s26 + $0x280] sm:$0xf] %v474_v32  ;;  %v602_v32 = vld [vmem:[%s4950_s25 + $0x700] sm:$0xf] }
  0xb5   : > { %477 = vst [vmem:[%s4954_s26 + $0x284] sm:$0xf] %v476_v33  ;;  %v604_v33 = vld [vmem:[%s4950_s25 + $0x708] sm:$0xf] }
  0xb6   : > { %479 = vst [vmem:[%s4954_s26 + $0x288] sm:$0xf] %v478_v34  ;;  %v606_v34 = vld [vmem:[%s4950_s25 + $0x710] sm:$0xf] }
  0xb7   : > { %481 = vst [vmem:[%s4954_s26 + $0x28c] sm:$0xf] %v480_v35  ;;  %v608_v35 = vld [vmem:[%s4950_s25 + $0x718] sm:$0xf] }
  0xb8   : > { %483 = vst [vmem:[%s4954_s26 + $0x290] sm:$0xf] %v482_v36  ;;  %v610_v36 = vld [vmem:[%s4950_s25 + $0x720] sm:$0xf] }
  0xb9   : > { %485 = vst [vmem:[%s4954_s26 + $0x294] sm:$0xf] %v484_v37  ;;  %v612_v37 = vld [vmem:[%s4950_s25 + $0x728] sm:$0xf] }
  0xba   : > { %487 = vst [vmem:[%s4954_s26 + $0x298] sm:$0xf] %v486_v38  ;;  %v614_v38 = vld [vmem:[%s4950_s25 + $0x730] sm:$0xf] }
  0xbb   : > { %489 = vst [vmem:[%s4954_s26 + $0x29c] sm:$0xf] %v488_v39  ;;  %v616_v39 = vld [vmem:[%s4950_s25 + $0x738] sm:$0xf] }
  0xbc   : > { %491 = vst [vmem:[%s4954_s26 + $0x2a0] sm:$0xf] %v490_v40  ;;  %v618_v40 = vld [vmem:[%s4950_s25 + $0x740] sm:$0xf] }
  0xbd   : > { %493 = vst [vmem:[%s4954_s26 + $0x2a4] sm:$0xf] %v492_v41  ;;  %v620_v41 = vld [vmem:[%s4950_s25 + $0x748] sm:$0xf] }
  0xbe   : > { %495 = vst [vmem:[%s4954_s26 + $0x2a8] sm:$0xf] %v494_v42  ;;  %v622_v42 = vld [vmem:[%s4950_s25 + $0x750] sm:$0xf] }
  0xbf   : > { %497 = vst [vmem:[%s4954_s26 + $0x2ac] sm:$0xf] %v496_v43  ;;  %v624_v43 = vld [vmem:[%s4950_s25 + $0x758] sm:$0xf] }
  0xc0   : > { %499 = vst [vmem:[%s4954_s26 + $0x2b0] sm:$0xf] %v498_v44  ;;  %v626_v44 = vld [vmem:[%s4950_s25 + $0x760] sm:$0xf] }
  0xc1   : > { %501 = vst [vmem:[%s4954_s26 + $0x2b4] sm:$0xf] %v500_v45  ;;  %v628_v45 = vld [vmem:[%s4950_s25 + $0x768] sm:$0xf] }
  0xc2   : > { %503 = vst [vmem:[%s4954_s26 + $0x2b8] sm:$0xf] %v502_v46  ;;  %v630_v46 = vld [vmem:[%s4950_s25 + $0x770] sm:$0xf] }
  0xc3   : > { %505 = vst [vmem:[%s4954_s26 + $0x2bc] sm:$0xf] %v504_v47  ;;  %v632_v47 = vld [vmem:[%s4950_s25 + $0x778] sm:$0xf] }
  0xc4   : > { %507 = vst [vmem:[%s4954_s26 + $0x2c0] sm:$0xf] %v506_v48  ;;  %v634_v48 = vld [vmem:[%s4950_s25 + $0x780] sm:$0xf] }
  0xc5   : > { %509 = vst [vmem:[%s4954_s26 + $0x2c4] sm:$0xf] %v508_v49  ;;  %v636_v49 = vld [vmem:[%s4950_s25 + $0x788] sm:$0xf] }
  0xc6   : > { %511 = vst [vmem:[%s4954_s26 + $0x2c8] sm:$0xf] %v510_v50  ;;  %v638_v50 = vld [vmem:[%s4950_s25 + $0x790] sm:$0xf] }
  0xc7   : > { %513 = vst [vmem:[%s4954_s26 + $0x2cc] sm:$0xf] %v512_v51  ;;  %v640_v51 = vld [vmem:[%s4950_s25 + $0x798] sm:$0xf] }
  0xc8   : > { %515 = vst [vmem:[%s4954_s26 + $0x2d0] sm:$0xf] %v514_v52  ;;  %v642_v52 = vld [vmem:[%s4950_s25 + $0x7a0] sm:$0xf] }
  0xc9   : > { %517 = vst [vmem:[%s4954_s26 + $0x2d4] sm:$0xf] %v516_v53  ;;  %v644_v53 = vld [vmem:[%s4950_s25 + $0x7a8] sm:$0xf] }
  0xca   : > { %519 = vst [vmem:[%s4954_s26 + $0x2d8] sm:$0xf] %v518_v54  ;;  %v646_v54 = vld [vmem:[%s4950_s25 + $0x7b0] sm:$0xf] }
  0xcb   : > { %521 = vst [vmem:[%s4954_s26 + $0x2dc] sm:$0xf] %v520_v55  ;;  %v648_v55 = vld [vmem:[%s4950_s25 + $0x7b8] sm:$0xf] }
  0xcc   : > { %523 = vst [vmem:[%s4954_s26 + $0x2e0] sm:$0xf] %v522_v56  ;;  %v650_v56 = vld [vmem:[%s4950_s25 + $0x7c0] sm:$0xf] }
  0xcd   : > { %525 = vst [vmem:[%s4954_s26 + $0x2e4] sm:$0xf] %v524_v57  ;;  %v652_v57 = vld [vmem:[%s4950_s25 + $0x7c8] sm:$0xf] }
  0xce   : > { %527 = vst [vmem:[%s4954_s26 + $0x2e8] sm:$0xf] %v526_v58  ;;  %v654_v58 = vld [vmem:[%s4950_s25 + $0x7d0] sm:$0xf] }
  0xcf   : > { %529 = vst [vmem:[%s4954_s26 + $0x2ec] sm:$0xf] %v528_v59  ;;  %v656_v59 = vld [vmem:[%s4950_s25 + $0x7d8] sm:$0xf] }
  0xd0   : > { %531 = vst [vmem:[%s4954_s26 + $0x2f0] sm:$0xf] %v530_v60  ;;  %v658_v60 = vld [vmem:[%s4950_s25 + $0x7e0] sm:$0xf] }
  0xd1   : > { %533 = vst [vmem:[%s4954_s26 + $0x2f4] sm:$0xf] %v532_v61  ;;  %v660_v61 = vld [vmem:[%s4950_s25 + $0x7e8] sm:$0xf] }
  0xd2   : > { %535 = vst [vmem:[%s4954_s26 + $0x2f8] sm:$0xf] %v534_v62  ;;  %v662_v62 = vld [vmem:[%s4950_s25 + $0x7f0] sm:$0xf] }
  0xd3   : > { %537 = vst [vmem:[%s4954_s26 + $0x2fc] sm:$0xf] %v536_v63  ;;  %v664_v63 = vld [vmem:[%s4950_s25 + $0x7f8] sm:$0xf] }
  0xd4   : > { %539 = vst [vmem:[%s4954_s26 + $0x300] sm:$0xf] %v538_v0 }
  0xd5   : > { %541 = vst [vmem:[%s4954_s26 + $0x304] sm:$0xf] %v540_v1 }
  0xd6   : > { %543 = vst [vmem:[%s4954_s26 + $0x308] sm:$0xf] %v542_v2 }
  0xd7   : > { %545 = vst [vmem:[%s4954_s26 + $0x30c] sm:$0xf] %v544_v3 }
  0xd8   : > { %547 = vst [vmem:[%s4954_s26 + $0x310] sm:$0xf] %v546_v4 }
  0xd9   : > { %549 = vst [vmem:[%s4954_s26 + $0x314] sm:$0xf] %v548_v5 }
  0xda   : > { %551 = vst [vmem:[%s4954_s26 + $0x318] sm:$0xf] %v550_v6 }
  0xdb   : > { %553 = vst [vmem:[%s4954_s26 + $0x31c] sm:$0xf] %v552_v7 }
  0xdc   : > { %555 = vst [vmem:[%s4954_s26 + $0x320] sm:$0xf] %v554_v8 }
  0xdd   : > { %557 = vst [vmem:[%s4954_s26 + $0x324] sm:$0xf] %v556_v9 }
  0xde   : > { %559 = vst [vmem:[%s4954_s26 + $0x328] sm:$0xf] %v558_v10 }
  0xdf   : > { %561 = vst [vmem:[%s4954_s26 + $0x32c] sm:$0xf] %v560_v11 }
  0xe0   : > { %563 = vst [vmem:[%s4954_s26 + $0x330] sm:$0xf] %v562_v12 }
  0xe1   : > { %565 = vst [vmem:[%s4954_s26 + $0x334] sm:$0xf] %v564_v13 }
  0xe2   : > { %567 = vst [vmem:[%s4954_s26 + $0x338] sm:$0xf] %v566_v14 }
  0xe3   : > { %569 = vst [vmem:[%s4954_s26 + $0x33c] sm:$0xf] %v568_v15 }
  0xe4   : > { %571 = vst [vmem:[%s4954_s26 + $0x340] sm:$0xf] %v570_v16 }
  0xe5   : > { %573 = vst [vmem:[%s4954_s26 + $0x344] sm:$0xf] %v572_v17 }
  0xe6   : > { %575 = vst [vmem:[%s4954_s26 + $0x348] sm:$0xf] %v574_v18 }
  0xe7   : > { %577 = vst [vmem:[%s4954_s26 + $0x34c] sm:$0xf] %v576_v19 }
  0xe8   : > { %579 = vst [vmem:[%s4954_s26 + $0x350] sm:$0xf] %v578_v20 }
  0xe9   : > { %581 = vst [vmem:[%s4954_s26 + $0x354] sm:$0xf] %v580_v21 }
  0xea   : > { %583 = vst [vmem:[%s4954_s26 + $0x358] sm:$0xf] %v582_v22 }
  0xeb   : > { %585 = vst [vmem:[%s4954_s26 + $0x35c] sm:$0xf] %v584_v23 }
  0xec   : > { %587 = vst [vmem:[%s4954_s26 + $0x360] sm:$0xf] %v586_v24 }
  0xed   : > { %589 = vst [vmem:[%s4954_s26 + $0x364] sm:$0xf] %v588_v25 }
  0xee   : > { %591 = vst [vmem:[%s4954_s26 + $0x368] sm:$0xf] %v590_v26 }
  0xef   : > { %593 = vst [vmem:[%s4954_s26 + $0x36c] sm:$0xf] %v592_v27 }
  0xf0   : > { %595 = vst [vmem:[%s4954_s26 + $0x370] sm:$0xf] %v594_v28 }
  0xf1   : > { %597 = vst [vmem:[%s4954_s26 + $0x374] sm:$0xf] %v596_v29 }
  0xf2   : > { %599 = vst [vmem:[%s4954_s26 + $0x378] sm:$0xf] %v598_v30 }
  0xf3   : > { %601 = vst [vmem:[%s4954_s26 + $0x37c] sm:$0xf] %v600_v31 }
  0xf4   : > { %603 = vst [vmem:[%s4954_s26 + $0x380] sm:$0xf] %v602_v32 }
  0xf5   : > { %605 = vst [vmem:[%s4954_s26 + $0x384] sm:$0xf] %v604_v33 }
  0xf6   : > { %607 = vst [vmem:[%s4954_s26 + $0x388] sm:$0xf] %v606_v34 }
  0xf7   : > { %609 = vst [vmem:[%s4954_s26 + $0x38c] sm:$0xf] %v608_v35 }
  0xf8   : > { %611 = vst [vmem:[%s4954_s26 + $0x390] sm:$0xf] %v610_v36 }
  0xf9   : > { %613 = vst [vmem:[%s4954_s26 + $0x394] sm:$0xf] %v612_v37 }
  0xfa   : > { %615 = vst [vmem:[%s4954_s26 + $0x398] sm:$0xf] %v614_v38 }
  0xfb   : > { %617 = vst [vmem:[%s4954_s26 + $0x39c] sm:$0xf] %v616_v39 }
  0xfc   : > { %619 = vst [vmem:[%s4954_s26 + $0x3a0] sm:$0xf] %v618_v40 }
  0xfd   : > { %621 = vst [vmem:[%s4954_s26 + $0x3a4] sm:$0xf] %v620_v41 }
  0xfe   : > { %623 = vst [vmem:[%s4954_s26 + $0x3a8] sm:$0xf] %v622_v42 }
  0xff   : > { %625 = vst [vmem:[%s4954_s26 + $0x3ac] sm:$0xf] %v624_v43 }
 0x100   : > { %627 = vst [vmem:[%s4954_s26 + $0x3b0] sm:$0xf] %v626_v44 }
 0x101   : > { %629 = vst [vmem:[%s4954_s26 + $0x3b4] sm:$0xf] %v628_v45 }
 0x102   : > { %631 = vst [vmem:[%s4954_s26 + $0x3b8] sm:$0xf] %v630_v46 }
 0x103   : > { %633 = vst [vmem:[%s4954_s26 + $0x3bc] sm:$0xf] %v632_v47 }
 0x104   : > { %635 = vst [vmem:[%s4954_s26 + $0x3c0] sm:$0xf] %v634_v48 }
 0x105   : > { %637 = vst [vmem:[%s4954_s26 + $0x3c4] sm:$0xf] %v636_v49 }
 0x106   : > { %639 = vst [vmem:[%s4954_s26 + $0x3c8] sm:$0xf] %v638_v50 }
 0x107   : > { %641 = vst [vmem:[%s4954_s26 + $0x3cc] sm:$0xf] %v640_v51 }
 0x108   : > { %643 = vst [vmem:[%s4954_s26 + $0x3d0] sm:$0xf] %v642_v52 }
 0x109   : > { %645 = vst [vmem:[%s4954_s26 + $0x3d4] sm:$0xf] %v644_v53 }
 0x10a   : > { %647 = vst [vmem:[%s4954_s26 + $0x3d8] sm:$0xf] %v646_v54 }
 0x10b   : > { %649 = vst [vmem:[%s4954_s26 + $0x3dc] sm:$0xf] %v648_v55 }
 0x10c   : > { %651 = vst [vmem:[%s4954_s26 + $0x3e0] sm:$0xf] %v650_v56 }
 0x10d   : > { %653 = vst [vmem:[%s4954_s26 + $0x3e4] sm:$0xf] %v652_v57 }
 0x10e   : > { %655 = vst [vmem:[%s4954_s26 + $0x3e8] sm:$0xf] %v654_v58 }
 0x10f   : > { %657 = vst [vmem:[%s4954_s26 + $0x3ec] sm:$0xf] %v656_v59 }
 0x110   : > { %659 = vst [vmem:[%s4954_s26 + $0x3f0] sm:$0xf] %v658_v60 }
 0x111   : > { %661 = vst [vmem:[%s4954_s26 + $0x3f4] sm:$0xf] %v660_v61 }
 0x112   : > { %663 = vst [vmem:[%s4954_s26 + $0x3f8] sm:$0xf] %v662_v62 }
 0x113   : > { %665 = vst [vmem:[%s4954_s26 + $0x3fc] sm:$0xf] %v664_v63 }
 0x114 PF: > { %p3989_p8 = scmp.ge.s32.totalorder %s4885_s13, 1  ;;  %p2250_p9 = scmp.lt.s32.totalorder %s4885_s13, 3 }
 0x116   : > { %p2251_p10 = pnand %p3989_p8, %p2250_p9 }
 0x117   : > { %s2257_s27 = sand.u32 (!%p2251_p10), 1, %s4869_s9  }
 0x118   : > { %2254 = sbr.rel (%p2251_p10) target bundleno = 591 (0x24f), region = 76  ;;  %s3990_s28 = sshll.u32 (!%p2251_p10), %s2257_s27, 10 }
 0x119   : > { %s5471_s29 = scalar_lea.vmem (!%p2251_p10), [#allocation2], %s3990_s28  ;;  %s3991_s30 = sshll.u32 (!%p2251_p10), %s2257_s27, 4 }
 0x11a   : > { %s2282_s3 = scalar_lea.vmem (!%p2251_p10), [#allocation3], %s3991_s30 }
 0x11d   : > { %v4675_v0 = vld [vmem:[%s5471_s29 + $0x38] sm:$0xff]  ;;  %v4674_v4 = vld [vmem:[%s5471_s29 + $0x30] sm:$0xff]  ;;  %v4673_v8 = vld [vmem:[%s5471_s29 + $0x28] sm:$0xff]  ;;  %s4633_s9 = sshll.u32 (%p4937_p6), %s4877_s11, 2 }
 0x11e   : > { %v4683_v1 = vld [vmem:[%s5471_s29 + $0x78] sm:$0xff]  ;;  %3507 = vmatpush.bf16.msra.mxu0 %v4675_v0  ;;  %v4682_v5 = vld [vmem:[%s5471_s29 + $0x70] sm:$0xff]  ;;  %v4681_v9 = vld [vmem:[%s5471_s29 + $0x68] sm:$0xff]  ;;  %s3838_s5 = scalar_lea.vmem (%p4937_p6), %s5818_s2, %s4633_s9 }
 0x11f   : > { %v4691_v2 = vld [vmem:[%s5471_s29 + $0xb8] sm:$0xff]  ;;  %3526 = vmatpush.bf16.msra.mxu1 %v4683_v1  ;;  %v4690_v6 = vld [vmem:[%s5471_s29 + $0xb0] sm:$0xff]  ;;  %v4689_v10 = vld [vmem:[%s5471_s29 + $0xa8] sm:$0xff] }
 0x120   : > { %v4699_v3 = vld [vmem:[%s5471_s29 + $0xf8] sm:$0xff]  ;;  %3545 = vmatpush.bf16.msra.mxu2 %v4691_v2  ;;  %v4698_v7 = vld [vmem:[%s5471_s29 + $0xf0] sm:$0xff]  ;;  %v4697_v11 = vld [vmem:[%s5471_s29 + $0xe8] sm:$0xff] }
 0x121   : > { %3564 = vmatpush.bf16.msra.mxu3 %v4699_v3  ;;  %v4672_v12 = vld [vmem:[%s5471_s29 + $0x20] sm:$0xff]  ;;  %v4671_v16 = vld [vmem:[%s5471_s29 + $0x18] sm:$0xff]  ;;  %v4670_v20 = vld [vmem:[%s5471_s29 + $0x10] sm:$0xff] }
 0x122   : > { %3508 = vmatpush.bf16.msra.mxu0 %v4674_v4  ;;  %v4680_v13 = vld [vmem:[%s5471_s29 + $0x60] sm:$0xff]  ;;  %v4679_v17 = vld [vmem:[%s5471_s29 + $0x58] sm:$0xff]  ;;  %v4678_v21 = vld [vmem:[%s5471_s29 + $0x50] sm:$0xff] }
 0x123   : > { %3527 = vmatpush.bf16.msra.mxu1 %v4682_v5  ;;  %v4688_v14 = vld [vmem:[%s5471_s29 + $0xa0] sm:$0xff]  ;;  %v4687_v18 = vld [vmem:[%s5471_s29 + $0x98] sm:$0xff]  ;;  %v4686_v22 = vld [vmem:[%s5471_s29 + $0x90] sm:$0xff] }
 0x124   : > { %3546 = vmatpush.bf16.msra.mxu2 %v4690_v6  ;;  %v4696_v15 = vld [vmem:[%s5471_s29 + $0xe0] sm:$0xff]  ;;  %v4695_v19 = vld [vmem:[%s5471_s29 + $0xd8] sm:$0xff]  ;;  %v4694_v23 = vld [vmem:[%s5471_s29 + $0xd0] sm:$0xff] }
 0x125   : > { %3565 = vmatpush.bf16.msra.mxu3 %v4698_v7  ;;  %v4669_v24 = vld [vmem:[%s5471_s29 + $0x8] sm:$0xff]  ;;  %v4668_v28 = vld [vmem:[%s5471_s29] sm:$0xff]  ;;  %v4723_v40 = vld [vmem:[%s5471_s29 + $0x1b8] sm:$0xff] }
 0x126   : > { %3509 = vmatpush.bf16.msra.mxu0 %v4673_v8  ;;  %v4677_v25 = vld [vmem:[%s5471_s29 + $0x48] sm:$0xff]  ;;  %v3994_v29 = vld [vmem:[%s5816_s0] sm:$0xf]  ;;  %v4636_v34 = vld [vmem:[%s5816_s0 + $0x4] sm:$0xf] }
 0x127   : > { %3528 = vmatpush.bf16.msra.mxu1 %v4681_v9  ;;  %v4685_v26 = vld [vmem:[%s5471_s29 + $0x88] sm:$0xff]  ;;  %v4644_v30 = vld [vmem:[%s5816_s0 + $0x3c] sm:$0xf0]  ;;  %v3996_v35 = vld [vmem:[%s5816_s0 + $0x40] sm:$0xf0] }
 0x128   : > { %3547 = vmatpush.bf16.msra.mxu2 %v4689_v10  ;;  %v4693_v27 = vld [vmem:[%s5471_s29 + $0xc8] sm:$0xff]  ;;  %v4676_v31 = vld [vmem:[%s5471_s29 + $0x40] sm:$0xff]  ;;  %v4707_v41 = vld [vmem:[%s5471_s29 + $0x138] sm:$0xff]  ;;  %v3995_v42 = vor.u32 %v4644_v30, %v3994_v29  ;;  %v3999_v43 = vor.u32 %v4636_v34, %v3996_v35 }
 0x129   : > { %3566 = vmatpush.bf16.msra.mxu3 %v4697_v11  ;;  %v4684_v32 = vld [vmem:[%s5471_s29 + $0x80] sm:$0xff]  ;;  %v4002_v36 = vld [vmem:[%s5816_s0 + $0x8] sm:$0xf]  ;;  %v4637_v38 = vld [vmem:[%s5816_s0 + $0xc] sm:$0xf] }
 0x12a   : > { %3510 = vmatpush.bf16.msra.mxu0 %v4672_v12  ;;  %v4692_v33 = vld [vmem:[%s5471_s29 + $0xc0] sm:$0xff]  ;;  %v4645_v37 = vld [vmem:[%s5816_s0 + $0x44] sm:$0xf0]  ;;  %v4004_v39 = vld [vmem:[%s5816_s0 + $0x48] sm:$0xf0] }
 0x12b   : > { %3529 = vmatpush.bf16.msra.mxu1 %v4680_v13  ;;  %v4003_v44 = vor.u32 %v4645_v37, %v4002_v36  ;;  %v4007_v45 = vor.u32 %v4637_v38, %v4004_v39  ;;  %v4715_v46 = vld [vmem:[%s5471_s29 + $0x178] sm:$0xff]  ;;  %v4722_v48 = vld [vmem:[%s5471_s29 + $0x1b0] sm:$0xff]  ;;  %v4721_v52 = vld [vmem:[%s5471_s29 + $0x1a8] sm:$0xff] }
 0x12c   : > { %3548 = vmatpush.bf16.msra.mxu2 %v4688_v14  ;;  %v4731_v47 = vld [vmem:[%s5471_s29 + $0x1f8] sm:$0xff]  ;;  %v4706_v49 = vld [vmem:[%s5471_s29 + $0x130] sm:$0xff]  ;;  %v4705_v53 = vld [vmem:[%s5471_s29 + $0x128] sm:$0xff] }
 0x12d   : > { %3567 = vmatpush.bf16.msra.mxu3 %v4696_v15  ;;  %v4714_v50 = vld [vmem:[%s5471_s29 + $0x170] sm:$0xff]  ;;  %v4713_v54 = vld [vmem:[%s5471_s29 + $0x168] sm:$0xff]  ;;  %v4720_v56 = vld [vmem:[%s5471_s29 + $0x1a0] sm:$0xff] }
 0x12e   : > { %3511 = vmatpush.bf16.msra.mxu0 %v4671_v16  ;;  %v4730_v51 = vld [vmem:[%s5471_s29 + $0x1f0] sm:$0xff]  ;;  %v4729_v55 = vld [vmem:[%s5471_s29 + $0x1e8] sm:$0xff]  ;;  %v4704_v57 = vld [vmem:[%s5471_s29 + $0x120] sm:$0xff] }
 0x12f   : > { %3530 = vmatpush.bf16.msra.mxu1 %v4679_v17  ;;  %v4712_v58 = vld [vmem:[%s5471_s29 + $0x160] sm:$0xff]  ;;  %v4066_v0 = vld [vmem:[%s5816_s0 + $0x88] sm:$0xf]  ;;  %v4653_v2 = vld [vmem:[%s5816_s0 + $0x8c] sm:$0xf] }
 0x130   : > { %3549 = vmatpush.bf16.msra.mxu2 %v4687_v18  ;;  %v4728_v59 = vld [vmem:[%s5471_s29 + $0x1e0] sm:$0xff]  ;;  %v4661_v1 = vld [vmem:[%s5816_s0 + $0xc4] sm:$0xf0]  ;;  %v4068_v3 = vld [vmem:[%s5816_s0 + $0xc8] sm:$0xf0] }
 0x131   : > { %3568 = vmatpush.bf16.msra.mxu3 %v4695_v19  ;;  %v4058_v60 = vld [vmem:[%s5816_s0 + $0x80] sm:$0xf]  ;;  %v4652_v62 = vld [vmem:[%s5816_s0 + $0x84] sm:$0xf]  ;;  %v4719_v4 = vld [vmem:[%s5471_s29 + $0x198] sm:$0xff]  ;;  %v4067_v8 = vor.u32 %v4661_v1, %v4066_v0  ;;  %v4071_v9 = vor.u32 %v4653_v2, %v4068_v3 }
 0x132   : > { %3512 = vmatpush.bf16.msra.mxu0 %v4670_v20  ;;  %v4660_v61 = vld [vmem:[%s5816_s0 + $0xbc] sm:$0xf0]  ;;  %v4060_v63 = vld [vmem:[%s5816_s0 + $0xc0] sm:$0xf0]  ;;  %v4703_v5 = vld [vmem:[%s5471_s29 + $0x118] sm:$0xff] }
 0x133   : > { %3531 = vmatpush.bf16.msra.mxu1 %v4678_v21  ;;  %v4059_v6 = vor.u32 %v4660_v61, %v4058_v60  ;;  %v4063_v7 = vor.u32 %v4652_v62, %v4060_v63  ;;  %v4711_v10 = vld [vmem:[%s5471_s29 + $0x158] sm:$0xff]  ;;  %v4718_v12 = vld [vmem:[%s5471_s29 + $0x190] sm:$0xff]  ;;  %v4717_v16 = vld [vmem:[%s5471_s29 + $0x188] sm:$0xff] }
 0x134   : > { %3550 = vmatpush.bf16.msra.mxu2 %v4686_v22  ;;  %v4727_v11 = vld [vmem:[%s5471_s29 + $0x1d8] sm:$0xff]  ;;  %v4702_v13 = vld [vmem:[%s5471_s29 + $0x110] sm:$0xff]  ;;  %v4701_v17 = vld [vmem:[%s5471_s29 + $0x108] sm:$0xff] }
 0x135   : > { %3569 = vmatpush.bf16.msra.mxu3 %v4694_v23  ;;  %v4710_v14 = vld [vmem:[%s5471_s29 + $0x150] sm:$0xff]  ;;  %v4709_v18 = vld [vmem:[%s5471_s29 + $0x148] sm:$0xff]  ;;  %v4716_v20 = vld [vmem:[%s5471_s29 + $0x180] sm:$0xff] }
 0x136   : > { %3513 = vmatpush.bf16.msra.mxu0 %v4669_v24  ;;  %v4726_v15 = vld [vmem:[%s5471_s29 + $0x1d0] sm:$0xff]  ;;  %v4725_v19 = vld [vmem:[%s5471_s29 + $0x1c8] sm:$0xff]  ;;  %v4700_v21 = vld [vmem:[%s5471_s29 + $0x100] sm:$0xff] }
 0x137   : > { %3532 = vmatpush.bf16.msra.mxu1 %v4677_v25  ;;  %v4708_v22 = vld [vmem:[%s5471_s29 + $0x140] sm:$0xff]  ;;  %v4010_v24 = vld [vmem:[%s5816_s0 + $0x10] sm:$0xf]  ;;  %v4755_v25 = vld [vmem:[%s5471_s29 + $0x2b8] sm:$0xff] }
 0x138   : > { %3551 = vmatpush.bf16.msra.mxu2 %v4685_v26  ;;  %v4724_v23 = vld [vmem:[%s5471_s29 + $0x1c0] sm:$0xff]  ;;  %v4739_v26 = vld [vmem:[%s5471_s29 + $0x238] sm:$0xff]  ;;  %v4012_v29 = vld [vmem:[%s5816_s0 + $0x50] sm:$0xf0] }
 0x139   : > { %3570 = vmatpush.bf16.msra.mxu3 %v4693_v27  ;;  %v4646_v27 = vld [vmem:[%s5816_s0 + $0x4c] sm:$0xf0]  ;;  %v4018_v30 = vld [vmem:[%s5816_s0 + $0x18] sm:$0xf]  ;;  %v4084_v61 = vld [vmem:[%s5816_s0 + $0xd8] sm:$0xf0] }
 0x13a   : > { %3514 = vmatpush.bf16.msra.mxu0 %v4668_v28  ;;  %v4638_v28 = vld [vmem:[%s5816_s0 + $0x14] sm:$0xf]  ;;  %v4747_v34 = vld [vmem:[%s5471_s29 + $0x278] sm:$0xff]  ;;  %v4011_v36 = vor.u32 %v4646_v27, %v4010_v24  ;;  %v4028_v24 = vld [vmem:[%s5816_s0 + $0x60] sm:$0xf0] }
 0x13b   : > { %3533 = vmatpush.bf16.msra.mxu1 %v4676_v31  ;;  %v4647_v31 = vld [vmem:[%s5816_s0 + $0x54] sm:$0xf0]  ;;  %v4754_v37 = vld [vmem:[%s5471_s29 + $0x2b0] sm:$0xff]  ;;  %v4015_v38 = vor.u32 %v4638_v28, %v4012_v29  ;;  %v4641_v27 = vld [vmem:[%s5816_s0 + $0x2c] sm:$0xf] }
 0x13c   : > { %3552 = vmatpush.bf16.msra.mxu2 %v4684_v32  ;;  %v4639_v32 = vld [vmem:[%s5816_s0 + $0x1c] sm:$0xf]  ;;  %v4019_v39 = vor.u32 %v4647_v31, %v4018_v30  ;;  %v4750_v1 = vld [vmem:[%s5471_s29 + $0x290] sm:$0xff]  ;;  %v4036_v28 = vld [vmem:[%s5816_s0 + $0x68] sm:$0xf0] }
 0x13d   : > { %3571 = vmatpush.bf16.msra.mxu3 %v4692_v33  ;;  %3515 = vmatmul.bf16.vlgmr.msra.gmra.mxu0 %v3995_v42  ;;  %v4020_v33 = vld [vmem:[%s5816_s0 + $0x58] sm:$0xf0]  ;;  %v4746_v42 = vld [vmem:[%s5471_s29 + $0x270] sm:$0xff] }
 0x13e   : > { %3583 = vmatpush.bf16.msrb.mxu0 %v4707_v41  ;;  %3534 = vmatmul.bf16.vlgmr.msra.gmra.mxu1 %v3999_v43  ;;  %v4763_v35 = vld [vmem:[%s5471_s29 + $0x2f8] sm:$0xff]  ;;  %v4738_v41 = vld [vmem:[%s5471_s29 + $0x230] sm:$0xff] }
 0x13f   : > { %3553 = vmatmul.bf16.vlgmr.msra.gmra.mxu2 %v4003_v44  ;;  %3602 = vmatpush.bf16.msrb.mxu1 %v4715_v46  ;;  %v4762_v43 = vld [vmem:[%s5471_s29 + $0x2f0] sm:$0xff]  ;;  %v4753_v44 = vld [vmem:[%s5471_s29 + $0x2a8] sm:$0xff]  ;;  %v4735_v60 = vld [vmem:[%s5471_s29 + $0x218] sm:$0xff] }
 0x140   : > { %3621 = vmatpush.bf16.msrb.mxu2 %v4723_v40  ;;  %3572 = vmatmul.bf16.vlgmr.msra.gmra.mxu3 %v4007_v45  ;;  %v4023_v40 = vor.u32 %v4639_v32, %v4020_v33  ;;  %v4737_v45 = vld [vmem:[%s5471_s29 + $0x228] sm:$0xff]  ;;  %v4743_v62 = vld [vmem:[%s5471_s29 + $0x258] sm:$0xff]  ;;  %v4778_v30 = vld [vmem:[%s5471_s29 + $0x370] sm:$0xff]  ;;  %v4039_v33 = vor.u32 %v4641_v27, %v4036_v28 }
 0x141   : > { %3640 = vmatpush.bf16.msrb.mxu3 %v4731_v47  ;;  %v4745_v46 = vld [vmem:[%s5471_s29 + $0x268] sm:$0xff]  ;;  %v4759_v63 = vld [vmem:[%s5471_s29 + $0x2d8] sm:$0xff] }
 0x142   : > { %3584 = vmatpush.bf16.msrb.mxu0 %v4706_v49  ;;  %v4761_v47 = vld [vmem:[%s5471_s29 + $0x2e8] sm:$0xff]  ;;  %v4736_v49 = vld [vmem:[%s5471_s29 + $0x220] sm:$0xff]  ;;  %v4116_v27 = vld [vmem:[%s5816_s0 + $0xf8] sm:$0xf0] }
 0x143   : > { %3603 = vmatpush.bf16.msrb.mxu1 %v4714_v50  ;;  %v4744_v50 = vld [vmem:[%s5471_s29 + $0x260] sm:$0xff] }
 0x144   : > { %3622 = vmatpush.bf16.msrb.mxu2 %v4722_v48  ;;  %v4752_v48 = vld [vmem:[%s5471_s29 + $0x2a0] sm:$0xff] }
 0x145   : > { %3641 = vmatpush.bf16.msrb.mxu3 %v4730_v51  ;;  %v4760_v51 = vld [vmem:[%s5471_s29 + $0x2e0] sm:$0xff] }
 0x146   : > { %3585 = vmatpush.bf16.msrb.mxu0 %v4705_v53  ;;  %v4662_v53 = vld [vmem:[%s5816_s0 + $0xcc] sm:$0xf0] }
 0x147   : > { %3604 = vmatpush.bf16.msrb.mxu1 %v4713_v54  ;;  %v4751_v54 = vld [vmem:[%s5471_s29 + $0x298] sm:$0xff] }
 0x148   : > { %3623 = vmatpush.bf16.msrb.mxu2 %v4721_v52  ;;  %v4074_v52 = vld [vmem:[%s5816_s0 + $0x90] sm:$0xf] }
 0x149   : > { %3642 = vmatpush.bf16.msrb.mxu3 %v4729_v55  ;;  %v4654_v55 = vld [vmem:[%s5816_s0 + $0x94] sm:$0xf]  ;;  %v4075_v0 = vor.u32 %v4662_v53, %v4074_v52  ;;  %v4657_v52 = vld [vmem:[%s5816_s0 + $0xac] sm:$0xf]  ;;  %v4767_v53 = vld [vmem:[%s5471_s29 + $0x318] sm:$0xff] }
 0x14a   : > { %3586 = vmatpush.bf16.msrb.mxu0 %v4704_v57  ;;  %v4082_v57 = vld [vmem:[%s5816_s0 + $0x98] sm:$0xf] }
 0x14b   : > { %3605 = vmatpush.bf16.msrb.mxu1 %v4712_v58  ;;  %v4663_v58 = vld [vmem:[%s5816_s0 + $0xd4] sm:$0xf0] }
 0x14c   : > { %3624 = vmatpush.bf16.msrb.mxu2 %v4720_v56  ;;  %v4076_v56 = vld [vmem:[%s5816_s0 + $0xd0] sm:$0xf0]  ;;  %v4083_v3 = vor.u32 %v4663_v58, %v4082_v57 }
 0x14d   : > { %3643 = vmatpush.bf16.msrb.mxu3 %v4728_v59  ;;  %3520 = vmatmul.bf16.gmra.mxu0 %v4059_v6  ;;  %v4655_v59 = vld [vmem:[%s5816_s0 + $0x9c] sm:$0xf]  ;;  %v4079_v2 = vor.u32 %v4654_v55, %v4076_v56  ;;  %v4742_v6 = vld [vmem:[%s5471_s29 + $0x250] sm:$0xff] }
 0x14e   : > { %3587 = vmatpush.bf16.msrb.mxu0 %v4703_v5  ;;  %3539 = vmatmul.bf16.gmra.mxu1 %v4063_v7  ;;  %v4734_v5 = vld [vmem:[%s5471_s29 + $0x210] sm:$0xff]  ;;  %v4791_v55 = vld [vmem:[%s5471_s29 + $0x3d8] sm:$0xff] }
 0x14f   : > { %3558 = vmatmul.bf16.gmra.mxu2 %v4067_v8  ;;  %3606 = vmatpush.bf16.msrb.mxu1 %v4711_v10  ;;  %v4758_v7 = vld [vmem:[%s5471_s29 + $0x2d0] sm:$0xff]  ;;  %v4749_v8 = vld [vmem:[%s5471_s29 + $0x288] sm:$0xff] }
 0x150   : > { %3625 = vmatpush.bf16.msrb.mxu2 %v4719_v4  ;;  %3577 = vmatmul.bf16.gmra.mxu3 %v4071_v9  ;;  %v4087_v4 = vor.u32 %v4655_v59, %v4084_v61  ;;  %v4733_v9 = vld [vmem:[%s5471_s29 + $0x208] sm:$0xff]  ;;  %v4782_v56 = vld [vmem:[%s5471_s29 + $0x390] sm:$0xff] }
 0x151   : > { %3644 = vmatpush.bf16.msrb.mxu3 %v4727_v11  ;;  %v4741_v10 = vld [vmem:[%s5471_s29 + $0x248] sm:$0xff]  ;;  %v4774_v58 = vld [vmem:[%s5471_s29 + $0x350] sm:$0xff] }
 0x152   : > { %3588 = vmatpush.bf16.msrb.mxu0 %v4702_v13  ;;  %v4757_v11 = vld [vmem:[%s5471_s29 + $0x2c8] sm:$0xff]  ;;  %v4787_v13 = vld [vmem:[%s5471_s29 + $0x3b8] sm:$0xff] }
 0x153   : > { %3607 = vmatpush.bf16.msrb.mxu1 %v4710_v14  ;;  %v4732_v14 = vld [vmem:[%s5471_s29 + $0x200] sm:$0xff] }
 0x154   : > { %3626 = vmatpush.bf16.msrb.mxu2 %v4718_v12  ;;  %v4748_v12 = vld [vmem:[%s5471_s29 + $0x280] sm:$0xff] }
 0x155   : > { %3645 = vmatpush.bf16.msrb.mxu3 %v4726_v15  ;;  %v4740_v15 = vld [vmem:[%s5471_s29 + $0x240] sm:$0xff] }
 0x156   : > { %3589 = vmatpush.bf16.msrb.mxu0 %v4701_v17  ;;  %v4026_v17 = vld [vmem:[%s5816_s0 + $0x20] sm:$0xf] }
 0x157   : > { %3608 = vmatpush.bf16.msrb.mxu1 %v4709_v18  ;;  %v4648_v18 = vld [vmem:[%s5816_s0 + $0x5c] sm:$0xf0] }
 0x158   : > { %3627 = vmatpush.bf16.msrb.mxu2 %v4717_v16  ;;  %v4756_v16 = vld [vmem:[%s5471_s29 + $0x2c0] sm:$0xff]  ;;  %v4027_v29 = vor.u32 %v4648_v18, %v4026_v17 }
 0x159   : > { %3646 = vmatpush.bf16.msrb.mxu3 %v4725_v19  ;;  %v4771_v19 = vld [vmem:[%s5471_s29 + $0x338] sm:$0xff] }
 0x15a   : > { %3590 = vmatpush.bf16.msrb.mxu0 %v4700_v21  ;;  %v4640_v21 = vld [vmem:[%s5816_s0 + $0x24] sm:$0xf] }
 0x15b   : > { %3609 = vmatpush.bf16.msrb.mxu1 %v4708_v22  ;;  %v4795_v22 = vld [vmem:[%s5471_s29 + $0x3f8] sm:$0xff]  ;;  %v4031_v31 = vor.u32 %v4640_v21, %v4028_v24  ;;  %v4666_v21 = vld [vmem:[%s5816_s0 + $0xec] sm:$0xf0] }
 0x15c   : > { %3628 = vmatpush.bf16.msrb.mxu2 %v4716_v20  ;;  %v4779_v20 = vld [vmem:[%s5471_s29 + $0x378] sm:$0xff] }
 0x15d   : > { %3647 = vmatpush.bf16.msrb.mxu3 %v4724_v23  ;;  %3591 = vmatmul.bf16.vlgmr.msrb.gmra.mxu0 %v4011_v36  ;;  %v4786_v23 = vld [vmem:[%s5471_s29 + $0x3b0] sm:$0xff]  ;;  %v4785_v36 = vld [vmem:[%s5471_s29 + $0x3a8] sm:$0xff]  ;;  %v4114_v24 = vld [vmem:[%s5816_s0 + $0xb8] sm:$0xf] }
 0x15e   : > { %3659 = vmatpush.bf16.msra.mxu0 %v4739_v26  ;;  %3610 = vmatmul.bf16.vlgmr.msrb.gmra.mxu1 %v4015_v38  ;;  %v4649_v26 = vld [vmem:[%s5816_s0 + $0x64] sm:$0xf0] }
 0x15f   : > { %3678 = vmatpush.bf16.msra.mxu1 %v4747_v34  ;;  %3629 = vmatmul.bf16.vlgmr.msrb.gmra.mxu2 %v4019_v39  ;;  %v4770_v34 = vld [vmem:[%s5471_s29 + $0x330] sm:$0xff]  ;;  %v4769_v38 = vld [vmem:[%s5471_s29 + $0x328] sm:$0xff] }
 0x160   : > { %3697 = vmatpush.bf16.msra.mxu2 %v4755_v25  ;;  %3648 = vmatmul.bf16.vlgmr.msrb.gmra.mxu3 %v4023_v40  ;;  %v4034_v25 = vld [vmem:[%s5816_s0 + $0x28] sm:$0xf]  ;;  %v4784_v40 = vld [vmem:[%s5471_s29 + $0x3a0] sm:$0xff] }
 0x161   : > { %3716 = vmatpush.bf16.msra.mxu3 %v4763_v35  ;;  %v4035_v32 = vor.u32 %v4649_v26, %v4034_v25  ;;  %v4794_v35 = vld [vmem:[%s5471_s29 + $0x3f0] sm:$0xff]  ;;  %v4793_v39 = vld [vmem:[%s5471_s29 + $0x3e8] sm:$0xff]  ;;  %v4667_v25 = vld [vmem:[%s5816_s0 + $0xf4] sm:$0xf0] }
 0x162   : > { %3660 = vmatpush.bf16.msra.mxu0 %v4738_v41  ;;  %v4776_v41 = vld [vmem:[%s5471_s29 + $0x360] sm:$0xff]  ;;  %v4659_v26 = vld [vmem:[%s5816_s0 + $0xbc] sm:$0xf] }
 0x163   : > { %3679 = vmatpush.bf16.msra.mxu1 %v4746_v42  ;;  %v4768_v42 = vld [vmem:[%s5471_s29 + $0x320] sm:$0xff] }
 0x164   : > { %3698 = vmatpush.bf16.msra.mxu2 %v4754_v37  ;;  %v4777_v37 = vld [vmem:[%s5471_s29 + $0x368] sm:$0xff] }
 0x165   : > { %3717 = vmatpush.bf16.msra.mxu3 %v4762_v43  ;;  %v4792_v43 = vld [vmem:[%s5471_s29 + $0x3e0] sm:$0xff] }
 0x166   : > { %3661 = vmatpush.bf16.msra.mxu0 %v4737_v45  ;;  %v4090_v45 = vld [vmem:[%s5816_s0 + $0xa0] sm:$0xf] }
 0x167   : > { %3680 = vmatpush.bf16.msra.mxu1 %v4745_v46  ;;  %v4664_v46 = vld [vmem:[%s5816_s0 + $0xdc] sm:$0xf0] }
 0x168   : > { %3699 = vmatpush.bf16.msra.mxu2 %v4753_v44  ;;  %v4783_v44 = vld [vmem:[%s5471_s29 + $0x398] sm:$0xff]  ;;  %v4091_v57 = vor.u32 %v4664_v46, %v4090_v45 }
 0x169   : > { %3718 = vmatpush.bf16.msra.mxu3 %v4761_v47  ;;  %v4775_v47 = vld [vmem:[%s5471_s29 + $0x358] sm:$0xff] }
 0x16a   : > { %3662 = vmatpush.bf16.msra.mxu0 %v4736_v49  ;;  %v4092_v49 = vld [vmem:[%s5816_s0 + $0xe0] sm:$0xf0] }
 0x16b   : > { %3681 = vmatpush.bf16.msra.mxu1 %v4744_v50  ;;  %v4098_v50 = vld [vmem:[%s5816_s0 + $0xa8] sm:$0xf] }
 0x16c   : > { %3700 = vmatpush.bf16.msra.mxu2 %v4752_v48  ;;  %v4656_v48 = vld [vmem:[%s5816_s0 + $0xa4] sm:$0xf] }
 0x16d   : > { %3719 = vmatpush.bf16.msra.mxu3 %v4760_v51  ;;  %3596 = vmatmul.bf16.gmra.mxu0 %v4075_v0  ;;  %v4665_v51 = vld [vmem:[%s5816_s0 + $0xe4] sm:$0xf0]  ;;  %v4095_v59 = vor.u32 %v4656_v48, %v4092_v49 }
 0x16e   : > { %3663 = vmatpush.bf16.msra.mxu0 %v4735_v60  ;;  %3615 = vmatmul.bf16.gmra.mxu1 %v4079_v2  ;;  %v4099_v60 = vor.u32 %v4665_v51, %v4098_v50  ;;  %v4781_v0 = vld [vmem:[%s5471_s29 + $0x388] sm:$0xff] }
 0x16f   : > { %3682 = vmatpush.bf16.msra.mxu1 %v4743_v62  ;;  %3634 = vmatmul.bf16.gmra.mxu2 %v4083_v3  ;;  %v4766_v62 = vld [vmem:[%s5471_s29 + $0x310] sm:$0xff]  ;;  %v4765_v2 = vld [vmem:[%s5471_s29 + $0x308] sm:$0xff] }
 0x170   : > { %3701 = vmatpush.bf16.msra.mxu2 %v4751_v54  ;;  %3653 = vmatmul.bf16.gmra.mxu3 %v4087_v4  ;;  %v4100_v54 = vld [vmem:[%s5816_s0 + $0xe8] sm:$0xf0]  ;;  %v4780_v4 = vld [vmem:[%s5471_s29 + $0x380] sm:$0xff] }
 0x171   : > { %3720 = vmatpush.bf16.msra.mxu3 %v4759_v63  ;;  %v4103_v61 = vor.u32 %v4657_v52, %v4100_v54  ;;  %v4790_v63 = vld [vmem:[%s5471_s29 + $0x3d0] sm:$0xff]  ;;  %v4789_v3 = vld [vmem:[%s5471_s29 + $0x3c8] sm:$0xff] }
 0x172   : > { %3664 = vmatpush.bf16.msra.mxu0 %v4734_v5  ;;  %v4772_v5 = vld [vmem:[%s5471_s29 + $0x340] sm:$0xff] }
 0x173   : > { %3683 = vmatpush.bf16.msra.mxu1 %v4742_v6  ;;  %v4764_v6 = vld [vmem:[%s5471_s29 + $0x300] sm:$0xff] }
 0x174   : > { %3702 = vmatpush.bf16.msra.mxu2 %v4750_v1  ;;  %v4773_v1 = vld [vmem:[%s5471_s29 + $0x348] sm:$0xff] }
 0x175   : > { %3721 = vmatpush.bf16.msra.mxu3 %v4758_v7  ;;  %v4788_v7 = vld [vmem:[%s5471_s29 + $0x3c0] sm:$0xff] }
 0x176   : > { %3665 = vmatpush.bf16.msra.mxu0 %v4733_v9  ;;  %v4650_v9 = vld [vmem:[%s5816_s0 + $0x6c] sm:$0xf0] }
 0x177   : > { %3684 = vmatpush.bf16.msra.mxu1 %v4741_v10  ;;  %v4642_v10 = vld [vmem:[%s5816_s0 + $0x34] sm:$0xf] }
 0x178   : > { %3703 = vmatpush.bf16.msra.mxu2 %v4749_v8  ;;  %v4042_v8 = vld [vmem:[%s5816_s0 + $0x30] sm:$0xf] }
 0x179   : > { %3722 = vmatpush.bf16.msra.mxu3 %v4757_v11  ;;  %v4044_v11 = vld [vmem:[%s5816_s0 + $0x70] sm:$0xf0] }
 0x17a   : > { %3666 = vmatpush.bf16.msra.mxu0 %v4732_v14  ;;  %v4643_v14 = vld [vmem:[%s5816_s0 + $0x3c] sm:$0xf]  ;;  %v4047_v17 = vor.u32 %v4642_v10, %v4044_v11 }
 0x17b   : > { %3685 = vmatpush.bf16.msra.mxu1 %v4740_v15  ;;  %v4052_v15 = vld [vmem:[%s5816_s0 + $0x78] sm:$0xf0] }
 0x17c   : > { %3704 = vmatpush.bf16.msra.mxu2 %v4748_v12  ;;  %v4050_v12 = vld [vmem:[%s5816_s0 + $0x38] sm:$0xf] }
 0x17d   : > { %3723 = vmatpush.bf16.msra.mxu3 %v4756_v16  ;;  %3667 = vmatmul.bf16.vlgmr.msra.gmra.mxu0 %v4027_v29  ;;  %v4043_v16 = vor.u32 %v4650_v9, %v4042_v8 }
 0x17e   : > { %3735 = vmatpush.bf16.msrb.mxu0 %v4771_v19  ;;  %3686 = vmatmul.bf16.vlgmr.msra.gmra.mxu1 %v4031_v31  ;;  %v4055_v19 = vor.u32 %v4643_v14, %v4052_v15  ;;  %v4119_v31 = vor.u32 %v4659_v26, %v4116_v27 }
 0x17f   : > { %3754 = vmatpush.bf16.msrb.mxu1 %v4779_v20  ;;  %3705 = vmatmul.bf16.vlgmr.msra.gmra.mxu2 %v4035_v32  ;;  %v4106_v20 = vld [vmem:[%s5816_s0 + $0xb0] sm:$0xf] }
 0x180   : > { %3773 = vmatpush.bf16.msrb.mxu2 %v4787_v13  ;;  %3724 = vmatmul.bf16.vlgmr.msra.gmra.mxu3 %v4039_v33  ;;  %v4651_v13 = vld [vmem:[%s5816_s0 + $0x74] sm:$0xf0]  ;;  %v4107_v28 = vor.u32 %v4666_v21, %v4106_v20 }
 0x181   : > { %3792 = vmatpush.bf16.msrb.mxu3 %v4795_v22  ;;  %v4051_v18 = vor.u32 %v4651_v13, %v4050_v12  ;;  %v4658_v22 = vld [vmem:[%s5816_s0 + $0xb4] sm:$0xf] }
 0x182   : > { %3736 = vmatpush.bf16.msrb.mxu0 %v4770_v34 }
 0x183   : > { %3755 = vmatpush.bf16.msrb.mxu1 %v4778_v30  ;;  %v4115_v30 = vor.u32 %v4667_v25, %v4114_v24 }
 0x184   : > { %3774 = vmatpush.bf16.msrb.mxu2 %v4786_v23  ;;  %v4108_v23 = vld [vmem:[%s5816_s0 + $0xf0] sm:$0xf0] }
 0x185   : > { %3793 = vmatpush.bf16.msrb.mxu3 %v4794_v35  ;;  %v4111_v29 = vor.u32 %v4658_v22, %v4108_v23 }
 0x186   : > { %3737 = vmatpush.bf16.msrb.mxu0 %v4769_v38 }
 0x187   : > { %3756 = vmatpush.bf16.msrb.mxu1 %v4777_v37 }
 0x188   : > { %3775 = vmatpush.bf16.msrb.mxu2 %v4785_v36 }
 0x189   : > { %3794 = vmatpush.bf16.msrb.mxu3 %v4793_v39 }
 0x18a   : > { %3738 = vmatpush.bf16.msrb.mxu0 %v4768_v42 }
 0x18b   : > { %3757 = vmatpush.bf16.msrb.mxu1 %v4776_v41 }
 0x18c   : > { %3776 = vmatpush.bf16.msrb.mxu2 %v4784_v40 }
 0x18d   : > { %3795 = vmatpush.bf16.msrb.mxu3 %v4792_v43  ;;  %3672 = vmatmul.bf16.gmra.mxu0 %v4091_v57 }
 0x18e   : > { %3739 = vmatpush.bf16.msrb.mxu0 %v4767_v53  ;;  %3691 = vmatmul.bf16.gmra.mxu1 %v4095_v59 }
 0x18f   : > { %3758 = vmatpush.bf16.msrb.mxu1 %v4775_v47  ;;  %3710 = vmatmul.bf16.gmra.mxu2 %v4099_v60 }
 0x190   : > { %3777 = vmatpush.bf16.msrb.mxu2 %v4783_v44  ;;  %3729 = vmatmul.bf16.gmra.mxu3 %v4103_v61 }
 0x191   : > { %3796 = vmatpush.bf16.msrb.mxu3 %v4791_v55 }
 0x192   : > { %3740 = vmatpush.bf16.msrb.mxu0 %v4766_v62 }
 0x193   : > { %3759 = vmatpush.bf16.msrb.mxu1 %v4774_v58 }
 0x194   : > { %3778 = vmatpush.bf16.msrb.mxu2 %v4782_v56 }
 0x195   : > { %3797 = vmatpush.bf16.msrb.mxu3 %v4790_v63 }
 0x196   : > { %3741 = vmatpush.bf16.msrb.mxu0 %v4765_v2 }
 0x197   : > { %3760 = vmatpush.bf16.msrb.mxu1 %v4773_v1 }
 0x198   : > { %3779 = vmatpush.bf16.msrb.mxu2 %v4781_v0 }
 0x199   : > { %3798 = vmatpush.bf16.msrb.mxu3 %v4789_v3 }
 0x19a   : > { %3742 = vmatpush.bf16.msrb.mxu0 %v4764_v6 }
 0x19b   : > { %3761 = vmatpush.bf16.msrb.mxu1 %v4772_v5 }
 0x19c   : > { %3780 = vmatpush.bf16.msrb.mxu2 %v4780_v4 }
 0x19d   : > { %3799 = vmatpush.bf16.msrb.mxu3 %v4788_v7  ;;  %3743 = vmatmul.bf16.vlgmr.msrb.gmra.mxu0 %v4043_v16 }
 0x19e   : > { %3762 = vmatmul.bf16.vlgmr.msrb.gmra.mxu1 %v4047_v17 }
 0x19f   : > { %3781 = vmatmul.bf16.vlgmr.msrb.gmra.mxu2 %v4051_v18 }
 0x1a0   : > { %3800 = vmatmul.bf16.vlgmr.msrb.gmra.mxu3 %v4055_v19 }
 0x1ad   : > { %3748 = vmatmul.bf16.gmra.mxu0 %v4107_v28 }
 0x1ae   : > { %3767 = vmatmul.bf16.gmra.mxu1 %v4111_v29 }
 0x1af   : > { %3786 = vmatmul.bf16.gmra.mxu2 %v4115_v30 }
 0x1b0   : > { %3805 = vmatmul.bf16.gmra.mxu3 %v4119_v31 }
 0x1ba   : > { %v3516_v32 = vpop.f32.mrf.mxu0 }
 0x1bb   : > { %v3535_v33 = vpop.f32.mrf.mxu1 }
 0x1bc   : > { %v3536_v34 = vadd.f32 %v3535_v33, %v3516_v32 }
 0x1c2   : > { %v3554_v35 = vpop.f32.mrf.mxu2  ;;  %v3518_v38 = vpop.f32.mrf.mxu0 }
 0x1c3   : > { %v3573_v36 = vpop.f32.mrf.mxu3  ;;  %v3555_v37 = vadd.f32 %v3554_v35, %v3536_v34  ;;  %v3537_v39 = vpop.f32.mrf.mxu1 }
 0x1c4   : > { %v3538_v40 = vadd.f32 %v3537_v39, %v3518_v38 }
 0x1c5   : > { %v3574_v41 = vadd.f32 %v3573_v36, %v3555_v37 }
 0x1ca   : > { %v3556_v42 = vpop.f32.mrf.mxu2  ;;  %v3521_v45 = vpop.f32.mrf.mxu0 }
 0x1cb   : > { %v3575_v43 = vpop.f32.mrf.mxu3  ;;  %v3557_v44 = vadd.f32 %v3556_v42, %v3538_v40  ;;  %v3540_v46 = vpop.f32.mrf.mxu1 }
 0x1cc   : > { %v3541_v47 = vadd.f32 %v3540_v46, %v3521_v45 }
 0x1cd   : > { %v3576_v48 = vadd.f32 %v3575_v43, %v3557_v44 }
 0x1d2   : > { %v3559_v49 = vpop.f32.mrf.mxu2  ;;  %v3523_v52 = vpop.f32.mrf.mxu0 }
 0x1d3   : > { %v3578_v50 = vpop.f32.mrf.mxu3  ;;  %v3560_v51 = vadd.f32 %v3559_v49, %v3541_v47  ;;  %v3542_v53 = vpop.f32.mrf.mxu1 }
 0x1d4   : > { %v3543_v54 = vadd.f32 %v3542_v53, %v3523_v52 }
 0x1d5   : > { %v3579_v55 = vadd.f32 %v3578_v50, %v3560_v51 }
 0x1da   : > { %v3561_v56 = vpop.f32.mrf.mxu2  ;;  %v3592_v59 = vpop.f32.mrf.mxu0 }
 0x1db   : > { %v3580_v57 = vpop.f32.mrf.mxu3  ;;  %v3562_v58 = vadd.f32 %v3561_v56, %v3543_v54  ;;  %v3611_v60 = vpop.f32.mrf.mxu1  ;;  %v3593_v18 = vadd.f32 %v3592_v59, %v3574_v41 }
 0x1dd   : > { %v3581_v61 = vadd.f32 %v3580_v57, %v3562_v58  ;;  %v3612_v20 = vadd.f32 %v3611_v60, %v3593_v18 }
 0x1e2   : > { %v3630_v62 = vpop.f32.mrf.mxu2  ;;  %v3594_v0 = vpop.f32.mrf.mxu0 }
 0x1e3   : > { %v3649_v63 = vpop.f32.mrf.mxu3  ;;  %v3613_v1 = vpop.f32.mrf.mxu1  ;;  %v3631_v24 = vadd.f32 %v3630_v62, %v3612_v20  ;;  %v3595_v25 = vadd.f32 %v3594_v0, %v3576_v48 }
 0x1e5   : > { %v3650_v26 = vadd.f32 %v3649_v63, %v3631_v24  ;;  %v3614_v27 = vadd.f32 %v3613_v1, %v3595_v25 }
 0x1ea   : > { %v3632_v2 = vpop.f32.mrf.mxu2  ;;  %v3597_v4 = vpop.f32.mrf.mxu0 }
 0x1eb   : > { %v3651_v3 = vpop.f32.mrf.mxu3  ;;  %v3616_v5 = vpop.f32.mrf.mxu1  ;;  %v3633_v29 = vadd.f32 %v3632_v2, %v3614_v27  ;;  %v3598_v35 = vadd.f32 %v3597_v4, %v3579_v55 }
 0x1ed   : > { %v3652_v34 = vadd.f32 %v3651_v3, %v3633_v29  ;;  %v3617_v40 = vadd.f32 %v3616_v5, %v3598_v35 }
 0x1f2   : > { %v3635_v6 = vpop.f32.mrf.mxu2  ;;  %v3599_v8 = vpop.f32.mrf.mxu0 }
 0x1f3   : > { %v3654_v7 = vpop.f32.mrf.mxu3  ;;  %v3618_v9 = vpop.f32.mrf.mxu1  ;;  %v3636_v44 = vadd.f32 %v3635_v6, %v3617_v40  ;;  %v3600_v45 = vadd.f32 %v3599_v8, %v3581_v61 }
 0x1f5   : > { %v3655_v50 = vadd.f32 %v3654_v7, %v3636_v44  ;;  %v3619_v51 = vadd.f32 %v3618_v9, %v3600_v45 }
 0x1fa   : > { %v3637_v10 = vpop.f32.mrf.mxu2  ;;  %v3668_v12 = vpop.f32.mrf.mxu0 }
 0x1fb   : > { %v3656_v11 = vpop.f32.mrf.mxu3  ;;  %v3687_v13 = vpop.f32.mrf.mxu1  ;;  %v3669_v30 = vadd.f32 %v3668_v12, %v3650_v26  ;;  %v3638_v53 = vadd.f32 %v3637_v10, %v3619_v51 }
 0x1fd   : > { %v3688_v36 = vadd.f32 %v3687_v13, %v3669_v30  ;;  %v3657_v63 = vadd.f32 %v3656_v11, %v3638_v53 }
 0x202   : > { %v3706_v14 = vpop.f32.mrf.mxu2  ;;  %v3670_v16 = vpop.f32.mrf.mxu0 }
 0x203   : > { %v3725_v15 = vpop.f32.mrf.mxu3  ;;  %v3689_v17 = vpop.f32.mrf.mxu1  ;;  %v3707_v37 = vadd.f32 %v3706_v14, %v3688_v36  ;;  %v3671_v38 = vadd.f32 %v3670_v16, %v3652_v34 }
 0x205   : > { %v3726_v46 = vadd.f32 %v3725_v15, %v3707_v37  ;;  %v3690_v47 = vadd.f32 %v3689_v17, %v3671_v38 }
 0x20a   : > { %v3708_v19 = vpop.f32.mrf.mxu2  ;;  %v3673_v22 = vpop.f32.mrf.mxu0 }
 0x20b   : > { %v3727_v21 = vpop.f32.mrf.mxu3  ;;  %v3692_v23 = vpop.f32.mrf.mxu1  ;;  %v3709_v48 = vadd.f32 %v3708_v19, %v3690_v47  ;;  %v3674_v55 = vadd.f32 %v3673_v22, %v3655_v50 }
 0x20d   : > { %v3728_v54 = vadd.f32 %v3727_v21, %v3709_v48  ;;  %v3693_v0 = vadd.f32 %v3692_v23, %v3674_v55 }
 0x212   : > { %v3711_v28 = vpop.f32.mrf.mxu2  ;;  %v3675_v32 = vpop.f32.mrf.mxu0 }
 0x213   : > { %v3730_v31 = vpop.f32.mrf.mxu3  ;;  %v3694_v33 = vpop.f32.mrf.mxu1  ;;  %v3712_v61 = vadd.f32 %v3711_v28, %v3693_v0  ;;  %v3676_v1 = vadd.f32 %v3675_v32, %v3657_v63 }
 0x215   : > { %v3731_v8 = vadd.f32 %v3730_v31, %v3712_v61  ;;  %v3695_v9 = vadd.f32 %v3694_v33, %v3676_v1 }
 0x21a   : > { %v3713_v39 = vpop.f32.mrf.mxu2  ;;  %v3744_v42 = vpop.f32.mrf.mxu0 }
 0x21b   : > { %v3732_v41 = vpop.f32.mrf.mxu3  ;;  %v3763_v43 = vpop.f32.mrf.mxu1  ;;  %v3745_v49 = vadd.f32 %v3744_v42, %v3726_v46  ;;  %v3714_v14 = vadd.f32 %v3713_v39, %v3695_v9 }
 0x21d   : > { %v3764_v56 = vadd.f32 %v3763_v43, %v3745_v49  ;;  %v3733_v19 = vadd.f32 %v3732_v41, %v3714_v14 }
 0x222   : > { %v3782_v52 = vpop.f32.mrf.mxu2  ;;  %v3746_v58 = vpop.f32.mrf.mxu0 }
 0x223   : > { %v3801_v57 = vpop.f32.mrf.mxu3  ;;  %v3765_v59 = vpop.f32.mrf.mxu1  ;;  %v3783_v60 = vadd.f32 %v3782_v52, %v3764_v56  ;;  %v3747_v62 = vadd.f32 %v3746_v58, %v3728_v54 }
 0x225   : > { %v3802_v2 = vadd.f32 %v3801_v57, %v3783_v60  ;;  %v3766_v3 = vadd.f32 %v3765_v59, %v3747_v62 }
 0x227   : > { %v3811_v10 = vmul.f32 0.2, %v3802_v2 }
 0x229   : > { %v3815_v16 = vmax.f32 %v3802_v2, %v3811_v10 }
 0x22a   : > { %v3784_v4 = vpop.f32.mrf.mxu2  ;;  %v3749_v7 = vpop.f32.mrf.mxu0 }
 0x22b   : > { %v3785_v5 = vadd.f32 %v3784_v4, %v3766_v3  ;;  %v3803_v6 = vpop.f32.mrf.mxu3  ;;  %v3768_v13 = vpop.f32.mrf.mxu1  ;;  %v3750_v11 = vadd.f32 %v3749_v7, %v3731_v8 }
 0x22d   : > { %v3804_v12 = vadd.f32 %v3803_v6, %v3785_v5  ;;  %v3769_v21 = vadd.f32 %v3768_v13, %v3750_v11 }
 0x22f   : > { %v3812_v15 = vmul.f32 0.2, %v3804_v12 }
 0x231   : > { %v3816_v17 = vmax.f32 %v3804_v12, %v3812_v15 }
 0x232   : > { %v3787_v18 = vpop.f32.mrf.mxu2  ;;  %v3751_v23 = vpop.f32.mrf.mxu0 }
 0x233   : > { %v4799_v20 = vpack.c.bf16 %v3816_v17, %v3815_v16  ;;  %v3806_v22 = vpop.f32.mrf.mxu3  ;;  %v3788_v24 = vadd.f32 %v3787_v18, %v3769_v21  ;;  %v3752_v25 = vadd.f32 %v3751_v23, %v3733_v19  ;;  %v3770_v26 = vpop.f32.mrf.mxu1 }
 0x235   : > { %4800 = vst [vmem:[%s2282_s3] sm:$0xff] %v4799_v20   ;;  %v3807_v27 = vadd.f32 %v3806_v22, %v3788_v24  ;;  %v3771_v28 = vadd.f32 %v3770_v26, %v3752_v25 }
 0x237   : > { %v3813_v32 = vmul.f32 0.2, %v3807_v27 }
 0x239   : > { %v3817_v35 = vmax.f32 %v3807_v27, %v3813_v32 }
 0x23a   : > { %v3789_v29 = vpop.f32.mrf.mxu2 }
 0x23b   : > { %v3790_v30 = vadd.f32 %v3789_v29, %v3771_v28  ;;  %v3808_v31 = vpop.f32.mrf.mxu3 }
 0x23c   : > { %v3855_v38 = vld [vmem:[%s2282_s3] sm:$0xf] (%p4937_p6)  ;;  %v3857_v39 = vld [vmem:[%s2282_s3 + $0x4] sm:$0xf] (%p4937_p6) }
 0x23d   : > { %v3809_v33 = vadd.f32 %v3808_v31, %v3790_v30  ;;  %3856 = vst [vmem:[%s3838_s5] sm:$0xf] (%p4937_p6), %v3855_v38 }
 0x23e   : > { %3858 = vst [vmem:[%s3838_s5 + $0x8] sm:$0xf] (%p4937_p6), %v3857_v39 }
 0x23f   : > { %v3814_v34 = vmul.f32 0.2, %v3809_v33 }
 0x241   : > { %v3818_v36 = vmax.f32 %v3809_v33, %v3814_v34  ;;  %3833 = sbr.rel (!%p4937_p6) target bundleno = 591 (0x24f), region = 84 }
 0x243   : > { %v4804_v37 = vpack.c.bf16 %v3818_v36, %v3817_v35 }
 0x245   : > { %4806 = vst [vmem:[%s2282_s3 + $0x8] sm:$0xff] %v4804_v37  }
 0x24c   : > { %v3859_v40 = vld [vmem:[%s2282_s3 + $0x8] sm:$0xf]  ;;  %v3861_v41 = vld [vmem:[%s2282_s3 + $0xc] sm:$0xf] }
 0x24d   : > { %3860 = vst [vmem:[%s3838_s5 + $0x10] sm:$0xf] %v3859_v40 }
 0x24e   : > { %3862 = vst [vmem:[%s3838_s5 + $0x18] sm:$0xf] %v3861_v41 }
 0x24f PF: > { %s12_s13 = sadd.s32 1, %s4885_s13   ;;  %s5820_s9 = smov %s4873_s10 }
 0x250   : > { %p9_p11 = scmp.ge.s32.totalorder %s12_s13, 4   ;;  %s5821_s10 = smov %s4942_s19 }
 0x251   : > { %s5822_s11 = smov %s4881_s12  ;;  %s5823_s12 = smov %s5825_s14 }
 0x252   :  { %11 = sbr.rel (!%p9_p11) target bundleno = 3 (0x3), region = 163 }

// kernel: forward.8
= control target key start
LH: loop header
LB: loop body
LE: loop exit
PB: predicated region body
PF: predicated region fallthrough
CT: control target
= control target key end

     0   :  { %s9270_s9 = smov 0   ;;  %s9272_s10 = smov 0   ;;  %s11043_s0 = inlined_call_operand.vmem [shape: bf16[32,4096], index: 0, kind: input, shape index: {}]   ;;  %s11044_s1 = inlined_call_operand.vmem [shape: bf16[4096,512], index: 1, kind: input, shape index: {}]   ;;  %s11045_s2 = inlined_call_operand.vmem [shape: bf16[32,512], index: 2, kind: output, shape index: {}]  }
   0x1   :  { %s9274_s11 = smov 0   ;;  %s9276_s12 = smov 0  }
   0x2   :  { %s9278_s13 = smov 0  }
   0x3 LB: > { %s21_s14 = sadd.s32 1, %s9249_s12  ;;  %s7550_s15 = sadd.s32 4294967295, %s9253_s13   ;;  %s9253_s13 = sphi %s9278_s13, %s12_s13   ;;  %s9249_s12 = sphi %s9276_s12, %s11050_s12   ;;  %s9245_s11 = sphi %s9274_s11, %s11049_s11   ;;  %s9241_s10 = sphi %s9272_s10, %s11048_s10   ;;  %s9237_s9 = sphi %s9270_s9, %s11047_s9  }
   0x4   : > { %p22_p0 = scmp.ge.s32.totalorder %s21_s14, 4  ;;  %p64_p1 = scmp.ne.s32.totalorder %s9241_s10, %s9237_s9 }
   0x5   : > { %p65_p2 = scmp.eq.s32.totalorder %s9253_s13, 0  ;;  %p96_p4 = scmp.eq.s32.totalorder %s7550_s15, 3 }
   0x6   : > { %s11052_s14 = smov (%p22_p0, %s21_s14), 0  ;;  %s57_s17 = sadd.s32 1, %s9241_s10 }
   0x7   : > { %p66_p3 = por %p65_p2, %p64_p1  ;;  %s54_s16 = ssub.s32 %s9249_s12, %s11052_s14 }
   0x8   : > { %p55_p5 = scmp.eq.s32.totalorder %s54_s16, 0  ;;  %p9305_p6 = por %p96_p4, %p64_p1 }
   0x9   : > { %p7554_p7 = scmp.ge.s32.totalorder %s9253_s13, 4 }
   0xa   : > { %s9310_s19 = scalar_select %p55_p5, %s9241_s10, %s57_s17  }
   0xb   : > { %128 = sbr.rel (%p7554_p7) target bundleno = 532 (0x214), region = 20 }
  0x10   : > { %131 = sbr.rel (!%p66_p3) target bundleno = 532 (0x214), region = 24  ;;  %s133_s20 = sand.u32 (%p66_p3), 1, %s9241_s10  }
  0x11   : > { %s7556_s21 = sshll.u32 (%p66_p3), %s9249_s12, 2  ;;  %s7555_s22 = sshll.u32 (%p66_p3), %s133_s20, 11 }
  0x12   : > { %s9318_s25 = scalar_lea.vmem (%p66_p3), %s11044_s1, %s7556_s21  ;;  %s9322_s26 = scalar_lea.vmem (%p66_p3), [#allocation2], %s7555_s22 }
  0x13   : > { %v154_v0 = vld [vmem:[%s9318_s25] sm:$0xf] (%p66_p3)  ;;  %v156_v1 = vld [vmem:[%s9318_s25 + $0x10] sm:$0xf] (%p66_p3) }
  0x14   : > { %155 = vst [vmem:[%s9322_s26] sm:$0xf] (%p66_p3), %v154_v0  ;;  %v158_v2 = vld [vmem:[%s9318_s25 + $0x20] sm:$0xf] (%p66_p3)  ;;  %v160_v3 = vld [vmem:[%s9318_s25 + $0x30] sm:$0xf] (%p66_p3) }
  0x15   : > { %157 = vst [vmem:[%s9322_s26 + $0x4] sm:$0xf] %v156_v1  ;;  %v162_v4 = vld [vmem:[%s9318_s25 + $0x40] sm:$0xf]  ;;  %v164_v5 = vld [vmem:[%s9318_s25 + $0x50] sm:$0xf] }
  0x16   : > { %159 = vst [vmem:[%s9322_s26 + $0x8] sm:$0xf] %v158_v2  ;;  %v166_v6 = vld [vmem:[%s9318_s25 + $0x60] sm:$0xf]  ;;  %v168_v7 = vld [vmem:[%s9318_s25 + $0x70] sm:$0xf] }
  0x17   : > { %161 = vst [vmem:[%s9322_s26 + $0xc] sm:$0xf] %v160_v3  ;;  %v170_v8 = vld [vmem:[%s9318_s25 + $0x80] sm:$0xf]  ;;  %v172_v9 = vld [vmem:[%s9318_s25 + $0x90] sm:$0xf] }
  0x18   : > { %163 = vst [vmem:[%s9322_s26 + $0x10] sm:$0xf] %v162_v4  ;;  %v174_v10 = vld [vmem:[%s9318_s25 + $0xa0] sm:$0xf]  ;;  %v176_v11 = vld [vmem:[%s9318_s25 + $0xb0] sm:$0xf] }
  0x19   : > { %165 = vst [vmem:[%s9322_s26 + $0x14] sm:$0xf] %v164_v5  ;;  %v178_v12 = vld [vmem:[%s9318_s25 + $0xc0] sm:$0xf]  ;;  %v180_v13 = vld [vmem:[%s9318_s25 + $0xd0] sm:$0xf] }
  0x1a   : > { %167 = vst [vmem:[%s9322_s26 + $0x18] sm:$0xf] %v166_v6  ;;  %v182_v14 = vld [vmem:[%s9318_s25 + $0xe0] sm:$0xf]  ;;  %v184_v15 = vld [vmem:[%s9318_s25 + $0xf0] sm:$0xf] }
  0x1b   : > { %169 = vst [vmem:[%s9322_s26 + $0x1c] sm:$0xf] %v168_v7  ;;  %v186_v16 = vld [vmem:[%s9318_s25 + $0x100] sm:$0xf]  ;;  %v188_v17 = vld [vmem:[%s9318_s25 + $0x110] sm:$0xf] }
  0x1c   : > { %171 = vst [vmem:[%s9322_s26 + $0x20] sm:$0xf] %v170_v8  ;;  %v190_v18 = vld [vmem:[%s9318_s25 + $0x120] sm:$0xf]  ;;  %v192_v19 = vld [vmem:[%s9318_s25 + $0x130] sm:$0xf] }
  0x1d   : > { %173 = vst [vmem:[%s9322_s26 + $0x24] sm:$0xf] %v172_v9  ;;  %v194_v20 = vld [vmem:[%s9318_s25 + $0x140] sm:$0xf]  ;;  %v196_v21 = vld [vmem:[%s9318_s25 + $0x150] sm:$0xf] }
  0x1e   : > { %175 = vst [vmem:[%s9322_s26 + $0x28] sm:$0xf] %v174_v10  ;;  %v198_v22 = vld [vmem:[%s9318_s25 + $0x160] sm:$0xf]  ;;  %v200_v23 = vld [vmem:[%s9318_s25 + $0x170] sm:$0xf] }
  0x1f   : > { %177 = vst [vmem:[%s9322_s26 + $0x2c] sm:$0xf] %v176_v11  ;;  %v202_v24 = vld [vmem:[%s9318_s25 + $0x180] sm:$0xf]  ;;  %v204_v25 = vld [vmem:[%s9318_s25 + $0x190] sm:$0xf] }
  0x20   : > { %179 = vst [vmem:[%s9322_s26 + $0x30] sm:$0xf] %v178_v12  ;;  %v206_v26 = vld [vmem:[%s9318_s25 + $0x1a0] sm:$0xf]  ;;  %v208_v27 = vld [vmem:[%s9318_s25 + $0x1b0] sm:$0xf] }
  0x21   : > { %181 = vst [vmem:[%s9322_s26 + $0x34] sm:$0xf] %v180_v13  ;;  %v210_v28 = vld [vmem:[%s9318_s25 + $0x1c0] sm:$0xf]  ;;  %v212_v29 = vld [vmem:[%s9318_s25 + $0x1d0] sm:$0xf] }
  0x22   : > { %183 = vst [vmem:[%s9322_s26 + $0x38] sm:$0xf] %v182_v14  ;;  %v214_v30 = vld [vmem:[%s9318_s25 + $0x1e0] sm:$0xf]  ;;  %v216_v31 = vld [vmem:[%s9318_s25 + $0x1f0] sm:$0xf] }
  0x23   : > { %185 = vst [vmem:[%s9322_s26 + $0x3c] sm:$0xf] %v184_v15  ;;  %v218_v32 = vld [vmem:[%s9318_s25 + $0x200] sm:$0xf]  ;;  %v220_v33 = vld [vmem:[%s9318_s25 + $0x210] sm:$0xf] }
  0x24   : > { %187 = vst [vmem:[%s9322_s26 + $0x40] sm:$0xf] %v186_v16  ;;  %v222_v34 = vld [vmem:[%s9318_s25 + $0x220] sm:$0xf]  ;;  %v224_v35 = vld [vmem:[%s9318_s25 + $0x230] sm:$0xf] }
  0x25   : > { %189 = vst [vmem:[%s9322_s26 + $0x44] sm:$0xf] %v188_v17  ;;  %v226_v36 = vld [vmem:[%s9318_s25 + $0x240] sm:$0xf]  ;;  %v228_v37 = vld [vmem:[%s9318_s25 + $0x250] sm:$0xf] }
  0x26   : > { %191 = vst [vmem:[%s9322_s26 + $0x48] sm:$0xf] %v190_v18  ;;  %v230_v38 = vld [vmem:[%s9318_s25 + $0x260] sm:$0xf]  ;;  %v232_v39 = vld [vmem:[%s9318_s25 + $0x270] sm:$0xf] }
  0x27   : > { %193 = vst [vmem:[%s9322_s26 + $0x4c] sm:$0xf] %v192_v19  ;;  %v234_v40 = vld [vmem:[%s9318_s25 + $0x280] sm:$0xf]  ;;  %v236_v41 = vld [vmem:[%s9318_s25 + $0x290] sm:$0xf] }
  0x28   : > { %195 = vst [vmem:[%s9322_s26 + $0x50] sm:$0xf] %v194_v20  ;;  %v238_v42 = vld [vmem:[%s9318_s25 + $0x2a0] sm:$0xf]  ;;  %v240_v43 = vld [vmem:[%s9318_s25 + $0x2b0] sm:$0xf] }
  0x29   : > { %197 = vst [vmem:[%s9322_s26 + $0x54] sm:$0xf] %v196_v21  ;;  %v242_v44 = vld [vmem:[%s9318_s25 + $0x2c0] sm:$0xf]  ;;  %v244_v45 = vld [vmem:[%s9318_s25 + $0x2d0] sm:$0xf] }
  0x2a   : > { %199 = vst [vmem:[%s9322_s26 + $0x58] sm:$0xf] %v198_v22  ;;  %v246_v46 = vld [vmem:[%s9318_s25 + $0x2e0] sm:$0xf]  ;;  %v248_v47 = vld [vmem:[%s9318_s25 + $0x2f0] sm:$0xf] }
  0x2b   : > { %201 = vst [vmem:[%s9322_s26 + $0x5c] sm:$0xf] %v200_v23  ;;  %v250_v48 = vld [vmem:[%s9318_s25 + $0x300] sm:$0xf]  ;;  %v252_v49 = vld [vmem:[%s9318_s25 + $0x310] sm:$0xf] }
  0x2c   : > { %203 = vst [vmem:[%s9322_s26 + $0x60] sm:$0xf] %v202_v24  ;;  %v254_v50 = vld [vmem:[%s9318_s25 + $0x320] sm:$0xf]  ;;  %v256_v51 = vld [vmem:[%s9318_s25 + $0x330] sm:$0xf] }
  0x2d   : > { %205 = vst [vmem:[%s9322_s26 + $0x64] sm:$0xf] %v204_v25  ;;  %v258_v52 = vld [vmem:[%s9318_s25 + $0x340] sm:$0xf]  ;;  %v260_v53 = vld [vmem:[%s9318_s25 + $0x350] sm:$0xf] }
  0x2e   : > { %207 = vst [vmem:[%s9322_s26 + $0x68] sm:$0xf] %v206_v26  ;;  %v262_v54 = vld [vmem:[%s9318_s25 + $0x360] sm:$0xf]  ;;  %v264_v55 = vld [vmem:[%s9318_s25 + $0x370] sm:$0xf] }
  0x2f   : > { %209 = vst [vmem:[%s9322_s26 + $0x6c] sm:$0xf] %v208_v27  ;;  %v266_v56 = vld [vmem:[%s9318_s25 + $0x380] sm:$0xf]  ;;  %v268_v57 = vld [vmem:[%s9318_s25 + $0x390] sm:$0xf] }
  0x30   : > { %211 = vst [vmem:[%s9322_s26 + $0x70] sm:$0xf] %v210_v28  ;;  %v270_v58 = vld [vmem:[%s9318_s25 + $0x3a0] sm:$0xf]  ;;  %v272_v59 = vld [vmem:[%s9318_s25 + $0x3b0] sm:$0xf] }
  0x31   : > { %213 = vst [vmem:[%s9322_s26 + $0x74] sm:$0xf] %v212_v29  ;;  %v274_v60 = vld [vmem:[%s9318_s25 + $0x3c0] sm:$0xf]  ;;  %v276_v61 = vld [vmem:[%s9318_s25 + $0x3d0] sm:$0xf] }
  0x32   : > { %215 = vst [vmem:[%s9322_s26 + $0x78] sm:$0xf] %v214_v30  ;;  %v278_v62 = vld [vmem:[%s9318_s25 + $0x3e0] sm:$0xf]  ;;  %v280_v63 = vld [vmem:[%s9318_s25 + $0x3f0] sm:$0xf] }
  0x33   : > { %217 = vst [vmem:[%s9322_s26 + $0x7c] sm:$0xf] %v216_v31  ;;  %v282_v0 = vld [vmem:[%s9318_s25 + $0x400] sm:$0xf]  ;;  %v284_v1 = vld [vmem:[%s9318_s25 + $0x410] sm:$0xf] }
  0x34   : > { %219 = vst [vmem:[%s9322_s26 + $0x80] sm:$0xf] %v218_v32  ;;  %v286_v2 = vld [vmem:[%s9318_s25 + $0x420] sm:$0xf]  ;;  %v288_v3 = vld [vmem:[%s9318_s25 + $0x430] sm:$0xf] }
  0x35   : > { %221 = vst [vmem:[%s9322_s26 + $0x84] sm:$0xf] %v220_v33  ;;  %v290_v4 = vld [vmem:[%s9318_s25 + $0x440] sm:$0xf]  ;;  %v292_v5 = vld [vmem:[%s9318_s25 + $0x450] sm:$0xf] }
  0x36   : > { %223 = vst [vmem:[%s9322_s26 + $0x88] sm:$0xf] %v222_v34  ;;  %v294_v6 = vld [vmem:[%s9318_s25 + $0x460] sm:$0xf]  ;;  %v296_v7 = vld [vmem:[%s9318_s25 + $0x470] sm:$0xf] }
  0x37   : > { %225 = vst [vmem:[%s9322_s26 + $0x8c] sm:$0xf] %v224_v35  ;;  %v298_v8 = vld [vmem:[%s9318_s25 + $0x480] sm:$0xf]  ;;  %v300_v9 = vld [vmem:[%s9318_s25 + $0x490] sm:$0xf] }
  0x38   : > { %227 = vst [vmem:[%s9322_s26 + $0x90] sm:$0xf] %v226_v36  ;;  %v302_v10 = vld [vmem:[%s9318_s25 + $0x4a0] sm:$0xf]  ;;  %v304_v11 = vld [vmem:[%s9318_s25 + $0x4b0] sm:$0xf] }
  0x39   : > { %229 = vst [vmem:[%s9322_s26 + $0x94] sm:$0xf] %v228_v37  ;;  %v306_v12 = vld [vmem:[%s9318_s25 + $0x4c0] sm:$0xf]  ;;  %v308_v13 = vld [vmem:[%s9318_s25 + $0x4d0] sm:$0xf] }
  0x3a   : > { %231 = vst [vmem:[%s9322_s26 + $0x98] sm:$0xf] %v230_v38  ;;  %v310_v14 = vld [vmem:[%s9318_s25 + $0x4e0] sm:$0xf]  ;;  %v312_v15 = vld [vmem:[%s9318_s25 + $0x4f0] sm:$0xf] }
  0x3b   : > { %233 = vst [vmem:[%s9322_s26 + $0x9c] sm:$0xf] %v232_v39  ;;  %v314_v16 = vld [vmem:[%s9318_s25 + $0x500] sm:$0xf]  ;;  %v316_v17 = vld [vmem:[%s9318_s25 + $0x510] sm:$0xf] }
  0x3c   : > { %235 = vst [vmem:[%s9322_s26 + $0xa0] sm:$0xf] %v234_v40  ;;  %v318_v18 = vld [vmem:[%s9318_s25 + $0x520] sm:$0xf]  ;;  %v320_v19 = vld [vmem:[%s9318_s25 + $0x530] sm:$0xf] }
  0x3d   : > { %237 = vst [vmem:[%s9322_s26 + $0xa4] sm:$0xf] %v236_v41  ;;  %v322_v20 = vld [vmem:[%s9318_s25 + $0x540] sm:$0xf]  ;;  %v324_v21 = vld [vmem:[%s9318_s25 + $0x550] sm:$0xf] }
  0x3e   : > { %239 = vst [vmem:[%s9322_s26 + $0xa8] sm:$0xf] %v238_v42  ;;  %v326_v22 = vld [vmem:[%s9318_s25 + $0x560] sm:$0xf]  ;;  %v328_v23 = vld [vmem:[%s9318_s25 + $0x570] sm:$0xf] }
  0x3f   : > { %241 = vst [vmem:[%s9322_s26 + $0xac] sm:$0xf] %v240_v43  ;;  %v330_v24 = vld [vmem:[%s9318_s25 + $0x580] sm:$0xf]  ;;  %v332_v25 = vld [vmem:[%s9318_s25 + $0x590] sm:$0xf] }
  0x40   : > { %243 = vst [vmem:[%s9322_s26 + $0xb0] sm:$0xf] %v242_v44  ;;  %v334_v26 = vld [vmem:[%s9318_s25 + $0x5a0] sm:$0xf]  ;;  %v336_v27 = vld [vmem:[%s9318_s25 + $0x5b0] sm:$0xf] }
  0x41   : > { %245 = vst [vmem:[%s9322_s26 + $0xb4] sm:$0xf] %v244_v45  ;;  %v338_v28 = vld [vmem:[%s9318_s25 + $0x5c0] sm:$0xf]  ;;  %v340_v29 = vld [vmem:[%s9318_s25 + $0x5d0] sm:$0xf] }
  0x42   : > { %247 = vst [vmem:[%s9322_s26 + $0xb8] sm:$0xf] %v246_v46  ;;  %v342_v30 = vld [vmem:[%s9318_s25 + $0x5e0] sm:$0xf]  ;;  %v344_v31 = vld [vmem:[%s9318_s25 + $0x5f0] sm:$0xf] }
  0x43   : > { %249 = vst [vmem:[%s9322_s26 + $0xbc] sm:$0xf] %v248_v47  ;;  %v346_v32 = vld [vmem:[%s9318_s25 + $0x600] sm:$0xf]  ;;  %v348_v33 = vld [vmem:[%s9318_s25 + $0x610] sm:$0xf] }
  0x44   : > { %251 = vst [vmem:[%s9322_s26 + $0xc0] sm:$0xf] %v250_v48  ;;  %v350_v34 = vld [vmem:[%s9318_s25 + $0x620] sm:$0xf]  ;;  %v352_v35 = vld [vmem:[%s9318_s25 + $0x630] sm:$0xf] }
  0x45   : > { %253 = vst [vmem:[%s9322_s26 + $0xc4] sm:$0xf] %v252_v49  ;;  %v354_v36 = vld [vmem:[%s9318_s25 + $0x640] sm:$0xf]  ;;  %v356_v37 = vld [vmem:[%s9318_s25 + $0x650] sm:$0xf] }
  0x46   : > { %255 = vst [vmem:[%s9322_s26 + $0xc8] sm:$0xf] %v254_v50  ;;  %v358_v38 = vld [vmem:[%s9318_s25 + $0x660] sm:$0xf]  ;;  %v360_v39 = vld [vmem:[%s9318_s25 + $0x670] sm:$0xf] }
  0x47   : > { %257 = vst [vmem:[%s9322_s26 + $0xcc] sm:$0xf] %v256_v51  ;;  %v362_v40 = vld [vmem:[%s9318_s25 + $0x680] sm:$0xf]  ;;  %v364_v41 = vld [vmem:[%s9318_s25 + $0x690] sm:$0xf] }
  0x48   : > { %259 = vst [vmem:[%s9322_s26 + $0xd0] sm:$0xf] %v258_v52  ;;  %v366_v42 = vld [vmem:[%s9318_s25 + $0x6a0] sm:$0xf]  ;;  %v368_v43 = vld [vmem:[%s9318_s25 + $0x6b0] sm:$0xf] }
  0x49   : > { %261 = vst [vmem:[%s9322_s26 + $0xd4] sm:$0xf] %v260_v53  ;;  %v370_v44 = vld [vmem:[%s9318_s25 + $0x6c0] sm:$0xf]  ;;  %v372_v45 = vld [vmem:[%s9318_s25 + $0x6d0] sm:$0xf] }
  0x4a   : > { %263 = vst [vmem:[%s9322_s26 + $0xd8] sm:$0xf] %v262_v54  ;;  %v374_v46 = vld [vmem:[%s9318_s25 + $0x6e0] sm:$0xf]  ;;  %v376_v47 = vld [vmem:[%s9318_s25 + $0x6f0] sm:$0xf] }
  0x4b   : > { %265 = vst [vmem:[%s9322_s26 + $0xdc] sm:$0xf] %v264_v55  ;;  %v378_v48 = vld [vmem:[%s9318_s25 + $0x700] sm:$0xf]  ;;  %v380_v49 = vld [vmem:[%s9318_s25 + $0x710] sm:$0xf] }
  0x4c   : > { %267 = vst [vmem:[%s9322_s26 + $0xe0] sm:$0xf] %v266_v56  ;;  %v382_v50 = vld [vmem:[%s9318_s25 + $0x720] sm:$0xf]  ;;  %v384_v51 = vld [vmem:[%s9318_s25 + $0x730] sm:$0xf] }
  0x4d   : > { %269 = vst [vmem:[%s9322_s26 + $0xe4] sm:$0xf] %v268_v57  ;;  %v386_v52 = vld [vmem:[%s9318_s25 + $0x740] sm:$0xf]  ;;  %v388_v53 = vld [vmem:[%s9318_s25 + $0x750] sm:$0xf] }
  0x4e   : > { %271 = vst [vmem:[%s9322_s26 + $0xe8] sm:$0xf] %v270_v58  ;;  %v390_v54 = vld [vmem:[%s9318_s25 + $0x760] sm:$0xf]  ;;  %v392_v55 = vld [vmem:[%s9318_s25 + $0x770] sm:$0xf] }
  0x4f   : > { %273 = vst [vmem:[%s9322_s26 + $0xec] sm:$0xf] %v272_v59  ;;  %v394_v56 = vld [vmem:[%s9318_s25 + $0x780] sm:$0xf]  ;;  %v396_v57 = vld [vmem:[%s9318_s25 + $0x790] sm:$0xf] }
  0x50   : > { %275 = vst [vmem:[%s9322_s26 + $0xf0] sm:$0xf] %v274_v60  ;;  %v398_v58 = vld [vmem:[%s9318_s25 + $0x7a0] sm:$0xf]  ;;  %v400_v59 = vld [vmem:[%s9318_s25 + $0x7b0] sm:$0xf] }
  0x51   : > { %277 = vst [vmem:[%s9322_s26 + $0xf4] sm:$0xf] %v276_v61  ;;  %v402_v60 = vld [vmem:[%s9318_s25 + $0x7c0] sm:$0xf]  ;;  %v404_v61 = vld [vmem:[%s9318_s25 + $0x7d0] sm:$0xf] }
  0x52   : > { %279 = vst [vmem:[%s9322_s26 + $0xf8] sm:$0xf] %v278_v62  ;;  %v406_v62 = vld [vmem:[%s9318_s25 + $0x7e0] sm:$0xf] }
  0x53   : > { %281 = vst [vmem:[%s9322_s26 + $0xfc] sm:$0xf] %v280_v63  ;;  %v408_v63 = vld [vmem:[%s9318_s25 + $0x7f0] sm:$0xf] }
  0x54   : > { %283 = vst [vmem:[%s9322_s26 + $0x100] sm:$0xf] %v282_v0  ;;  %v410_v0 = vld [vmem:[%s9318_s25 + $0x800] sm:$0xf] }
  0x55   : > { %285 = vst [vmem:[%s9322_s26 + $0x104] sm:$0xf] %v284_v1  ;;  %v412_v1 = vld [vmem:[%s9318_s25 + $0x810] sm:$0xf] }
  0x56   : > { %287 = vst [vmem:[%s9322_s26 + $0x108] sm:$0xf] %v286_v2  ;;  %v414_v2 = vld [vmem:[%s9318_s25 + $0x820] sm:$0xf] }
  0x57   : > { %289 = vst [vmem:[%s9322_s26 + $0x10c] sm:$0xf] %v288_v3  ;;  %v416_v3 = vld [vmem:[%s9318_s25 + $0x830] sm:$0xf] }
  0x58   : > { %291 = vst [vmem:[%s9322_s26 + $0x110] sm:$0xf] %v290_v4  ;;  %v418_v4 = vld [vmem:[%s9318_s25 + $0x840] sm:$0xf] }
  0x59   : > { %293 = vst [vmem:[%s9322_s26 + $0x114] sm:$0xf] %v292_v5  ;;  %v420_v5 = vld [vmem:[%s9318_s25 + $0x850] sm:$0xf] }
  0x5a   : > { %295 = vst [vmem:[%s9322_s26 + $0x118] sm:$0xf] %v294_v6  ;;  %v422_v6 = vld [vmem:[%s9318_s25 + $0x860] sm:$0xf] }
  0x5b   : > { %297 = vst [vmem:[%s9322_s26 + $0x11c] sm:$0xf] %v296_v7  ;;  %v424_v7 = vld [vmem:[%s9318_s25 + $0x870] sm:$0xf] }
  0x5c   : > { %299 = vst [vmem:[%s9322_s26 + $0x120] sm:$0xf] %v298_v8  ;;  %v426_v8 = vld [vmem:[%s9318_s25 + $0x880] sm:$0xf] }
  0x5d   : > { %301 = vst [vmem:[%s9322_s26 + $0x124] sm:$0xf] %v300_v9  ;;  %v428_v9 = vld [vmem:[%s9318_s25 + $0x890] sm:$0xf] }
  0x5e   : > { %303 = vst [vmem:[%s9322_s26 + $0x128] sm:$0xf] %v302_v10  ;;  %v430_v10 = vld [vmem:[%s9318_s25 + $0x8a0] sm:$0xf] }
  0x5f   : > { %305 = vst [vmem:[%s9322_s26 + $0x12c] sm:$0xf] %v304_v11  ;;  %v432_v11 = vld [vmem:[%s9318_s25 + $0x8b0] sm:$0xf] }
  0x60   : > { %307 = vst [vmem:[%s9322_s26 + $0x130] sm:$0xf] %v306_v12  ;;  %v434_v12 = vld [vmem:[%s9318_s25 + $0x8c0] sm:$0xf] }
  0x61   : > { %309 = vst [vmem:[%s9322_s26 + $0x134] sm:$0xf] %v308_v13  ;;  %v436_v13 = vld [vmem:[%s9318_s25 + $0x8d0] sm:$0xf] }
  0x62   : > { %311 = vst [vmem:[%s9322_s26 + $0x138] sm:$0xf] %v310_v14  ;;  %v438_v14 = vld [vmem:[%s9318_s25 + $0x8e0] sm:$0xf] }
  0x63   : > { %313 = vst [vmem:[%s9322_s26 + $0x13c] sm:$0xf] %v312_v15  ;;  %v440_v15 = vld [vmem:[%s9318_s25 + $0x8f0] sm:$0xf] }
  0x64   : > { %315 = vst [vmem:[%s9322_s26 + $0x140] sm:$0xf] %v314_v16  ;;  %v442_v16 = vld [vmem:[%s9318_s25 + $0x900] sm:$0xf] }
  0x65   : > { %317 = vst [vmem:[%s9322_s26 + $0x144] sm:$0xf] %v316_v17  ;;  %v444_v17 = vld [vmem:[%s9318_s25 + $0x910] sm:$0xf] }
  0x66   : > { %319 = vst [vmem:[%s9322_s26 + $0x148] sm:$0xf] %v318_v18  ;;  %v446_v18 = vld [vmem:[%s9318_s25 + $0x920] sm:$0xf] }
  0x67   : > { %321 = vst [vmem:[%s9322_s26 + $0x14c] sm:$0xf] %v320_v19  ;;  %v448_v19 = vld [vmem:[%s9318_s25 + $0x930] sm:$0xf] }
  0x68   : > { %323 = vst [vmem:[%s9322_s26 + $0x150] sm:$0xf] %v322_v20  ;;  %v450_v20 = vld [vmem:[%s9318_s25 + $0x940] sm:$0xf] }
  0x69   : > { %325 = vst [vmem:[%s9322_s26 + $0x154] sm:$0xf] %v324_v21  ;;  %v452_v21 = vld [vmem:[%s9318_s25 + $0x950] sm:$0xf] }
  0x6a   : > { %327 = vst [vmem:[%s9322_s26 + $0x158] sm:$0xf] %v326_v22  ;;  %v454_v22 = vld [vmem:[%s9318_s25 + $0x960] sm:$0xf] }
  0x6b   : > { %329 = vst [vmem:[%s9322_s26 + $0x15c] sm:$0xf] %v328_v23  ;;  %v456_v23 = vld [vmem:[%s9318_s25 + $0x970] sm:$0xf] }
  0x6c   : > { %331 = vst [vmem:[%s9322_s26 + $0x160] sm:$0xf] %v330_v24  ;;  %v458_v24 = vld [vmem:[%s9318_s25 + $0x980] sm:$0xf] }
  0x6d   : > { %333 = vst [vmem:[%s9322_s26 + $0x164] sm:$0xf] %v332_v25  ;;  %v460_v25 = vld [vmem:[%s9318_s25 + $0x990] sm:$0xf] }
  0x6e   : > { %335 = vst [vmem:[%s9322_s26 + $0x168] sm:$0xf] %v334_v26  ;;  %v462_v26 = vld [vmem:[%s9318_s25 + $0x9a0] sm:$0xf] }
  0x6f   : > { %337 = vst [vmem:[%s9322_s26 + $0x16c] sm:$0xf] %v336_v27  ;;  %v464_v27 = vld [vmem:[%s9318_s25 + $0x9b0] sm:$0xf] }
  0x70   : > { %339 = vst [vmem:[%s9322_s26 + $0x170] sm:$0xf] %v338_v28  ;;  %v466_v28 = vld [vmem:[%s9318_s25 + $0x9c0] sm:$0xf] }
  0x71   : > { %341 = vst [vmem:[%s9322_s26 + $0x174] sm:$0xf] %v340_v29  ;;  %v468_v29 = vld [vmem:[%s9318_s25 + $0x9d0] sm:$0xf] }
  0x72   : > { %343 = vst [vmem:[%s9322_s26 + $0x178] sm:$0xf] %v342_v30  ;;  %v470_v30 = vld [vmem:[%s9318_s25 + $0x9e0] sm:$0xf] }
  0x73   : > { %345 = vst [vmem:[%s9322_s26 + $0x17c] sm:$0xf] %v344_v31  ;;  %v472_v31 = vld [vmem:[%s9318_s25 + $0x9f0] sm:$0xf] }
  0x74   : > { %347 = vst [vmem:[%s9322_s26 + $0x180] sm:$0xf] %v346_v32  ;;  %v474_v32 = vld [vmem:[%s9318_s25 + $0xa00] sm:$0xf] }
  0x75   : > { %349 = vst [vmem:[%s9322_s26 + $0x184] sm:$0xf] %v348_v33  ;;  %v476_v33 = vld [vmem:[%s9318_s25 + $0xa10] sm:$0xf] }
  0x76   : > { %351 = vst [vmem:[%s9322_s26 + $0x188] sm:$0xf] %v350_v34  ;;  %v478_v34 = vld [vmem:[%s9318_s25 + $0xa20] sm:$0xf] }
  0x77   : > { %353 = vst [vmem:[%s9322_s26 + $0x18c] sm:$0xf] %v352_v35  ;;  %v480_v35 = vld [vmem:[%s9318_s25 + $0xa30] sm:$0xf] }
  0x78   : > { %355 = vst [vmem:[%s9322_s26 + $0x190] sm:$0xf] %v354_v36  ;;  %v482_v36 = vld [vmem:[%s9318_s25 + $0xa40] sm:$0xf] }
  0x79   : > { %357 = vst [vmem:[%s9322_s26 + $0x194] sm:$0xf] %v356_v37  ;;  %v484_v37 = vld [vmem:[%s9318_s25 + $0xa50] sm:$0xf] }
  0x7a   : > { %359 = vst [vmem:[%s9322_s26 + $0x198] sm:$0xf] %v358_v38  ;;  %v486_v38 = vld [vmem:[%s9318_s25 + $0xa60] sm:$0xf] }
  0x7b   : > { %361 = vst [vmem:[%s9322_s26 + $0x19c] sm:$0xf] %v360_v39  ;;  %v488_v39 = vld [vmem:[%s9318_s25 + $0xa70] sm:$0xf] }
  0x7c   : > { %363 = vst [vmem:[%s9322_s26 + $0x1a0] sm:$0xf] %v362_v40  ;;  %v490_v40 = vld [vmem:[%s9318_s25 + $0xa80] sm:$0xf] }
  0x7d   : > { %365 = vst [vmem:[%s9322_s26 + $0x1a4] sm:$0xf] %v364_v41  ;;  %v492_v41 = vld [vmem:[%s9318_s25 + $0xa90] sm:$0xf] }
  0x7e   : > { %367 = vst [vmem:[%s9322_s26 + $0x1a8] sm:$0xf] %v366_v42  ;;  %v494_v42 = vld [vmem:[%s9318_s25 + $0xaa0] sm:$0xf] }
  0x7f   : > { %369 = vst [vmem:[%s9322_s26 + $0x1ac] sm:$0xf] %v368_v43  ;;  %v496_v43 = vld [vmem:[%s9318_s25 + $0xab0] sm:$0xf] }
  0x80   : > { %371 = vst [vmem:[%s9322_s26 + $0x1b0] sm:$0xf] %v370_v44  ;;  %v498_v44 = vld [vmem:[%s9318_s25 + $0xac0] sm:$0xf] }
  0x81   : > { %373 = vst [vmem:[%s9322_s26 + $0x1b4] sm:$0xf] %v372_v45  ;;  %v500_v45 = vld [vmem:[%s9318_s25 + $0xad0] sm:$0xf] }
  0x82   : > { %375 = vst [vmem:[%s9322_s26 + $0x1b8] sm:$0xf] %v374_v46  ;;  %v502_v46 = vld [vmem:[%s9318_s25 + $0xae0] sm:$0xf] }
  0x83   : > { %377 = vst [vmem:[%s9322_s26 + $0x1bc] sm:$0xf] %v376_v47  ;;  %v504_v47 = vld [vmem:[%s9318_s25 + $0xaf0] sm:$0xf] }
  0x84   : > { %379 = vst [vmem:[%s9322_s26 + $0x1c0] sm:$0xf] %v378_v48  ;;  %v506_v48 = vld [vmem:[%s9318_s25 + $0xb00] sm:$0xf] }
  0x85   : > { %381 = vst [vmem:[%s9322_s26 + $0x1c4] sm:$0xf] %v380_v49  ;;  %v508_v49 = vld [vmem:[%s9318_s25 + $0xb10] sm:$0xf] }
  0x86   : > { %383 = vst [vmem:[%s9322_s26 + $0x1c8] sm:$0xf] %v382_v50  ;;  %v510_v50 = vld [vmem:[%s9318_s25 + $0xb20] sm:$0xf] }
  0x87   : > { %385 = vst [vmem:[%s9322_s26 + $0x1cc] sm:$0xf] %v384_v51  ;;  %v512_v51 = vld [vmem:[%s9318_s25 + $0xb30] sm:$0xf] }
  0x88   : > { %387 = vst [vmem:[%s9322_s26 + $0x1d0] sm:$0xf] %v386_v52  ;;  %v514_v52 = vld [vmem:[%s9318_s25 + $0xb40] sm:$0xf] }
  0x89   : > { %389 = vst [vmem:[%s9322_s26 + $0x1d4] sm:$0xf] %v388_v53  ;;  %v516_v53 = vld [vmem:[%s9318_s25 + $0xb50] sm:$0xf] }
  0x8a   : > { %391 = vst [vmem:[%s9322_s26 + $0x1d8] sm:$0xf] %v390_v54  ;;  %v518_v54 = vld [vmem:[%s9318_s25 + $0xb60] sm:$0xf] }
  0x8b   : > { %393 = vst [vmem:[%s9322_s26 + $0x1dc] sm:$0xf] %v392_v55  ;;  %v520_v55 = vld [vmem:[%s9318_s25 + $0xb70] sm:$0xf] }
  0x8c   : > { %395 = vst [vmem:[%s9322_s26 + $0x1e0] sm:$0xf] %v394_v56  ;;  %v522_v56 = vld [vmem:[%s9318_s25 + $0xb80] sm:$0xf] }
  0x8d   : > { %397 = vst [vmem:[%s9322_s26 + $0x1e4] sm:$0xf] %v396_v57  ;;  %v524_v57 = vld [vmem:[%s9318_s25 + $0xb90] sm:$0xf] }
  0x8e   : > { %399 = vst [vmem:[%s9322_s26 + $0x1e8] sm:$0xf] %v398_v58  ;;  %v526_v58 = vld [vmem:[%s9318_s25 + $0xba0] sm:$0xf] }
  0x8f   : > { %401 = vst [vmem:[%s9322_s26 + $0x1ec] sm:$0xf] %v400_v59  ;;  %v528_v59 = vld [vmem:[%s9318_s25 + $0xbb0] sm:$0xf] }
  0x90   : > { %403 = vst [vmem:[%s9322_s26 + $0x1f0] sm:$0xf] %v402_v60  ;;  %v530_v60 = vld [vmem:[%s9318_s25 + $0xbc0] sm:$0xf] }
  0x91   : > { %405 = vst [vmem:[%s9322_s26 + $0x1f4] sm:$0xf] %v404_v61  ;;  %v532_v61 = vld [vmem:[%s9318_s25 + $0xbd0] sm:$0xf] }
  0x92   : > { %407 = vst [vmem:[%s9322_s26 + $0x1f8] sm:$0xf] %v406_v62  ;;  %v534_v62 = vld [vmem:[%s9318_s25 + $0xbe0] sm:$0xf] }
  0x93   : > { %409 = vst [vmem:[%s9322_s26 + $0x1fc] sm:$0xf] %v408_v63  ;;  %v536_v63 = vld [vmem:[%s9318_s25 + $0xbf0] sm:$0xf] }
  0x94   : > { %411 = vst [vmem:[%s9322_s26 + $0x200] sm:$0xf] %v410_v0  ;;  %v538_v0 = vld [vmem:[%s9318_s25 + $0xc00] sm:$0xf] }
  0x95   : > { %413 = vst [vmem:[%s9322_s26 + $0x204] sm:$0xf] %v412_v1  ;;  %v540_v1 = vld [vmem:[%s9318_s25 + $0xc10] sm:$0xf] }
  0x96   : > { %415 = vst [vmem:[%s9322_s26 + $0x208] sm:$0xf] %v414_v2  ;;  %v542_v2 = vld [vmem:[%s9318_s25 + $0xc20] sm:$0xf] }
  0x97   : > { %417 = vst [vmem:[%s9322_s26 + $0x20c] sm:$0xf] %v416_v3  ;;  %v544_v3 = vld [vmem:[%s9318_s25 + $0xc30] sm:$0xf] }
  0x98   : > { %419 = vst [vmem:[%s9322_s26 + $0x210] sm:$0xf] %v418_v4  ;;  %v546_v4 = vld [vmem:[%s9318_s25 + $0xc40] sm:$0xf] }
  0x99   : > { %421 = vst [vmem:[%s9322_s26 + $0x214] sm:$0xf] %v420_v5  ;;  %v548_v5 = vld [vmem:[%s9318_s25 + $0xc50] sm:$0xf] }
  0x9a   : > { %423 = vst [vmem:[%s9322_s26 + $0x218] sm:$0xf] %v422_v6  ;;  %v550_v6 = vld [vmem:[%s9318_s25 + $0xc60] sm:$0xf] }
  0x9b   : > { %425 = vst [vmem:[%s9322_s26 + $0x21c] sm:$0xf] %v424_v7  ;;  %v552_v7 = vld [vmem:[%s9318_s25 + $0xc70] sm:$0xf] }
  0x9c   : > { %427 = vst [vmem:[%s9322_s26 + $0x220] sm:$0xf] %v426_v8  ;;  %v554_v8 = vld [vmem:[%s9318_s25 + $0xc80] sm:$0xf] }
  0x9d   : > { %429 = vst [vmem:[%s9322_s26 + $0x224] sm:$0xf] %v428_v9  ;;  %v556_v9 = vld [vmem:[%s9318_s25 + $0xc90] sm:$0xf] }
  0x9e   : > { %431 = vst [vmem:[%s9322_s26 + $0x228] sm:$0xf] %v430_v10  ;;  %v558_v10 = vld [vmem:[%s9318_s25 + $0xca0] sm:$0xf] }
  0x9f   : > { %433 = vst [vmem:[%s9322_s26 + $0x22c] sm:$0xf] %v432_v11  ;;  %v560_v11 = vld [vmem:[%s9318_s25 + $0xcb0] sm:$0xf] }
  0xa0   : > { %435 = vst [vmem:[%s9322_s26 + $0x230] sm:$0xf] %v434_v12  ;;  %v562_v12 = vld [vmem:[%s9318_s25 + $0xcc0] sm:$0xf] }
  0xa1   : > { %437 = vst [vmem:[%s9322_s26 + $0x234] sm:$0xf] %v436_v13  ;;  %v564_v13 = vld [vmem:[%s9318_s25 + $0xcd0] sm:$0xf] }
  0xa2   : > { %439 = vst [vmem:[%s9322_s26 + $0x238] sm:$0xf] %v438_v14  ;;  %v566_v14 = vld [vmem:[%s9318_s25 + $0xce0] sm:$0xf] }
  0xa3   : > { %441 = vst [vmem:[%s9322_s26 + $0x23c] sm:$0xf] %v440_v15  ;;  %v568_v15 = vld [vmem:[%s9318_s25 + $0xcf0] sm:$0xf] }
  0xa4   : > { %443 = vst [vmem:[%s9322_s26 + $0x240] sm:$0xf] %v442_v16  ;;  %v570_v16 = vld [vmem:[%s9318_s25 + $0xd00] sm:$0xf] }
  0xa5   : > { %445 = vst [vmem:[%s9322_s26 + $0x244] sm:$0xf] %v444_v17  ;;  %v572_v17 = vld [vmem:[%s9318_s25 + $0xd10] sm:$0xf] }
  0xa6   : > { %447 = vst [vmem:[%s9322_s26 + $0x248] sm:$0xf] %v446_v18  ;;  %v574_v18 = vld [vmem:[%s9318_s25 + $0xd20] sm:$0xf] }
  0xa7   : > { %449 = vst [vmem:[%s9322_s26 + $0x24c] sm:$0xf] %v448_v19  ;;  %v576_v19 = vld [vmem:[%s9318_s25 + $0xd30] sm:$0xf] }
  0xa8   : > { %451 = vst [vmem:[%s9322_s26 + $0x250] sm:$0xf] %v450_v20  ;;  %v578_v20 = vld [vmem:[%s9318_s25 + $0xd40] sm:$0xf] }
  0xa9   : > { %453 = vst [vmem:[%s9322_s26 + $0x254] sm:$0xf] %v452_v21  ;;  %v580_v21 = vld [vmem:[%s9318_s25 + $0xd50] sm:$0xf] }
  0xaa   : > { %455 = vst [vmem:[%s9322_s26 + $0x258] sm:$0xf] %v454_v22  ;;  %v582_v22 = vld [vmem:[%s9318_s25 + $0xd60] sm:$0xf] }
  0xab   : > { %457 = vst [vmem:[%s9322_s26 + $0x25c] sm:$0xf] %v456_v23  ;;  %v584_v23 = vld [vmem:[%s9318_s25 + $0xd70] sm:$0xf] }
  0xac   : > { %459 = vst [vmem:[%s9322_s26 + $0x260] sm:$0xf] %v458_v24  ;;  %v586_v24 = vld [vmem:[%s9318_s25 + $0xd80] sm:$0xf] }
  0xad   : > { %461 = vst [vmem:[%s9322_s26 + $0x264] sm:$0xf] %v460_v25  ;;  %v588_v25 = vld [vmem:[%s9318_s25 + $0xd90] sm:$0xf] }
  0xae   : > { %463 = vst [vmem:[%s9322_s26 + $0x268] sm:$0xf] %v462_v26  ;;  %v590_v26 = vld [vmem:[%s9318_s25 + $0xda0] sm:$0xf] }
  0xaf   : > { %465 = vst [vmem:[%s9322_s26 + $0x26c] sm:$0xf] %v464_v27  ;;  %v592_v27 = vld [vmem:[%s9318_s25 + $0xdb0] sm:$0xf] }
  0xb0   : > { %467 = vst [vmem:[%s9322_s26 + $0x270] sm:$0xf] %v466_v28  ;;  %v594_v28 = vld [vmem:[%s9318_s25 + $0xdc0] sm:$0xf] }
  0xb1   : > { %469 = vst [vmem:[%s9322_s26 + $0x274] sm:$0xf] %v468_v29  ;;  %v596_v29 = vld [vmem:[%s9318_s25 + $0xdd0] sm:$0xf] }
  0xb2   : > { %471 = vst [vmem:[%s9322_s26 + $0x278] sm:$0xf] %v470_v30  ;;  %v598_v30 = vld [vmem:[%s9318_s25 + $0xde0] sm:$0xf] }
  0xb3   : > { %473 = vst [vmem:[%s9322_s26 + $0x27c] sm:$0xf] %v472_v31  ;;  %v600_v31 = vld [vmem:[%s9318_s25 + $0xdf0] sm:$0xf] }
  0xb4   : > { %475 = vst [vmem:[%s9322_s26 + $0x280] sm:$0xf] %v474_v32  ;;  %v602_v32 = vld [vmem:[%s9318_s25 + $0xe00] sm:$0xf] }
  0xb5   : > { %477 = vst [vmem:[%s9322_s26 + $0x284] sm:$0xf] %v476_v33  ;;  %v604_v33 = vld [vmem:[%s9318_s25 + $0xe10] sm:$0xf] }
  0xb6   : > { %479 = vst [vmem:[%s9322_s26 + $0x288] sm:$0xf] %v478_v34  ;;  %v606_v34 = vld [vmem:[%s9318_s25 + $0xe20] sm:$0xf] }
  0xb7   : > { %481 = vst [vmem:[%s9322_s26 + $0x28c] sm:$0xf] %v480_v35  ;;  %v608_v35 = vld [vmem:[%s9318_s25 + $0xe30] sm:$0xf] }
  0xb8   : > { %483 = vst [vmem:[%s9322_s26 + $0x290] sm:$0xf] %v482_v36  ;;  %v610_v36 = vld [vmem:[%s9318_s25 + $0xe40] sm:$0xf] }
  0xb9   : > { %485 = vst [vmem:[%s9322_s26 + $0x294] sm:$0xf] %v484_v37  ;;  %v612_v37 = vld [vmem:[%s9318_s25 + $0xe50] sm:$0xf] }
  0xba   : > { %487 = vst [vmem:[%s9322_s26 + $0x298] sm:$0xf] %v486_v38  ;;  %v614_v38 = vld [vmem:[%s9318_s25 + $0xe60] sm:$0xf] }
  0xbb   : > { %489 = vst [vmem:[%s9322_s26 + $0x29c] sm:$0xf] %v488_v39  ;;  %v616_v39 = vld [vmem:[%s9318_s25 + $0xe70] sm:$0xf] }
  0xbc   : > { %491 = vst [vmem:[%s9322_s26 + $0x2a0] sm:$0xf] %v490_v40  ;;  %v618_v40 = vld [vmem:[%s9318_s25 + $0xe80] sm:$0xf] }
  0xbd   : > { %493 = vst [vmem:[%s9322_s26 + $0x2a4] sm:$0xf] %v492_v41  ;;  %v620_v41 = vld [vmem:[%s9318_s25 + $0xe90] sm:$0xf] }
  0xbe   : > { %495 = vst [vmem:[%s9322_s26 + $0x2a8] sm:$0xf] %v494_v42  ;;  %v622_v42 = vld [vmem:[%s9318_s25 + $0xea0] sm:$0xf] }
  0xbf   : > { %497 = vst [vmem:[%s9322_s26 + $0x2ac] sm:$0xf] %v496_v43  ;;  %v624_v43 = vld [vmem:[%s9318_s25 + $0xeb0] sm:$0xf] }
  0xc0   : > { %499 = vst [vmem:[%s9322_s26 + $0x2b0] sm:$0xf] %v498_v44  ;;  %v626_v44 = vld [vmem:[%s9318_s25 + $0xec0] sm:$0xf] }
  0xc1   : > { %501 = vst [vmem:[%s9322_s26 + $0x2b4] sm:$0xf] %v500_v45  ;;  %v628_v45 = vld [vmem:[%s9318_s25 + $0xed0] sm:$0xf] }
  0xc2   : > { %503 = vst [vmem:[%s9322_s26 + $0x2b8] sm:$0xf] %v502_v46  ;;  %v630_v46 = vld [vmem:[%s9318_s25 + $0xee0] sm:$0xf] }
  0xc3   : > { %505 = vst [vmem:[%s9322_s26 + $0x2bc] sm:$0xf] %v504_v47  ;;  %v632_v47 = vld [vmem:[%s9318_s25 + $0xef0] sm:$0xf] }
  0xc4   : > { %507 = vst [vmem:[%s9322_s26 + $0x2c0] sm:$0xf] %v506_v48  ;;  %v634_v48 = vld [vmem:[%s9318_s25 + $0xf00] sm:$0xf] }
  0xc5   : > { %509 = vst [vmem:[%s9322_s26 + $0x2c4] sm:$0xf] %v508_v49  ;;  %v636_v49 = vld [vmem:[%s9318_s25 + $0xf10] sm:$0xf] }
  0xc6   : > { %511 = vst [vmem:[%s9322_s26 + $0x2c8] sm:$0xf] %v510_v50  ;;  %v638_v50 = vld [vmem:[%s9318_s25 + $0xf20] sm:$0xf] }
  0xc7   : > { %513 = vst [vmem:[%s9322_s26 + $0x2cc] sm:$0xf] %v512_v51  ;;  %v640_v51 = vld [vmem:[%s9318_s25 + $0xf30] sm:$0xf] }
  0xc8   : > { %515 = vst [vmem:[%s9322_s26 + $0x2d0] sm:$0xf] %v514_v52  ;;  %v642_v52 = vld [vmem:[%s9318_s25 + $0xf40] sm:$0xf] }
  0xc9   : > { %517 = vst [vmem:[%s9322_s26 + $0x2d4] sm:$0xf] %v516_v53  ;;  %v644_v53 = vld [vmem:[%s9318_s25 + $0xf50] sm:$0xf] }
  0xca   : > { %519 = vst [vmem:[%s9322_s26 + $0x2d8] sm:$0xf] %v518_v54  ;;  %v646_v54 = vld [vmem:[%s9318_s25 + $0xf60] sm:$0xf] }
  0xcb   : > { %521 = vst [vmem:[%s9322_s26 + $0x2dc] sm:$0xf] %v520_v55  ;;  %v648_v55 = vld [vmem:[%s9318_s25 + $0xf70] sm:$0xf] }
  0xcc   : > { %523 = vst [vmem:[%s9322_s26 + $0x2e0] sm:$0xf] %v522_v56  ;;  %v650_v56 = vld [vmem:[%s9318_s25 + $0xf80] sm:$0xf] }
  0xcd   : > { %525 = vst [vmem:[%s9322_s26 + $0x2e4] sm:$0xf] %v524_v57  ;;  %v652_v57 = vld [vmem:[%s9318_s25 + $0xf90] sm:$0xf] }
  0xce   : > { %527 = vst [vmem:[%s9322_s26 + $0x2e8] sm:$0xf] %v526_v58  ;;  %v654_v58 = vld [vmem:[%s9318_s25 + $0xfa0] sm:$0xf] }
  0xcf   : > { %529 = vst [vmem:[%s9322_s26 + $0x2ec] sm:$0xf] %v528_v59  ;;  %v656_v59 = vld [vmem:[%s9318_s25 + $0xfb0] sm:$0xf] }
  0xd0   : > { %531 = vst [vmem:[%s9322_s26 + $0x2f0] sm:$0xf] %v530_v60  ;;  %v658_v60 = vld [vmem:[%s9318_s25 + $0xfc0] sm:$0xf] }
  0xd1   : > { %533 = vst [vmem:[%s9322_s26 + $0x2f4] sm:$0xf] %v532_v61  ;;  %v660_v61 = vld [vmem:[%s9318_s25 + $0xfd0] sm:$0xf] }
  0xd2   : > { %535 = vst [vmem:[%s9322_s26 + $0x2f8] sm:$0xf] %v534_v62  ;;  %v662_v62 = vld [vmem:[%s9318_s25 + $0xfe0] sm:$0xf] }
  0xd3   : > { %537 = vst [vmem:[%s9322_s26 + $0x2fc] sm:$0xf] %v536_v63  ;;  %v664_v63 = vld [vmem:[%s9318_s25 + $0xff0] sm:$0xf] }
  0xd4   : > { %539 = vst [vmem:[%s9322_s26 + $0x300] sm:$0xf] %v538_v0  ;;  %v666_v0 = vld [vmem:[%s9318_s25 + $0x1000] sm:$0xf] }
  0xd5   : > { %541 = vst [vmem:[%s9322_s26 + $0x304] sm:$0xf] %v540_v1  ;;  %v668_v1 = vld [vmem:[%s9318_s25 + $0x1010] sm:$0xf] }
  0xd6   : > { %543 = vst [vmem:[%s9322_s26 + $0x308] sm:$0xf] %v542_v2  ;;  %v670_v2 = vld [vmem:[%s9318_s25 + $0x1020] sm:$0xf] }
  0xd7   : > { %545 = vst [vmem:[%s9322_s26 + $0x30c] sm:$0xf] %v544_v3  ;;  %v672_v3 = vld [vmem:[%s9318_s25 + $0x1030] sm:$0xf] }
  0xd8   : > { %547 = vst [vmem:[%s9322_s26 + $0x310] sm:$0xf] %v546_v4  ;;  %v674_v4 = vld [vmem:[%s9318_s25 + $0x1040] sm:$0xf] }
  0xd9   : > { %549 = vst [vmem:[%s9322_s26 + $0x314] sm:$0xf] %v548_v5  ;;  %v676_v5 = vld [vmem:[%s9318_s25 + $0x1050] sm:$0xf] }
  0xda   : > { %551 = vst [vmem:[%s9322_s26 + $0x318] sm:$0xf] %v550_v6  ;;  %v678_v6 = vld [vmem:[%s9318_s25 + $0x1060] sm:$0xf] }
  0xdb   : > { %553 = vst [vmem:[%s9322_s26 + $0x31c] sm:$0xf] %v552_v7  ;;  %v680_v7 = vld [vmem:[%s9318_s25 + $0x1070] sm:$0xf] }
  0xdc   : > { %555 = vst [vmem:[%s9322_s26 + $0x320] sm:$0xf] %v554_v8  ;;  %v682_v8 = vld [vmem:[%s9318_s25 + $0x1080] sm:$0xf] }
  0xdd   : > { %557 = vst [vmem:[%s9322_s26 + $0x324] sm:$0xf] %v556_v9  ;;  %v684_v9 = vld [vmem:[%s9318_s25 + $0x1090] sm:$0xf] }
  0xde   : > { %559 = vst [vmem:[%s9322_s26 + $0x328] sm:$0xf] %v558_v10  ;;  %v686_v10 = vld [vmem:[%s9318_s25 + $0x10a0] sm:$0xf] }
  0xdf   : > { %561 = vst [vmem:[%s9322_s26 + $0x32c] sm:$0xf] %v560_v11  ;;  %v688_v11 = vld [vmem:[%s9318_s25 + $0x10b0] sm:$0xf] }
  0xe0   : > { %563 = vst [vmem:[%s9322_s26 + $0x330] sm:$0xf] %v562_v12  ;;  %v690_v12 = vld [vmem:[%s9318_s25 + $0x10c0] sm:$0xf] }
  0xe1   : > { %565 = vst [vmem:[%s9322_s26 + $0x334] sm:$0xf] %v564_v13  ;;  %v692_v13 = vld [vmem:[%s9318_s25 + $0x10d0] sm:$0xf] }
  0xe2   : > { %567 = vst [vmem:[%s9322_s26 + $0x338] sm:$0xf] %v566_v14  ;;  %v694_v14 = vld [vmem:[%s9318_s25 + $0x10e0] sm:$0xf] }
  0xe3   : > { %569 = vst [vmem:[%s9322_s26 + $0x33c] sm:$0xf] %v568_v15  ;;  %v696_v15 = vld [vmem:[%s9318_s25 + $0x10f0] sm:$0xf] }
  0xe4   : > { %571 = vst [vmem:[%s9322_s26 + $0x340] sm:$0xf] %v570_v16  ;;  %v698_v16 = vld [vmem:[%s9318_s25 + $0x1100] sm:$0xf] }
  0xe5   : > { %573 = vst [vmem:[%s9322_s26 + $0x344] sm:$0xf] %v572_v17  ;;  %v700_v17 = vld [vmem:[%s9318_s25 + $0x1110] sm:$0xf] }
  0xe6   : > { %575 = vst [vmem:[%s9322_s26 + $0x348] sm:$0xf] %v574_v18  ;;  %v702_v18 = vld [vmem:[%s9318_s25 + $0x1120] sm:$0xf] }
  0xe7   : > { %577 = vst [vmem:[%s9322_s26 + $0x34c] sm:$0xf] %v576_v19  ;;  %v704_v19 = vld [vmem:[%s9318_s25 + $0x1130] sm:$0xf] }
  0xe8   : > { %579 = vst [vmem:[%s9322_s26 + $0x350] sm:$0xf] %v578_v20  ;;  %v706_v20 = vld [vmem:[%s9318_s25 + $0x1140] sm:$0xf] }
  0xe9   : > { %581 = vst [vmem:[%s9322_s26 + $0x354] sm:$0xf] %v580_v21  ;;  %v708_v21 = vld [vmem:[%s9318_s25 + $0x1150] sm:$0xf] }
  0xea   : > { %583 = vst [vmem:[%s9322_s26 + $0x358] sm:$0xf] %v582_v22  ;;  %v710_v22 = vld [vmem:[%s9318_s25 + $0x1160] sm:$0xf] }
  0xeb   : > { %585 = vst [vmem:[%s9322_s26 + $0x35c] sm:$0xf] %v584_v23  ;;  %v712_v23 = vld [vmem:[%s9318_s25 + $0x1170] sm:$0xf] }
  0xec   : > { %587 = vst [vmem:[%s9322_s26 + $0x360] sm:$0xf] %v586_v24  ;;  %v714_v24 = vld [vmem:[%s9318_s25 + $0x1180] sm:$0xf] }
  0xed   : > { %589 = vst [vmem:[%s9322_s26 + $0x364] sm:$0xf] %v588_v25  ;;  %v716_v25 = vld [vmem:[%s9318_s25 + $0x1190] sm:$0xf] }
  0xee   : > { %591 = vst [vmem:[%s9322_s26 + $0x368] sm:$0xf] %v590_v26  ;;  %v718_v26 = vld [vmem:[%s9318_s25 + $0x11a0] sm:$0xf] }
  0xef   : > { %593 = vst [vmem:[%s9322_s26 + $0x36c] sm:$0xf] %v592_v27  ;;  %v720_v27 = vld [vmem:[%s9318_s25 + $0x11b0] sm:$0xf] }
  0xf0   : > { %595 = vst [vmem:[%s9322_s26 + $0x370] sm:$0xf] %v594_v28  ;;  %v722_v28 = vld [vmem:[%s9318_s25 + $0x11c0] sm:$0xf] }
  0xf1   : > { %597 = vst [vmem:[%s9322_s26 + $0x374] sm:$0xf] %v596_v29  ;;  %v724_v29 = vld [vmem:[%s9318_s25 + $0x11d0] sm:$0xf] }
  0xf2   : > { %599 = vst [vmem:[%s9322_s26 + $0x378] sm:$0xf] %v598_v30  ;;  %v726_v30 = vld [vmem:[%s9318_s25 + $0x11e0] sm:$0xf] }
  0xf3   : > { %601 = vst [vmem:[%s9322_s26 + $0x37c] sm:$0xf] %v600_v31  ;;  %v728_v31 = vld [vmem:[%s9318_s25 + $0x11f0] sm:$0xf] }
  0xf4   : > { %603 = vst [vmem:[%s9322_s26 + $0x380] sm:$0xf] %v602_v32  ;;  %v730_v32 = vld [vmem:[%s9318_s25 + $0x1200] sm:$0xf] }
  0xf5   : > { %605 = vst [vmem:[%s9322_s26 + $0x384] sm:$0xf] %v604_v33  ;;  %v732_v33 = vld [vmem:[%s9318_s25 + $0x1210] sm:$0xf] }
  0xf6   : > { %607 = vst [vmem:[%s9322_s26 + $0x388] sm:$0xf] %v606_v34  ;;  %v734_v34 = vld [vmem:[%s9318_s25 + $0x1220] sm:$0xf] }
  0xf7   : > { %609 = vst [vmem:[%s9322_s26 + $0x38c] sm:$0xf] %v608_v35  ;;  %v736_v35 = vld [vmem:[%s9318_s25 + $0x1230] sm:$0xf] }
  0xf8   : > { %611 = vst [vmem:[%s9322_s26 + $0x390] sm:$0xf] %v610_v36  ;;  %v738_v36 = vld [vmem:[%s9318_s25 + $0x1240] sm:$0xf] }
  0xf9   : > { %613 = vst [vmem:[%s9322_s26 + $0x394] sm:$0xf] %v612_v37  ;;  %v740_v37 = vld [vmem:[%s9318_s25 + $0x1250] sm:$0xf] }
  0xfa   : > { %615 = vst [vmem:[%s9322_s26 + $0x398] sm:$0xf] %v614_v38  ;;  %v742_v38 = vld [vmem:[%s9318_s25 + $0x1260] sm:$0xf] }
  0xfb   : > { %617 = vst [vmem:[%s9322_s26 + $0x39c] sm:$0xf] %v616_v39  ;;  %v744_v39 = vld [vmem:[%s9318_s25 + $0x1270] sm:$0xf] }
  0xfc   : > { %619 = vst [vmem:[%s9322_s26 + $0x3a0] sm:$0xf] %v618_v40  ;;  %v746_v40 = vld [vmem:[%s9318_s25 + $0x1280] sm:$0xf] }
  0xfd   : > { %621 = vst [vmem:[%s9322_s26 + $0x3a4] sm:$0xf] %v620_v41  ;;  %v748_v41 = vld [vmem:[%s9318_s25 + $0x1290] sm:$0xf] }
  0xfe   : > { %623 = vst [vmem:[%s9322_s26 + $0x3a8] sm:$0xf] %v622_v42  ;;  %v750_v42 = vld [vmem:[%s9318_s25 + $0x12a0] sm:$0xf] }
  0xff   : > { %625 = vst [vmem:[%s9322_s26 + $0x3ac] sm:$0xf] %v624_v43  ;;  %v752_v43 = vld [vmem:[%s9318_s25 + $0x12b0] sm:$0xf] }
 0x100   : > { %627 = vst [vmem:[%s9322_s26 + $0x3b0] sm:$0xf] %v626_v44  ;;  %v754_v44 = vld [vmem:[%s9318_s25 + $0x12c0] sm:$0xf] }
 0x101   : > { %629 = vst [vmem:[%s9322_s26 + $0x3b4] sm:$0xf] %v628_v45  ;;  %v756_v45 = vld [vmem:[%s9318_s25 + $0x12d0] sm:$0xf] }
 0x102   : > { %631 = vst [vmem:[%s9322_s26 + $0x3b8] sm:$0xf] %v630_v46  ;;  %v758_v46 = vld [vmem:[%s9318_s25 + $0x12e0] sm:$0xf] }
 0x103   : > { %633 = vst [vmem:[%s9322_s26 + $0x3bc] sm:$0xf] %v632_v47  ;;  %v760_v47 = vld [vmem:[%s9318_s25 + $0x12f0] sm:$0xf] }
 0x104   : > { %635 = vst [vmem:[%s9322_s26 + $0x3c0] sm:$0xf] %v634_v48  ;;  %v762_v48 = vld [vmem:[%s9318_s25 + $0x1300] sm:$0xf] }
 0x105   : > { %637 = vst [vmem:[%s9322_s26 + $0x3c4] sm:$0xf] %v636_v49  ;;  %v764_v49 = vld [vmem:[%s9318_s25 + $0x1310] sm:$0xf] }
 0x106   : > { %639 = vst [vmem:[%s9322_s26 + $0x3c8] sm:$0xf] %v638_v50  ;;  %v766_v50 = vld [vmem:[%s9318_s25 + $0x1320] sm:$0xf] }
 0x107   : > { %641 = vst [vmem:[%s9322_s26 + $0x3cc] sm:$0xf] %v640_v51  ;;  %v768_v51 = vld [vmem:[%s9318_s25 + $0x1330] sm:$0xf] }
 0x108   : > { %643 = vst [vmem:[%s9322_s26 + $0x3d0] sm:$0xf] %v642_v52  ;;  %v770_v52 = vld [vmem:[%s9318_s25 + $0x1340] sm:$0xf] }
 0x109   : > { %645 = vst [vmem:[%s9322_s26 + $0x3d4] sm:$0xf] %v644_v53  ;;  %v772_v53 = vld [vmem:[%s9318_s25 + $0x1350] sm:$0xf] }
 0x10a   : > { %647 = vst [vmem:[%s9322_s26 + $0x3d8] sm:$0xf] %v646_v54  ;;  %v774_v54 = vld [vmem:[%s9318_s25 + $0x1360] sm:$0xf] }
 0x10b   : > { %649 = vst [vmem:[%s9322_s26 + $0x3dc] sm:$0xf] %v648_v55  ;;  %v776_v55 = vld [vmem:[%s9318_s25 + $0x1370] sm:$0xf] }
 0x10c   : > { %651 = vst [vmem:[%s9322_s26 + $0x3e0] sm:$0xf] %v650_v56  ;;  %v778_v56 = vld [vmem:[%s9318_s25 + $0x1380] sm:$0xf] }
 0x10d   : > { %653 = vst [vmem:[%s9322_s26 + $0x3e4] sm:$0xf] %v652_v57  ;;  %v780_v57 = vld [vmem:[%s9318_s25 + $0x1390] sm:$0xf] }
 0x10e   : > { %655 = vst [vmem:[%s9322_s26 + $0x3e8] sm:$0xf] %v654_v58  ;;  %v782_v58 = vld [vmem:[%s9318_s25 + $0x13a0] sm:$0xf] }
 0x10f   : > { %657 = vst [vmem:[%s9322_s26 + $0x3ec] sm:$0xf] %v656_v59  ;;  %v784_v59 = vld [vmem:[%s9318_s25 + $0x13b0] sm:$0xf] }
 0x110   : > { %659 = vst [vmem:[%s9322_s26 + $0x3f0] sm:$0xf] %v658_v60  ;;  %v786_v60 = vld [vmem:[%s9318_s25 + $0x13c0] sm:$0xf] }
 0x111   : > { %661 = vst [vmem:[%s9322_s26 + $0x3f4] sm:$0xf] %v660_v61  ;;  %v788_v61 = vld [vmem:[%s9318_s25 + $0x13d0] sm:$0xf] }
 0x112   : > { %663 = vst [vmem:[%s9322_s26 + $0x3f8] sm:$0xf] %v662_v62  ;;  %v790_v62 = vld [vmem:[%s9318_s25 + $0x13e0] sm:$0xf] }
 0x113   : > { %665 = vst [vmem:[%s9322_s26 + $0x3fc] sm:$0xf] %v664_v63  ;;  %v792_v63 = vld [vmem:[%s9318_s25 + $0x13f0] sm:$0xf] }
 0x114   : > { %667 = vst [vmem:[%s9322_s26 + $0x400] sm:$0xf] %v666_v0  ;;  %v794_v0 = vld [vmem:[%s9318_s25 + $0x1400] sm:$0xf] }
 0x115   : > { %669 = vst [vmem:[%s9322_s26 + $0x404] sm:$0xf] %v668_v1  ;;  %v796_v1 = vld [vmem:[%s9318_s25 + $0x1410] sm:$0xf] }
 0x116   : > { %671 = vst [vmem:[%s9322_s26 + $0x408] sm:$0xf] %v670_v2  ;;  %v798_v2 = vld [vmem:[%s9318_s25 + $0x1420] sm:$0xf] }
 0x117   : > { %673 = vst [vmem:[%s9322_s26 + $0x40c] sm:$0xf] %v672_v3  ;;  %v800_v3 = vld [vmem:[%s9318_s25 + $0x1430] sm:$0xf] }
 0x118   : > { %675 = vst [vmem:[%s9322_s26 + $0x410] sm:$0xf] %v674_v4  ;;  %v802_v4 = vld [vmem:[%s9318_s25 + $0x1440] sm:$0xf] }
 0x119   : > { %677 = vst [vmem:[%s9322_s26 + $0x414] sm:$0xf] %v676_v5  ;;  %v804_v5 = vld [vmem:[%s9318_s25 + $0x1450] sm:$0xf] }
 0x11a   : > { %679 = vst [vmem:[%s9322_s26 + $0x418] sm:$0xf] %v678_v6  ;;  %v806_v6 = vld [vmem:[%s9318_s25 + $0x1460] sm:$0xf] }
 0x11b   : > { %681 = vst [vmem:[%s9322_s26 + $0x41c] sm:$0xf] %v680_v7  ;;  %v808_v7 = vld [vmem:[%s9318_s25 + $0x1470] sm:$0xf] }
 0x11c   : > { %683 = vst [vmem:[%s9322_s26 + $0x420] sm:$0xf] %v682_v8  ;;  %v810_v8 = vld [vmem:[%s9318_s25 + $0x1480] sm:$0xf] }
 0x11d   : > { %685 = vst [vmem:[%s9322_s26 + $0x424] sm:$0xf] %v684_v9  ;;  %v812_v9 = vld [vmem:[%s9318_s25 + $0x1490] sm:$0xf] }
 0x11e   : > { %687 = vst [vmem:[%s9322_s26 + $0x428] sm:$0xf] %v686_v10  ;;  %v814_v10 = vld [vmem:[%s9318_s25 + $0x14a0] sm:$0xf] }
 0x11f   : > { %689 = vst [vmem:[%s9322_s26 + $0x42c] sm:$0xf] %v688_v11  ;;  %v816_v11 = vld [vmem:[%s9318_s25 + $0x14b0] sm:$0xf] }
 0x120   : > { %691 = vst [vmem:[%s9322_s26 + $0x430] sm:$0xf] %v690_v12  ;;  %v818_v12 = vld [vmem:[%s9318_s25 + $0x14c0] sm:$0xf] }
 0x121   : > { %693 = vst [vmem:[%s9322_s26 + $0x434] sm:$0xf] %v692_v13  ;;  %v820_v13 = vld [vmem:[%s9318_s25 + $0x14d0] sm:$0xf] }
 0x122   : > { %695 = vst [vmem:[%s9322_s26 + $0x438] sm:$0xf] %v694_v14  ;;  %v822_v14 = vld [vmem:[%s9318_s25 + $0x14e0] sm:$0xf] }
 0x123   : > { %697 = vst [vmem:[%s9322_s26 + $0x43c] sm:$0xf] %v696_v15  ;;  %v824_v15 = vld [vmem:[%s9318_s25 + $0x14f0] sm:$0xf] }
 0x124   : > { %699 = vst [vmem:[%s9322_s26 + $0x440] sm:$0xf] %v698_v16  ;;  %v826_v16 = vld [vmem:[%s9318_s25 + $0x1500] sm:$0xf] }
 0x125   : > { %701 = vst [vmem:[%s9322_s26 + $0x444] sm:$0xf] %v700_v17  ;;  %v828_v17 = vld [vmem:[%s9318_s25 + $0x1510] sm:$0xf] }
 0x126   : > { %703 = vst [vmem:[%s9322_s26 + $0x448] sm:$0xf] %v702_v18  ;;  %v830_v18 = vld [vmem:[%s9318_s25 + $0x1520] sm:$0xf] }
 0x127   : > { %705 = vst [vmem:[%s9322_s26 + $0x44c] sm:$0xf] %v704_v19  ;;  %v832_v19 = vld [vmem:[%s9318_s25 + $0x1530] sm:$0xf] }
 0x128   : > { %707 = vst [vmem:[%s9322_s26 + $0x450] sm:$0xf] %v706_v20  ;;  %v834_v20 = vld [vmem:[%s9318_s25 + $0x1540] sm:$0xf] }
 0x129   : > { %709 = vst [vmem:[%s9322_s26 + $0x454] sm:$0xf] %v708_v21  ;;  %v836_v21 = vld [vmem:[%s9318_s25 + $0x1550] sm:$0xf] }
 0x12a   : > { %711 = vst [vmem:[%s9322_s26 + $0x458] sm:$0xf] %v710_v22  ;;  %v838_v22 = vld [vmem:[%s9318_s25 + $0x1560] sm:$0xf] }
 0x12b   : > { %713 = vst [vmem:[%s9322_s26 + $0x45c] sm:$0xf] %v712_v23  ;;  %v840_v23 = vld [vmem:[%s9318_s25 + $0x1570] sm:$0xf] }
 0x12c   : > { %715 = vst [vmem:[%s9322_s26 + $0x460] sm:$0xf] %v714_v24  ;;  %v842_v24 = vld [vmem:[%s9318_s25 + $0x1580] sm:$0xf] }
 0x12d   : > { %717 = vst [vmem:[%s9322_s26 + $0x464] sm:$0xf] %v716_v25  ;;  %v844_v25 = vld [vmem:[%s9318_s25 + $0x1590] sm:$0xf] }
 0x12e   : > { %719 = vst [vmem:[%s9322_s26 + $0x468] sm:$0xf] %v718_v26  ;;  %v846_v26 = vld [vmem:[%s9318_s25 + $0x15a0] sm:$0xf] }
 0x12f   : > { %721 = vst [vmem:[%s9322_s26 + $0x46c] sm:$0xf] %v720_v27  ;;  %v848_v27 = vld [vmem:[%s9318_s25 + $0x15b0] sm:$0xf] }
 0x130   : > { %723 = vst [vmem:[%s9322_s26 + $0x470] sm:$0xf] %v722_v28  ;;  %v850_v28 = vld [vmem:[%s9318_s25 + $0x15c0] sm:$0xf] }
 0x131   : > { %725 = vst [vmem:[%s9322_s26 + $0x474] sm:$0xf] %v724_v29  ;;  %v852_v29 = vld [vmem:[%s9318_s25 + $0x15d0] sm:$0xf] }
 0x132   : > { %727 = vst [vmem:[%s9322_s26 + $0x478] sm:$0xf] %v726_v30  ;;  %v854_v30 = vld [vmem:[%s9318_s25 + $0x15e0] sm:$0xf] }
 0x133   : > { %729 = vst [vmem:[%s9322_s26 + $0x47c] sm:$0xf] %v728_v31  ;;  %v856_v31 = vld [vmem:[%s9318_s25 + $0x15f0] sm:$0xf] }
 0x134   : > { %731 = vst [vmem:[%s9322_s26 + $0x480] sm:$0xf] %v730_v32  ;;  %v858_v32 = vld [vmem:[%s9318_s25 + $0x1600] sm:$0xf] }
 0x135   : > { %733 = vst [vmem:[%s9322_s26 + $0x484] sm:$0xf] %v732_v33  ;;  %v860_v33 = vld [vmem:[%s9318_s25 + $0x1610] sm:$0xf] }
 0x136   : > { %735 = vst [vmem:[%s9322_s26 + $0x488] sm:$0xf] %v734_v34  ;;  %v862_v34 = vld [vmem:[%s9318_s25 + $0x1620] sm:$0xf] }
 0x137   : > { %737 = vst [vmem:[%s9322_s26 + $0x48c] sm:$0xf] %v736_v35  ;;  %v864_v35 = vld [vmem:[%s9318_s25 + $0x1630] sm:$0xf] }
 0x138   : > { %739 = vst [vmem:[%s9322_s26 + $0x490] sm:$0xf] %v738_v36  ;;  %v866_v36 = vld [vmem:[%s9318_s25 + $0x1640] sm:$0xf] }
 0x139   : > { %741 = vst [vmem:[%s9322_s26 + $0x494] sm:$0xf] %v740_v37  ;;  %v868_v37 = vld [vmem:[%s9318_s25 + $0x1650] sm:$0xf] }
 0x13a   : > { %743 = vst [vmem:[%s9322_s26 + $0x498] sm:$0xf] %v742_v38  ;;  %v870_v38 = vld [vmem:[%s9318_s25 + $0x1660] sm:$0xf] }
 0x13b   : > { %745 = vst [vmem:[%s9322_s26 + $0x49c] sm:$0xf] %v744_v39  ;;  %v872_v39 = vld [vmem:[%s9318_s25 + $0x1670] sm:$0xf] }
 0x13c   : > { %747 = vst [vmem:[%s9322_s26 + $0x4a0] sm:$0xf] %v746_v40  ;;  %v874_v40 = vld [vmem:[%s9318_s25 + $0x1680] sm:$0xf] }
 0x13d   : > { %749 = vst [vmem:[%s9322_s26 + $0x4a4] sm:$0xf] %v748_v41  ;;  %v876_v41 = vld [vmem:[%s9318_s25 + $0x1690] sm:$0xf] }
 0x13e   : > { %751 = vst [vmem:[%s9322_s26 + $0x4a8] sm:$0xf] %v750_v42  ;;  %v878_v42 = vld [vmem:[%s9318_s25 + $0x16a0] sm:$0xf] }
 0x13f   : > { %753 = vst [vmem:[%s9322_s26 + $0x4ac] sm:$0xf] %v752_v43  ;;  %v880_v43 = vld [vmem:[%s9318_s25 + $0x16b0] sm:$0xf] }
 0x140   : > { %755 = vst [vmem:[%s9322_s26 + $0x4b0] sm:$0xf] %v754_v44  ;;  %v882_v44 = vld [vmem:[%s9318_s25 + $0x16c0] sm:$0xf] }
 0x141   : > { %757 = vst [vmem:[%s9322_s26 + $0x4b4] sm:$0xf] %v756_v45  ;;  %v884_v45 = vld [vmem:[%s9318_s25 + $0x16d0] sm:$0xf] }
 0x142   : > { %759 = vst [vmem:[%s9322_s26 + $0x4b8] sm:$0xf] %v758_v46  ;;  %v886_v46 = vld [vmem:[%s9318_s25 + $0x16e0] sm:$0xf] }
 0x143   : > { %761 = vst [vmem:[%s9322_s26 + $0x4bc] sm:$0xf] %v760_v47  ;;  %v888_v47 = vld [vmem:[%s9318_s25 + $0x16f0] sm:$0xf] }
 0x144   : > { %763 = vst [vmem:[%s9322_s26 + $0x4c0] sm:$0xf] %v762_v48  ;;  %v890_v48 = vld [vmem:[%s9318_s25 + $0x1700] sm:$0xf] }
 0x145   : > { %765 = vst [vmem:[%s9322_s26 + $0x4c4] sm:$0xf] %v764_v49  ;;  %v892_v49 = vld [vmem:[%s9318_s25 + $0x1710] sm:$0xf] }
 0x146   : > { %767 = vst [vmem:[%s9322_s26 + $0x4c8] sm:$0xf] %v766_v50  ;;  %v894_v50 = vld [vmem:[%s9318_s25 + $0x1720] sm:$0xf] }
 0x147   : > { %769 = vst [vmem:[%s9322_s26 + $0x4cc] sm:$0xf] %v768_v51  ;;  %v896_v51 = vld [vmem:[%s9318_s25 + $0x1730] sm:$0xf] }
 0x148   : > { %771 = vst [vmem:[%s9322_s26 + $0x4d0] sm:$0xf] %v770_v52  ;;  %v898_v52 = vld [vmem:[%s9318_s25 + $0x1740] sm:$0xf] }
 0x149   : > { %773 = vst [vmem:[%s9322_s26 + $0x4d4] sm:$0xf] %v772_v53  ;;  %v900_v53 = vld [vmem:[%s9318_s25 + $0x1750] sm:$0xf] }
 0x14a   : > { %775 = vst [vmem:[%s9322_s26 + $0x4d8] sm:$0xf] %v774_v54  ;;  %v902_v54 = vld [vmem:[%s9318_s25 + $0x1760] sm:$0xf] }
 0x14b   : > { %777 = vst [vmem:[%s9322_s26 + $0x4dc] sm:$0xf] %v776_v55  ;;  %v904_v55 = vld [vmem:[%s9318_s25 + $0x1770] sm:$0xf] }
 0x14c   : > { %779 = vst [vmem:[%s9322_s26 + $0x4e0] sm:$0xf] %v778_v56  ;;  %v906_v56 = vld [vmem:[%s9318_s25 + $0x1780] sm:$0xf] }
 0x14d   : > { %781 = vst [vmem:[%s9322_s26 + $0x4e4] sm:$0xf] %v780_v57  ;;  %v908_v57 = vld [vmem:[%s9318_s25 + $0x1790] sm:$0xf] }
 0x14e   : > { %783 = vst [vmem:[%s9322_s26 + $0x4e8] sm:$0xf] %v782_v58  ;;  %v910_v58 = vld [vmem:[%s9318_s25 + $0x17a0] sm:$0xf] }
 0x14f   : > { %785 = vst [vmem:[%s9322_s26 + $0x4ec] sm:$0xf] %v784_v59  ;;  %v912_v59 = vld [vmem:[%s9318_s25 + $0x17b0] sm:$0xf] }
 0x150   : > { %787 = vst [vmem:[%s9322_s26 + $0x4f0] sm:$0xf] %v786_v60  ;;  %v914_v60 = vld [vmem:[%s9318_s25 + $0x17c0] sm:$0xf] }
 0x151   : > { %789 = vst [vmem:[%s9322_s26 + $0x4f4] sm:$0xf] %v788_v61  ;;  %v916_v61 = vld [vmem:[%s9318_s25 + $0x17d0] sm:$0xf] }
 0x152   : > { %791 = vst [vmem:[%s9322_s26 + $0x4f8] sm:$0xf] %v790_v62  ;;  %v918_v62 = vld [vmem:[%s9318_s25 + $0x17e0] sm:$0xf] }
 0x153   : > { %793 = vst [vmem:[%s9322_s26 + $0x4fc] sm:$0xf] %v792_v63  ;;  %v920_v63 = vld [vmem:[%s9318_s25 + $0x17f0] sm:$0xf] }
 0x154   : > { %795 = vst [vmem:[%s9322_s26 + $0x500] sm:$0xf] %v794_v0  ;;  %v922_v0 = vld [vmem:[%s9318_s25 + $0x1800] sm:$0xf] }
 0x155   : > { %797 = vst [vmem:[%s9322_s26 + $0x504] sm:$0xf] %v796_v1  ;;  %v924_v1 = vld [vmem:[%s9318_s25 + $0x1810] sm:$0xf] }
 0x156   : > { %799 = vst [vmem:[%s9322_s26 + $0x508] sm:$0xf] %v798_v2  ;;  %v926_v2 = vld [vmem:[%s9318_s25 + $0x1820] sm:$0xf] }
 0x157   : > { %801 = vst [vmem:[%s9322_s26 + $0x50c] sm:$0xf] %v800_v3  ;;  %v928_v3 = vld [vmem:[%s9318_s25 + $0x1830] sm:$0xf] }
 0x158   : > { %803 = vst [vmem:[%s9322_s26 + $0x510] sm:$0xf] %v802_v4  ;;  %v930_v4 = vld [vmem:[%s9318_s25 + $0x1840] sm:$0xf] }
 0x159   : > { %805 = vst [vmem:[%s9322_s26 + $0x514] sm:$0xf] %v804_v5  ;;  %v932_v5 = vld [vmem:[%s9318_s25 + $0x1850] sm:$0xf] }
 0x15a   : > { %807 = vst [vmem:[%s9322_s26 + $0x518] sm:$0xf] %v806_v6  ;;  %v934_v6 = vld [vmem:[%s9318_s25 + $0x1860] sm:$0xf] }
 0x15b   : > { %809 = vst [vmem:[%s9322_s26 + $0x51c] sm:$0xf] %v808_v7  ;;  %v936_v7 = vld [vmem:[%s9318_s25 + $0x1870] sm:$0xf] }
 0x15c   : > { %811 = vst [vmem:[%s9322_s26 + $0x520] sm:$0xf] %v810_v8  ;;  %v938_v8 = vld [vmem:[%s9318_s25 + $0x1880] sm:$0xf] }
 0x15d   : > { %813 = vst [vmem:[%s9322_s26 + $0x524] sm:$0xf] %v812_v9  ;;  %v940_v9 = vld [vmem:[%s9318_s25 + $0x1890] sm:$0xf] }
 0x15e   : > { %815 = vst [vmem:[%s9322_s26 + $0x528] sm:$0xf] %v814_v10  ;;  %v942_v10 = vld [vmem:[%s9318_s25 + $0x18a0] sm:$0xf] }
 0x15f   : > { %817 = vst [vmem:[%s9322_s26 + $0x52c] sm:$0xf] %v816_v11  ;;  %v944_v11 = vld [vmem:[%s9318_s25 + $0x18b0] sm:$0xf] }
 0x160   : > { %819 = vst [vmem:[%s9322_s26 + $0x530] sm:$0xf] %v818_v12  ;;  %v946_v12 = vld [vmem:[%s9318_s25 + $0x18c0] sm:$0xf] }
 0x161   : > { %821 = vst [vmem:[%s9322_s26 + $0x534] sm:$0xf] %v820_v13  ;;  %v948_v13 = vld [vmem:[%s9318_s25 + $0x18d0] sm:$0xf] }
 0x162   : > { %823 = vst [vmem:[%s9322_s26 + $0x538] sm:$0xf] %v822_v14  ;;  %v950_v14 = vld [vmem:[%s9318_s25 + $0x18e0] sm:$0xf] }
 0x163   : > { %825 = vst [vmem:[%s9322_s26 + $0x53c] sm:$0xf] %v824_v15  ;;  %v952_v15 = vld [vmem:[%s9318_s25 + $0x18f0] sm:$0xf] }
 0x164   : > { %827 = vst [vmem:[%s9322_s26 + $0x540] sm:$0xf] %v826_v16  ;;  %v954_v16 = vld [vmem:[%s9318_s25 + $0x1900] sm:$0xf] }
 0x165   : > { %829 = vst [vmem:[%s9322_s26 + $0x544] sm:$0xf] %v828_v17  ;;  %v956_v17 = vld [vmem:[%s9318_s25 + $0x1910] sm:$0xf] }
 0x166   : > { %831 = vst [vmem:[%s9322_s26 + $0x548] sm:$0xf] %v830_v18  ;;  %v958_v18 = vld [vmem:[%s9318_s25 + $0x1920] sm:$0xf] }
 0x167   : > { %833 = vst [vmem:[%s9322_s26 + $0x54c] sm:$0xf] %v832_v19  ;;  %v960_v19 = vld [vmem:[%s9318_s25 + $0x1930] sm:$0xf] }
 0x168   : > { %835 = vst [vmem:[%s9322_s26 + $0x550] sm:$0xf] %v834_v20  ;;  %v962_v20 = vld [vmem:[%s9318_s25 + $0x1940] sm:$0xf] }
 0x169   : > { %837 = vst [vmem:[%s9322_s26 + $0x554] sm:$0xf] %v836_v21  ;;  %v964_v21 = vld [vmem:[%s9318_s25 + $0x1950] sm:$0xf] }
 0x16a   : > { %839 = vst [vmem:[%s9322_s26 + $0x558] sm:$0xf] %v838_v22  ;;  %v966_v22 = vld [vmem:[%s9318_s25 + $0x1960] sm:$0xf] }
 0x16b   : > { %841 = vst [vmem:[%s9322_s26 + $0x55c] sm:$0xf] %v840_v23  ;;  %v968_v23 = vld [vmem:[%s9318_s25 + $0x1970] sm:$0xf] }
 0x16c   : > { %843 = vst [vmem:[%s9322_s26 + $0x560] sm:$0xf] %v842_v24  ;;  %v970_v24 = vld [vmem:[%s9318_s25 + $0x1980] sm:$0xf] }
 0x16d   : > { %845 = vst [vmem:[%s9322_s26 + $0x564] sm:$0xf] %v844_v25  ;;  %v972_v25 = vld [vmem:[%s9318_s25 + $0x1990] sm:$0xf] }
 0x16e   : > { %847 = vst [vmem:[%s9322_s26 + $0x568] sm:$0xf] %v846_v26  ;;  %v974_v26 = vld [vmem:[%s9318_s25 + $0x19a0] sm:$0xf] }
 0x16f   : > { %849 = vst [vmem:[%s9322_s26 + $0x56c] sm:$0xf] %v848_v27  ;;  %v976_v27 = vld [vmem:[%s9318_s25 + $0x19b0] sm:$0xf] }
 0x170   : > { %851 = vst [vmem:[%s9322_s26 + $0x570] sm:$0xf] %v850_v28  ;;  %v978_v28 = vld [vmem:[%s9318_s25 + $0x19c0] sm:$0xf] }
 0x171   : > { %853 = vst [vmem:[%s9322_s26 + $0x574] sm:$0xf] %v852_v29  ;;  %v980_v29 = vld [vmem:[%s9318_s25 + $0x19d0] sm:$0xf] }
 0x172   : > { %855 = vst [vmem:[%s9322_s26 + $0x578] sm:$0xf] %v854_v30  ;;  %v982_v30 = vld [vmem:[%s9318_s25 + $0x19e0] sm:$0xf] }
 0x173   : > { %857 = vst [vmem:[%s9322_s26 + $0x57c] sm:$0xf] %v856_v31  ;;  %v984_v31 = vld [vmem:[%s9318_s25 + $0x19f0] sm:$0xf] }
 0x174   : > { %859 = vst [vmem:[%s9322_s26 + $0x580] sm:$0xf] %v858_v32  ;;  %v986_v32 = vld [vmem:[%s9318_s25 + $0x1a00] sm:$0xf] }
 0x175   : > { %861 = vst [vmem:[%s9322_s26 + $0x584] sm:$0xf] %v860_v33  ;;  %v988_v33 = vld [vmem:[%s9318_s25 + $0x1a10] sm:$0xf] }
 0x176   : > { %863 = vst [vmem:[%s9322_s26 + $0x588] sm:$0xf] %v862_v34  ;;  %v990_v34 = vld [vmem:[%s9318_s25 + $0x1a20] sm:$0xf] }
 0x177   : > { %865 = vst [vmem:[%s9322_s26 + $0x58c] sm:$0xf] %v864_v35  ;;  %v992_v35 = vld [vmem:[%s9318_s25 + $0x1a30] sm:$0xf] }
 0x178   : > { %867 = vst [vmem:[%s9322_s26 + $0x590] sm:$0xf] %v866_v36  ;;  %v994_v36 = vld [vmem:[%s9318_s25 + $0x1a40] sm:$0xf] }
 0x179   : > { %869 = vst [vmem:[%s9322_s26 + $0x594] sm:$0xf] %v868_v37  ;;  %v996_v37 = vld [vmem:[%s9318_s25 + $0x1a50] sm:$0xf] }
 0x17a   : > { %871 = vst [vmem:[%s9322_s26 + $0x598] sm:$0xf] %v870_v38  ;;  %v998_v38 = vld [vmem:[%s9318_s25 + $0x1a60] sm:$0xf] }
 0x17b   : > { %873 = vst [vmem:[%s9322_s26 + $0x59c] sm:$0xf] %v872_v39  ;;  %v1000_v39 = vld [vmem:[%s9318_s25 + $0x1a70] sm:$0xf] }
 0x17c   : > { %875 = vst [vmem:[%s9322_s26 + $0x5a0] sm:$0xf] %v874_v40  ;;  %v1002_v40 = vld [vmem:[%s9318_s25 + $0x1a80] sm:$0xf] }
 0x17d   : > { %877 = vst [vmem:[%s9322_s26 + $0x5a4] sm:$0xf] %v876_v41  ;;  %v1004_v41 = vld [vmem:[%s9318_s25 + $0x1a90] sm:$0xf] }
 0x17e   : > { %879 = vst [vmem:[%s9322_s26 + $0x5a8] sm:$0xf] %v878_v42  ;;  %v1006_v42 = vld [vmem:[%s9318_s25 + $0x1aa0] sm:$0xf] }
 0x17f   : > { %881 = vst [vmem:[%s9322_s26 + $0x5ac] sm:$0xf] %v880_v43  ;;  %v1008_v43 = vld [vmem:[%s9318_s25 + $0x1ab0] sm:$0xf] }
 0x180   : > { %883 = vst [vmem:[%s9322_s26 + $0x5b0] sm:$0xf] %v882_v44  ;;  %v1010_v44 = vld [vmem:[%s9318_s25 + $0x1ac0] sm:$0xf] }
 0x181   : > { %885 = vst [vmem:[%s9322_s26 + $0x5b4] sm:$0xf] %v884_v45  ;;  %v1012_v45 = vld [vmem:[%s9318_s25 + $0x1ad0] sm:$0xf] }
 0x182   : > { %887 = vst [vmem:[%s9322_s26 + $0x5b8] sm:$0xf] %v886_v46  ;;  %v1014_v46 = vld [vmem:[%s9318_s25 + $0x1ae0] sm:$0xf] }
 0x183   : > { %889 = vst [vmem:[%s9322_s26 + $0x5bc] sm:$0xf] %v888_v47  ;;  %v1016_v47 = vld [vmem:[%s9318_s25 + $0x1af0] sm:$0xf] }
 0x184   : > { %891 = vst [vmem:[%s9322_s26 + $0x5c0] sm:$0xf] %v890_v48  ;;  %v1018_v48 = vld [vmem:[%s9318_s25 + $0x1b00] sm:$0xf] }
 0x185   : > { %893 = vst [vmem:[%s9322_s26 + $0x5c4] sm:$0xf] %v892_v49  ;;  %v1020_v49 = vld [vmem:[%s9318_s25 + $0x1b10] sm:$0xf] }
 0x186   : > { %895 = vst [vmem:[%s9322_s26 + $0x5c8] sm:$0xf] %v894_v50  ;;  %v1022_v50 = vld [vmem:[%s9318_s25 + $0x1b20] sm:$0xf] }
 0x187   : > { %897 = vst [vmem:[%s9322_s26 + $0x5cc] sm:$0xf] %v896_v51  ;;  %v1024_v51 = vld [vmem:[%s9318_s25 + $0x1b30] sm:$0xf] }
 0x188   : > { %899 = vst [vmem:[%s9322_s26 + $0x5d0] sm:$0xf] %v898_v52  ;;  %v1026_v52 = vld [vmem:[%s9318_s25 + $0x1b40] sm:$0xf] }
 0x189   : > { %901 = vst [vmem:[%s9322_s26 + $0x5d4] sm:$0xf] %v900_v53  ;;  %v1028_v53 = vld [vmem:[%s9318_s25 + $0x1b50] sm:$0xf] }
 0x18a   : > { %903 = vst [vmem:[%s9322_s26 + $0x5d8] sm:$0xf] %v902_v54  ;;  %v1030_v54 = vld [vmem:[%s9318_s25 + $0x1b60] sm:$0xf] }
 0x18b   : > { %905 = vst [vmem:[%s9322_s26 + $0x5dc] sm:$0xf] %v904_v55  ;;  %v1032_v55 = vld [vmem:[%s9318_s25 + $0x1b70] sm:$0xf] }
 0x18c   : > { %907 = vst [vmem:[%s9322_s26 + $0x5e0] sm:$0xf] %v906_v56  ;;  %v1034_v56 = vld [vmem:[%s9318_s25 + $0x1b80] sm:$0xf] }
 0x18d   : > { %909 = vst [vmem:[%s9322_s26 + $0x5e4] sm:$0xf] %v908_v57  ;;  %v1036_v57 = vld [vmem:[%s9318_s25 + $0x1b90] sm:$0xf] }
 0x18e   : > { %911 = vst [vmem:[%s9322_s26 + $0x5e8] sm:$0xf] %v910_v58  ;;  %v1038_v58 = vld [vmem:[%s9318_s25 + $0x1ba0] sm:$0xf] }
 0x18f   : > { %913 = vst [vmem:[%s9322_s26 + $0x5ec] sm:$0xf] %v912_v59  ;;  %v1040_v59 = vld [vmem:[%s9318_s25 + $0x1bb0] sm:$0xf] }
 0x190   : > { %915 = vst [vmem:[%s9322_s26 + $0x5f0] sm:$0xf] %v914_v60  ;;  %v1042_v60 = vld [vmem:[%s9318_s25 + $0x1bc0] sm:$0xf] }
 0x191   : > { %917 = vst [vmem:[%s9322_s26 + $0x5f4] sm:$0xf] %v916_v61  ;;  %v1044_v61 = vld [vmem:[%s9318_s25 + $0x1bd0] sm:$0xf] }
 0x192   : > { %919 = vst [vmem:[%s9322_s26 + $0x5f8] sm:$0xf] %v918_v62  ;;  %v1046_v62 = vld [vmem:[%s9318_s25 + $0x1be0] sm:$0xf] }
 0x193   : > { %921 = vst [vmem:[%s9322_s26 + $0x5fc] sm:$0xf] %v920_v63  ;;  %v1048_v63 = vld [vmem:[%s9318_s25 + $0x1bf0] sm:$0xf] }
 0x194   : > { %923 = vst [vmem:[%s9322_s26 + $0x600] sm:$0xf] %v922_v0  ;;  %v1050_v0 = vld [vmem:[%s9318_s25 + $0x1c00] sm:$0xf] }
 0x195   : > { %925 = vst [vmem:[%s9322_s26 + $0x604] sm:$0xf] %v924_v1  ;;  %v1052_v1 = vld [vmem:[%s9318_s25 + $0x1c10] sm:$0xf] }
 0x196   : > { %927 = vst [vmem:[%s9322_s26 + $0x608] sm:$0xf] %v926_v2  ;;  %v1054_v2 = vld [vmem:[%s9318_s25 + $0x1c20] sm:$0xf] }
 0x197   : > { %929 = vst [vmem:[%s9322_s26 + $0x60c] sm:$0xf] %v928_v3  ;;  %v1056_v3 = vld [vmem:[%s9318_s25 + $0x1c30] sm:$0xf] }
 0x198   : > { %931 = vst [vmem:[%s9322_s26 + $0x610] sm:$0xf] %v930_v4  ;;  %v1058_v4 = vld [vmem:[%s9318_s25 + $0x1c40] sm:$0xf] }
 0x199   : > { %933 = vst [vmem:[%s9322_s26 + $0x614] sm:$0xf] %v932_v5  ;;  %v1060_v5 = vld [vmem:[%s9318_s25 + $0x1c50] sm:$0xf] }
 0x19a   : > { %935 = vst [vmem:[%s9322_s26 + $0x618] sm:$0xf] %v934_v6  ;;  %v1062_v6 = vld [vmem:[%s9318_s25 + $0x1c60] sm:$0xf] }
 0x19b   : > { %937 = vst [vmem:[%s9322_s26 + $0x61c] sm:$0xf] %v936_v7  ;;  %v1064_v7 = vld [vmem:[%s9318_s25 + $0x1c70] sm:$0xf] }
 0x19c   : > { %939 = vst [vmem:[%s9322_s26 + $0x620] sm:$0xf] %v938_v8  ;;  %v1066_v8 = vld [vmem:[%s9318_s25 + $0x1c80] sm:$0xf] }
 0x19d   : > { %941 = vst [vmem:[%s9322_s26 + $0x624] sm:$0xf] %v940_v9  ;;  %v1068_v9 = vld [vmem:[%s9318_s25 + $0x1c90] sm:$0xf] }
 0x19e   : > { %943 = vst [vmem:[%s9322_s26 + $0x628] sm:$0xf] %v942_v10  ;;  %v1070_v10 = vld [vmem:[%s9318_s25 + $0x1ca0] sm:$0xf] }
 0x19f   : > { %945 = vst [vmem:[%s9322_s26 + $0x62c] sm:$0xf] %v944_v11  ;;  %v1072_v11 = vld [vmem:[%s9318_s25 + $0x1cb0] sm:$0xf] }
 0x1a0   : > { %947 = vst [vmem:[%s9322_s26 + $0x630] sm:$0xf] %v946_v12  ;;  %v1074_v12 = vld [vmem:[%s9318_s25 + $0x1cc0] sm:$0xf] }
 0x1a1   : > { %949 = vst [vmem:[%s9322_s26 + $0x634] sm:$0xf] %v948_v13  ;;  %v1076_v13 = vld [vmem:[%s9318_s25 + $0x1cd0] sm:$0xf] }
 0x1a2   : > { %951 = vst [vmem:[%s9322_s26 + $0x638] sm:$0xf] %v950_v14  ;;  %v1078_v14 = vld [vmem:[%s9318_s25 + $0x1ce0] sm:$0xf] }
 0x1a3   : > { %953 = vst [vmem:[%s9322_s26 + $0x63c] sm:$0xf] %v952_v15  ;;  %v1080_v15 = vld [vmem:[%s9318_s25 + $0x1cf0] sm:$0xf] }
 0x1a4   : > { %955 = vst [vmem:[%s9322_s26 + $0x640] sm:$0xf] %v954_v16  ;;  %v1082_v16 = vld [vmem:[%s9318_s25 + $0x1d00] sm:$0xf] }
 0x1a5   : > { %957 = vst [vmem:[%s9322_s26 + $0x644] sm:$0xf] %v956_v17  ;;  %v1084_v17 = vld [vmem:[%s9318_s25 + $0x1d10] sm:$0xf] }
 0x1a6   : > { %959 = vst [vmem:[%s9322_s26 + $0x648] sm:$0xf] %v958_v18  ;;  %v1086_v18 = vld [vmem:[%s9318_s25 + $0x1d20] sm:$0xf] }
 0x1a7   : > { %961 = vst [vmem:[%s9322_s26 + $0x64c] sm:$0xf] %v960_v19  ;;  %v1088_v19 = vld [vmem:[%s9318_s25 + $0x1d30] sm:$0xf] }
 0x1a8   : > { %963 = vst [vmem:[%s9322_s26 + $0x650] sm:$0xf] %v962_v20  ;;  %v1090_v20 = vld [vmem:[%s9318_s25 + $0x1d40] sm:$0xf] }
 0x1a9   : > { %965 = vst [vmem:[%s9322_s26 + $0x654] sm:$0xf] %v964_v21  ;;  %v1092_v21 = vld [vmem:[%s9318_s25 + $0x1d50] sm:$0xf] }
 0x1aa   : > { %967 = vst [vmem:[%s9322_s26 + $0x658] sm:$0xf] %v966_v22  ;;  %v1094_v22 = vld [vmem:[%s9318_s25 + $0x1d60] sm:$0xf] }
 0x1ab   : > { %969 = vst [vmem:[%s9322_s26 + $0x65c] sm:$0xf] %v968_v23  ;;  %v1096_v23 = vld [vmem:[%s9318_s25 + $0x1d70] sm:$0xf] }
 0x1ac   : > { %971 = vst [vmem:[%s9322_s26 + $0x660] sm:$0xf] %v970_v24  ;;  %v1098_v24 = vld [vmem:[%s9318_s25 + $0x1d80] sm:$0xf] }
 0x1ad   : > { %973 = vst [vmem:[%s9322_s26 + $0x664] sm:$0xf] %v972_v25  ;;  %v1100_v25 = vld [vmem:[%s9318_s25 + $0x1d90] sm:$0xf] }
 0x1ae   : > { %975 = vst [vmem:[%s9322_s26 + $0x668] sm:$0xf] %v974_v26  ;;  %v1102_v26 = vld [vmem:[%s9318_s25 + $0x1da0] sm:$0xf] }
 0x1af   : > { %977 = vst [vmem:[%s9322_s26 + $0x66c] sm:$0xf] %v976_v27  ;;  %v1104_v27 = vld [vmem:[%s9318_s25 + $0x1db0] sm:$0xf] }
 0x1b0   : > { %979 = vst [vmem:[%s9322_s26 + $0x670] sm:$0xf] %v978_v28  ;;  %v1106_v28 = vld [vmem:[%s9318_s25 + $0x1dc0] sm:$0xf] }
 0x1b1   : > { %981 = vst [vmem:[%s9322_s26 + $0x674] sm:$0xf] %v980_v29  ;;  %v1108_v29 = vld [vmem:[%s9318_s25 + $0x1dd0] sm:$0xf] }
 0x1b2   : > { %983 = vst [vmem:[%s9322_s26 + $0x678] sm:$0xf] %v982_v30  ;;  %v1110_v30 = vld [vmem:[%s9318_s25 + $0x1de0] sm:$0xf] }
 0x1b3   : > { %985 = vst [vmem:[%s9322_s26 + $0x67c] sm:$0xf] %v984_v31  ;;  %v1112_v31 = vld [vmem:[%s9318_s25 + $0x1df0] sm:$0xf] }
 0x1b4   : > { %987 = vst [vmem:[%s9322_s26 + $0x680] sm:$0xf] %v986_v32  ;;  %v1114_v32 = vld [vmem:[%s9318_s25 + $0x1e00] sm:$0xf] }
 0x1b5   : > { %989 = vst [vmem:[%s9322_s26 + $0x684] sm:$0xf] %v988_v33  ;;  %v1116_v33 = vld [vmem:[%s9318_s25 + $0x1e10] sm:$0xf] }
 0x1b6   : > { %991 = vst [vmem:[%s9322_s26 + $0x688] sm:$0xf] %v990_v34  ;;  %v1118_v34 = vld [vmem:[%s9318_s25 + $0x1e20] sm:$0xf] }
 0x1b7   : > { %993 = vst [vmem:[%s9322_s26 + $0x68c] sm:$0xf] %v992_v35  ;;  %v1120_v35 = vld [vmem:[%s9318_s25 + $0x1e30] sm:$0xf] }
 0x1b8   : > { %995 = vst [vmem:[%s9322_s26 + $0x690] sm:$0xf] %v994_v36  ;;  %v1122_v36 = vld [vmem:[%s9318_s25 + $0x1e40] sm:$0xf] }
 0x1b9   : > { %997 = vst [vmem:[%s9322_s26 + $0x694] sm:$0xf] %v996_v37  ;;  %v1124_v37 = vld [vmem:[%s9318_s25 + $0x1e50] sm:$0xf] }
 0x1ba   : > { %999 = vst [vmem:[%s9322_s26 + $0x698] sm:$0xf] %v998_v38  ;;  %v1126_v38 = vld [vmem:[%s9318_s25 + $0x1e60] sm:$0xf] }
 0x1bb   : > { %1001 = vst [vmem:[%s9322_s26 + $0x69c] sm:$0xf] %v1000_v39  ;;  %v1128_v39 = vld [vmem:[%s9318_s25 + $0x1e70] sm:$0xf] }
 0x1bc   : > { %1003 = vst [vmem:[%s9322_s26 + $0x6a0] sm:$0xf] %v1002_v40  ;;  %v1130_v40 = vld [vmem:[%s9318_s25 + $0x1e80] sm:$0xf] }
 0x1bd   : > { %1005 = vst [vmem:[%s9322_s26 + $0x6a4] sm:$0xf] %v1004_v41  ;;  %v1132_v41 = vld [vmem:[%s9318_s25 + $0x1e90] sm:$0xf] }
 0x1be   : > { %1007 = vst [vmem:[%s9322_s26 + $0x6a8] sm:$0xf] %v1006_v42  ;;  %v1134_v42 = vld [vmem:[%s9318_s25 + $0x1ea0] sm:$0xf] }
 0x1bf   : > { %1009 = vst [vmem:[%s9322_s26 + $0x6ac] sm:$0xf] %v1008_v43  ;;  %v1136_v43 = vld [vmem:[%s9318_s25 + $0x1eb0] sm:$0xf] }
 0x1c0   : > { %1011 = vst [vmem:[%s9322_s26 + $0x6b0] sm:$0xf] %v1010_v44  ;;  %v1138_v44 = vld [vmem:[%s9318_s25 + $0x1ec0] sm:$0xf] }
 0x1c1   : > { %1013 = vst [vmem:[%s9322_s26 + $0x6b4] sm:$0xf] %v1012_v45  ;;  %v1140_v45 = vld [vmem:[%s9318_s25 + $0x1ed0] sm:$0xf] }
 0x1c2   : > { %1015 = vst [vmem:[%s9322_s26 + $0x6b8] sm:$0xf] %v1014_v46  ;;  %v1142_v46 = vld [vmem:[%s9318_s25 + $0x1ee0] sm:$0xf] }
 0x1c3   : > { %1017 = vst [vmem:[%s9322_s26 + $0x6bc] sm:$0xf] %v1016_v47  ;;  %v1144_v47 = vld [vmem:[%s9318_s25 + $0x1ef0] sm:$0xf] }
 0x1c4   : > { %1019 = vst [vmem:[%s9322_s26 + $0x6c0] sm:$0xf] %v1018_v48  ;;  %v1146_v48 = vld [vmem:[%s9318_s25 + $0x1f00] sm:$0xf] }
 0x1c5   : > { %1021 = vst [vmem:[%s9322_s26 + $0x6c4] sm:$0xf] %v1020_v49  ;;  %v1148_v49 = vld [vmem:[%s9318_s25 + $0x1f10] sm:$0xf] }
 0x1c6   : > { %1023 = vst [vmem:[%s9322_s26 + $0x6c8] sm:$0xf] %v1022_v50  ;;  %v1150_v50 = vld [vmem:[%s9318_s25 + $0x1f20] sm:$0xf] }
 0x1c7   : > { %1025 = vst [vmem:[%s9322_s26 + $0x6cc] sm:$0xf] %v1024_v51  ;;  %v1152_v51 = vld [vmem:[%s9318_s25 + $0x1f30] sm:$0xf] }
 0x1c8   : > { %1027 = vst [vmem:[%s9322_s26 + $0x6d0] sm:$0xf] %v1026_v52  ;;  %v1154_v52 = vld [vmem:[%s9318_s25 + $0x1f40] sm:$0xf] }
 0x1c9   : > { %1029 = vst [vmem:[%s9322_s26 + $0x6d4] sm:$0xf] %v1028_v53  ;;  %v1156_v53 = vld [vmem:[%s9318_s25 + $0x1f50] sm:$0xf] }
 0x1ca   : > { %1031 = vst [vmem:[%s9322_s26 + $0x6d8] sm:$0xf] %v1030_v54  ;;  %v1158_v54 = vld [vmem:[%s9318_s25 + $0x1f60] sm:$0xf] }
 0x1cb   : > { %1033 = vst [vmem:[%s9322_s26 + $0x6dc] sm:$0xf] %v1032_v55  ;;  %v1160_v55 = vld [vmem:[%s9318_s25 + $0x1f70] sm:$0xf] }
 0x1cc   : > { %1035 = vst [vmem:[%s9322_s26 + $0x6e0] sm:$0xf] %v1034_v56  ;;  %v1162_v56 = vld [vmem:[%s9318_s25 + $0x1f80] sm:$0xf] }
 0x1cd   : > { %1037 = vst [vmem:[%s9322_s26 + $0x6e4] sm:$0xf] %v1036_v57  ;;  %v1164_v57 = vld [vmem:[%s9318_s25 + $0x1f90] sm:$0xf] }
 0x1ce   : > { %1039 = vst [vmem:[%s9322_s26 + $0x6e8] sm:$0xf] %v1038_v58  ;;  %v1166_v58 = vld [vmem:[%s9318_s25 + $0x1fa0] sm:$0xf] }
 0x1cf   : > { %1041 = vst [vmem:[%s9322_s26 + $0x6ec] sm:$0xf] %v1040_v59  ;;  %v1168_v59 = vld [vmem:[%s9318_s25 + $0x1fb0] sm:$0xf] }
 0x1d0   : > { %1043 = vst [vmem:[%s9322_s26 + $0x6f0] sm:$0xf] %v1042_v60  ;;  %v1170_v60 = vld [vmem:[%s9318_s25 + $0x1fc0] sm:$0xf] }
 0x1d1   : > { %1045 = vst [vmem:[%s9322_s26 + $0x6f4] sm:$0xf] %v1044_v61  ;;  %v1172_v61 = vld [vmem:[%s9318_s25 + $0x1fd0] sm:$0xf] }
 0x1d2   : > { %1047 = vst [vmem:[%s9322_s26 + $0x6f8] sm:$0xf] %v1046_v62  ;;  %v1174_v62 = vld [vmem:[%s9318_s25 + $0x1fe0] sm:$0xf] }
 0x1d3   : > { %1049 = vst [vmem:[%s9322_s26 + $0x6fc] sm:$0xf] %v1048_v63  ;;  %v1176_v63 = vld [vmem:[%s9318_s25 + $0x1ff0] sm:$0xf] }
 0x1d4   : > { %1051 = vst [vmem:[%s9322_s26 + $0x700] sm:$0xf] %v1050_v0 }
 0x1d5   : > { %1053 = vst [vmem:[%s9322_s26 + $0x704] sm:$0xf] %v1052_v1 }
 0x1d6   : > { %1055 = vst [vmem:[%s9322_s26 + $0x708] sm:$0xf] %v1054_v2 }
 0x1d7   : > { %1057 = vst [vmem:[%s9322_s26 + $0x70c] sm:$0xf] %v1056_v3 }
 0x1d8   : > { %1059 = vst [vmem:[%s9322_s26 + $0x710] sm:$0xf] %v1058_v4 }
 0x1d9   : > { %1061 = vst [vmem:[%s9322_s26 + $0x714] sm:$0xf] %v1060_v5 }
 0x1da   : > { %1063 = vst [vmem:[%s9322_s26 + $0x718] sm:$0xf] %v1062_v6 }
 0x1db   : > { %1065 = vst [vmem:[%s9322_s26 + $0x71c] sm:$0xf] %v1064_v7 }
 0x1dc   : > { %1067 = vst [vmem:[%s9322_s26 + $0x720] sm:$0xf] %v1066_v8 }
 0x1dd   : > { %1069 = vst [vmem:[%s9322_s26 + $0x724] sm:$0xf] %v1068_v9 }
 0x1de   : > { %1071 = vst [vmem:[%s9322_s26 + $0x728] sm:$0xf] %v1070_v10 }
 0x1df   : > { %1073 = vst [vmem:[%s9322_s26 + $0x72c] sm:$0xf] %v1072_v11 }
 0x1e0   : > { %1075 = vst [vmem:[%s9322_s26 + $0x730] sm:$0xf] %v1074_v12 }
 0x1e1   : > { %1077 = vst [vmem:[%s9322_s26 + $0x734] sm:$0xf] %v1076_v13 }
 0x1e2   : > { %1079 = vst [vmem:[%s9322_s26 + $0x738] sm:$0xf] %v1078_v14 }
 0x1e3   : > { %1081 = vst [vmem:[%s9322_s26 + $0x73c] sm:$0xf] %v1080_v15 }
 0x1e4   : > { %1083 = vst [vmem:[%s9322_s26 + $0x740] sm:$0xf] %v1082_v16 }
 0x1e5   : > { %1085 = vst [vmem:[%s9322_s26 + $0x744] sm:$0xf] %v1084_v17 }
 0x1e6   : > { %1087 = vst [vmem:[%s9322_s26 + $0x748] sm:$0xf] %v1086_v18 }
 0x1e7   : > { %1089 = vst [vmem:[%s9322_s26 + $0x74c] sm:$0xf] %v1088_v19 }
 0x1e8   : > { %1091 = vst [vmem:[%s9322_s26 + $0x750] sm:$0xf] %v1090_v20 }
 0x1e9   : > { %1093 = vst [vmem:[%s9322_s26 + $0x754] sm:$0xf] %v1092_v21 }
 0x1ea   : > { %1095 = vst [vmem:[%s9322_s26 + $0x758] sm:$0xf] %v1094_v22 }
 0x1eb   : > { %1097 = vst [vmem:[%s9322_s26 + $0x75c] sm:$0xf] %v1096_v23 }
 0x1ec   : > { %1099 = vst [vmem:[%s9322_s26 + $0x760] sm:$0xf] %v1098_v24 }
 0x1ed   : > { %1101 = vst [vmem:[%s9322_s26 + $0x764] sm:$0xf] %v1100_v25 }
 0x1ee   : > { %1103 = vst [vmem:[%s9322_s26 + $0x768] sm:$0xf] %v1102_v26 }
 0x1ef   : > { %1105 = vst [vmem:[%s9322_s26 + $0x76c] sm:$0xf] %v1104_v27 }
 0x1f0   : > { %1107 = vst [vmem:[%s9322_s26 + $0x770] sm:$0xf] %v1106_v28 }
 0x1f1   : > { %1109 = vst [vmem:[%s9322_s26 + $0x774] sm:$0xf] %v1108_v29 }
 0x1f2   : > { %1111 = vst [vmem:[%s9322_s26 + $0x778] sm:$0xf] %v1110_v30 }
 0x1f3   : > { %1113 = vst [vmem:[%s9322_s26 + $0x77c] sm:$0xf] %v1112_v31 }
 0x1f4   : > { %1115 = vst [vmem:[%s9322_s26 + $0x780] sm:$0xf] %v1114_v32 }
 0x1f5   : > { %1117 = vst [vmem:[%s9322_s26 + $0x784] sm:$0xf] %v1116_v33 }
 0x1f6   : > { %1119 = vst [vmem:[%s9322_s26 + $0x788] sm:$0xf] %v1118_v34 }
 0x1f7   : > { %1121 = vst [vmem:[%s9322_s26 + $0x78c] sm:$0xf] %v1120_v35 }
 0x1f8   : > { %1123 = vst [vmem:[%s9322_s26 + $0x790] sm:$0xf] %v1122_v36 }
 0x1f9   : > { %1125 = vst [vmem:[%s9322_s26 + $0x794] sm:$0xf] %v1124_v37 }
 0x1fa   : > { %1127 = vst [vmem:[%s9322_s26 + $0x798] sm:$0xf] %v1126_v38 }
 0x1fb   : > { %1129 = vst [vmem:[%s9322_s26 + $0x79c] sm:$0xf] %v1128_v39 }
 0x1fc   : > { %1131 = vst [vmem:[%s9322_s26 + $0x7a0] sm:$0xf] %v1130_v40 }
 0x1fd   : > { %1133 = vst [vmem:[%s9322_s26 + $0x7a4] sm:$0xf] %v1132_v41 }
 0x1fe   : > { %1135 = vst [vmem:[%s9322_s26 + $0x7a8] sm:$0xf] %v1134_v42 }
 0x1ff   : > { %1137 = vst [vmem:[%s9322_s26 + $0x7ac] sm:$0xf] %v1136_v43 }
 0x200   : > { %1139 = vst [vmem:[%s9322_s26 + $0x7b0] sm:$0xf] %v1138_v44 }
 0x201   : > { %1141 = vst [vmem:[%s9322_s26 + $0x7b4] sm:$0xf] %v1140_v45 }
 0x202   : > { %1143 = vst [vmem:[%s9322_s26 + $0x7b8] sm:$0xf] %v1142_v46 }
 0x203   : > { %1145 = vst [vmem:[%s9322_s26 + $0x7bc] sm:$0xf] %v1144_v47 }
 0x204   : > { %1147 = vst [vmem:[%s9322_s26 + $0x7c0] sm:$0xf] %v1146_v48 }
 0x205   : > { %1149 = vst [vmem:[%s9322_s26 + $0x7c4] sm:$0xf] %v1148_v49 }
 0x206   : > { %1151 = vst [vmem:[%s9322_s26 + $0x7c8] sm:$0xf] %v1150_v50 }
 0x207   : > { %1153 = vst [vmem:[%s9322_s26 + $0x7cc] sm:$0xf] %v1152_v51 }
 0x208   : > { %1155 = vst [vmem:[%s9322_s26 + $0x7d0] sm:$0xf] %v1154_v52 }
 0x209   : > { %1157 = vst [vmem:[%s9322_s26 + $0x7d4] sm:$0xf] %v1156_v53 }
 0x20a   : > { %1159 = vst [vmem:[%s9322_s26 + $0x7d8] sm:$0xf] %v1158_v54 }
 0x20b   : > { %1161 = vst [vmem:[%s9322_s26 + $0x7dc] sm:$0xf] %v1160_v55 }
 0x20c   : > { %1163 = vst [vmem:[%s9322_s26 + $0x7e0] sm:$0xf] %v1162_v56 }
 0x20d   : > { %1165 = vst [vmem:[%s9322_s26 + $0x7e4] sm:$0xf] %v1164_v57 }
 0x20e   : > { %1167 = vst [vmem:[%s9322_s26 + $0x7e8] sm:$0xf] %v1166_v58 }
 0x20f   : > { %1169 = vst [vmem:[%s9322_s26 + $0x7ec] sm:$0xf] %v1168_v59 }
 0x210   : > { %1171 = vst [vmem:[%s9322_s26 + $0x7f0] sm:$0xf] %v1170_v60 }
 0x211   : > { %1173 = vst [vmem:[%s9322_s26 + $0x7f4] sm:$0xf] %v1172_v61 }
 0x212   : > { %1175 = vst [vmem:[%s9322_s26 + $0x7f8] sm:$0xf] %v1174_v62 }
 0x213   : > { %1177 = vst [vmem:[%s9322_s26 + $0x7fc] sm:$0xf] %v1176_v63 }
 0x214 PF: > { %p7557_p8 = scmp.ge.s32.totalorder %s9253_s13, 1  ;;  %p4298_p9 = scmp.lt.s32.totalorder %s9253_s13, 5 }
 0x216   : > { %p4299_p10 = pnand %p7557_p8, %p4298_p9 }
 0x217   : > { %s4305_s27 = sand.u32 (!%p4299_p10), 1, %s9237_s9  }
 0x218   : > { %4302 = sbr.rel (%p4299_p10) target bundleno = 975 (0x3cf), region = 76  ;;  %s7558_s28 = sshll.u32 (!%p4299_p10), %s4305_s27, 11 }
 0x219   : > { %s10351_s29 = scalar_lea.vmem (!%p4299_p10), [#allocation2], %s7558_s28  ;;  %s7559_s4 = sshll.u32 (!%p4299_p10), %s4305_s27, 4 }
 0x21a   : > { %s4330_s5 = scalar_lea.vmem (!%p4299_p10), [#allocation3], %s7559_s4 }
 0x21d   : > { %v8915_v0 = vld [vmem:[%s10351_s29 + $0x38] sm:$0xff]  ;;  %v8914_v4 = vld [vmem:[%s10351_s29 + $0x30] sm:$0xff]  ;;  %v8913_v8 = vld [vmem:[%s10351_s29 + $0x28] sm:$0xff]  ;;  %s8841_s9 = sshll.u32 (%p9305_p6), %s9245_s11, 2 }
 0x21e   : > { %v8923_v1 = vld [vmem:[%s10351_s29 + $0x78] sm:$0xff]  ;;  %6771 = vmatpush.bf16.msra.mxu0 %v8915_v0  ;;  %v8922_v5 = vld [vmem:[%s10351_s29 + $0x70] sm:$0xff]  ;;  %v8921_v9 = vld [vmem:[%s10351_s29 + $0x68] sm:$0xff]  ;;  %s7406_s7 = scalar_lea.vmem (%p9305_p6), %s11045_s2, %s8841_s9 }
 0x21f   : > { %v8931_v2 = vld [vmem:[%s10351_s29 + $0xb8] sm:$0xff]  ;;  %6790 = vmatpush.bf16.msra.mxu1 %v8923_v1  ;;  %v8930_v6 = vld [vmem:[%s10351_s29 + $0xb0] sm:$0xff]  ;;  %v8929_v10 = vld [vmem:[%s10351_s29 + $0xa8] sm:$0xff] }
 0x220   : > { %v8939_v3 = vld [vmem:[%s10351_s29 + $0xf8] sm:$0xff]  ;;  %6809 = vmatpush.bf16.msra.mxu2 %v8931_v2  ;;  %v8938_v7 = vld [vmem:[%s10351_s29 + $0xf0] sm:$0xff]  ;;  %v8937_v11 = vld [vmem:[%s10351_s29 + $0xe8] sm:$0xff] }
 0x221   : > { %6828 = vmatpush.bf16.msra.mxu3 %v8939_v3  ;;  %v8912_v12 = vld [vmem:[%s10351_s29 + $0x20] sm:$0xff]  ;;  %v8911_v16 = vld [vmem:[%s10351_s29 + $0x18] sm:$0xff]  ;;  %v8910_v20 = vld [vmem:[%s10351_s29 + $0x10] sm:$0xff] }
 0x222   : > { %6772 = vmatpush.bf16.msra.mxu0 %v8914_v4  ;;  %v8920_v13 = vld [vmem:[%s10351_s29 + $0x60] sm:$0xff]  ;;  %v8919_v17 = vld [vmem:[%s10351_s29 + $0x58] sm:$0xff]  ;;  %v8918_v21 = vld [vmem:[%s10351_s29 + $0x50] sm:$0xff] }
 0x223   : > { %6791 = vmatpush.bf16.msra.mxu1 %v8922_v5  ;;  %v8928_v14 = vld [vmem:[%s10351_s29 + $0xa0] sm:$0xff]  ;;  %v8927_v18 = vld [vmem:[%s10351_s29 + $0x98] sm:$0xff]  ;;  %v8926_v22 = vld [vmem:[%s10351_s29 + $0x90] sm:$0xff] }
 0x224   : > { %6810 = vmatpush.bf16.msra.mxu2 %v8930_v6  ;;  %v8936_v15 = vld [vmem:[%s10351_s29 + $0xe0] sm:$0xff]  ;;  %v8935_v19 = vld [vmem:[%s10351_s29 + $0xd8] sm:$0xff]  ;;  %v8934_v23 = vld [vmem:[%s10351_s29 + $0xd0] sm:$0xff] }
 0x225   : > { %6829 = vmatpush.bf16.msra.mxu3 %v8938_v7  ;;  %v8909_v24 = vld [vmem:[%s10351_s29 + $0x8] sm:$0xff]  ;;  %v8908_v28 = vld [vmem:[%s10351_s29] sm:$0xff]  ;;  %v8963_v40 = vld [vmem:[%s10351_s29 + $0x1b8] sm:$0xff] }
 0x226   : > { %6773 = vmatpush.bf16.msra.mxu0 %v8913_v8  ;;  %v8917_v25 = vld [vmem:[%s10351_s29 + $0x48] sm:$0xff]  ;;  %v7562_v29 = vld [vmem:[%s11043_s0] sm:$0xf]  ;;  %v8844_v34 = vld [vmem:[%s11043_s0 + $0x4] sm:$0xf] }
 0x227   : > { %6792 = vmatpush.bf16.msra.mxu1 %v8921_v9  ;;  %v8925_v26 = vld [vmem:[%s10351_s29 + $0x88] sm:$0xff]  ;;  %v8860_v30 = vld [vmem:[%s11043_s0 + $0x7c] sm:$0xf0]  ;;  %v7564_v35 = vld [vmem:[%s11043_s0 + $0x80] sm:$0xf0] }
 0x228   : > { %6811 = vmatpush.bf16.msra.mxu2 %v8929_v10  ;;  %v8933_v27 = vld [vmem:[%s10351_s29 + $0xc8] sm:$0xff]  ;;  %v8916_v31 = vld [vmem:[%s10351_s29 + $0x40] sm:$0xff]  ;;  %v8947_v41 = vld [vmem:[%s10351_s29 + $0x138] sm:$0xff]  ;;  %v7563_v42 = vor.u32 %v8860_v30, %v7562_v29  ;;  %v7567_v43 = vor.u32 %v8844_v34, %v7564_v35 }
 0x229   : > { %6830 = vmatpush.bf16.msra.mxu3 %v8937_v11  ;;  %v8924_v32 = vld [vmem:[%s10351_s29 + $0x80] sm:$0xff]  ;;  %v7570_v36 = vld [vmem:[%s11043_s0 + $0x8] sm:$0xf]  ;;  %v8845_v38 = vld [vmem:[%s11043_s0 + $0xc] sm:$0xf] }
 0x22a   : > { %6774 = vmatpush.bf16.msra.mxu0 %v8912_v12  ;;  %v8932_v33 = vld [vmem:[%s10351_s29 + $0xc0] sm:$0xff]  ;;  %v8861_v37 = vld [vmem:[%s11043_s0 + $0x84] sm:$0xf0]  ;;  %v7572_v39 = vld [vmem:[%s11043_s0 + $0x88] sm:$0xf0] }
 0x22b   : > { %6793 = vmatpush.bf16.msra.mxu1 %v8920_v13  ;;  %v7571_v44 = vor.u32 %v8861_v37, %v7570_v36  ;;  %v7575_v45 = vor.u32 %v8845_v38, %v7572_v39  ;;  %v8955_v46 = vld [vmem:[%s10351_s29 + $0x178] sm:$0xff]  ;;  %v8962_v48 = vld [vmem:[%s10351_s29 + $0x1b0] sm:$0xff]  ;;  %v8961_v52 = vld [vmem:[%s10351_s29 + $0x1a8] sm:$0xff] }
 0x22c   : > { %6812 = vmatpush.bf16.msra.mxu2 %v8928_v14  ;;  %v8971_v47 = vld [vmem:[%s10351_s29 + $0x1f8] sm:$0xff]  ;;  %v8946_v49 = vld [vmem:[%s10351_s29 + $0x130] sm:$0xff]  ;;  %v8945_v53 = vld [vmem:[%s10351_s29 + $0x128] sm:$0xff] }
 0x22d   : > { %6831 = vmatpush.bf16.msra.mxu3 %v8936_v15  ;;  %v8954_v50 = vld [vmem:[%s10351_s29 + $0x170] sm:$0xff]  ;;  %v8953_v54 = vld [vmem:[%s10351_s29 + $0x168] sm:$0xff]  ;;  %v8960_v56 = vld [vmem:[%s10351_s29 + $0x1a0] sm:$0xff] }
 0x22e   : > { %6775 = vmatpush.bf16.msra.mxu0 %v8911_v16  ;;  %v8970_v51 = vld [vmem:[%s10351_s29 + $0x1f0] sm:$0xff]  ;;  %v8969_v55 = vld [vmem:[%s10351_s29 + $0x1e8] sm:$0xff]  ;;  %v8944_v57 = vld [vmem:[%s10351_s29 + $0x120] sm:$0xff] }
 0x22f   : > { %6794 = vmatpush.bf16.msra.mxu1 %v8919_v17  ;;  %v8952_v58 = vld [vmem:[%s10351_s29 + $0x160] sm:$0xff]  ;;  %v7698_v0 = vld [vmem:[%s11043_s0 + $0x108] sm:$0xf]  ;;  %v8877_v2 = vld [vmem:[%s11043_s0 + $0x10c] sm:$0xf] }
 0x230   : > { %6813 = vmatpush.bf16.msra.mxu2 %v8927_v18  ;;  %v8968_v59 = vld [vmem:[%s10351_s29 + $0x1e0] sm:$0xff]  ;;  %v8893_v1 = vld [vmem:[%s11043_s0 + $0x184] sm:$0xf0]  ;;  %v7700_v3 = vld [vmem:[%s11043_s0 + $0x188] sm:$0xf0] }
 0x231   : > { %6832 = vmatpush.bf16.msra.mxu3 %v8935_v19  ;;  %v7690_v60 = vld [vmem:[%s11043_s0 + $0x100] sm:$0xf]  ;;  %v8876_v62 = vld [vmem:[%s11043_s0 + $0x104] sm:$0xf]  ;;  %v8959_v4 = vld [vmem:[%s10351_s29 + $0x198] sm:$0xff]  ;;  %v7699_v8 = vor.u32 %v8893_v1, %v7698_v0  ;;  %v7703_v9 = vor.u32 %v8877_v2, %v7700_v3 }
 0x232   : > { %6776 = vmatpush.bf16.msra.mxu0 %v8910_v20  ;;  %v8892_v61 = vld [vmem:[%s11043_s0 + $0x17c] sm:$0xf0]  ;;  %v7692_v63 = vld [vmem:[%s11043_s0 + $0x180] sm:$0xf0]  ;;  %v8943_v5 = vld [vmem:[%s10351_s29 + $0x118] sm:$0xff] }
 0x233   : > { %6795 = vmatpush.bf16.msra.mxu1 %v8918_v21  ;;  %v7691_v6 = vor.u32 %v8892_v61, %v7690_v60  ;;  %v7695_v7 = vor.u32 %v8876_v62, %v7692_v63  ;;  %v8951_v10 = vld [vmem:[%s10351_s29 + $0x158] sm:$0xff]  ;;  %v8958_v12 = vld [vmem:[%s10351_s29 + $0x190] sm:$0xff]  ;;  %v8957_v16 = vld [vmem:[%s10351_s29 + $0x188] sm:$0xff] }
 0x234   : > { %6814 = vmatpush.bf16.msra.mxu2 %v8926_v22  ;;  %v8967_v11 = vld [vmem:[%s10351_s29 + $0x1d8] sm:$0xff]  ;;  %v8942_v13 = vld [vmem:[%s10351_s29 + $0x110] sm:$0xff]  ;;  %v8941_v17 = vld [vmem:[%s10351_s29 + $0x108] sm:$0xff] }
 0x235   : > { %6833 = vmatpush.bf16.msra.mxu3 %v8934_v23  ;;  %v8950_v14 = vld [vmem:[%s10351_s29 + $0x150] sm:$0xff]  ;;  %v8949_v18 = vld [vmem:[%s10351_s29 + $0x148] sm:$0xff]  ;;  %v8956_v20 = vld [vmem:[%s10351_s29 + $0x180] sm:$0xff] }
 0x236   : > { %6777 = vmatpush.bf16.msra.mxu0 %v8909_v24  ;;  %v8966_v15 = vld [vmem:[%s10351_s29 + $0x1d0] sm:$0xff]  ;;  %v8965_v19 = vld [vmem:[%s10351_s29 + $0x1c8] sm:$0xff]  ;;  %v8940_v21 = vld [vmem:[%s10351_s29 + $0x100] sm:$0xff] }
 0x237   : > { %6796 = vmatpush.bf16.msra.mxu1 %v8917_v25  ;;  %v8948_v22 = vld [vmem:[%s10351_s29 + $0x140] sm:$0xff]  ;;  %v7578_v24 = vld [vmem:[%s11043_s0 + $0x10] sm:$0xf]  ;;  %v8995_v25 = vld [vmem:[%s10351_s29 + $0x2b8] sm:$0xff] }
 0x238   : > { %6815 = vmatpush.bf16.msra.mxu2 %v8925_v26  ;;  %v8964_v23 = vld [vmem:[%s10351_s29 + $0x1c0] sm:$0xff]  ;;  %v8979_v26 = vld [vmem:[%s10351_s29 + $0x238] sm:$0xff]  ;;  %v7580_v29 = vld [vmem:[%s11043_s0 + $0x90] sm:$0xf0] }
 0x239   : > { %6834 = vmatpush.bf16.msra.mxu3 %v8933_v27  ;;  %v8862_v27 = vld [vmem:[%s11043_s0 + $0x8c] sm:$0xf0]  ;;  %v7586_v30 = vld [vmem:[%s11043_s0 + $0x18] sm:$0xf]  ;;  %v7716_v61 = vld [vmem:[%s11043_s0 + $0x198] sm:$0xf0] }
 0x23a   : > { %6778 = vmatpush.bf16.msra.mxu0 %v8908_v28  ;;  %v8846_v28 = vld [vmem:[%s11043_s0 + $0x14] sm:$0xf]  ;;  %v8987_v34 = vld [vmem:[%s10351_s29 + $0x278] sm:$0xff]  ;;  %v7579_v36 = vor.u32 %v8862_v27, %v7578_v24  ;;  %v7596_v24 = vld [vmem:[%s11043_s0 + $0xa0] sm:$0xf0] }
 0x23b   : > { %6797 = vmatpush.bf16.msra.mxu1 %v8916_v31  ;;  %v8863_v31 = vld [vmem:[%s11043_s0 + $0x94] sm:$0xf0]  ;;  %v8994_v37 = vld [vmem:[%s10351_s29 + $0x2b0] sm:$0xff]  ;;  %v7583_v38 = vor.u32 %v8846_v28, %v7580_v29  ;;  %v8849_v27 = vld [vmem:[%s11043_s0 + $0x2c] sm:$0xf] }
 0x23c   : > { %6816 = vmatpush.bf16.msra.mxu2 %v8924_v32  ;;  %v8847_v32 = vld [vmem:[%s11043_s0 + $0x1c] sm:$0xf]  ;;  %v7587_v39 = vor.u32 %v8863_v31, %v7586_v30  ;;  %v8990_v1 = vld [vmem:[%s10351_s29 + $0x290] sm:$0xff]  ;;  %v7604_v28 = vld [vmem:[%s11043_s0 + $0xa8] sm:$0xf0] }
 0x23d   : > { %6835 = vmatpush.bf16.msra.mxu3 %v8932_v33  ;;  %6779 = vmatmul.bf16.vlgmr.msra.gmra.mxu0 %v7563_v42  ;;  %v7588_v33 = vld [vmem:[%s11043_s0 + $0x98] sm:$0xf0]  ;;  %v8986_v42 = vld [vmem:[%s10351_s29 + $0x270] sm:$0xff] }
 0x23e   : > { %6847 = vmatpush.bf16.msrb.mxu0 %v8947_v41  ;;  %6798 = vmatmul.bf16.vlgmr.msra.gmra.mxu1 %v7567_v43  ;;  %v9003_v35 = vld [vmem:[%s10351_s29 + $0x2f8] sm:$0xff]  ;;  %v8978_v41 = vld [vmem:[%s10351_s29 + $0x230] sm:$0xff] }
 0x23f   : > { %6817 = vmatmul.bf16.vlgmr.msra.gmra.mxu2 %v7571_v44  ;;  %6866 = vmatpush.bf16.msrb.mxu1 %v8955_v46  ;;  %v9002_v43 = vld [vmem:[%s10351_s29 + $0x2f0] sm:$0xff]  ;;  %v8993_v44 = vld [vmem:[%s10351_s29 + $0x2a8] sm:$0xff]  ;;  %v8975_v60 = vld [vmem:[%s10351_s29 + $0x218] sm:$0xff] }
 0x240   : > { %6885 = vmatpush.bf16.msrb.mxu2 %v8963_v40  ;;  %6836 = vmatmul.bf16.vlgmr.msra.gmra.mxu3 %v7575_v45  ;;  %v7591_v40 = vor.u32 %v8847_v32, %v7588_v33  ;;  %v8977_v45 = vld [vmem:[%s10351_s29 + $0x228] sm:$0xff]  ;;  %v8983_v62 = vld [vmem:[%s10351_s29 + $0x258] sm:$0xff]  ;;  %v9018_v30 = vld [vmem:[%s10351_s29 + $0x370] sm:$0xff]  ;;  %v7607_v33 = vor.u32 %v8849_v27, %v7604_v28 }
 0x241   : > { %6904 = vmatpush.bf16.msrb.mxu3 %v8971_v47  ;;  %v8985_v46 = vld [vmem:[%s10351_s29 + $0x268] sm:$0xff]  ;;  %v8999_v63 = vld [vmem:[%s10351_s29 + $0x2d8] sm:$0xff] }
 0x242   : > { %6848 = vmatpush.bf16.msrb.mxu0 %v8946_v49  ;;  %v9001_v47 = vld [vmem:[%s10351_s29 + $0x2e8] sm:$0xff]  ;;  %v8976_v49 = vld [vmem:[%s10351_s29 + $0x220] sm:$0xff] }
 0x243   : > { %6867 = vmatpush.bf16.msrb.mxu1 %v8954_v50  ;;  %v8984_v50 = vld [vmem:[%s10351_s29 + $0x260] sm:$0xff]  ;;  %v9057_v28 = vld [vmem:[%s10351_s29 + $0x4a8] sm:$0xff] }
 0x244   : > { %6886 = vmatpush.bf16.msrb.mxu2 %v8962_v48  ;;  %v8992_v48 = vld [vmem:[%s10351_s29 + $0x2a0] sm:$0xff] }
 0x245   : > { %6905 = vmatpush.bf16.msrb.mxu3 %v8970_v51  ;;  %v9000_v51 = vld [vmem:[%s10351_s29 + $0x2e0] sm:$0xff] }
 0x246   : > { %6849 = vmatpush.bf16.msrb.mxu0 %v8945_v53  ;;  %v8894_v53 = vld [vmem:[%s11043_s0 + $0x18c] sm:$0xf0] }
 0x247   : > { %6868 = vmatpush.bf16.msrb.mxu1 %v8953_v54  ;;  %v8991_v54 = vld [vmem:[%s10351_s29 + $0x298] sm:$0xff] }
 0x248   : > { %6887 = vmatpush.bf16.msrb.mxu2 %v8961_v52  ;;  %v7706_v52 = vld [vmem:[%s11043_s0 + $0x110] sm:$0xf] }
 0x249   : > { %6906 = vmatpush.bf16.msrb.mxu3 %v8969_v55  ;;  %v8878_v55 = vld [vmem:[%s11043_s0 + $0x114] sm:$0xf]  ;;  %v7707_v0 = vor.u32 %v8894_v53, %v7706_v52  ;;  %v8881_v52 = vld [vmem:[%s11043_s0 + $0x12c] sm:$0xf]  ;;  %v9007_v53 = vld [vmem:[%s10351_s29 + $0x318] sm:$0xff] }
 0x24a   : > { %6850 = vmatpush.bf16.msrb.mxu0 %v8944_v57  ;;  %v7714_v57 = vld [vmem:[%s11043_s0 + $0x118] sm:$0xf] }
 0x24b   : > { %6869 = vmatpush.bf16.msrb.mxu1 %v8952_v58  ;;  %v8895_v58 = vld [vmem:[%s11043_s0 + $0x194] sm:$0xf0] }
 0x24c   : > { %6888 = vmatpush.bf16.msrb.mxu2 %v8960_v56  ;;  %v7708_v56 = vld [vmem:[%s11043_s0 + $0x190] sm:$0xf0]  ;;  %v7715_v3 = vor.u32 %v8895_v58, %v7714_v57 }
 0x24d   : > { %6907 = vmatpush.bf16.msrb.mxu3 %v8968_v59  ;;  %6784 = vmatmul.bf16.gmra.mxu0 %v7691_v6  ;;  %v8879_v59 = vld [vmem:[%s11043_s0 + $0x11c] sm:$0xf]  ;;  %v7711_v2 = vor.u32 %v8878_v55, %v7708_v56  ;;  %v8982_v6 = vld [vmem:[%s10351_s29 + $0x250] sm:$0xff] }
 0x24e   : > { %6851 = vmatpush.bf16.msrb.mxu0 %v8943_v5  ;;  %6803 = vmatmul.bf16.gmra.mxu1 %v7695_v7  ;;  %v8974_v5 = vld [vmem:[%s10351_s29 + $0x210] sm:$0xff]  ;;  %v9031_v55 = vld [vmem:[%s10351_s29 + $0x3d8] sm:$0xff] }
 0x24f   : > { %6822 = vmatmul.bf16.gmra.mxu2 %v7699_v8  ;;  %6870 = vmatpush.bf16.msrb.mxu1 %v8951_v10  ;;  %v8998_v7 = vld [vmem:[%s10351_s29 + $0x2d0] sm:$0xff]  ;;  %v8989_v8 = vld [vmem:[%s10351_s29 + $0x288] sm:$0xff] }
 0x250   : > { %6889 = vmatpush.bf16.msrb.mxu2 %v8959_v4  ;;  %6841 = vmatmul.bf16.gmra.mxu3 %v7703_v9  ;;  %v7719_v4 = vor.u32 %v8879_v59, %v7716_v61  ;;  %v8973_v9 = vld [vmem:[%s10351_s29 + $0x208] sm:$0xff]  ;;  %v9022_v56 = vld [vmem:[%s10351_s29 + $0x390] sm:$0xff] }
 0x251   : > { %6908 = vmatpush.bf16.msrb.mxu3 %v8967_v11  ;;  %v8981_v10 = vld [vmem:[%s10351_s29 + $0x248] sm:$0xff]  ;;  %v9014_v58 = vld [vmem:[%s10351_s29 + $0x350] sm:$0xff] }
 0x252   : > { %6852 = vmatpush.bf16.msrb.mxu0 %v8942_v13  ;;  %v8997_v11 = vld [vmem:[%s10351_s29 + $0x2c8] sm:$0xff]  ;;  %v9027_v13 = vld [vmem:[%s10351_s29 + $0x3b8] sm:$0xff] }
 0x253   : > { %6871 = vmatpush.bf16.msrb.mxu1 %v8950_v14  ;;  %v8972_v14 = vld [vmem:[%s10351_s29 + $0x200] sm:$0xff] }
 0x254   : > { %6890 = vmatpush.bf16.msrb.mxu2 %v8958_v12  ;;  %v8988_v12 = vld [vmem:[%s10351_s29 + $0x280] sm:$0xff] }
 0x255   : > { %6909 = vmatpush.bf16.msrb.mxu3 %v8966_v15  ;;  %v8980_v15 = vld [vmem:[%s10351_s29 + $0x240] sm:$0xff] }
 0x256   : > { %6853 = vmatpush.bf16.msrb.mxu0 %v8941_v17  ;;  %v7594_v17 = vld [vmem:[%s11043_s0 + $0x20] sm:$0xf] }
 0x257   : > { %6872 = vmatpush.bf16.msrb.mxu1 %v8949_v18  ;;  %v8864_v18 = vld [vmem:[%s11043_s0 + $0x9c] sm:$0xf0] }
 0x258   : > { %6891 = vmatpush.bf16.msrb.mxu2 %v8957_v16  ;;  %v8996_v16 = vld [vmem:[%s10351_s29 + $0x2c0] sm:$0xff]  ;;  %v7595_v29 = vor.u32 %v8864_v18, %v7594_v17  ;;  %v7612_v17 = vld [vmem:[%s11043_s0 + $0xb0] sm:$0xf0]  ;;  %v7618_v18 = vld [vmem:[%s11043_s0 + $0x38] sm:$0xf] }
 0x259   : > { %6910 = vmatpush.bf16.msrb.mxu3 %v8965_v19  ;;  %v9011_v19 = vld [vmem:[%s10351_s29 + $0x338] sm:$0xff] }
 0x25a   : > { %6854 = vmatpush.bf16.msrb.mxu0 %v8940_v21  ;;  %v8848_v21 = vld [vmem:[%s11043_s0 + $0x24] sm:$0xf] }
 0x25b   : > { %6873 = vmatpush.bf16.msrb.mxu1 %v8948_v22  ;;  %v9035_v22 = vld [vmem:[%s10351_s29 + $0x3f8] sm:$0xff]  ;;  %v7599_v31 = vor.u32 %v8848_v21, %v7596_v24  ;;  %v9066_v24 = vld [vmem:[%s10351_s29 + $0x4f0] sm:$0xff] }
 0x25c   : > { %6892 = vmatpush.bf16.msrb.mxu2 %v8956_v20  ;;  %v9019_v20 = vld [vmem:[%s10351_s29 + $0x378] sm:$0xff] }
 0x25d   : > { %6911 = vmatpush.bf16.msrb.mxu3 %v8964_v23  ;;  %6855 = vmatmul.bf16.vlgmr.msrb.gmra.mxu0 %v7579_v36  ;;  %v9026_v23 = vld [vmem:[%s10351_s29 + $0x3b0] sm:$0xff]  ;;  %v9025_v36 = vld [vmem:[%s10351_s29 + $0x3a8] sm:$0xff]  ;;  %v7620_v21 = vld [vmem:[%s11043_s0 + $0xb8] sm:$0xf0] }
 0x25e   : > { %6923 = vmatpush.bf16.msra.mxu0 %v8979_v26  ;;  %6874 = vmatmul.bf16.vlgmr.msrb.gmra.mxu1 %v7583_v38  ;;  %v8865_v26 = vld [vmem:[%s11043_s0 + $0xa4] sm:$0xf0] }
 0x25f   : > { %6942 = vmatpush.bf16.msra.mxu1 %v8987_v34  ;;  %6893 = vmatmul.bf16.vlgmr.msrb.gmra.mxu2 %v7587_v39  ;;  %v9010_v34 = vld [vmem:[%s10351_s29 + $0x330] sm:$0xff]  ;;  %v9009_v38 = vld [vmem:[%s10351_s29 + $0x328] sm:$0xff] }
 0x260   : > { %6961 = vmatpush.bf16.msra.mxu2 %v8995_v25  ;;  %6912 = vmatmul.bf16.vlgmr.msrb.gmra.mxu3 %v7591_v40  ;;  %v7602_v25 = vld [vmem:[%s11043_s0 + $0x28] sm:$0xf]  ;;  %v9024_v40 = vld [vmem:[%s10351_s29 + $0x3a0] sm:$0xff] }
 0x261   : > { %6980 = vmatpush.bf16.msra.mxu3 %v9003_v35  ;;  %v7603_v32 = vor.u32 %v8865_v26, %v7602_v25  ;;  %v9034_v35 = vld [vmem:[%s10351_s29 + $0x3f0] sm:$0xff]  ;;  %v9033_v39 = vld [vmem:[%s10351_s29 + $0x3e8] sm:$0xff] }
 0x262   : > { %6924 = vmatpush.bf16.msra.mxu0 %v8978_v41  ;;  %v9016_v41 = vld [vmem:[%s10351_s29 + $0x360] sm:$0xff] }
 0x263   : > { %6943 = vmatpush.bf16.msra.mxu1 %v8986_v42  ;;  %v9008_v42 = vld [vmem:[%s10351_s29 + $0x320] sm:$0xff] }
 0x264   : > { %6962 = vmatpush.bf16.msra.mxu2 %v8994_v37  ;;  %v9017_v37 = vld [vmem:[%s10351_s29 + $0x368] sm:$0xff] }
 0x265   : > { %6981 = vmatpush.bf16.msra.mxu3 %v9002_v43  ;;  %v9032_v43 = vld [vmem:[%s10351_s29 + $0x3e0] sm:$0xff] }
 0x266   : > { %6925 = vmatpush.bf16.msra.mxu0 %v8977_v45  ;;  %v7722_v45 = vld [vmem:[%s11043_s0 + $0x120] sm:$0xf] }
 0x267   : > { %6944 = vmatpush.bf16.msra.mxu1 %v8985_v46  ;;  %v8896_v46 = vld [vmem:[%s11043_s0 + $0x19c] sm:$0xf0] }
 0x268   : > { %6963 = vmatpush.bf16.msra.mxu2 %v8993_v44  ;;  %v9023_v44 = vld [vmem:[%s10351_s29 + $0x398] sm:$0xff]  ;;  %v7723_v57 = vor.u32 %v8896_v46, %v7722_v45 }
 0x269   : > { %6982 = vmatpush.bf16.msra.mxu3 %v9001_v47  ;;  %v9015_v47 = vld [vmem:[%s10351_s29 + $0x358] sm:$0xff] }
 0x26a   : > { %6926 = vmatpush.bf16.msra.mxu0 %v8976_v49  ;;  %v7724_v49 = vld [vmem:[%s11043_s0 + $0x1a0] sm:$0xf0]  ;;  %v8899_v45 = vld [vmem:[%s11043_s0 + $0x1b4] sm:$0xf0]  ;;  %v8883_v46 = vld [vmem:[%s11043_s0 + $0x13c] sm:$0xf] }
 0x26b   : > { %6945 = vmatpush.bf16.msra.mxu1 %v8984_v50  ;;  %v7730_v50 = vld [vmem:[%s11043_s0 + $0x128] sm:$0xf] }
 0x26c   : > { %6964 = vmatpush.bf16.msra.mxu2 %v8992_v48  ;;  %v8880_v48 = vld [vmem:[%s11043_s0 + $0x124] sm:$0xf] }
 0x26d   : > { %6983 = vmatpush.bf16.msra.mxu3 %v9000_v51  ;;  %6860 = vmatmul.bf16.gmra.mxu0 %v7707_v0  ;;  %v8897_v51 = vld [vmem:[%s11043_s0 + $0x1a4] sm:$0xf0]  ;;  %v7727_v59 = vor.u32 %v8880_v48, %v7724_v49  ;;  %v7748_v48 = vld [vmem:[%s11043_s0 + $0x1b8] sm:$0xf0]  ;;  %v9038_v49 = vld [vmem:[%s10351_s29 + $0x410] sm:$0xff] }
 0x26e   : > { %6927 = vmatpush.bf16.msra.mxu0 %v8975_v60  ;;  %6879 = vmatmul.bf16.gmra.mxu1 %v7711_v2  ;;  %v7731_v60 = vor.u32 %v8897_v51, %v7730_v50  ;;  %v9021_v0 = vld [vmem:[%s10351_s29 + $0x388] sm:$0xff]  ;;  %v9046_v50 = vld [vmem:[%s10351_s29 + $0x450] sm:$0xff] }
 0x26f   : > { %6946 = vmatpush.bf16.msra.mxu1 %v8983_v62  ;;  %6898 = vmatmul.bf16.gmra.mxu2 %v7715_v3  ;;  %v9006_v62 = vld [vmem:[%s10351_s29 + $0x310] sm:$0xff]  ;;  %v9005_v2 = vld [vmem:[%s10351_s29 + $0x308] sm:$0xff] }
 0x270   : > { %6965 = vmatpush.bf16.msra.mxu2 %v8991_v54  ;;  %6917 = vmatmul.bf16.gmra.mxu3 %v7719_v4  ;;  %v7732_v54 = vld [vmem:[%s11043_s0 + $0x1a8] sm:$0xf0]  ;;  %v9020_v4 = vld [vmem:[%s10351_s29 + $0x380] sm:$0xff] }
 0x271   : > { %6984 = vmatpush.bf16.msra.mxu3 %v8999_v63  ;;  %v7735_v61 = vor.u32 %v8881_v52, %v7732_v54  ;;  %v9030_v63 = vld [vmem:[%s10351_s29 + $0x3d0] sm:$0xff]  ;;  %v9029_v3 = vld [vmem:[%s10351_s29 + $0x3c8] sm:$0xff] }
 0x272   : > { %6928 = vmatpush.bf16.msra.mxu0 %v8974_v5  ;;  %v9012_v5 = vld [vmem:[%s10351_s29 + $0x340] sm:$0xff]  ;;  %v9062_v52 = vld [vmem:[%s10351_s29 + $0x4d0] sm:$0xff] }
 0x273   : > { %6947 = vmatpush.bf16.msra.mxu1 %v8982_v6  ;;  %v9059_v6 = vld [vmem:[%s10351_s29 + $0x4b8] sm:$0xff] }
 0x274   : > { %6966 = vmatpush.bf16.msra.mxu2 %v8990_v1  ;;  %v9013_v1 = vld [vmem:[%s10351_s29 + $0x348] sm:$0xff] }
 0x275   : > { %6985 = vmatpush.bf16.msra.mxu3 %v8998_v7  ;;  %v9051_v7 = vld [vmem:[%s10351_s29 + $0x478] sm:$0xff] }
 0x276   : > { %6929 = vmatpush.bf16.msra.mxu0 %v8973_v9  ;;  %v9028_v9 = vld [vmem:[%s10351_s29 + $0x3c0] sm:$0xff] }
 0x277   : > { %6948 = vmatpush.bf16.msra.mxu1 %v8981_v10  ;;  %v9043_v10 = vld [vmem:[%s10351_s29 + $0x438] sm:$0xff] }
 0x278   : > { %6967 = vmatpush.bf16.msra.mxu2 %v8989_v8  ;;  %v9004_v8 = vld [vmem:[%s10351_s29 + $0x300] sm:$0xff] }
 0x279   : > { %6986 = vmatpush.bf16.msra.mxu3 %v8997_v11  ;;  %v7610_v11 = vld [vmem:[%s11043_s0 + $0x30] sm:$0xf] }
 0x27a   : > { %6930 = vmatpush.bf16.msra.mxu0 %v8972_v14  ;;  %v8866_v14 = vld [vmem:[%s11043_s0 + $0xac] sm:$0xf0] }
 0x27b   : > { %6949 = vmatpush.bf16.msra.mxu1 %v8980_v15  ;;  %v8850_v15 = vld [vmem:[%s11043_s0 + $0x34] sm:$0xf] }
 0x27c   : > { %6968 = vmatpush.bf16.msra.mxu2 %v8988_v12  ;;  %v9067_v12 = vld [vmem:[%s10351_s29 + $0x4f8] sm:$0xff]  ;;  %v7615_v25 = vor.u32 %v8850_v15, %v7612_v17  ;;  %v7636_v15 = vld [vmem:[%s11043_s0 + $0xc8] sm:$0xf0] }
 0x27d   : > { %6987 = vmatpush.bf16.msra.mxu3 %v8996_v16  ;;  %6931 = vmatmul.bf16.vlgmr.msra.gmra.mxu0 %v7595_v29  ;;  %v9050_v16 = vld [vmem:[%s10351_s29 + $0x470] sm:$0xff]  ;;  %v9041_v29 = vld [vmem:[%s10351_s29 + $0x428] sm:$0xff] }
 0x27e   : > { %6999 = vmatpush.bf16.msrb.mxu0 %v9011_v19  ;;  %6950 = vmatmul.bf16.vlgmr.msra.gmra.mxu1 %v7599_v31  ;;  %v8867_v19 = vld [vmem:[%s11043_s0 + $0xb4] sm:$0xf0]  ;;  %v9065_v31 = vld [vmem:[%s10351_s29 + $0x4e8] sm:$0xff] }
 0x27f   : > { %7018 = vmatpush.bf16.msrb.mxu1 %v9019_v20  ;;  %6969 = vmatmul.bf16.vlgmr.msra.gmra.mxu2 %v7603_v32  ;;  %v8851_v20 = vld [vmem:[%s11043_s0 + $0x3c] sm:$0xf]  ;;  %v7619_v26 = vor.u32 %v8867_v19, %v7618_v18  ;;  %v9056_v32 = vld [vmem:[%s10351_s29 + $0x4a0] sm:$0xff]  ;;  %v9089_v17 = vld [vmem:[%s10351_s29 + $0x5a8] sm:$0xff] }
 0x280   : > { %7037 = vmatpush.bf16.msrb.mxu2 %v9027_v13  ;;  %6988 = vmatmul.bf16.vlgmr.msra.gmra.mxu3 %v7607_v33  ;;  %v9058_v13 = vld [vmem:[%s10351_s29 + $0x4b0] sm:$0xff]  ;;  %v7623_v27 = vor.u32 %v8851_v20, %v7620_v21  ;;  %v9040_v33 = vld [vmem:[%s10351_s29 + $0x420] sm:$0xff] }
 0x281   : > { %7056 = vmatpush.bf16.msrb.mxu3 %v9035_v22  ;;  %v9042_v22 = vld [vmem:[%s10351_s29 + $0x430] sm:$0xff] }
 0x282   : > { %7000 = vmatpush.bf16.msrb.mxu0 %v9010_v34  ;;  %v9048_v34 = vld [vmem:[%s10351_s29 + $0x460] sm:$0xff] }
 0x283   : > { %7019 = vmatpush.bf16.msrb.mxu1 %v9018_v30  ;;  %v9049_v30 = vld [vmem:[%s10351_s29 + $0x468] sm:$0xff] }
 0x284   : > { %7038 = vmatpush.bf16.msrb.mxu2 %v9026_v23  ;;  %v7611_v23 = vor.u32 %v8866_v14, %v7610_v11  ;;  %v7634_v11 = vld [vmem:[%s11043_s0 + $0x48] sm:$0xf]  ;;  %v8853_v14 = vld [vmem:[%s11043_s0 + $0x4c] sm:$0xf] }
 0x285   : > { %7057 = vmatpush.bf16.msrb.mxu3 %v9034_v35  ;;  %v9064_v35 = vld [vmem:[%s10351_s29 + $0x4e0] sm:$0xff] }
 0x286   : > { %7001 = vmatpush.bf16.msrb.mxu0 %v9009_v38  ;;  %v9047_v38 = vld [vmem:[%s10351_s29 + $0x458] sm:$0xff] }
 0x287   : > { %7020 = vmatpush.bf16.msrb.mxu1 %v9017_v37  ;;  %v9039_v37 = vld [vmem:[%s10351_s29 + $0x418] sm:$0xff] }
 0x288   : > { %7039 = vmatpush.bf16.msrb.mxu2 %v9025_v36  ;;  %v9055_v36 = vld [vmem:[%s10351_s29 + $0x498] sm:$0xff] }
 0x289   : > { %7058 = vmatpush.bf16.msrb.mxu3 %v9033_v39  ;;  %v7738_v39 = vld [vmem:[%s11043_s0 + $0x130] sm:$0xf] }
 0x28a   : > { %7002 = vmatpush.bf16.msrb.mxu0 %v9008_v42  ;;  %v8882_v42 = vld [vmem:[%s11043_s0 + $0x134] sm:$0xf] }
 0x28b   : > { %7021 = vmatpush.bf16.msrb.mxu1 %v9016_v41  ;;  %v9063_v41 = vld [vmem:[%s10351_s29 + $0x4d8] sm:$0xff] }
 0x28c   : > { %7040 = vmatpush.bf16.msrb.mxu2 %v9024_v40  ;;  %v8898_v40 = vld [vmem:[%s11043_s0 + $0x1ac] sm:$0xf0] }
 0x28d   : > { %7059 = vmatpush.bf16.msrb.mxu3 %v9032_v43  ;;  %6936 = vmatmul.bf16.gmra.mxu0 %v7723_v57  ;;  %v7740_v43 = vld [vmem:[%s11043_s0 + $0x1b0] sm:$0xf0]  ;;  %v7739_v51 = vor.u32 %v8898_v40, %v7738_v39  ;;  %v9037_v57 = vld [vmem:[%s10351_s29 + $0x408] sm:$0xff]  ;;  %v9079_v40 = vld [vmem:[%s10351_s29 + $0x558] sm:$0xff] }
 0x28e   : > { %7003 = vmatpush.bf16.msrb.mxu0 %v9007_v53  ;;  %6955 = vmatmul.bf16.gmra.mxu1 %v7727_v59  ;;  %v7743_v53 = vor.u32 %v8882_v42, %v7740_v43  ;;  %v9061_v59 = vld [vmem:[%s10351_s29 + $0x4c8] sm:$0xff]  ;;  %v7754_v42 = vld [vmem:[%s11043_s0 + $0x140] sm:$0xf] }
 0x28f   : > { %7022 = vmatpush.bf16.msrb.mxu1 %v9015_v47  ;;  %6974 = vmatmul.bf16.gmra.mxu2 %v7731_v60  ;;  %v9054_v47 = vld [vmem:[%s10351_s29 + $0x490] sm:$0xff]  ;;  %v9052_v60 = vld [vmem:[%s10351_s29 + $0x480] sm:$0xff] }
 0x290   : > { %7041 = vmatpush.bf16.msrb.mxu2 %v9023_v44  ;;  %6993 = vmatmul.bf16.gmra.mxu3 %v7735_v61  ;;  %v7746_v44 = vld [vmem:[%s11043_s0 + $0x138] sm:$0xf]  ;;  %v9036_v61 = vld [vmem:[%s10351_s29 + $0x400] sm:$0xff] }
 0x291   : > { %7060 = vmatpush.bf16.msrb.mxu3 %v9031_v55  ;;  %v7747_v54 = vor.u32 %v8899_v45, %v7746_v44  ;;  %v7751_v55 = vor.u32 %v8883_v46, %v7748_v48  ;;  %v8900_v43 = vld [vmem:[%s11043_s0 + $0x1bc] sm:$0xf0]  ;;  %v9086_v44 = vld [vmem:[%s10351_s29 + $0x590] sm:$0xff]  ;;  %v8884_v45 = vld [vmem:[%s11043_s0 + $0x144] sm:$0xf] }
 0x292   : > { %7004 = vmatpush.bf16.msrb.mxu0 %v9006_v62  ;;  %v9044_v62 = vld [vmem:[%s10351_s29 + $0x440] sm:$0xff]  ;;  %v8901_v48 = vld [vmem:[%s11043_s0 + $0x1c4] sm:$0xf0] }
 0x293   : > { %7023 = vmatpush.bf16.msrb.mxu1 %v9014_v58  ;;  %v9045_v58 = vld [vmem:[%s10351_s29 + $0x448] sm:$0xff]  ;;  %v7756_v46 = vld [vmem:[%s11043_s0 + $0x1c0] sm:$0xf0] }
 0x294   : > { %7042 = vmatpush.bf16.msrb.mxu2 %v9022_v56  ;;  %v9053_v56 = vld [vmem:[%s10351_s29 + $0x488] sm:$0xff] }
 0x295   : > { %7061 = vmatpush.bf16.msrb.mxu3 %v9030_v63  ;;  %v9060_v63 = vld [vmem:[%s10351_s29 + $0x4c0] sm:$0xff] }
 0x296   : > { %7005 = vmatpush.bf16.msrb.mxu0 %v9005_v2  ;;  %v9083_v2 = vld [vmem:[%s10351_s29 + $0x578] sm:$0xff] }
 0x297   : > { %7024 = vmatpush.bf16.msrb.mxu1 %v9013_v1  ;;  %v9075_v1 = vld [vmem:[%s10351_s29 + $0x538] sm:$0xff] }
 0x298   : > { %7043 = vmatpush.bf16.msrb.mxu2 %v9021_v0  ;;  %v9091_v0 = vld [vmem:[%s10351_s29 + $0x5b8] sm:$0xff] }
 0x299   : > { %7062 = vmatpush.bf16.msrb.mxu3 %v9029_v3  ;;  %v9099_v3 = vld [vmem:[%s10351_s29 + $0x5f8] sm:$0xff] }
 0x29a   : > { %7006 = vmatpush.bf16.msrb.mxu0 %v9004_v8  ;;  %v7628_v8 = vld [vmem:[%s11043_s0 + $0xc0] sm:$0xf0] }
 0x29b   : > { %7025 = vmatpush.bf16.msrb.mxu1 %v9012_v5  ;;  %v8868_v5 = vld [vmem:[%s11043_s0 + $0xbc] sm:$0xf0] }
 0x29c   : > { %7044 = vmatpush.bf16.msrb.mxu2 %v9020_v4  ;;  %v7626_v4 = vld [vmem:[%s11043_s0 + $0x40] sm:$0xf] }
 0x29d   : > { %7063 = vmatpush.bf16.msrb.mxu3 %v9028_v9  ;;  %7007 = vmatmul.bf16.vlgmr.msrb.gmra.mxu0 %v7611_v23  ;;  %v9074_v9 = vld [vmem:[%s10351_s29 + $0x530] sm:$0xff]  ;;  %v7639_v23 = vor.u32 %v8853_v14, %v7636_v15 }
 0x29e   : > { %7075 = vmatpush.bf16.msra.mxu0 %v9043_v10  ;;  %7026 = vmatmul.bf16.vlgmr.msrb.gmra.mxu1 %v7615_v25  ;;  %v9082_v10 = vld [vmem:[%s10351_s29 + $0x570] sm:$0xff]  ;;  %v9081_v25 = vld [vmem:[%s10351_s29 + $0x568] sm:$0xff] }
 0x29f   : > { %7094 = vmatpush.bf16.msra.mxu1 %v9051_v7  ;;  %7045 = vmatmul.bf16.vlgmr.msrb.gmra.mxu2 %v7619_v26  ;;  %v9090_v7 = vld [vmem:[%s10351_s29 + $0x5b0] sm:$0xff]  ;;  %v9097_v26 = vld [vmem:[%s10351_s29 + $0x5e8] sm:$0xff] }
 0x2a0   : > { %7113 = vmatpush.bf16.msra.mxu2 %v9059_v6  ;;  %7064 = vmatmul.bf16.vlgmr.msrb.gmra.mxu3 %v7623_v27  ;;  %v8852_v6 = vld [vmem:[%s11043_s0 + $0x44] sm:$0xf] }
 0x2a1   : > { %7132 = vmatpush.bf16.msra.mxu3 %v9067_v12  ;;  %v8869_v12 = vld [vmem:[%s11043_s0 + $0xc4] sm:$0xf0]  ;;  %v7631_v20 = vor.u32 %v8852_v6, %v7628_v8  ;;  %v9088_v27 = vld [vmem:[%s10351_s29 + $0x5a0] sm:$0xff]  ;;  %v9123_v6 = vld [vmem:[%s10351_s29 + $0x6b8] sm:$0xff] }
 0x2a2   : > { %7076 = vmatpush.bf16.msra.mxu0 %v9042_v22  ;;  %v7635_v21 = vor.u32 %v8869_v12, %v7634_v11  ;;  %v9076_v8 = vld [vmem:[%s10351_s29 + $0x540] sm:$0xff]  ;;  %v9107_v12 = vld [vmem:[%s10351_s29 + $0x638] sm:$0xff] }
 0x2a3   : > { %7095 = vmatpush.bf16.msra.mxu1 %v9050_v16  ;;  %v7627_v16 = vor.u32 %v8868_v5, %v7626_v4  ;;  %v9093_v4 = vld [vmem:[%s10351_s29 + $0x5c8] sm:$0xff]  ;;  %v9084_v5 = vld [vmem:[%s10351_s29 + $0x580] sm:$0xff] }
 0x2a4   : > { %7114 = vmatpush.bf16.msra.mxu2 %v9058_v13  ;;  %v9098_v13 = vld [vmem:[%s10351_s29 + $0x5f0] sm:$0xff] }
 0x2a5   : > { %7133 = vmatpush.bf16.msra.mxu3 %v9066_v24  ;;  %v9073_v24 = vld [vmem:[%s10351_s29 + $0x528] sm:$0xff] }
 0x2a6   : > { %7077 = vmatpush.bf16.msra.mxu0 %v9041_v29  ;;  %v9080_v29 = vld [vmem:[%s10351_s29 + $0x560] sm:$0xff] }
 0x2a7   : > { %7096 = vmatpush.bf16.msra.mxu1 %v9049_v30  ;;  %v9096_v30 = vld [vmem:[%s10351_s29 + $0x5e0] sm:$0xff] }
 0x2a8   : > { %7115 = vmatpush.bf16.msra.mxu2 %v9057_v28  ;;  %v9072_v28 = vld [vmem:[%s10351_s29 + $0x520] sm:$0xff] }
 0x2a9   : > { %7134 = vmatpush.bf16.msra.mxu3 %v9065_v31 }
 0x2aa   : > { %7078 = vmatpush.bf16.msra.mxu0 %v9040_v33  ;;  %v9087_v33 = vld [vmem:[%s10351_s29 + $0x598] sm:$0xff] }
 0x2ab   : > { %7097 = vmatpush.bf16.msra.mxu1 %v9048_v34 }
 0x2ac   : > { %7116 = vmatpush.bf16.msra.mxu2 %v9056_v32 }
 0x2ad   : > { %7135 = vmatpush.bf16.msra.mxu3 %v9064_v35  ;;  %7012 = vmatmul.bf16.gmra.mxu0 %v7739_v51  ;;  %v7764_v51 = vld [vmem:[%s11043_s0 + $0x1c8] sm:$0xf0] }
 0x2ae   : > { %7079 = vmatpush.bf16.msra.mxu0 %v9039_v37  ;;  %7031 = vmatmul.bf16.gmra.mxu1 %v7743_v53  ;;  %v9094_v53 = vld [vmem:[%s10351_s29 + $0x5d0] sm:$0xff] }
 0x2af   : > { %7098 = vmatpush.bf16.msra.mxu1 %v9047_v38  ;;  %7050 = vmatmul.bf16.gmra.mxu2 %v7747_v54  ;;  %v9071_v38 = vld [vmem:[%s10351_s29 + $0x518] sm:$0xff] }
 0x2b0   : > { %7117 = vmatpush.bf16.msra.mxu2 %v9055_v36  ;;  %7069 = vmatmul.bf16.gmra.mxu3 %v7751_v55 }
 0x2b1   : > { %7136 = vmatpush.bf16.msra.mxu3 %v9063_v41  ;;  %v9095_v41 = vld [vmem:[%s10351_s29 + $0x5d8] sm:$0xff] }
 0x2b2   : > { %7080 = vmatpush.bf16.msra.mxu0 %v9038_v49  ;;  %v8885_v49 = vld [vmem:[%s11043_s0 + $0x14c] sm:$0xf] }
 0x2b3   : > { %7099 = vmatpush.bf16.msra.mxu1 %v9046_v50  ;;  %v9070_v50 = vld [vmem:[%s10351_s29 + $0x510] sm:$0xff] }
 0x2b4   : > { %7118 = vmatpush.bf16.msra.mxu2 %v9054_v47  ;;  %v7762_v47 = vld [vmem:[%s11043_s0 + $0x148] sm:$0xf] }
 0x2b5   : > { %7137 = vmatpush.bf16.msra.mxu3 %v9062_v52  ;;  %v9078_v52 = vld [vmem:[%s10351_s29 + $0x550] sm:$0xff] }
 0x2b6   : > { %7081 = vmatpush.bf16.msra.mxu0 %v9037_v57  ;;  %v9085_v57 = vld [vmem:[%s10351_s29 + $0x588] sm:$0xff] }
 0x2b7   : > { %7100 = vmatpush.bf16.msra.mxu1 %v9045_v58 }
 0x2b8   : > { %7119 = vmatpush.bf16.msra.mxu2 %v9053_v56  ;;  %v7755_v56 = vor.u32 %v8900_v43, %v7754_v42 }
 0x2b9   : > { %7138 = vmatpush.bf16.msra.mxu3 %v9061_v59 }
 0x2ba   : > { %7082 = vmatpush.bf16.msra.mxu0 %v9036_v61  ;;  %v6780_v18 = vpop.f32.mrf.mxu0  ;;  %v7759_v61 = vor.u32 %v8884_v45, %v7756_v46  ;;  %v9105_v45 = vld [vmem:[%s10351_s29 + $0x628] sm:$0xff] }
 0x2bb   : > { %7101 = vmatpush.bf16.msra.mxu1 %v9044_v62  ;;  %v6799_v19 = vpop.f32.mrf.mxu1  ;;  %v7763_v62 = vor.u32 %v8901_v48, %v7762_v47  ;;  %v9129_v47 = vld [vmem:[%s10351_s29 + $0x6e8] sm:$0xff]  ;;  %v9120_v48 = vld [vmem:[%s10351_s29 + $0x6a0] sm:$0xff] }
 0x2bc   : > { %7120 = vmatpush.bf16.msra.mxu2 %v9052_v60  ;;  %v6800_v22 = vadd.f32 %v6799_v19, %v6780_v18  ;;  %v9122_v18 = vld [vmem:[%s10351_s29 + $0x6b0] sm:$0xff] }
 0x2bd   : > { %7139 = vmatpush.bf16.msra.mxu3 %v9060_v63  ;;  %7083 = vmatmul.bf16.vlgmr.msra.gmra.mxu0 %v7627_v16 }
 0x2be   : > { %7151 = vmatpush.bf16.msrb.mxu0 %v9075_v1  ;;  %7102 = vmatmul.bf16.vlgmr.msra.gmra.mxu1 %v7631_v20  ;;  %v9069_v1 = vld [vmem:[%s10351_s29 + $0x508] sm:$0xff] }
 0x2bf   : > { %7170 = vmatpush.bf16.msrb.mxu1 %v9083_v2  ;;  %7121 = vmatmul.bf16.vlgmr.msra.gmra.mxu2 %v7635_v21  ;;  %v7642_v21 = vld [vmem:[%s11043_s0 + $0x50] sm:$0xf] }
 0x2c0   : > { %7189 = vmatpush.bf16.msrb.mxu2 %v9091_v0  ;;  %7140 = vmatmul.bf16.vlgmr.msra.gmra.mxu3 %v7639_v23  ;;  %v7767_v0 = vor.u32 %v8885_v49, %v7764_v51  ;;  %v9106_v23 = vld [vmem:[%s10351_s29 + $0x630] sm:$0xff]  ;;  %v9128_v51 = vld [vmem:[%s10351_s29 + $0x6e0] sm:$0xff] }
 0x2c1   : > { %7208 = vmatpush.bf16.msrb.mxu3 %v9099_v3  ;;  %v9077_v3 = vld [vmem:[%s10351_s29 + $0x548] sm:$0xff] }
 0x2c2   : > { %7152 = vmatpush.bf16.msrb.mxu0 %v9074_v9  ;;  %v6818_v31 = vpop.f32.mrf.mxu2  ;;  %v6782_v35 = vpop.f32.mrf.mxu0  ;;  %v9092_v9 = vld [vmem:[%s10351_s29 + $0x5c0] sm:$0xff] }
 0x2c3   : > { %7171 = vmatpush.bf16.msrb.mxu1 %v9082_v10  ;;  %v6837_v32 = vpop.f32.mrf.mxu3  ;;  %v6819_v34 = vadd.f32 %v6818_v31, %v6800_v22  ;;  %v6801_v36 = vpop.f32.mrf.mxu1  ;;  %v8870_v22 = vld [vmem:[%s11043_s0 + $0xcc] sm:$0xf0]  ;;  %v8855_v31 = vld [vmem:[%s11043_s0 + $0x5c] sm:$0xf] }
 0x2c4   : > { %7190 = vmatpush.bf16.msrb.mxu2 %v9090_v7  ;;  %v6802_v37 = vadd.f32 %v6801_v36, %v6782_v35  ;;  %v9068_v7 = vld [vmem:[%s10351_s29 + $0x500] sm:$0xff]  ;;  %v7643_v35 = vor.u32 %v8870_v22, %v7642_v21  ;;  %v9113_v36 = vld [vmem:[%s10351_s29 + $0x668] sm:$0xff] }
 0x2c5   : > { %7209 = vmatpush.bf16.msrb.mxu3 %v9098_v13  ;;  %v10747_v39 = vadd.f32 %v6837_v32, %v6819_v34  ;;  %v9115_v13 = vld [vmem:[%s10351_s29 + $0x678] sm:$0xff] }
 0x2c6   : > { %7153 = vmatpush.bf16.msrb.mxu0 %v9073_v24  ;;  %v9114_v24 = vld [vmem:[%s10351_s29 + $0x670] sm:$0xff]  ;;  %v7652_v32 = vld [vmem:[%s11043_s0 + $0xd8] sm:$0xf0] }
 0x2c7   : > { %7172 = vmatpush.bf16.msrb.mxu1 %v9081_v25  ;;  %v8854_v25 = vld [vmem:[%s11043_s0 + $0x54] sm:$0xf] }
 0x2c8   : > { %7191 = vmatpush.bf16.msrb.mxu2 %v9089_v17  ;;  %v9131_v17 = vld [vmem:[%s10351_s29 + $0x6f8] sm:$0xff] }
 0x2c9   : > { %7210 = vmatpush.bf16.msrb.mxu3 %v9097_v26  ;;  %v9130_v26 = vld [vmem:[%s10351_s29 + $0x6f0] sm:$0xff] }
 0x2ca   : > { %7154 = vmatpush.bf16.msrb.mxu0 %v9072_v28  ;;  %v6820_v54 = vpop.f32.mrf.mxu2  ;;  %v6785_v59 = vpop.f32.mrf.mxu0  ;;  %v7644_v28 = vld [vmem:[%s11043_s0 + $0xd0] sm:$0xf0] }
 0x2cb   : > { %7173 = vmatpush.bf16.msrb.mxu1 %v9080_v29  ;;  %v6839_v55 = vpop.f32.mrf.mxu3  ;;  %v6821_v58 = vadd.f32 %v6820_v54, %v6802_v37  ;;  %v6804_v60 = vpop.f32.mrf.mxu1  ;;  %v7650_v29 = vld [vmem:[%s11043_s0 + $0x58] sm:$0xf] }
 0x2cc   : > { %7192 = vmatpush.bf16.msrb.mxu2 %v9088_v27  ;;  %v6805_v63 = vadd.f32 %v6804_v60, %v6785_v59  ;;  %v9121_v27 = vld [vmem:[%s10351_s29 + $0x6a8] sm:$0xff]  ;;  %v9111_v54 = vld [vmem:[%s10351_s29 + $0x658] sm:$0xff] }
 0x2cd   : > { %7211 = vmatpush.bf16.msrb.mxu3 %v9096_v30  ;;  %v10781_v2 = vadd.f32 %v6839_v55, %v6821_v58  ;;  %7088 = vmatmul.bf16.gmra.mxu0 %v7755_v56  ;;  %v8871_v30 = vld [vmem:[%s11043_s0 + $0xd4] sm:$0xf0] }
 0x2ce   : > { %7155 = vmatpush.bf16.msrb.mxu0 %v9071_v38  ;;  %7107 = vmatmul.bf16.gmra.mxu1 %v7759_v61  ;;  %v9103_v60 = vld [vmem:[%s10351_s29 + $0x618] sm:$0xff] }
 0x2cf   : > { %7174 = vmatpush.bf16.msrb.mxu1 %v9079_v40  ;;  %7126 = vmatmul.bf16.gmra.mxu2 %v7763_v62  ;;  %v7647_v40 = vor.u32 %v8854_v25, %v7644_v28  ;;  %v9127_v62 = vld [vmem:[%s10351_s29 + $0x6d8] sm:$0xff]  ;;  %v9101_v25 = vld [vmem:[%s10351_s29 + $0x608] sm:$0xff]  ;;  %v9116_v28 = vld [vmem:[%s10351_s29 + $0x680] sm:$0xff] }
 0x2d0   : > { %7193 = vmatpush.bf16.msrb.mxu2 %v9087_v33  ;;  %7145 = vmatmul.bf16.gmra.mxu3 %v7767_v0 }
 0x2d1   : > { %7212 = vmatpush.bf16.msrb.mxu3 %v9095_v41  ;;  %v7651_v41 = vor.u32 %v8871_v30, %v7650_v29  ;;  %v9108_v30 = vld [vmem:[%s10351_s29 + $0x640] sm:$0xff] }
 0x2d2   : > { %7156 = vmatpush.bf16.msrb.mxu0 %v9070_v50  ;;  %v6823_v10 = vpop.f32.mrf.mxu2  ;;  %v6787_v15 = vpop.f32.mrf.mxu0  ;;  %v9112_v50 = vld [vmem:[%s10351_s29 + $0x660] sm:$0xff] }
 0x2d3   : > { %7175 = vmatpush.bf16.msrb.mxu1 %v9078_v52  ;;  %v6842_v11 = vpop.f32.mrf.mxu3  ;;  %v6824_v14 = vadd.f32 %v6823_v10, %v6805_v63  ;;  %v6806_v16 = vpop.f32.mrf.mxu1  ;;  %v9119_v52 = vld [vmem:[%s10351_s29 + $0x698] sm:$0xff]  ;;  %v9118_v63 = vld [vmem:[%s10351_s29 + $0x690] sm:$0xff] }
 0x2d4   : > { %7194 = vmatpush.bf16.msrb.mxu2 %v9086_v44  ;;  %v6807_v19 = vadd.f32 %v6806_v16, %v6787_v15  ;;  %v7655_v44 = vor.u32 %v8855_v31, %v7652_v32  ;;  %v7780_v10 = vld [vmem:[%s11043_s0 + $0x1d8] sm:$0xf0]  ;;  %v9109_v15 = vld [vmem:[%s10351_s29 + $0x648] sm:$0xff]  ;;  %v9100_v32 = vld [vmem:[%s10351_s29 + $0x600] sm:$0xff] }
 0x2d5   : > { %7213 = vmatpush.bf16.msrb.mxu3 %v9094_v53  ;;  %v10794_v20 = vadd.f32 %v6842_v11, %v6824_v14  ;;  %v9126_v11 = vld [vmem:[%s10351_s29 + $0x6d0] sm:$0xff]  ;;  %v9147_v31 = vld [vmem:[%s10351_s29 + $0x778] sm:$0xff] }
 0x2d6   : > { %7157 = vmatpush.bf16.msrb.mxu0 %v9069_v1  ;;  %v7770_v1 = vld [vmem:[%s11043_s0 + $0x150] sm:$0xf] }
 0x2d7   : > { %7176 = vmatpush.bf16.msrb.mxu1 %v9077_v3  ;;  %v9110_v3 = vld [vmem:[%s10351_s29 + $0x650] sm:$0xff] }
 0x2d8   : > { %7195 = vmatpush.bf16.msrb.mxu2 %v9085_v57 }
 0x2d9   : > { %7214 = vmatpush.bf16.msrb.mxu3 %v9093_v4  ;;  %v8886_v4 = vld [vmem:[%s11043_s0 + $0x154] sm:$0xf] }
 0x2da   : > { %7158 = vmatpush.bf16.msrb.mxu0 %v9068_v7  ;;  %v6825_v33 = vpop.f32.mrf.mxu2  ;;  %v6856_v38 = vpop.f32.mrf.mxu0  ;;  %v8903_v7 = vld [vmem:[%s11043_s0 + $0x1d4] sm:$0xf0] }
 0x2db   : > { %7177 = vmatpush.bf16.msrb.mxu1 %v9076_v8  ;;  %v6844_v34 = vpop.f32.mrf.mxu3  ;;  %v6826_v37 = vadd.f32 %v6825_v33, %v6807_v19  ;;  %v6857_v42 = vadd.f32 %v6856_v38, %v10747_v39  ;;  %v6875_v43 = vpop.f32.mrf.mxu1  ;;  %v9104_v39 = vld [vmem:[%s10351_s29 + $0x620] sm:$0xff]  ;;  %v8887_v8 = vld [vmem:[%s11043_s0 + $0x15c] sm:$0xf] }
 0x2dc   : > { %7196 = vmatpush.bf16.msrb.mxu2 %v9084_v5  ;;  %v7772_v5 = vld [vmem:[%s11043_s0 + $0x1d0] sm:$0xf0]  ;;  %v9124_v33 = vld [vmem:[%s10351_s29 + $0x6c0] sm:$0xff] }
 0x2dd   : > { %7215 = vmatpush.bf16.msrb.mxu3 %v9092_v9  ;;  %v10827_v46 = vadd.f32 %v6844_v34, %v6826_v37  ;;  %v6876_v49 = vadd.f32 %v6875_v43, %v6857_v42  ;;  %7159 = vmatmul.bf16.vlgmr.msrb.gmra.mxu0 %v7643_v35  ;;  %v9102_v9 = vld [vmem:[%s10351_s29 + $0x610] sm:$0xff]  ;;  %v7775_v19 = vor.u32 %v8886_v4, %v7772_v5  ;;  %v9139_v34 = vld [vmem:[%s10351_s29 + $0x738] sm:$0xff] }
 0x2de   : > { %7227 = vmatpush.bf16.msra.mxu0 %v9107_v12  ;;  %7178 = vmatmul.bf16.vlgmr.msrb.gmra.mxu1 %v7647_v40  ;;  %v9117_v12 = vld [vmem:[%s10351_s29 + $0x688] sm:$0xff]  ;;  %v9154_v37 = vld [vmem:[%s10351_s29 + $0x7b0] sm:$0xff] }
 0x2df   : > { %7246 = vmatpush.bf16.msra.mxu1 %v9115_v13  ;;  %7197 = vmatmul.bf16.vlgmr.msrb.gmra.mxu2 %v7651_v41  ;;  %v9146_v42 = vld [vmem:[%s10351_s29 + $0x770] sm:$0xff] }
 0x2e0   : > { %7265 = vmatpush.bf16.msra.mxu2 %v9123_v6  ;;  %7216 = vmatmul.bf16.vlgmr.msrb.gmra.mxu3 %v7655_v44  ;;  %v7778_v6 = vld [vmem:[%s11043_s0 + $0x158] sm:$0xf] }
 0x2e1   : > { %7284 = vmatpush.bf16.msra.mxu3 %v9131_v17  ;;  %v7779_v21 = vor.u32 %v8903_v7, %v7778_v6  ;;  %v9152_v7 = vld [vmem:[%s10351_s29 + $0x7a0] sm:$0xff] }
 0x2e2   : > { %7228 = vmatpush.bf16.msra.mxu0 %v9106_v23  ;;  %v6894_v53 = vpop.f32.mrf.mxu2  ;;  %v6858_v57 = vpop.f32.mrf.mxu0 }
 0x2e3   : > { %7247 = vmatpush.bf16.msra.mxu1 %v9114_v24  ;;  %v6895_v55 = vadd.f32 %v6894_v53, %v6876_v49  ;;  %v6913_v56 = vpop.f32.mrf.mxu3  ;;  %v6859_v58 = vadd.f32 %v6858_v57, %v10781_v2  ;;  %v6877_v59 = vpop.f32.mrf.mxu1  ;;  %v8902_v2 = vld [vmem:[%s11043_s0 + $0x1cc] sm:$0xf0]  ;;  %v7783_v24 = vor.u32 %v8887_v8, %v7780_v10  ;;  %v7658_v49 = vld [vmem:[%s11043_s0 + $0x60] sm:$0xf]  ;;  %v7660_v53 = vld [vmem:[%s11043_s0 + $0xe0] sm:$0xf0] }
 0x2e4   : > { %7266 = vmatpush.bf16.msra.mxu2 %v9122_v18  ;;  %v7771_v14 = vor.u32 %v8902_v2, %v7770_v1  ;;  %v7668_v57 = vld [vmem:[%s11043_s0 + $0xe8] sm:$0xf0]  ;;  %v9144_v10 = vld [vmem:[%s10351_s29 + $0x760] sm:$0xff] }
 0x2e5   : > { %7285 = vmatpush.bf16.msra.mxu3 %v9130_v26  ;;  %v10838_v61 = vadd.f32 %v6913_v56, %v6895_v55  ;;  %v6878_v0 = vadd.f32 %v6877_v59, %v6859_v58  ;;  %v8873_v55 = vld [vmem:[%s11043_s0 + $0xe4] sm:$0xf0]  ;;  %v8857_v56 = vld [vmem:[%s11043_s0 + $0x6c] sm:$0xf] }
 0x2e6   : > { %7229 = vmatpush.bf16.msra.mxu0 %v9105_v45  ;;  %v9137_v58 = vld [vmem:[%s10351_s29 + $0x728] sm:$0xff]  ;;  %v7671_v6 = vor.u32 %v8857_v56, %v7668_v57  ;;  %v9156_v56 = vld [vmem:[%s10351_s29 + $0x7c0] sm:$0xff] }
 0x2e7   : > { %7248 = vmatpush.bf16.msra.mxu1 %v9113_v36  ;;  %v9163_v36 = vld [vmem:[%s10351_s29 + $0x7f8] sm:$0xff] }
 0x2e8   : > { %7267 = vmatpush.bf16.msra.mxu2 %v9121_v27  ;;  %v9125_v27 = vld [vmem:[%s10351_s29 + $0x6c8] sm:$0xff] }
 0x2e9   : > { %7286 = vmatpush.bf16.msra.mxu3 %v9129_v47  ;;  %v9138_v47 = vld [vmem:[%s10351_s29 + $0x730] sm:$0xff] }
 0x2ea   : > { %7230 = vmatpush.bf16.msra.mxu0 %v9104_v39  ;;  %v6896_v13 = vpop.f32.mrf.mxu2  ;;  %v6861_v18 = vpop.f32.mrf.mxu0  ;;  %v9153_v39 = vld [vmem:[%s10351_s29 + $0x7a8] sm:$0xff] }
 0x2eb   : > { %7249 = vmatpush.bf16.msra.mxu1 %v9112_v50  ;;  %v6897_v16 = vadd.f32 %v6896_v13, %v6878_v0  ;;  %v6915_v17 = vpop.f32.mrf.mxu3  ;;  %v6862_v22 = vadd.f32 %v6861_v18, %v10794_v20  ;;  %v6880_v23 = vpop.f32.mrf.mxu1  ;;  %v9155_v20 = vld [vmem:[%s10351_s29 + $0x7b8] sm:$0xff]  ;;  %v9162_v50 = vld [vmem:[%s10351_s29 + $0x7f0] sm:$0xff] }
 0x2ec   : > { %7268 = vmatpush.bf16.msra.mxu2 %v9120_v48  ;;  %v9135_v13 = vld [vmem:[%s10351_s29 + $0x718] sm:$0xff] }
 0x2ed   : > { %7287 = vmatpush.bf16.msra.mxu3 %v9128_v51  ;;  %v10873_v26 = vadd.f32 %v6915_v17, %v6897_v16  ;;  %v6881_v29 = vadd.f32 %v6880_v23, %v6862_v22  ;;  %7164 = vmatmul.bf16.gmra.mxu0 %v7771_v14  ;;  %v8856_v51 = vld [vmem:[%s11043_s0 + $0x64] sm:$0xf]  ;;  %v9143_v14 = vld [vmem:[%s10351_s29 + $0x758] sm:$0xff]  ;;  %v9150_v23 = vld [vmem:[%s10351_s29 + $0x790] sm:$0xff] }
 0x2ee   : > { %7231 = vmatpush.bf16.msra.mxu0 %v9103_v60  ;;  %7183 = vmatmul.bf16.gmra.mxu1 %v7775_v19  ;;  %v7663_v2 = vor.u32 %v8856_v51, %v7660_v53  ;;  %v9159_v16 = vld [vmem:[%s10351_s29 + $0x7d8] sm:$0xff]  ;;  %v9148_v51 = vld [vmem:[%s10351_s29 + $0x780] sm:$0xff] }
 0x2ef   : > { %7250 = vmatpush.bf16.msra.mxu1 %v9111_v54  ;;  %7202 = vmatmul.bf16.gmra.mxu2 %v7779_v21  ;;  %v7666_v54 = vld [vmem:[%s11043_s0 + $0x68] sm:$0xf]  ;;  %v9132_v53 = vld [vmem:[%s10351_s29 + $0x700] sm:$0xff] }
 0x2f0   : > { %7269 = vmatpush.bf16.msra.mxu2 %v9119_v52  ;;  %7221 = vmatmul.bf16.gmra.mxu3 %v7783_v24  ;;  %v9145_v52 = vld [vmem:[%s10351_s29 + $0x768] sm:$0xff] }
 0x2f1   : > { %7288 = vmatpush.bf16.msra.mxu3 %v9127_v62  ;;  %v9161_v62 = vld [vmem:[%s10351_s29 + $0x7e8] sm:$0xff] }
 0x2f2   : > { %7232 = vmatpush.bf16.msra.mxu0 %v9102_v9  ;;  %v6899_v35 = vpop.f32.mrf.mxu2  ;;  %v6863_v41 = vpop.f32.mrf.mxu0  ;;  %v9136_v9 = vld [vmem:[%s10351_s29 + $0x720] sm:$0xff] }
 0x2f3   : > { %7251 = vmatpush.bf16.msra.mxu1 %v9110_v3  ;;  %v6900_v38 = vadd.f32 %v6899_v35, %v6881_v29  ;;  %v6918_v40 = vpop.f32.mrf.mxu3  ;;  %v6864_v43 = vadd.f32 %v6863_v41, %v10827_v46  ;;  %v6882_v44 = vpop.f32.mrf.mxu1  ;;  %v8872_v46 = vld [vmem:[%s11043_s0 + $0xdc] sm:$0xf0]  ;;  %v7667_v3 = vor.u32 %v8873_v55, %v7666_v54  ;;  %v9149_v35 = vld [vmem:[%s10351_s29 + $0x788] sm:$0xff] }
 0x2f4   : > { %7270 = vmatpush.bf16.msra.mxu2 %v9118_v63  ;;  %v7659_v60 = vor.u32 %v8872_v46, %v7658_v49  ;;  %v7786_v29 = vld [vmem:[%s11043_s0 + $0x160] sm:$0xf] }
 0x2f5   : > { %7289 = vmatpush.bf16.msra.mxu3 %v9126_v11  ;;  %v10887_v45 = vadd.f32 %v6918_v40, %v6900_v38  ;;  %v6883_v48 = vadd.f32 %v6882_v44, %v6864_v43  ;;  %v9141_v38 = vld [vmem:[%s10351_s29 + $0x748] sm:$0xff]  ;;  %v9140_v54 = vld [vmem:[%s10351_s29 + $0x740] sm:$0xff] }
 0x2f6   : > { %7233 = vmatpush.bf16.msra.mxu0 %v9101_v25  ;;  %v9134_v25 = vld [vmem:[%s10351_s29 + $0x710] sm:$0xff] }
 0x2f7   : > { %7252 = vmatpush.bf16.msra.mxu1 %v9109_v15 }
 0x2f8   : > { %7271 = vmatpush.bf16.msra.mxu2 %v9117_v12  ;;  %v9160_v12 = vld [vmem:[%s10351_s29 + $0x7e0] sm:$0xff] }
 0x2f9   : > { %7290 = vmatpush.bf16.msra.mxu3 %v9125_v27  ;;  %v9142_v27 = vld [vmem:[%s10351_s29 + $0x750] sm:$0xff] }
 0x2fa   : > { %7234 = vmatpush.bf16.msra.mxu0 %v9100_v32  ;;  %v6901_v59 = vpop.f32.mrf.mxu2  ;;  %v6932_v1 = vpop.f32.mrf.mxu0  ;;  %v7794_v32 = vld [vmem:[%s11043_s0 + $0x168] sm:$0xf] }
 0x2fb   : > { %7253 = vmatpush.bf16.msra.mxu1 %v9108_v30  ;;  %v6902_v63 = vadd.f32 %v6901_v59, %v6883_v48  ;;  %v6920_v0 = vpop.f32.mrf.mxu3  ;;  %v6933_v4 = vadd.f32 %v6932_v1, %v10838_v61  ;;  %v6951_v5 = vpop.f32.mrf.mxu1  ;;  %v9151_v61 = vld [vmem:[%s10351_s29 + $0x798] sm:$0xff]  ;;  %v9158_v30 = vld [vmem:[%s10351_s29 + $0x7d0] sm:$0xff] }
 0x2fc   : > { %7272 = vmatpush.bf16.msra.mxu2 %v9116_v28  ;;  %v7674_v1 = vld [vmem:[%s11043_s0 + $0x70] sm:$0xf] }
 0x2fd   : > { %7291 = vmatpush.bf16.msra.mxu3 %v9124_v33  ;;  %v10921_v8 = vadd.f32 %v6920_v0, %v6902_v63  ;;  %v6952_v11 = vadd.f32 %v6951_v5, %v6933_v4  ;;  %7235 = vmatmul.bf16.vlgmr.msra.gmra.mxu0 %v7659_v60  ;;  %v8905_v33 = vld [vmem:[%s11043_s0 + $0x1e4] sm:$0xf0]  ;;  %v7676_v4 = vld [vmem:[%s11043_s0 + $0xf0] sm:$0xf0]  ;;  %v7682_v5 = vld [vmem:[%s11043_s0 + $0x78] sm:$0xf] }
 0x2fe   : > { %7303 = vmatpush.bf16.msrb.mxu0 %v9139_v34  ;;  %7254 = vmatmul.bf16.vlgmr.msra.gmra.mxu1 %v7663_v2  ;;  %v8889_v34 = vld [vmem:[%s11043_s0 + $0x16c] sm:$0xf]  ;;  %v7795_v49 = vor.u32 %v8905_v33, %v7794_v32  ;;  %v8874_v2 = vld [vmem:[%s11043_s0 + $0xec] sm:$0xf0]  ;;  %v7810_v32 = vld [vmem:[%s11043_s0 + $0x178] sm:$0xf] }
 0x2ff   : > { %7322 = vmatpush.bf16.msrb.mxu1 %v9147_v31  ;;  %7273 = vmatmul.bf16.vlgmr.msra.gmra.mxu2 %v7667_v3  ;;  %v7788_v31 = vld [vmem:[%s11043_s0 + $0x1e0] sm:$0xf0]  ;;  %v8858_v3 = vld [vmem:[%s11043_s0 + $0x74] sm:$0xf]  ;;  %v8907_v33 = vld [vmem:[%s11043_s0 + $0x1f4] sm:$0xf0] }
 0x300   : > { %7341 = vmatpush.bf16.msrb.mxu2 %v9155_v20  ;;  %7292 = vmatmul.bf16.vlgmr.msra.gmra.mxu3 %v7671_v6  ;;  %v8888_v20 = vld [vmem:[%s11043_s0 + $0x164] sm:$0xf]  ;;  %v8875_v6 = vld [vmem:[%s11043_s0 + $0xf4] sm:$0xf0] }
 0x301   : > { %7360 = vmatpush.bf16.msrb.mxu3 %v9163_v36  ;;  %v7796_v36 = vld [vmem:[%s11043_s0 + $0x1e8] sm:$0xf0]  ;;  %v7791_v48 = vor.u32 %v8888_v20, %v7788_v31  ;;  %v8890_v20 = vld [vmem:[%s11043_s0 + $0x174] sm:$0xf] }
 0x302   : > { %7304 = vmatpush.bf16.msrb.mxu0 %v9138_v47  ;;  %v6970_v15 = vpop.f32.mrf.mxu2  ;;  %v6934_v19 = vpop.f32.mrf.mxu0  ;;  %v7799_v46 = vor.u32 %v8889_v34, %v7796_v36  ;;  %v7804_v31 = vld [vmem:[%s11043_s0 + $0x1f0] sm:$0xf0]  ;;  %v8891_v34 = vld [vmem:[%s11043_s0 + $0x17c] sm:$0xf] }
 0x303   : > { %7323 = vmatpush.bf16.msrb.mxu1 %v9146_v42  ;;  %v6971_v17 = vadd.f32 %v6970_v15, %v6952_v11  ;;  %v6989_v18 = vpop.f32.mrf.mxu3  ;;  %v6935_v21 = vadd.f32 %v6934_v19, %v10873_v26  ;;  %v6953_v22 = vpop.f32.mrf.mxu1  ;;  %v8904_v26 = vld [vmem:[%s11043_s0 + $0x1dc] sm:$0xf0]  ;;  %v9157_v42 = vld [vmem:[%s10351_s29 + $0x7c8] sm:$0xff] }
 0x304   : > { %7342 = vmatpush.bf16.msrb.mxu2 %v9154_v37  ;;  %v9133_v37 = vld [vmem:[%s10351_s29 + $0x708] sm:$0xff]  ;;  %v7787_v41 = vor.u32 %v8904_v26, %v7786_v29 }
 0x305   : > { %7361 = vmatpush.bf16.msrb.mxu3 %v9162_v50  ;;  %v10932_v24 = vadd.f32 %v6989_v18, %v6971_v17  ;;  %v6954_v28 = vadd.f32 %v6953_v22, %v6935_v21 }
 0x306   : > { %7305 = vmatpush.bf16.msrb.mxu0 %v9137_v58 }
 0x307   : > { %7324 = vmatpush.bf16.msrb.mxu1 %v9145_v52 }
 0x308   : > { %7343 = vmatpush.bf16.msrb.mxu2 %v9153_v39 }
 0x309   : > { %7362 = vmatpush.bf16.msrb.mxu3 %v9161_v62 }
 0x30a   : > { %7306 = vmatpush.bf16.msrb.mxu0 %v9136_v9  ;;  %v6972_v40 = vpop.f32.mrf.mxu2  ;;  %v6937_v47 = vpop.f32.mrf.mxu0 }
 0x30b   : > { %7325 = vmatpush.bf16.msrb.mxu1 %v9144_v10  ;;  %v6973_v43 = vadd.f32 %v6972_v40, %v6954_v28  ;;  %v6991_v44 = vpop.f32.mrf.mxu3  ;;  %v6938_v50 = vadd.f32 %v6937_v47, %v10887_v45  ;;  %v6956_v39 = vpop.f32.mrf.mxu1  ;;  %v7675_v10 = vor.u32 %v8874_v2, %v7674_v1 }
 0x30c   : > { %7344 = vmatpush.bf16.msrb.mxu2 %v9152_v7  ;;  %v8859_v7 = vld [vmem:[%s11043_s0 + $0x7c] sm:$0xf] }
 0x30d   : > { %7363 = vmatpush.bf16.msrb.mxu3 %v9160_v12  ;;  %v6992_v52 = vadd.f32 %v6991_v44, %v6973_v43  ;;  %v6957_v55 = vadd.f32 %v6956_v39, %v6938_v50  ;;  %7240 = vmatmul.bf16.gmra.mxu0 %v7787_v41  ;;  %v7811_v43 = vor.u32 %v8907_v33, %v7810_v32 }
 0x30e   : > { %7307 = vmatpush.bf16.msrb.mxu0 %v9135_v13  ;;  %7259 = vmatmul.bf16.gmra.mxu1 %v7791_v48  ;;  %v7679_v13 = vor.u32 %v8858_v3, %v7676_v4 }
 0x30f   : > { %7326 = vmatpush.bf16.msrb.mxu1 %v9143_v14  ;;  %7278 = vmatmul.bf16.gmra.mxu2 %v7795_v49  ;;  %v7683_v14 = vor.u32 %v8875_v6, %v7682_v5 }
 0x310   : > { %7345 = vmatpush.bf16.msrb.mxu2 %v9151_v61  ;;  %7297 = vmatmul.bf16.gmra.mxu3 %v7799_v46 }
 0x311   : > { %7364 = vmatpush.bf16.msrb.mxu3 %v9159_v16 }
 0x312   : > { %7308 = vmatpush.bf16.msrb.mxu0 %v9134_v25  ;;  %v6975_v45 = vpop.f32.mrf.mxu2  ;;  %v6939_v59 = vpop.f32.mrf.mxu0 }
 0x313   : > { %7327 = vmatpush.bf16.msrb.mxu1 %v9142_v27  ;;  %v6976_v57 = vadd.f32 %v6975_v45, %v6957_v55  ;;  %v6994_v58 = vpop.f32.mrf.mxu3  ;;  %v6940_v60 = vadd.f32 %v6939_v59, %v10921_v8  ;;  %v6958_v62 = vpop.f32.mrf.mxu1  ;;  %v7684_v8 = vld [vmem:[%s11043_s0 + $0xf8] sm:$0xf0] }
 0x314   : > { %7346 = vmatpush.bf16.msrb.mxu2 %v9150_v23  ;;  %v7687_v17 = vor.u32 %v8859_v7, %v7684_v8 }
 0x315   : > { %7365 = vmatpush.bf16.msrb.mxu3 %v9158_v30  ;;  %v6995_v63 = vadd.f32 %v6994_v58, %v6976_v57  ;;  %v6959_v0 = vadd.f32 %v6958_v62, %v6940_v60  ;;  %v8906_v30 = vld [vmem:[%s11043_s0 + $0x1ec] sm:$0xf0] }
 0x316   : > { %7309 = vmatpush.bf16.msrb.mxu0 %v9133_v37 }
 0x317   : > { %7328 = vmatpush.bf16.msrb.mxu1 %v9141_v38 }
 0x318   : > { %7347 = vmatpush.bf16.msrb.mxu2 %v9149_v35  ;;  %v7812_v35 = vld [vmem:[%s11043_s0 + $0x1f8] sm:$0xf0] }
 0x319   : > { %7366 = vmatpush.bf16.msrb.mxu3 %v9157_v42  ;;  %v7807_v42 = vor.u32 %v8890_v20, %v7804_v31  ;;  %v7815_v48 = vor.u32 %v8891_v34, %v7812_v35 }
 0x31a   : > { %7310 = vmatpush.bf16.msrb.mxu0 %v9132_v53  ;;  %v6977_v9 = vpop.f32.mrf.mxu2  ;;  %v7008_v61 = vpop.f32.mrf.mxu0 }
 0x31b   : > { %7329 = vmatpush.bf16.msrb.mxu1 %v9140_v54  ;;  %v6978_v11 = vadd.f32 %v6977_v9, %v6959_v0  ;;  %v6996_v12 = vpop.f32.mrf.mxu3  ;;  %v7009_v15 = vadd.f32 %v7008_v61, %v10932_v24  ;;  %v7027_v16 = vpop.f32.mrf.mxu1  ;;  %v7802_v24 = vld [vmem:[%s11043_s0 + $0x170] sm:$0xf] }
 0x31c   : > { %7348 = vmatpush.bf16.msrb.mxu2 %v9148_v51  ;;  %v7803_v37 = vor.u32 %v8906_v30, %v7802_v24 }
 0x31d   : > { %7367 = vmatpush.bf16.msrb.mxu3 %v9156_v56  ;;  %v6997_v18 = vadd.f32 %v6996_v12, %v6978_v11  ;;  %v7028_v19 = vadd.f32 %v7027_v16, %v7009_v15  ;;  %7311 = vmatmul.bf16.vlgmr.msrb.gmra.mxu0 %v7675_v10 }
 0x31e   : > { %7330 = vmatmul.bf16.vlgmr.msrb.gmra.mxu1 %v7679_v13 }
 0x31f   : > { %7349 = vmatmul.bf16.vlgmr.msrb.gmra.mxu2 %v7683_v14 }
 0x320   : > { %7368 = vmatmul.bf16.vlgmr.msrb.gmra.mxu3 %v7687_v17 }
 0x322   : > { %v7046_v21 = vpop.f32.mrf.mxu2  ;;  %v7010_v25 = vpop.f32.mrf.mxu0 }
 0x323   : > { %v7047_v22 = vadd.f32 %v7046_v21, %v7028_v19  ;;  %v7065_v23 = vpop.f32.mrf.mxu3  ;;  %v7011_v27 = vadd.f32 %v7010_v25, %v6992_v52  ;;  %v7029_v28 = vpop.f32.mrf.mxu1 }
 0x325   : > { %v7066_v29 = vadd.f32 %v7065_v23, %v7047_v22  ;;  %v7030_v26 = vadd.f32 %v7029_v28, %v7011_v27 }
 0x32a   : > { %v7048_v36 = vpop.f32.mrf.mxu2  ;;  %v7013_v41 = vpop.f32.mrf.mxu0 }
 0x32b   : > { %v7049_v38 = vadd.f32 %v7048_v36, %v7030_v26  ;;  %v7067_v40 = vpop.f32.mrf.mxu3  ;;  %v7014_v44 = vadd.f32 %v7013_v41, %v6995_v63  ;;  %v7032_v47 = vpop.f32.mrf.mxu1 }
 0x32d   : > { %v7068_v49 = vadd.f32 %v7067_v40, %v7049_v38  ;;  %v7033_v50 = vadd.f32 %v7032_v47, %v7014_v44  ;;  %7316 = vmatmul.bf16.gmra.mxu0 %v7803_v37 }
 0x32e   : > { %7335 = vmatmul.bf16.gmra.mxu1 %v7807_v42 }
 0x32f   : > { %7354 = vmatmul.bf16.gmra.mxu2 %v7811_v43 }
 0x330   : > { %7373 = vmatmul.bf16.gmra.mxu3 %v7815_v48 }
 0x332   : > { %v7051_v39 = vpop.f32.mrf.mxu2  ;;  %v7015_v52 = vpop.f32.mrf.mxu0 }
 0x333   : > { %v7052_v46 = vadd.f32 %v7051_v39, %v7033_v50  ;;  %v7070_v51 = vpop.f32.mrf.mxu3  ;;  %v7016_v53 = vadd.f32 %v7015_v52, %v6997_v18  ;;  %v7034_v54 = vpop.f32.mrf.mxu1 }
 0x335   : > { %v7071_v55 = vadd.f32 %v7070_v51, %v7052_v46  ;;  %v7035_v56 = vadd.f32 %v7034_v54, %v7016_v53 }
 0x33a   : > { %v7053_v45 = vpop.f32.mrf.mxu2  ;;  %v7084_v59 = vpop.f32.mrf.mxu0 }
 0x33b   : > { %v7054_v57 = vadd.f32 %v7053_v45, %v7035_v56  ;;  %v7072_v58 = vpop.f32.mrf.mxu3  ;;  %v7085_v60 = vadd.f32 %v7084_v59, %v7066_v29  ;;  %v7103_v62 = vpop.f32.mrf.mxu1 }
 0x33d   : > { %v7073_v63 = vadd.f32 %v7072_v58, %v7054_v57  ;;  %v7104_v0 = vadd.f32 %v7103_v62, %v7085_v60 }
 0x342   : > { %v7122_v1 = vpop.f32.mrf.mxu2  ;;  %v7086_v4 = vpop.f32.mrf.mxu0 }
 0x343   : > { %v7123_v2 = vadd.f32 %v7122_v1, %v7104_v0  ;;  %v7141_v3 = vpop.f32.mrf.mxu3  ;;  %v7087_v5 = vadd.f32 %v7086_v4, %v7068_v49  ;;  %v7105_v6 = vpop.f32.mrf.mxu1 }
 0x345   : > { %v7142_v7 = vadd.f32 %v7141_v3, %v7123_v2  ;;  %v7106_v8 = vadd.f32 %v7105_v6, %v7087_v5 }
 0x34a   : > { %v7124_v9 = vpop.f32.mrf.mxu2  ;;  %v7089_v12 = vpop.f32.mrf.mxu0 }
 0x34b   : > { %v7125_v10 = vadd.f32 %v7124_v9, %v7106_v8  ;;  %v7143_v11 = vpop.f32.mrf.mxu3  ;;  %v7090_v61 = vadd.f32 %v7089_v12, %v7071_v55  ;;  %v7108_v13 = vpop.f32.mrf.mxu1 }
 0x34d   : > { %v7144_v14 = vadd.f32 %v7143_v11, %v7125_v10  ;;  %v7109_v15 = vadd.f32 %v7108_v13, %v7090_v61 }
 0x352   : > { %v7127_v16 = vpop.f32.mrf.mxu2  ;;  %v7091_v19 = vpop.f32.mrf.mxu0 }
 0x353   : > { %v7128_v17 = vadd.f32 %v7127_v16, %v7109_v15  ;;  %v7146_v18 = vpop.f32.mrf.mxu3  ;;  %v7092_v21 = vadd.f32 %v7091_v19, %v7073_v63  ;;  %v7110_v22 = vpop.f32.mrf.mxu1 }
 0x355   : > { %v7147_v23 = vadd.f32 %v7146_v18, %v7128_v17  ;;  %v7111_v25 = vadd.f32 %v7110_v22, %v7092_v21 }
 0x35a   : > { %v7129_v27 = vpop.f32.mrf.mxu2  ;;  %v7160_v26 = vpop.f32.mrf.mxu0 }
 0x35b   : > { %v7130_v28 = vadd.f32 %v7129_v27, %v7111_v25  ;;  %v7148_v29 = vpop.f32.mrf.mxu3  ;;  %v7179_v24 = vpop.f32.mrf.mxu1  ;;  %v7161_v51 = vadd.f32 %v7160_v26, %v7142_v7 }
 0x35d   : > { %v7149_v30 = vadd.f32 %v7148_v29, %v7130_v28  ;;  %v7180_v53 = vadd.f32 %v7179_v24, %v7161_v51 }
 0x362   : > { %v7198_v20 = vpop.f32.mrf.mxu2  ;;  %v7162_v32 = vpop.f32.mrf.mxu0 }
 0x363   : > { %v7217_v31 = vpop.f32.mrf.mxu3  ;;  %v7181_v33 = vpop.f32.mrf.mxu1  ;;  %v7199_v45 = vadd.f32 %v7198_v20, %v7180_v53  ;;  %v7163_v57 = vadd.f32 %v7162_v32, %v7144_v14 }
 0x365   : > { %v7218_v58 = vadd.f32 %v7217_v31, %v7199_v45  ;;  %v7182_v59 = vadd.f32 %v7181_v33, %v7163_v57 }
 0x36a   : > { %v7200_v34 = vpop.f32.mrf.mxu2  ;;  %v7165_v36 = vpop.f32.mrf.mxu0 }
 0x36b   : > { %v7219_v35 = vpop.f32.mrf.mxu3  ;;  %v7184_v37 = vpop.f32.mrf.mxu1  ;;  %v7201_v62 = vadd.f32 %v7200_v34, %v7182_v59  ;;  %v7166_v4 = vadd.f32 %v7165_v36, %v7147_v23 }
 0x36d   : > { %v7220_v3 = vadd.f32 %v7219_v35, %v7201_v62  ;;  %v7185_v9 = vadd.f32 %v7184_v37, %v7166_v4 }
 0x372   : > { %v7203_v38 = vpop.f32.mrf.mxu2  ;;  %v7167_v41 = vpop.f32.mrf.mxu0 }
 0x373   : > { %v7222_v40 = vpop.f32.mrf.mxu3  ;;  %v7186_v42 = vpop.f32.mrf.mxu1  ;;  %v7204_v61 = vadd.f32 %v7203_v38, %v7185_v9  ;;  %v7168_v13 = vadd.f32 %v7167_v41, %v7149_v30 }
 0x375   : > { %v7223_v18 = vadd.f32 %v7222_v40, %v7204_v61  ;;  %v7187_v19 = vadd.f32 %v7186_v42, %v7168_v13 }
 0x37a   : > { %v7205_v43 = vpop.f32.mrf.mxu2  ;;  %v7236_v47 = vpop.f32.mrf.mxu0 }
 0x37b   : > { %v7224_v44 = vpop.f32.mrf.mxu3  ;;  %v7255_v48 = vpop.f32.mrf.mxu1  ;;  %v7237_v63 = vadd.f32 %v7236_v47, %v7218_v58  ;;  %v7206_v22 = vadd.f32 %v7205_v43, %v7187_v19 }
 0x37d   : > { %v7256_v5 = vadd.f32 %v7255_v48, %v7237_v63  ;;  %v7225_v31 = vadd.f32 %v7224_v44, %v7206_v22 }
 0x382   : > { %v7274_v49 = vpop.f32.mrf.mxu2  ;;  %v7238_v39 = vpop.f32.mrf.mxu0 }
 0x383   : > { %v7293_v50 = vpop.f32.mrf.mxu3  ;;  %v7257_v46 = vpop.f32.mrf.mxu1  ;;  %v7275_v6 = vadd.f32 %v7274_v49, %v7256_v5  ;;  %v7239_v7 = vadd.f32 %v7238_v39, %v7220_v3 }
 0x385   : > { %v7294_v14 = vadd.f32 %v7293_v50, %v7275_v6  ;;  %v7258_v15 = vadd.f32 %v7257_v46, %v7239_v7 }
 0x38a   : > { %v7276_v52 = vpop.f32.mrf.mxu2  ;;  %v7241_v55 = vpop.f32.mrf.mxu0 }
 0x38b   : > { %v7295_v54 = vpop.f32.mrf.mxu3  ;;  %v7260_v56 = vpop.f32.mrf.mxu1  ;;  %v7277_v16 = vadd.f32 %v7276_v52, %v7258_v15  ;;  %v7242_v23 = vadd.f32 %v7241_v55, %v7223_v18 }
 0x38d   : > { %v7296_v25 = vadd.f32 %v7295_v54, %v7277_v16  ;;  %v7261_v32 = vadd.f32 %v7260_v56, %v7242_v23 }
 0x392   : > { %v7279_v60 = vpop.f32.mrf.mxu2  ;;  %v7243_v1 = vpop.f32.mrf.mxu0 }
 0x393   : > { %v7298_v0 = vpop.f32.mrf.mxu3  ;;  %v7262_v2 = vpop.f32.mrf.mxu1  ;;  %v7280_v30 = vadd.f32 %v7279_v60, %v7261_v32  ;;  %v7244_v33 = vadd.f32 %v7243_v1, %v7225_v31 }
 0x395   : > { %v7299_v41 = vadd.f32 %v7298_v0, %v7280_v30  ;;  %v7263_v42 = vadd.f32 %v7262_v2, %v7244_v33 }
 0x39a   : > { %v7281_v8 = vpop.f32.mrf.mxu2  ;;  %v7312_v11 = vpop.f32.mrf.mxu0 }
 0x39b   : > { %v7300_v10 = vpop.f32.mrf.mxu3  ;;  %v7331_v12 = vpop.f32.mrf.mxu1  ;;  %v7313_v17 = vadd.f32 %v7312_v11, %v7294_v14  ;;  %v7282_v49 = vadd.f32 %v7281_v8, %v7263_v42 }
 0x39d   : > { %v7332_v27 = vadd.f32 %v7331_v12, %v7313_v17  ;;  %v7301_v52 = vadd.f32 %v7300_v10, %v7282_v49 }
 0x3a2   : > { %v7350_v21 = vpop.f32.mrf.mxu2  ;;  %v7314_v29 = vpop.f32.mrf.mxu0 }
 0x3a3   : > { %v7369_v28 = vpop.f32.mrf.mxu3  ;;  %v7333_v26 = vpop.f32.mrf.mxu1  ;;  %v7351_v24 = vadd.f32 %v7350_v21, %v7332_v27  ;;  %v7315_v20 = vadd.f32 %v7314_v29, %v7296_v25 }
 0x3a5   : > { %v7370_v34 = vadd.f32 %v7369_v28, %v7351_v24  ;;  %v7334_v35 = vadd.f32 %v7333_v26, %v7315_v20 }
 0x3a7   : > { %v7379_v43 = vmul.f32 0.2, %v7370_v34 }
 0x3a9   : > { %v7383_v39 = vmax.f32 %v7370_v34, %v7379_v43 }
 0x3aa   : > { %v7352_v36 = vpop.f32.mrf.mxu2  ;;  %v7317_v40 = vpop.f32.mrf.mxu0 }
 0x3ab   : > { %v7353_v37 = vadd.f32 %v7352_v36, %v7334_v35  ;;  %v7371_v38 = vpop.f32.mrf.mxu3  ;;  %v7336_v48 = vpop.f32.mrf.mxu1  ;;  %v7318_v44 = vadd.f32 %v7317_v40, %v7299_v41 }
 0x3ad   : > { %v7372_v47 = vadd.f32 %v7371_v38, %v7353_v37  ;;  %v7337_v54 = vadd.f32 %v7336_v48, %v7318_v44 }
 0x3af   : > { %v7380_v50 = vmul.f32 0.2, %v7372_v47 }
 0x3b1   : > { %v7384_v46 = vmax.f32 %v7372_v47, %v7380_v50 }
 0x3b2   : > { %v7355_v51 = vpop.f32.mrf.mxu2  ;;  %v7319_v56 = vpop.f32.mrf.mxu0 }
 0x3b3   : > { %v9167_v53 = vpack.c.bf16 %v7384_v46, %v7383_v39  ;;  %v7374_v55 = vpop.f32.mrf.mxu3  ;;  %v7356_v45 = vadd.f32 %v7355_v51, %v7337_v54  ;;  %v7320_v57 = vadd.f32 %v7319_v56, %v7301_v52  ;;  %v7338_v58 = vpop.f32.mrf.mxu1 }
 0x3b5   : > { %9168 = vst [vmem:[%s4330_s5] sm:$0xff] %v9167_v53   ;;  %v7375_v59 = vadd.f32 %v7374_v55, %v7356_v45  ;;  %v7339_v60 = vadd.f32 %v7338_v58, %v7320_v57 }
 0x3b7   : > { %v7381_v1 = vmul.f32 0.2, %v7375_v59 }
 0x3b9   : > { %v7385_v4 = vmax.f32 %v7375_v59, %v7381_v1 }
 0x3ba   : > { %v7357_v62 = vpop.f32.mrf.mxu2 }
 0x3bb   : > { %v7358_v63 = vadd.f32 %v7357_v62, %v7339_v60  ;;  %v7376_v0 = vpop.f32.mrf.mxu3 }
 0x3bc   : > { %v7423_v7 = vld [vmem:[%s4330_s5] sm:$0xf] (%p9305_p6)  ;;  %v7425_v8 = vld [vmem:[%s4330_s5 + $0x4] sm:$0xf] (%p9305_p6) }
 0x3bd   : > { %v7377_v2 = vadd.f32 %v7376_v0, %v7358_v63  ;;  %7424 = vst [vmem:[%s7406_s7] sm:$0xf] (%p9305_p6), %v7423_v7 }
 0x3be   : > { %7426 = vst [vmem:[%s7406_s7 + $0x10] sm:$0xf] (%p9305_p6), %v7425_v8 }
 0x3bf   : > { %v7382_v3 = vmul.f32 0.2, %v7377_v2 }
 0x3c1   : > { %v7386_v5 = vmax.f32 %v7377_v2, %v7382_v3  ;;  %7401 = sbr.rel (!%p9305_p6) target bundleno = 975 (0x3cf), region = 84 }
 0x3c3   : > { %v9172_v6 = vpack.c.bf16 %v7386_v5, %v7385_v4 }
 0x3c5   : > { %9174 = vst [vmem:[%s4330_s5 + $0x8] sm:$0xff] %v9172_v6  }
 0x3cc   : > { %v7427_v9 = vld [vmem:[%s4330_s5 + $0x8] sm:$0xf]  ;;  %v7429_v10 = vld [vmem:[%s4330_s5 + $0xc] sm:$0xf] }
 0x3cd   : > { %7428 = vst [vmem:[%s7406_s7 + $0x20] sm:$0xf] %v7427_v9 }
 0x3ce   : > { %7430 = vst [vmem:[%s7406_s7 + $0x30] sm:$0xf] %v7429_v10 }
 0x3cf PF: > { %s12_s13 = sadd.s32 1, %s9253_s13   ;;  %s11047_s9 = smov %s9241_s10 }
 0x3d0   : > { %p9_p11 = scmp.ge.s32.totalorder %s12_s13, 6   ;;  %s11048_s10 = smov %s9310_s19 }
 0x3d1   : > { %s11049_s11 = smov %s9249_s12  ;;  %s11050_s12 = smov %s11052_s14 }
 0x3d2   :  { %11 = sbr.rel (!%p9_p11) target bundleno = 3 (0x3), region = 163 }

// kernel: forward.9
= control target key start
LH: loop header
LB: loop body
LE: loop exit
PB: predicated region body
PF: predicated region fallthrough
CT: control target
= control target key end

     0   :  { %s10306_s1 = inlined_call_operand.vmem [shape: bf16[8192,128], index: 1, kind: input, shape index: {}]   ;;  %s10307_s0 = inlined_call_operand.vmem [shape: bf16[16,8192], index: 0, kind: input, shape index: {}]   ;;  %s10308_s2 = inlined_call_operand.vmem [shape: f32[1,128], index: 2, kind: input, shape index: {}]   ;;  %s10309_s3 = inlined_call_operand.vmem [shape: f32[16,128], index: 3, kind: output, shape index: {}]  }
   0x1   :  { %v7775_v0 = vld [vmem:[%s10306_s1 + $0x38] sm:$0xff]  ;;  %v7774_v4 = vld [vmem:[%s10306_s1 + $0x30] sm:$0xff]  ;;  %v7773_v8 = vld [vmem:[%s10306_s1 + $0x28] sm:$0xff] }
   0x2   :  { %v7783_v1 = vld [vmem:[%s10306_s1 + $0x78] sm:$0xff]  ;;  %4498 = vmatpush.bf16.msra.mxu0 %v7775_v0  ;;  %v7782_v5 = vld [vmem:[%s10306_s1 + $0x70] sm:$0xff]  ;;  %v7781_v9 = vld [vmem:[%s10306_s1 + $0x68] sm:$0xff] }
   0x3   :  { %v7791_v2 = vld [vmem:[%s10306_s1 + $0xb8] sm:$0xff]  ;;  %4512 = vmatpush.bf16.msra.mxu1 %v7783_v1  ;;  %v7790_v6 = vld [vmem:[%s10306_s1 + $0xb0] sm:$0xff]  ;;  %v7789_v10 = vld [vmem:[%s10306_s1 + $0xa8] sm:$0xff] }
   0x4   :  { %v7799_v3 = vld [vmem:[%s10306_s1 + $0xf8] sm:$0xff]  ;;  %4526 = vmatpush.bf16.msra.mxu2 %v7791_v2  ;;  %v7798_v7 = vld [vmem:[%s10306_s1 + $0xf0] sm:$0xff]  ;;  %v7797_v11 = vld [vmem:[%s10306_s1 + $0xe8] sm:$0xff] }
   0x5   :  { %4540 = vmatpush.bf16.msra.mxu3 %v7799_v3  ;;  %v7772_v12 = vld [vmem:[%s10306_s1 + $0x20] sm:$0xff]  ;;  %v7771_v16 = vld [vmem:[%s10306_s1 + $0x18] sm:$0xff]  ;;  %v7770_v20 = vld [vmem:[%s10306_s1 + $0x10] sm:$0xff] }
   0x6   :  { %4499 = vmatpush.bf16.msra.mxu0 %v7774_v4  ;;  %v7780_v13 = vld [vmem:[%s10306_s1 + $0x60] sm:$0xff]  ;;  %v7779_v17 = vld [vmem:[%s10306_s1 + $0x58] sm:$0xff]  ;;  %v7778_v21 = vld [vmem:[%s10306_s1 + $0x50] sm:$0xff] }
   0x7   :  { %4513 = vmatpush.bf16.msra.mxu1 %v7782_v5  ;;  %v7788_v14 = vld [vmem:[%s10306_s1 + $0xa0] sm:$0xff]  ;;  %v7787_v18 = vld [vmem:[%s10306_s1 + $0x98] sm:$0xff]  ;;  %v7786_v22 = vld [vmem:[%s10306_s1 + $0x90] sm:$0xff] }
   0x8   :  { %4527 = vmatpush.bf16.msra.mxu2 %v7790_v6  ;;  %v7796_v15 = vld [vmem:[%s10306_s1 + $0xe0] sm:$0xff]  ;;  %v7795_v19 = vld [vmem:[%s10306_s1 + $0xd8] sm:$0xff]  ;;  %v7794_v23 = vld [vmem:[%s10306_s1 + $0xd0] sm:$0xff] }
   0x9   :  { %4541 = vmatpush.bf16.msra.mxu3 %v7798_v7  ;;  %v7769_v24 = vld [vmem:[%s10306_s1 + $0x8] sm:$0xff]  ;;  %v7768_v28 = vld [vmem:[%s10306_s1] sm:$0xff]  ;;  %v7807_v32 = vld [vmem:[%s10306_s1 + $0x138] sm:$0xff] }
   0xa   :  { %4500 = vmatpush.bf16.msra.mxu0 %v7773_v8  ;;  %v7777_v25 = vld [vmem:[%s10306_s1 + $0x48] sm:$0xff]  ;;  %v7776_v29 = vld [vmem:[%s10306_s1 + $0x40] sm:$0xff]  ;;  %v7815_v33 = vld [vmem:[%s10306_s1 + $0x178] sm:$0xff] }
   0xb   :  { %4514 = vmatpush.bf16.msra.mxu1 %v7781_v9  ;;  %v7785_v26 = vld [vmem:[%s10306_s1 + $0x88] sm:$0xff]  ;;  %v7784_v30 = vld [vmem:[%s10306_s1 + $0x80] sm:$0xff]  ;;  %v7823_v42 = vld [vmem:[%s10306_s1 + $0x1b8] sm:$0xff] }
   0xc   :  { %4528 = vmatpush.bf16.msra.mxu2 %v7789_v10  ;;  %v7793_v27 = vld [vmem:[%s10306_s1 + $0xc8] sm:$0xff]  ;;  %v7792_v31 = vld [vmem:[%s10306_s1 + $0xc0] sm:$0xff]  ;;  %v7831_v43 = vld [vmem:[%s10306_s1 + $0x1f8] sm:$0xff] }
   0xd   :  { %4542 = vmatpush.bf16.msra.mxu3 %v7797_v11  ;;  %v5402_v34 = vld [vmem:[%s10307_s0] sm:$0xf]  ;;  %v5410_v36 = vld [vmem:[%s10307_s0 + $0x8] sm:$0xf]  ;;  %v7704_v38 = vld [vmem:[%s10307_s0 + $0x4] sm:$0xf] }
   0xe   :  { %4501 = vmatpush.bf16.msra.mxu0 %v7772_v12  ;;  %v7736_v35 = vld [vmem:[%s10307_s0 + $0xfc] sm:$0xf0]  ;;  %v7737_v37 = vld [vmem:[%s10307_s0 + $0x104] sm:$0xf0]  ;;  %v5404_v39 = vld [vmem:[%s10307_s0 + $0x100] sm:$0xf0] }
   0xf   :  { %4515 = vmatpush.bf16.msra.mxu1 %v7780_v13  ;;  %v7705_v40 = vld [vmem:[%s10307_s0 + $0xc] sm:$0xf]  ;;  %v5403_v44 = vor.u32 %v7736_v35, %v5402_v34  ;;  %v5411_v45 = vor.u32 %v7737_v37, %v5410_v36  ;;  %v5407_v46 = vor.u32 %v7704_v38, %v5404_v39  ;;  %v7806_v48 = vld [vmem:[%s10306_s1 + $0x130] sm:$0xff]  ;;  %v7804_v56 = vld [vmem:[%s10306_s1 + $0x120] sm:$0xff] }
  0x10   :  { %4529 = vmatpush.bf16.msra.mxu2 %v7788_v14  ;;  %v5412_v41 = vld [vmem:[%s10307_s0 + $0x108] sm:$0xf0]  ;;  %v7814_v49 = vld [vmem:[%s10306_s1 + $0x170] sm:$0xff]  ;;  %v7812_v57 = vld [vmem:[%s10306_s1 + $0x160] sm:$0xff] }
  0x11   :  { %4543 = vmatpush.bf16.msra.mxu3 %v7796_v15  ;;  %v5415_v47 = vor.u32 %v7705_v40, %v5412_v41  ;;  %v7822_v50 = vld [vmem:[%s10306_s1 + $0x1b0] sm:$0xff]  ;;  %v7805_v52 = vld [vmem:[%s10306_s1 + $0x128] sm:$0xff]  ;;  %v7820_v58 = vld [vmem:[%s10306_s1 + $0x1a0] sm:$0xff] }
  0x12   :  { %4502 = vmatpush.bf16.msra.mxu0 %v7771_v16  ;;  %v7830_v51 = vld [vmem:[%s10306_s1 + $0x1f0] sm:$0xff]  ;;  %v7813_v53 = vld [vmem:[%s10306_s1 + $0x168] sm:$0xff]  ;;  %v7828_v59 = vld [vmem:[%s10306_s1 + $0x1e0] sm:$0xff] }
  0x13   :  { %4516 = vmatpush.bf16.msra.mxu1 %v7779_v17  ;;  %v7821_v54 = vld [vmem:[%s10306_s1 + $0x1a8] sm:$0xff]  ;;  %v7803_v60 = vld [vmem:[%s10306_s1 + $0x118] sm:$0xff]  ;;  %v7802_v0 = vld [vmem:[%s10306_s1 + $0x110] sm:$0xff] }
  0x14   :  { %4530 = vmatpush.bf16.msra.mxu2 %v7787_v18  ;;  %v7829_v55 = vld [vmem:[%s10306_s1 + $0x1e8] sm:$0xff]  ;;  %v7811_v61 = vld [vmem:[%s10306_s1 + $0x158] sm:$0xff]  ;;  %v7810_v1 = vld [vmem:[%s10306_s1 + $0x150] sm:$0xff] }
  0x15   :  { %4544 = vmatpush.bf16.msra.mxu3 %v7795_v19  ;;  %v7819_v62 = vld [vmem:[%s10306_s1 + $0x198] sm:$0xff]  ;;  %v7818_v2 = vld [vmem:[%s10306_s1 + $0x190] sm:$0xff]  ;;  %v7801_v4 = vld [vmem:[%s10306_s1 + $0x108] sm:$0xff] }
  0x16   :  { %4503 = vmatpush.bf16.msra.mxu0 %v7770_v20  ;;  %v7827_v63 = vld [vmem:[%s10306_s1 + $0x1d8] sm:$0xff]  ;;  %v7826_v3 = vld [vmem:[%s10306_s1 + $0x1d0] sm:$0xff]  ;;  %v7809_v5 = vld [vmem:[%s10306_s1 + $0x148] sm:$0xff] }
  0x17   :  { %4517 = vmatpush.bf16.msra.mxu1 %v7778_v21  ;;  %v7817_v6 = vld [vmem:[%s10306_s1 + $0x188] sm:$0xff]  ;;  %v7800_v8 = vld [vmem:[%s10306_s1 + $0x100] sm:$0xff]  ;;  %v7839_v12 = vld [vmem:[%s10306_s1 + $0x238] sm:$0xff] }
  0x18   :  { %4531 = vmatpush.bf16.msra.mxu2 %v7786_v22  ;;  %v7825_v7 = vld [vmem:[%s10306_s1 + $0x1c8] sm:$0xff]  ;;  %v7808_v9 = vld [vmem:[%s10306_s1 + $0x140] sm:$0xff]  ;;  %v7847_v13 = vld [vmem:[%s10306_s1 + $0x278] sm:$0xff] }
  0x19   :  { %4545 = vmatpush.bf16.msra.mxu3 %v7794_v23  ;;  %v7816_v10 = vld [vmem:[%s10306_s1 + $0x180] sm:$0xff]  ;;  %v5418_v14 = vld [vmem:[%s10307_s0 + $0x10] sm:$0xf]  ;;  %v5426_v16 = vld [vmem:[%s10307_s0 + $0x18] sm:$0xf] }
  0x1a   :  { %4504 = vmatpush.bf16.msra.mxu0 %v7769_v24  ;;  %v7824_v11 = vld [vmem:[%s10306_s1 + $0x1c0] sm:$0xff]  ;;  %v7738_v15 = vld [vmem:[%s10307_s0 + $0x10c] sm:$0xf0]  ;;  %v7739_v17 = vld [vmem:[%s10307_s0 + $0x114] sm:$0xf0] }
  0x1b   :  { %4518 = vmatpush.bf16.msra.mxu1 %v7777_v25  ;;  %v7706_v18 = vld [vmem:[%s10307_s0 + $0x14] sm:$0xf]  ;;  %v7707_v20 = vld [vmem:[%s10307_s0 + $0x1c] sm:$0xf]  ;;  %v5419_v24 = vor.u32 %v7738_v15, %v5418_v14  ;;  %v5427_v25 = vor.u32 %v7739_v17, %v5426_v16  ;;  %v7853_v34 = vld [vmem:[%s10306_s1 + $0x2a8] sm:$0xff] }
  0x1c   :  { %4532 = vmatpush.bf16.msra.mxu2 %v7785_v26  ;;  %v5420_v19 = vld [vmem:[%s10307_s0 + $0x110] sm:$0xf0]  ;;  %v5428_v21 = vld [vmem:[%s10307_s0 + $0x118] sm:$0xf0]  ;;  %v7861_v35 = vld [vmem:[%s10306_s1 + $0x2e8] sm:$0xff] }
  0x1d   :  { %4546 = vmatpush.bf16.msra.mxu3 %v7793_v27  ;;  %v7855_v22 = vld [vmem:[%s10306_s1 + $0x2b8] sm:$0xff]  ;;  %v5423_v26 = vor.u32 %v7706_v18, %v5420_v19  ;;  %v5431_v27 = vor.u32 %v7707_v20, %v5428_v21  ;;  %v7836_v36 = vld [vmem:[%s10306_s1 + $0x220] sm:$0xff]  ;;  %v7885_v14 = vld [vmem:[%s10306_s1 + $0x3a8] sm:$0xff] }
  0x1e   :  { %4505 = vmatpush.bf16.msra.mxu0 %v7768_v28  ;;  %v7863_v23 = vld [vmem:[%s10306_s1 + $0x2f8] sm:$0xff]  ;;  %v7838_v28 = vld [vmem:[%s10306_s1 + $0x230] sm:$0xff]  ;;  %v7844_v37 = vld [vmem:[%s10306_s1 + $0x260] sm:$0xff] }
  0x1f   :  { %4519 = vmatpush.bf16.msra.mxu1 %v7776_v29  ;;  %v7846_v29 = vld [vmem:[%s10306_s1 + $0x270] sm:$0xff]  ;;  %v7852_v38 = vld [vmem:[%s10306_s1 + $0x2a0] sm:$0xff]  ;;  %v7835_v40 = vld [vmem:[%s10306_s1 + $0x218] sm:$0xff] }
  0x20   :  { %4533 = vmatpush.bf16.msra.mxu2 %v7784_v30  ;;  %v7854_v30 = vld [vmem:[%s10306_s1 + $0x2b0] sm:$0xff]  ;;  %v7860_v39 = vld [vmem:[%s10306_s1 + $0x2e0] sm:$0xff]  ;;  %v7843_v41 = vld [vmem:[%s10306_s1 + $0x258] sm:$0xff] }
  0x21   :  { %4547 = vmatpush.bf16.msra.mxu3 %v7792_v31  ;;  %4506 = vmatmul.bf16.vlgmr.msra.gmra.mxu0 %v5403_v44  ;;  %v7862_v31 = vld [vmem:[%s10306_s1 + $0x2f0] sm:$0xff]  ;;  %v7893_v15 = vld [vmem:[%s10306_s1 + $0x3e8] sm:$0xff]  ;;  %v7868_v16 = vld [vmem:[%s10306_s1 + $0x320] sm:$0xff] }
  0x22   :  { %4554 = vmatpush.bf16.msrb.mxu0 %v7807_v32  ;;  %4520 = vmatmul.bf16.vlgmr.msra.gmra.mxu1 %v5407_v46  ;;  %v7837_v32 = vld [vmem:[%s10306_s1 + $0x228] sm:$0xff]  ;;  %v7834_v44 = vld [vmem:[%s10306_s1 + $0x210] sm:$0xff]  ;;  %v7876_v17 = vld [vmem:[%s10306_s1 + $0x360] sm:$0xff] }
  0x23   :  { %4568 = vmatpush.bf16.msrb.mxu1 %v7815_v33  ;;  %4534 = vmatmul.bf16.vlgmr.msra.gmra.mxu2 %v5411_v45  ;;  %v7845_v33 = vld [vmem:[%s10306_s1 + $0x268] sm:$0xff]  ;;  %v7842_v45 = vld [vmem:[%s10306_s1 + $0x250] sm:$0xff]  ;;  %v7884_v18 = vld [vmem:[%s10306_s1 + $0x3a0] sm:$0xff] }
  0x24   :  { %4582 = vmatpush.bf16.msrb.mxu2 %v7823_v42  ;;  %4548 = vmatmul.bf16.vlgmr.msra.gmra.mxu3 %v5415_v47  ;;  %v7851_v42 = vld [vmem:[%s10306_s1 + $0x298] sm:$0xff]  ;;  %v7850_v46 = vld [vmem:[%s10306_s1 + $0x290] sm:$0xff]  ;;  %v7892_v19 = vld [vmem:[%s10306_s1 + $0x3e0] sm:$0xff] }
  0x25   :  { %4596 = vmatpush.bf16.msrb.mxu3 %v7831_v43  ;;  %v7859_v43 = vld [vmem:[%s10306_s1 + $0x2d8] sm:$0xff]  ;;  %v7858_v47 = vld [vmem:[%s10306_s1 + $0x2d0] sm:$0xff] }
  0x26   :  { %4555 = vmatpush.bf16.msrb.mxu0 %v7806_v48  ;;  %v7833_v48 = vld [vmem:[%s10306_s1 + $0x208] sm:$0xff]  ;;  %v7867_v20 = vld [vmem:[%s10306_s1 + $0x318] sm:$0xff] }
  0x27   :  { %4569 = vmatpush.bf16.msrb.mxu1 %v7814_v49  ;;  %v7841_v49 = vld [vmem:[%s10306_s1 + $0x248] sm:$0xff]  ;;  %v7875_v21 = vld [vmem:[%s10306_s1 + $0x358] sm:$0xff] }
  0x28   :  { %4583 = vmatpush.bf16.msrb.mxu2 %v7822_v50  ;;  %v7849_v50 = vld [vmem:[%s10306_s1 + $0x288] sm:$0xff] }
  0x29   :  { %4597 = vmatpush.bf16.msrb.mxu3 %v7830_v51  ;;  %v7857_v51 = vld [vmem:[%s10306_s1 + $0x2c8] sm:$0xff] }
  0x2a   :  { %4556 = vmatpush.bf16.msrb.mxu0 %v7805_v52  ;;  %v7832_v52 = vld [vmem:[%s10306_s1 + $0x200] sm:$0xff] }
  0x2b   :  { %4570 = vmatpush.bf16.msrb.mxu1 %v7813_v53  ;;  %v7840_v53 = vld [vmem:[%s10306_s1 + $0x240] sm:$0xff] }
  0x2c   :  { %4584 = vmatpush.bf16.msrb.mxu2 %v7821_v54  ;;  %v7848_v54 = vld [vmem:[%s10306_s1 + $0x280] sm:$0xff] }
  0x2d   :  { %4598 = vmatpush.bf16.msrb.mxu3 %v7829_v55  ;;  %v7856_v55 = vld [vmem:[%s10306_s1 + $0x2c0] sm:$0xff] }
  0x2e   :  { %4557 = vmatpush.bf16.msrb.mxu0 %v7804_v56  ;;  %v7871_v56 = vld [vmem:[%s10306_s1 + $0x338] sm:$0xff] }
  0x2f   :  { %4571 = vmatpush.bf16.msrb.mxu1 %v7812_v57  ;;  %v7879_v57 = vld [vmem:[%s10306_s1 + $0x378] sm:$0xff] }
  0x30   :  { %4585 = vmatpush.bf16.msrb.mxu2 %v7820_v58  ;;  %v5434_v58 = vld [vmem:[%s10307_s0 + $0x20] sm:$0xf] }
  0x31   :  { %4599 = vmatpush.bf16.msrb.mxu3 %v7828_v59  ;;  %v7740_v59 = vld [vmem:[%s10307_s0 + $0x11c] sm:$0xf0] }
  0x32   :  { %4558 = vmatpush.bf16.msrb.mxu0 %v7803_v60  ;;  %v5442_v60 = vld [vmem:[%s10307_s0 + $0x28] sm:$0xf] }
  0x33   :  { %4572 = vmatpush.bf16.msrb.mxu1 %v7811_v61  ;;  %v7741_v61 = vld [vmem:[%s10307_s0 + $0x124] sm:$0xf0] }
  0x34   :  { %4586 = vmatpush.bf16.msrb.mxu2 %v7819_v62  ;;  %v7708_v62 = vld [vmem:[%s10307_s0 + $0x24] sm:$0xf] }
  0x35   :  { %4600 = vmatpush.bf16.msrb.mxu3 %v7827_v63  ;;  %v5436_v63 = vld [vmem:[%s10307_s0 + $0x120] sm:$0xf0] }
  0x36   :  { %4559 = vmatpush.bf16.msrb.mxu0 %v7802_v0  ;;  %v7709_v0 = vld [vmem:[%s10307_s0 + $0x2c] sm:$0xf] }
  0x37   :  { %4573 = vmatpush.bf16.msrb.mxu1 %v7810_v1  ;;  %v5444_v1 = vld [vmem:[%s10307_s0 + $0x128] sm:$0xf0] }
  0x38   :  { %4587 = vmatpush.bf16.msrb.mxu2 %v7818_v2  ;;  %v7887_v2 = vld [vmem:[%s10306_s1 + $0x3b8] sm:$0xff] }
  0x39   :  { %4601 = vmatpush.bf16.msrb.mxu3 %v7826_v3  ;;  %v7895_v3 = vld [vmem:[%s10306_s1 + $0x3f8] sm:$0xff] }
  0x3a   :  { %4560 = vmatpush.bf16.msrb.mxu0 %v7801_v4  ;;  %v5435_v4 = vor.u32 %v7740_v59, %v5434_v58  ;;  %v7917_v58 = vld [vmem:[%s10306_s1 + $0x4a8] sm:$0xff] }
  0x3b   :  { %4574 = vmatpush.bf16.msrb.mxu1 %v7809_v5  ;;  %v5443_v5 = vor.u32 %v7741_v61, %v5442_v60  ;;  %v7925_v59 = vld [vmem:[%s10306_s1 + $0x4e8] sm:$0xff]  ;;  %v7900_v60 = vld [vmem:[%s10306_s1 + $0x420] sm:$0xff] }
  0x3c   :  { %4588 = vmatpush.bf16.msrb.mxu2 %v7817_v6  ;;  %v5439_v6 = vor.u32 %v7708_v62, %v5436_v63  ;;  %v7908_v61 = vld [vmem:[%s10306_s1 + $0x460] sm:$0xff] }
  0x3d   :  { %4602 = vmatpush.bf16.msrb.mxu3 %v7825_v7  ;;  %v5447_v7 = vor.u32 %v7709_v0, %v5444_v1  ;;  %v7916_v62 = vld [vmem:[%s10306_s1 + $0x4a0] sm:$0xff]  ;;  %v7899_v0 = vld [vmem:[%s10306_s1 + $0x418] sm:$0xff] }
  0x3e   :  { %4561 = vmatpush.bf16.msrb.mxu0 %v7800_v8  ;;  %v7870_v8 = vld [vmem:[%s10306_s1 + $0x330] sm:$0xff]  ;;  %v7924_v63 = vld [vmem:[%s10306_s1 + $0x4e0] sm:$0xff]  ;;  %v7907_v1 = vld [vmem:[%s10306_s1 + $0x458] sm:$0xff] }
  0x3f   :  { %4575 = vmatpush.bf16.msrb.mxu1 %v7808_v9  ;;  %v7878_v9 = vld [vmem:[%s10306_s1 + $0x370] sm:$0xff] }
  0x40   :  { %4589 = vmatpush.bf16.msrb.mxu2 %v7816_v10  ;;  %v7886_v10 = vld [vmem:[%s10306_s1 + $0x3b0] sm:$0xff] }
  0x41   :  { %4603 = vmatpush.bf16.msrb.mxu3 %v7824_v11  ;;  %4562 = vmatmul.bf16.vlgmr.msrb.gmra.mxu0 %v5419_v24  ;;  %v7894_v11 = vld [vmem:[%s10306_s1 + $0x3f0] sm:$0xff] }
  0x42   :  { %4610 = vmatpush.bf16.msra.mxu0 %v7839_v12  ;;  %4576 = vmatmul.bf16.vlgmr.msrb.gmra.mxu1 %v5423_v26  ;;  %v7869_v12 = vld [vmem:[%s10306_s1 + $0x328] sm:$0xff]  ;;  %v7866_v24 = vld [vmem:[%s10306_s1 + $0x310] sm:$0xff] }
  0x43   :  { %4624 = vmatpush.bf16.msra.mxu1 %v7847_v13  ;;  %4590 = vmatmul.bf16.vlgmr.msrb.gmra.mxu2 %v5427_v25  ;;  %v7877_v13 = vld [vmem:[%s10306_s1 + $0x368] sm:$0xff]  ;;  %v7874_v25 = vld [vmem:[%s10306_s1 + $0x350] sm:$0xff] }
  0x44   :  { %4638 = vmatpush.bf16.msra.mxu2 %v7855_v22  ;;  %4604 = vmatmul.bf16.vlgmr.msrb.gmra.mxu3 %v5431_v27  ;;  %v7883_v22 = vld [vmem:[%s10306_s1 + $0x398] sm:$0xff]  ;;  %v7882_v26 = vld [vmem:[%s10306_s1 + $0x390] sm:$0xff] }
  0x45   :  { %4652 = vmatpush.bf16.msra.mxu3 %v7863_v23  ;;  %v7891_v23 = vld [vmem:[%s10306_s1 + $0x3d8] sm:$0xff]  ;;  %v7890_v27 = vld [vmem:[%s10306_s1 + $0x3d0] sm:$0xff] }
  0x46   :  { %4611 = vmatpush.bf16.msra.mxu0 %v7838_v28  ;;  %v7865_v28 = vld [vmem:[%s10306_s1 + $0x308] sm:$0xff] }
  0x47   :  { %4625 = vmatpush.bf16.msra.mxu1 %v7846_v29  ;;  %v7873_v29 = vld [vmem:[%s10306_s1 + $0x348] sm:$0xff] }
  0x48   :  { %4639 = vmatpush.bf16.msra.mxu2 %v7854_v30  ;;  %v7881_v30 = vld [vmem:[%s10306_s1 + $0x388] sm:$0xff] }
  0x49   :  { %4653 = vmatpush.bf16.msra.mxu3 %v7862_v31  ;;  %v7889_v31 = vld [vmem:[%s10306_s1 + $0x3c8] sm:$0xff] }
  0x4a   :  { %4612 = vmatpush.bf16.msra.mxu0 %v7837_v32  ;;  %v7864_v32 = vld [vmem:[%s10306_s1 + $0x300] sm:$0xff] }
  0x4b   :  { %4626 = vmatpush.bf16.msra.mxu1 %v7845_v33  ;;  %v7872_v33 = vld [vmem:[%s10306_s1 + $0x340] sm:$0xff] }
  0x4c   :  { %4640 = vmatpush.bf16.msra.mxu2 %v7853_v34  ;;  %v7880_v34 = vld [vmem:[%s10306_s1 + $0x380] sm:$0xff] }
  0x4d   :  { %4654 = vmatpush.bf16.msra.mxu3 %v7861_v35  ;;  %v7888_v35 = vld [vmem:[%s10306_s1 + $0x3c0] sm:$0xff] }
  0x4e   :  { %4613 = vmatpush.bf16.msra.mxu0 %v7836_v36  ;;  %v7903_v36 = vld [vmem:[%s10306_s1 + $0x438] sm:$0xff] }
  0x4f   :  { %4627 = vmatpush.bf16.msra.mxu1 %v7844_v37  ;;  %v7911_v37 = vld [vmem:[%s10306_s1 + $0x478] sm:$0xff] }
  0x50   :  { %4641 = vmatpush.bf16.msra.mxu2 %v7852_v38  ;;  %v5450_v38 = vld [vmem:[%s10307_s0 + $0x30] sm:$0xf] }
  0x51   :  { %4655 = vmatpush.bf16.msra.mxu3 %v7860_v39  ;;  %v7742_v39 = vld [vmem:[%s10307_s0 + $0x12c] sm:$0xf0] }
  0x52   :  { %4614 = vmatpush.bf16.msra.mxu0 %v7835_v40  ;;  %v5458_v40 = vld [vmem:[%s10307_s0 + $0x38] sm:$0xf] }
  0x53   :  { %4628 = vmatpush.bf16.msra.mxu1 %v7843_v41  ;;  %v7743_v41 = vld [vmem:[%s10307_s0 + $0x134] sm:$0xf0] }
  0x54   :  { %4642 = vmatpush.bf16.msra.mxu2 %v7851_v42  ;;  %v7710_v42 = vld [vmem:[%s10307_s0 + $0x34] sm:$0xf] }
  0x55   :  { %4656 = vmatpush.bf16.msra.mxu3 %v7859_v43  ;;  %v5452_v43 = vld [vmem:[%s10307_s0 + $0x130] sm:$0xf0] }
  0x56   :  { %4615 = vmatpush.bf16.msra.mxu0 %v7834_v44  ;;  %v7711_v44 = vld [vmem:[%s10307_s0 + $0x3c] sm:$0xf] }
  0x57   :  { %4629 = vmatpush.bf16.msra.mxu1 %v7842_v45  ;;  %v5460_v45 = vld [vmem:[%s10307_s0 + $0x138] sm:$0xf0] }
  0x58   :  { %4643 = vmatpush.bf16.msra.mxu2 %v7850_v46  ;;  %v7919_v46 = vld [vmem:[%s10306_s1 + $0x4b8] sm:$0xff] }
  0x59   :  { %4657 = vmatpush.bf16.msra.mxu3 %v7858_v47  ;;  %v7927_v47 = vld [vmem:[%s10306_s1 + $0x4f8] sm:$0xff] }
  0x5a   :  { %4616 = vmatpush.bf16.msra.mxu0 %v7833_v48  ;;  %v5451_v48 = vor.u32 %v7742_v39, %v5450_v38  ;;  %v8934_v38 = vld [vmem:[%s10308_s2] ss:$0 sm:$0xff]  ;;  %v7949_v39 = vld [vmem:[%s10306_s1 + $0x5a8] sm:$0xff] }
  0x5b   :  { %4630 = vmatpush.bf16.msra.mxu1 %v7841_v49  ;;  %v5459_v49 = vor.u32 %v7743_v41, %v5458_v40  ;;  %v7957_v40 = vld [vmem:[%s10306_s1 + $0x5e8] sm:$0xff] }
  0x5c   :  { %4644 = vmatpush.bf16.msra.mxu2 %v7849_v50  ;;  %v5455_v50 = vor.u32 %v7710_v42, %v5452_v43  ;;  %v7932_v42 = vld [vmem:[%s10306_s1 + $0x520] sm:$0xff] }
  0x5d   :  { %4658 = vmatpush.bf16.msra.mxu3 %v7857_v51  ;;  %v5463_v51 = vor.u32 %v7711_v44, %v5460_v45  ;;  %v7940_v43 = vld [vmem:[%s10306_s1 + $0x560] sm:$0xff] }
  0x5e   :  { %4617 = vmatpush.bf16.msra.mxu0 %v7832_v52  ;;  %v7902_v52 = vld [vmem:[%s10306_s1 + $0x430] sm:$0xff]  ;;  %v7948_v45 = vld [vmem:[%s10306_s1 + $0x5a0] sm:$0xff] }
  0x5f   :  { %4631 = vmatpush.bf16.msra.mxu1 %v7840_v53  ;;  %v7910_v53 = vld [vmem:[%s10306_s1 + $0x470] sm:$0xff] }
  0x60   :  { %4645 = vmatpush.bf16.msra.mxu2 %v7848_v54  ;;  %v7918_v54 = vld [vmem:[%s10306_s1 + $0x4b0] sm:$0xff] }
  0x61   :  { %4659 = vmatpush.bf16.msra.mxu3 %v7856_v55  ;;  %4618 = vmatmul.bf16.vlgmr.msra.gmra.mxu0 %v5435_v4  ;;  %v7926_v55 = vld [vmem:[%s10306_s1 + $0x4f0] sm:$0xff] }
  0x62   :  { %4666 = vmatpush.bf16.msrb.mxu0 %v7871_v56  ;;  %4632 = vmatmul.bf16.vlgmr.msra.gmra.mxu1 %v5439_v6  ;;  %v7901_v56 = vld [vmem:[%s10306_s1 + $0x428] sm:$0xff]  ;;  %v7898_v4 = vld [vmem:[%s10306_s1 + $0x410] sm:$0xff] }
  0x63   :  { %4680 = vmatpush.bf16.msrb.mxu1 %v7879_v57  ;;  %4646 = vmatmul.bf16.vlgmr.msra.gmra.mxu2 %v5443_v5  ;;  %v7909_v57 = vld [vmem:[%s10306_s1 + $0x468] sm:$0xff]  ;;  %v7906_v5 = vld [vmem:[%s10306_s1 + $0x450] sm:$0xff] }
  0x64   :  { %4694 = vmatpush.bf16.msrb.mxu2 %v7887_v2  ;;  %4660 = vmatmul.bf16.vlgmr.msra.gmra.mxu3 %v5447_v7  ;;  %v7915_v2 = vld [vmem:[%s10306_s1 + $0x498] sm:$0xff]  ;;  %v7914_v6 = vld [vmem:[%s10306_s1 + $0x490] sm:$0xff] }
  0x65   :  { %4708 = vmatpush.bf16.msrb.mxu3 %v7895_v3  ;;  %v7923_v3 = vld [vmem:[%s10306_s1 + $0x4d8] sm:$0xff]  ;;  %v7922_v7 = vld [vmem:[%s10306_s1 + $0x4d0] sm:$0xff] }
  0x66   :  { %4667 = vmatpush.bf16.msrb.mxu0 %v7870_v8  ;;  %v7897_v8 = vld [vmem:[%s10306_s1 + $0x408] sm:$0xff] }
  0x67   :  { %4681 = vmatpush.bf16.msrb.mxu1 %v7878_v9  ;;  %v7905_v9 = vld [vmem:[%s10306_s1 + $0x448] sm:$0xff] }
  0x68   :  { %4695 = vmatpush.bf16.msrb.mxu2 %v7886_v10  ;;  %v7913_v10 = vld [vmem:[%s10306_s1 + $0x488] sm:$0xff] }
  0x69   :  { %4709 = vmatpush.bf16.msrb.mxu3 %v7894_v11  ;;  %v7921_v11 = vld [vmem:[%s10306_s1 + $0x4c8] sm:$0xff] }
  0x6a   :  { %4668 = vmatpush.bf16.msrb.mxu0 %v7869_v12  ;;  %v7896_v12 = vld [vmem:[%s10306_s1 + $0x400] sm:$0xff] }
  0x6b   :  { %4682 = vmatpush.bf16.msrb.mxu1 %v7877_v13  ;;  %v7904_v13 = vld [vmem:[%s10306_s1 + $0x440] sm:$0xff] }
  0x6c   :  { %4696 = vmatpush.bf16.msrb.mxu2 %v7885_v14  ;;  %v7912_v14 = vld [vmem:[%s10306_s1 + $0x480] sm:$0xff] }
  0x6d   :  { %4710 = vmatpush.bf16.msrb.mxu3 %v7893_v15  ;;  %v7920_v15 = vld [vmem:[%s10306_s1 + $0x4c0] sm:$0xff] }
  0x6e   :  { %4669 = vmatpush.bf16.msrb.mxu0 %v7868_v16  ;;  %v7935_v16 = vld [vmem:[%s10306_s1 + $0x538] sm:$0xff] }
  0x6f   :  { %4683 = vmatpush.bf16.msrb.mxu1 %v7876_v17  ;;  %v7943_v17 = vld [vmem:[%s10306_s1 + $0x578] sm:$0xff] }
  0x70   :  { %4697 = vmatpush.bf16.msrb.mxu2 %v7884_v18  ;;  %v5466_v18 = vld [vmem:[%s10307_s0 + $0x40] sm:$0xf] }
  0x71   :  { %4711 = vmatpush.bf16.msrb.mxu3 %v7892_v19  ;;  %v7744_v19 = vld [vmem:[%s10307_s0 + $0x13c] sm:$0xf0] }
  0x72   :  { %4670 = vmatpush.bf16.msrb.mxu0 %v7867_v20  ;;  %v5474_v20 = vld [vmem:[%s10307_s0 + $0x48] sm:$0xf] }
  0x73   :  { %4684 = vmatpush.bf16.msrb.mxu1 %v7875_v21  ;;  %v7745_v21 = vld [vmem:[%s10307_s0 + $0x144] sm:$0xf0] }
  0x74   :  { %4698 = vmatpush.bf16.msrb.mxu2 %v7883_v22  ;;  %v7712_v22 = vld [vmem:[%s10307_s0 + $0x44] sm:$0xf] }
  0x75   :  { %4712 = vmatpush.bf16.msrb.mxu3 %v7891_v23  ;;  %v5468_v23 = vld [vmem:[%s10307_s0 + $0x140] sm:$0xf0] }
  0x76   :  { %4671 = vmatpush.bf16.msrb.mxu0 %v7866_v24  ;;  %v7713_v24 = vld [vmem:[%s10307_s0 + $0x4c] sm:$0xf] }
  0x77   :  { %4685 = vmatpush.bf16.msrb.mxu1 %v7874_v25  ;;  %v5476_v25 = vld [vmem:[%s10307_s0 + $0x148] sm:$0xf0] }
  0x78   :  { %4699 = vmatpush.bf16.msrb.mxu2 %v7882_v26  ;;  %v7951_v26 = vld [vmem:[%s10306_s1 + $0x5b8] sm:$0xff] }
  0x79   :  { %4713 = vmatpush.bf16.msrb.mxu3 %v7890_v27  ;;  %v7959_v27 = vld [vmem:[%s10306_s1 + $0x5f8] sm:$0xff] }
  0x7a   :  { %4672 = vmatpush.bf16.msrb.mxu0 %v7865_v28  ;;  %v5467_v28 = vor.u32 %v7744_v19, %v5466_v18 }
  0x7b   :  { %4686 = vmatpush.bf16.msrb.mxu1 %v7873_v29  ;;  %v5475_v29 = vor.u32 %v7745_v21, %v5474_v20 }
  0x7c   :  { %4700 = vmatpush.bf16.msrb.mxu2 %v7881_v30  ;;  %v5471_v30 = vor.u32 %v7712_v22, %v5468_v23  ;;  %v7966_v23 = vld [vmem:[%s10306_s1 + $0x630] sm:$0xff] }
  0x7d   :  { %4714 = vmatpush.bf16.msrb.mxu3 %v7889_v31  ;;  %v5479_v31 = vor.u32 %v7713_v24, %v5476_v25  ;;  %v7974_v24 = vld [vmem:[%s10306_s1 + $0x670] sm:$0xff] }
  0x7e   :  { %4673 = vmatpush.bf16.msrb.mxu0 %v7864_v32  ;;  %v7934_v32 = vld [vmem:[%s10306_s1 + $0x530] sm:$0xff] }
  0x7f   :  { %4687 = vmatpush.bf16.msrb.mxu1 %v7872_v33  ;;  %v7942_v33 = vld [vmem:[%s10306_s1 + $0x570] sm:$0xff] }
  0x80   :  { %4701 = vmatpush.bf16.msrb.mxu2 %v7880_v34  ;;  %v7950_v34 = vld [vmem:[%s10306_s1 + $0x5b0] sm:$0xff] }
  0x81   :  { %4715 = vmatpush.bf16.msrb.mxu3 %v7888_v35  ;;  %4674 = vmatmul.bf16.vlgmr.msrb.gmra.mxu0 %v5451_v48  ;;  %v7958_v35 = vld [vmem:[%s10306_s1 + $0x5f0] sm:$0xff] }
  0x82   :  { %4722 = vmatpush.bf16.msra.mxu0 %v7903_v36  ;;  %4688 = vmatmul.bf16.vlgmr.msrb.gmra.mxu1 %v5455_v50  ;;  %v7933_v36 = vld [vmem:[%s10306_s1 + $0x528] sm:$0xff]  ;;  %v7939_v50 = vld [vmem:[%s10306_s1 + $0x558] sm:$0xff]  ;;  %v7982_v25 = vld [vmem:[%s10306_s1 + $0x6b0] sm:$0xff] }
  0x83   :  { %4736 = vmatpush.bf16.msra.mxu1 %v7911_v37  ;;  %4702 = vmatmul.bf16.vlgmr.msrb.gmra.mxu2 %v5459_v49  ;;  %v7941_v37 = vld [vmem:[%s10306_s1 + $0x568] sm:$0xff]  ;;  %v7931_v49 = vld [vmem:[%s10306_s1 + $0x518] sm:$0xff] }
  0x84   :  { %4750 = vmatpush.bf16.msra.mxu2 %v7919_v46  ;;  %4716 = vmatmul.bf16.vlgmr.msrb.gmra.mxu3 %v5463_v51  ;;  %v7956_v46 = vld [vmem:[%s10306_s1 + $0x5e0] sm:$0xff]  ;;  %v7947_v51 = vld [vmem:[%s10306_s1 + $0x598] sm:$0xff] }
  0x85   :  { %4764 = vmatpush.bf16.msra.mxu3 %v7927_v47 }
  0x86   :  { %4723 = vmatpush.bf16.msra.mxu0 %v7902_v52  ;;  %v7955_v52 = vld [vmem:[%s10306_s1 + $0x5d8] sm:$0xff] }
  0x87   :  { %4737 = vmatpush.bf16.msra.mxu1 %v7910_v53 }
  0x88   :  { %4751 = vmatpush.bf16.msra.mxu2 %v7918_v54 }
  0x89   :  { %4765 = vmatpush.bf16.msra.mxu3 %v7926_v55 }
  0x8a   :  { %4724 = vmatpush.bf16.msra.mxu0 %v7901_v56  ;;  %v7930_v56 = vld [vmem:[%s10306_s1 + $0x510] sm:$0xff] }
  0x8b   :  { %4738 = vmatpush.bf16.msra.mxu1 %v7909_v57  ;;  %v7938_v57 = vld [vmem:[%s10306_s1 + $0x550] sm:$0xff] }
  0x8c   :  { %4752 = vmatpush.bf16.msra.mxu2 %v7917_v58 }
  0x8d   :  { %4766 = vmatpush.bf16.msra.mxu3 %v7925_v59  ;;  %v7946_v59 = vld [vmem:[%s10306_s1 + $0x590] sm:$0xff] }
  0x8e   :  { %4725 = vmatpush.bf16.msra.mxu0 %v7900_v60  ;;  %v7954_v60 = vld [vmem:[%s10306_s1 + $0x5d0] sm:$0xff] }
  0x8f   :  { %4739 = vmatpush.bf16.msra.mxu1 %v7908_v61  ;;  %v7929_v61 = vld [vmem:[%s10306_s1 + $0x508] sm:$0xff] }
  0x90   :  { %4753 = vmatpush.bf16.msra.mxu2 %v7916_v62  ;;  %v7937_v62 = vld [vmem:[%s10306_s1 + $0x548] sm:$0xff] }
  0x91   :  { %4767 = vmatpush.bf16.msra.mxu3 %v7924_v63  ;;  %v7945_v63 = vld [vmem:[%s10306_s1 + $0x588] sm:$0xff] }
  0x92   :  { %4726 = vmatpush.bf16.msra.mxu0 %v7899_v0  ;;  %v7953_v0 = vld [vmem:[%s10306_s1 + $0x5c8] sm:$0xff] }
  0x93   :  { %4740 = vmatpush.bf16.msra.mxu1 %v7907_v1  ;;  %v7928_v1 = vld [vmem:[%s10306_s1 + $0x500] sm:$0xff] }
  0x94   :  { %4754 = vmatpush.bf16.msra.mxu2 %v7915_v2  ;;  %v7936_v2 = vld [vmem:[%s10306_s1 + $0x540] sm:$0xff] }
  0x95   :  { %4768 = vmatpush.bf16.msra.mxu3 %v7923_v3  ;;  %v7944_v3 = vld [vmem:[%s10306_s1 + $0x580] sm:$0xff] }
  0x96   :  { %4727 = vmatpush.bf16.msra.mxu0 %v7898_v4  ;;  %v7952_v4 = vld [vmem:[%s10306_s1 + $0x5c0] sm:$0xff] }
  0x97   :  { %4741 = vmatpush.bf16.msra.mxu1 %v7906_v5  ;;  %v7967_v5 = vld [vmem:[%s10306_s1 + $0x638] sm:$0xff] }
  0x98   :  { %4755 = vmatpush.bf16.msra.mxu2 %v7914_v6  ;;  %v7975_v6 = vld [vmem:[%s10306_s1 + $0x678] sm:$0xff] }
  0x99   :  { %4769 = vmatpush.bf16.msra.mxu3 %v7922_v7  ;;  %v5482_v7 = vld [vmem:[%s10307_s0 + $0x50] sm:$0xf] }
  0x9a   :  { %4728 = vmatpush.bf16.msra.mxu0 %v7897_v8  ;;  %v7746_v8 = vld [vmem:[%s10307_s0 + $0x14c] sm:$0xf0] }
  0x9b   :  { %4742 = vmatpush.bf16.msra.mxu1 %v7905_v9  ;;  %v5490_v9 = vld [vmem:[%s10307_s0 + $0x58] sm:$0xf]  ;;  %v5483_v18 = vor.u32 %v7746_v8, %v5482_v7  ;;  %v5508_v7 = vld [vmem:[%s10307_s0 + $0x168] sm:$0xf0] }
  0x9c   :  { %4756 = vmatpush.bf16.msra.mxu2 %v7913_v10  ;;  %v7747_v10 = vld [vmem:[%s10307_s0 + $0x154] sm:$0xf0] }
  0x9d   :  { %4770 = vmatpush.bf16.msra.mxu3 %v7921_v11  ;;  %v7714_v11 = vld [vmem:[%s10307_s0 + $0x54] sm:$0xf]  ;;  %v5491_v19 = vor.u32 %v7747_v10, %v5490_v9  ;;  %v8015_v8 = vld [vmem:[%s10306_s1 + $0x7b8] sm:$0xff] }
  0x9e   :  { %4729 = vmatpush.bf16.msra.mxu0 %v7896_v12  ;;  %v4507_v41 = vpop.f32.mrf.mxu0  ;;  %v5484_v12 = vld [vmem:[%s10307_s0 + $0x150] sm:$0xf0]  ;;  %v8023_v9 = vld [vmem:[%s10306_s1 + $0x7f8] sm:$0xff] }
  0x9f   :  { %4743 = vmatpush.bf16.msra.mxu1 %v7904_v13  ;;  %v4508_v44 = vadd.f32 %v8934_v38, %v4507_v41  ;;  %v4521_v47 = vpop.f32.mrf.mxu1  ;;  %v7715_v13 = vld [vmem:[%s10307_s0 + $0x5c] sm:$0xf]  ;;  %v5487_v20 = vor.u32 %v7714_v11, %v5484_v12 }
  0xa0   :  { %4757 = vmatpush.bf16.msra.mxu2 %v7912_v14  ;;  %v5492_v14 = vld [vmem:[%s10307_s0 + $0x158] sm:$0xf0] }
  0xa1   :  { %4771 = vmatpush.bf16.msra.mxu3 %v7920_v15  ;;  %4730 = vmatmul.bf16.vlgmr.msra.gmra.mxu0 %v5467_v28  ;;  %v4522_v48 = vadd.f32 %v4521_v47, %v4508_v44  ;;  %v7983_v15 = vld [vmem:[%s10306_s1 + $0x6b8] sm:$0xff]  ;;  %v5495_v21 = vor.u32 %v7715_v13, %v5492_v14  ;;  %v7965_v28 = vld [vmem:[%s10306_s1 + $0x628] sm:$0xff] }
  0xa2   :  { %4778 = vmatpush.bf16.msrb.mxu0 %v7935_v16  ;;  %4744 = vmatmul.bf16.vlgmr.msra.gmra.mxu1 %v5471_v30  ;;  %v7991_v16 = vld [vmem:[%s10306_s1 + $0x6f8] sm:$0xff]  ;;  %v7981_v30 = vld [vmem:[%s10306_s1 + $0x6a8] sm:$0xff] }
  0xa3   :  { %4792 = vmatpush.bf16.msrb.mxu1 %v7943_v17  ;;  %4758 = vmatmul.bf16.vlgmr.msra.gmra.mxu2 %v5475_v29  ;;  %v7973_v29 = vld [vmem:[%s10306_s1 + $0x668] sm:$0xff]  ;;  %v7979_v44 = vld [vmem:[%s10306_s1 + $0x698] sm:$0xff] }
  0xa4   :  { %4806 = vmatpush.bf16.msrb.mxu2 %v7951_v26  ;;  %4772 = vmatmul.bf16.vlgmr.msra.gmra.mxu3 %v5479_v31  ;;  %v7990_v26 = vld [vmem:[%s10306_s1 + $0x6f0] sm:$0xff]  ;;  %v7989_v31 = vld [vmem:[%s10306_s1 + $0x6e8] sm:$0xff] }
  0xa5   :  { %4820 = vmatpush.bf16.msrb.mxu3 %v7959_v27 }
  0xa6   :  { %4779 = vmatpush.bf16.msrb.mxu0 %v7934_v32  ;;  %v4535_v53 = vpop.f32.mrf.mxu2  ;;  %v9041_v17 = vpop.f32.mrf.mxu0 }
  0xa7   :  { %4793 = vmatpush.bf16.msrb.mxu1 %v7942_v33  ;;  %v4536_v54 = vadd.f32 %v4535_v53, %v4522_v48  ;;  %v4549_v55 = vpop.f32.mrf.mxu3  ;;  %v9043_v22 = vpop.f32.mrf.mxu1  ;;  %v7986_v53 = vld [vmem:[%s10306_s1 + $0x6d0] sm:$0xff] }
  0xa8   :  { %4807 = vmatpush.bf16.msrb.mxu2 %v7950_v34 }
  0xa9   :  { %4821 = vmatpush.bf16.msrb.mxu3 %v7958_v35  ;;  %v8973_v58 = vadd.f32 %v4549_v55, %v4536_v54  ;;  %v7964_v35 = vld [vmem:[%s10306_s1 + $0x620] sm:$0xff]  ;;  %v7961_v54 = vld [vmem:[%s10306_s1 + $0x608] sm:$0xff] }
  0xaa   :  { %4780 = vmatpush.bf16.msrb.mxu0 %v7933_v36  ;;  %v7972_v36 = vld [vmem:[%s10306_s1 + $0x660] sm:$0xff]  ;;  %v7969_v55 = vld [vmem:[%s10306_s1 + $0x648] sm:$0xff] }
  0xab   :  { %4794 = vmatpush.bf16.msrb.mxu1 %v7941_v37  ;;  %v7980_v37 = vld [vmem:[%s10306_s1 + $0x6a0] sm:$0xff] }
  0xac   :  { %4808 = vmatpush.bf16.msrb.mxu2 %v7949_v39  ;;  %v7988_v39 = vld [vmem:[%s10306_s1 + $0x6e0] sm:$0xff] }
  0xad   :  { %4822 = vmatpush.bf16.msrb.mxu3 %v7957_v40 }
  0xae   :  { %4781 = vmatpush.bf16.msrb.mxu0 %v7932_v42  ;;  %v9057_v27 = vpop.f32.mrf.mxu2  ;;  %v7963_v42 = vld [vmem:[%s10306_s1 + $0x618] sm:$0xff] }
  0xaf   :  { %4795 = vmatpush.bf16.msrb.mxu1 %v7940_v43  ;;  %v9071_v32 = vpop.f32.mrf.mxu3  ;;  %v7971_v43 = vld [vmem:[%s10306_s1 + $0x658] sm:$0xff] }
  0xb0   :  { %4809 = vmatpush.bf16.msrb.mxu2 %v7948_v45  ;;  %v7987_v45 = vld [vmem:[%s10306_s1 + $0x6d8] sm:$0xff] }
  0xb1   :  { %4823 = vmatpush.bf16.msrb.mxu3 %v7956_v46 }
  0xb2   :  { %4782 = vmatpush.bf16.msrb.mxu0 %v7931_v49 }
  0xb3   :  { %4796 = vmatpush.bf16.msrb.mxu1 %v7939_v50  ;;  %v7962_v50 = vld [vmem:[%s10306_s1 + $0x610] sm:$0xff] }
  0xb4   :  { %4810 = vmatpush.bf16.msrb.mxu2 %v7947_v51  ;;  %v7970_v51 = vld [vmem:[%s10306_s1 + $0x650] sm:$0xff] }
  0xb5   :  { %4824 = vmatpush.bf16.msrb.mxu3 %v7955_v52  ;;  %v7978_v52 = vld [vmem:[%s10306_s1 + $0x690] sm:$0xff] }
  0xb6   :  { %4783 = vmatpush.bf16.msrb.mxu0 %v7930_v56  ;;  %v7977_v56 = vld [vmem:[%s10306_s1 + $0x688] sm:$0xff] }
  0xb7   :  { %4797 = vmatpush.bf16.msrb.mxu1 %v7938_v57  ;;  %v7985_v57 = vld [vmem:[%s10306_s1 + $0x6c8] sm:$0xff] }
  0xb8   :  { %4811 = vmatpush.bf16.msrb.mxu2 %v7946_v59  ;;  %v7968_v59 = vld [vmem:[%s10306_s1 + $0x640] sm:$0xff] }
  0xb9   :  { %4825 = vmatpush.bf16.msrb.mxu3 %v7954_v60  ;;  %v7976_v60 = vld [vmem:[%s10306_s1 + $0x680] sm:$0xff] }
  0xba   :  { %4784 = vmatpush.bf16.msrb.mxu0 %v7929_v61  ;;  %v7984_v61 = vld [vmem:[%s10306_s1 + $0x6c0] sm:$0xff] }
  0xbb   :  { %4798 = vmatpush.bf16.msrb.mxu1 %v7937_v62  ;;  %v7999_v62 = vld [vmem:[%s10306_s1 + $0x738] sm:$0xff] }
  0xbc   :  { %4812 = vmatpush.bf16.msrb.mxu2 %v7945_v63  ;;  %v8007_v63 = vld [vmem:[%s10306_s1 + $0x778] sm:$0xff] }
  0xbd   :  { %4826 = vmatpush.bf16.msrb.mxu3 %v7953_v0  ;;  %v5498_v0 = vld [vmem:[%s10307_s0 + $0x60] sm:$0xf] }
  0xbe   :  { %4785 = vmatpush.bf16.msrb.mxu0 %v7928_v1  ;;  %v4563_v33 = vpop.f32.mrf.mxu0  ;;  %v7748_v1 = vld [vmem:[%s10307_s0 + $0x15c] sm:$0xf0] }
  0xbf   :  { %4799 = vmatpush.bf16.msrb.mxu1 %v7936_v2  ;;  %v4564_v34 = vadd.f32 %v4563_v33, %v8973_v58  ;;  %v4577_v40 = vpop.f32.mrf.mxu1  ;;  %v7960_v58 = vld [vmem:[%s10306_s1 + $0x600] sm:$0xff]  ;;  %v5506_v2 = vld [vmem:[%s10307_s0 + $0x68] sm:$0xf]  ;;  %v5499_v10 = vor.u32 %v7748_v1, %v5498_v0  ;;  %v7718_v0 = vld [vmem:[%s10307_s0 + $0x74] sm:$0xf] }
  0xc0   :  { %4813 = vmatpush.bf16.msrb.mxu2 %v7944_v3  ;;  %v7749_v3 = vld [vmem:[%s10307_s0 + $0x164] sm:$0xf0]  ;;  %v8004_v33 = vld [vmem:[%s10306_s1 + $0x760] sm:$0xff]  ;;  %v5516_v1 = vld [vmem:[%s10307_s0 + $0x170] sm:$0xf0] }
  0xc1   :  { %4827 = vmatpush.bf16.msrb.mxu3 %v7952_v4  ;;  %4786 = vmatmul.bf16.vlgmr.msrb.gmra.mxu0 %v5483_v18  ;;  %v4578_v41 = vadd.f32 %v4577_v40, %v4564_v34  ;;  %v7716_v4 = vld [vmem:[%s10307_s0 + $0x64] sm:$0xf]  ;;  %v5507_v11 = vor.u32 %v7749_v3, %v5506_v2  ;;  %v8006_v18 = vld [vmem:[%s10306_s1 + $0x770] sm:$0xff]  ;;  %v8003_v40 = vld [vmem:[%s10306_s1 + $0x758] sm:$0xff] }
  0xc2   :  { %4834 = vmatpush.bf16.msra.mxu0 %v7967_v5  ;;  %4800 = vmatmul.bf16.vlgmr.msrb.gmra.mxu1 %v5487_v20  ;;  %v5500_v5 = vld [vmem:[%s10307_s0 + $0x160] sm:$0xf0]  ;;  %v8022_v20 = vld [vmem:[%s10306_s1 + $0x7f0] sm:$0xff]  ;;  %v7719_v2 = vld [vmem:[%s10307_s0 + $0x7c] sm:$0xf] }
  0xc3   :  { %4848 = vmatpush.bf16.msra.mxu1 %v7975_v6  ;;  %4814 = vmatmul.bf16.vlgmr.msrb.gmra.mxu2 %v5491_v19  ;;  %v7717_v6 = vld [vmem:[%s10307_s0 + $0x6c] sm:$0xf]  ;;  %v5503_v13 = vor.u32 %v7716_v4, %v5500_v5  ;;  %v8014_v19 = vld [vmem:[%s10306_s1 + $0x7b0] sm:$0xff]  ;;  %v5524_v3 = vld [vmem:[%s10307_s0 + $0x178] sm:$0xf0] }
  0xc4   :  { %4862 = vmatpush.bf16.msra.mxu2 %v7983_v15  ;;  %4828 = vmatmul.bf16.vlgmr.msrb.gmra.mxu3 %v5495_v21  ;;  %v5511_v14 = vor.u32 %v7717_v6, %v5508_v7  ;;  %v7997_v21 = vld [vmem:[%s10306_s1 + $0x728] sm:$0xff]  ;;  %v8047_v4 = vld [vmem:[%s10306_s1 + $0x8b8] sm:$0xff] }
  0xc5   :  { %4876 = vmatpush.bf16.msra.mxu3 %v7991_v16  ;;  %v7998_v16 = vld [vmem:[%s10306_s1 + $0x730] sm:$0xff]  ;;  %v8055_v5 = vld [vmem:[%s10306_s1 + $0x8f8] sm:$0xff] }
  0xc6   :  { %4835 = vmatpush.bf16.msra.mxu0 %v7966_v23  ;;  %v4591_v46 = vpop.f32.mrf.mxu2  ;;  %v9172_v12 = vpop.f32.mrf.mxu0  ;;  %v8005_v23 = vld [vmem:[%s10306_s1 + $0x768] sm:$0xff] }
  0xc7   :  { %4849 = vmatpush.bf16.msra.mxu1 %v7974_v24  ;;  %v4592_v47 = vadd.f32 %v4591_v46, %v4578_v41  ;;  %v4605_v48 = vpop.f32.mrf.mxu3  ;;  %v9174_v15 = vpop.f32.mrf.mxu1  ;;  %v8011_v41 = vld [vmem:[%s10306_s1 + $0x798] sm:$0xff] }
  0xc8   :  { %4863 = vmatpush.bf16.msra.mxu2 %v7982_v25  ;;  %v8013_v25 = vld [vmem:[%s10306_s1 + $0x7a8] sm:$0xff] }
  0xc9   :  { %4877 = vmatpush.bf16.msra.mxu3 %v7990_v26  ;;  %v9098_v49 = vadd.f32 %v4605_v48, %v4592_v47  ;;  %v8021_v26 = vld [vmem:[%s10306_s1 + $0x7e8] sm:$0xff]  ;;  %v7994_v47 = vld [vmem:[%s10306_s1 + $0x710] sm:$0xff] }
  0xca   :  { %4836 = vmatpush.bf16.msra.mxu0 %v7965_v28  ;;  %v8002_v48 = vld [vmem:[%s10306_s1 + $0x750] sm:$0xff] }
  0xcb   :  { %4850 = vmatpush.bf16.msra.mxu1 %v7973_v29 }
  0xcc   :  { %4864 = vmatpush.bf16.msra.mxu2 %v7981_v30 }
  0xcd   :  { %4878 = vmatpush.bf16.msra.mxu3 %v7989_v31  ;;  %v7996_v31 = vld [vmem:[%s10306_s1 + $0x720] sm:$0xff] }
  0xce   :  { %4837 = vmatpush.bf16.msra.mxu0 %v7964_v35  ;;  %v9194_v24 = vpop.f32.mrf.mxu2  ;;  %v8012_v35 = vld [vmem:[%s10306_s1 + $0x7a0] sm:$0xff] }
  0xcf   :  { %4851 = vmatpush.bf16.msra.mxu1 %v7972_v36  ;;  %v9202_v28 = vpop.f32.mrf.mxu3  ;;  %v8020_v36 = vld [vmem:[%s10306_s1 + $0x7e0] sm:$0xff] }
  0xd0   :  { %4865 = vmatpush.bf16.msra.mxu2 %v7980_v37 }
  0xd1   :  { %4879 = vmatpush.bf16.msra.mxu3 %v7988_v39  ;;  %v7995_v39 = vld [vmem:[%s10306_s1 + $0x718] sm:$0xff] }
  0xd2   :  { %4838 = vmatpush.bf16.msra.mxu0 %v7963_v42  ;;  %v8019_v42 = vld [vmem:[%s10306_s1 + $0x7d8] sm:$0xff] }
  0xd3   :  { %4852 = vmatpush.bf16.msra.mxu1 %v7971_v43 }
  0xd4   :  { %4866 = vmatpush.bf16.msra.mxu2 %v7979_v44 }
  0xd5   :  { %4880 = vmatpush.bf16.msra.mxu3 %v7987_v45 }
  0xd6   :  { %4839 = vmatpush.bf16.msra.mxu0 %v7962_v50  ;;  %v8018_v50 = vld [vmem:[%s10306_s1 + $0x7d0] sm:$0xff] }
  0xd7   :  { %4853 = vmatpush.bf16.msra.mxu1 %v7970_v51  ;;  %v7993_v51 = vld [vmem:[%s10306_s1 + $0x708] sm:$0xff] }
  0xd8   :  { %4867 = vmatpush.bf16.msra.mxu2 %v7978_v52  ;;  %v8001_v52 = vld [vmem:[%s10306_s1 + $0x748] sm:$0xff] }
  0xd9   :  { %4881 = vmatpush.bf16.msra.mxu3 %v7986_v53  ;;  %v8009_v53 = vld [vmem:[%s10306_s1 + $0x788] sm:$0xff] }
  0xda   :  { %4840 = vmatpush.bf16.msra.mxu0 %v7961_v54  ;;  %v8017_v54 = vld [vmem:[%s10306_s1 + $0x7c8] sm:$0xff] }
  0xdb   :  { %4854 = vmatpush.bf16.msra.mxu1 %v7969_v55  ;;  %v7992_v55 = vld [vmem:[%s10306_s1 + $0x700] sm:$0xff] }
  0xdc   :  { %4868 = vmatpush.bf16.msra.mxu2 %v7977_v56  ;;  %v8000_v56 = vld [vmem:[%s10306_s1 + $0x740] sm:$0xff] }
  0xdd   :  { %4882 = vmatpush.bf16.msra.mxu3 %v7985_v57  ;;  %v8008_v57 = vld [vmem:[%s10306_s1 + $0x780] sm:$0xff] }
  0xde   :  { %4841 = vmatpush.bf16.msra.mxu0 %v7960_v58  ;;  %v4619_v29 = vpop.f32.mrf.mxu0  ;;  %v8016_v58 = vld [vmem:[%s10306_s1 + $0x7c0] sm:$0xff] }
  0xdf   :  { %4855 = vmatpush.bf16.msra.mxu1 %v7968_v59  ;;  %v4620_v30 = vadd.f32 %v4619_v29, %v9098_v49  ;;  %v4633_v34 = vpop.f32.mrf.mxu1  ;;  %v8010_v49 = vld [vmem:[%s10306_s1 + $0x790] sm:$0xff]  ;;  %v4510_v59 = vadd.f32 %v8934_v38, %v9041_v17  ;;  %v5522_v38 = vld [vmem:[%s10307_s0 + $0x78] sm:$0xf] }
  0xe0   :  { %4869 = vmatpush.bf16.msra.mxu2 %v7976_v60  ;;  %v8031_v60 = vld [vmem:[%s10306_s1 + $0x838] sm:$0xff] }
  0xe1   :  { %4883 = vmatpush.bf16.msra.mxu3 %v7984_v61  ;;  %4842 = vmatmul.bf16.vlgmr.msra.gmra.mxu0 %v5499_v10  ;;  %v4634_v37 = vadd.f32 %v4633_v34, %v4620_v30  ;;  %v8039_v61 = vld [vmem:[%s10306_s1 + $0x878] sm:$0xff]  ;;  %v4524_v6 = vadd.f32 %v9043_v22, %v4510_v59  ;;  %v5519_v10 = vor.u32 %v7718_v0, %v5516_v1  ;;  %v8038_v22 = vld [vmem:[%s10306_s1 + $0x870] sm:$0xff]  ;;  %v8036_v34 = vld [vmem:[%s10306_s1 + $0x860] sm:$0xff] }
  0xe2   :  { %4890 = vmatpush.bf16.msrb.mxu0 %v7999_v62  ;;  %4856 = vmatmul.bf16.vlgmr.msra.gmra.mxu1 %v5503_v13  ;;  %v5514_v62 = vld [vmem:[%s10307_s0 + $0x70] sm:$0xf]  ;;  %v7751_v17 = vld [vmem:[%s10307_s0 + $0x174] sm:$0xf0]  ;;  %v8048_v59 = vld [vmem:[%s10306_s1 + $0x8c0] sm:$0xff] }
  0xe3   :  { %4904 = vmatpush.bf16.msrb.mxu1 %v8007_v63  ;;  %4870 = vmatmul.bf16.vlgmr.msra.gmra.mxu2 %v5507_v11  ;;  %v7750_v63 = vld [vmem:[%s10307_s0 + $0x16c] sm:$0xf0]  ;;  %v5527_v11 = vor.u32 %v7719_v2, %v5524_v3  ;;  %v7720_v0 = vld [vmem:[%s10307_s0 + $0x84] sm:$0xf]  ;;  %v7721_v3 = vld [vmem:[%s10307_s0 + $0x8c] sm:$0xf] }
  0xe4   :  { %4918 = vmatpush.bf16.msrb.mxu2 %v8015_v8  ;;  %4884 = vmatmul.bf16.vlgmr.msra.gmra.mxu3 %v5511_v14  ;;  %v5515_v7 = vor.u32 %v7750_v63, %v5514_v62  ;;  %v5523_v8 = vor.u32 %v7751_v17, %v5522_v38  ;;  %v8030_v14 = vld [vmem:[%s10306_s1 + $0x830] sm:$0xff]  ;;  %v5530_v62 = vld [vmem:[%s10307_s0 + $0x80] sm:$0xf]  ;;  %v5538_v38 = vld [vmem:[%s10307_s0 + $0x88] sm:$0xf] }
  0xe5   :  { %4932 = vmatpush.bf16.msrb.mxu3 %v8023_v9  ;;  %v7752_v63 = vld [vmem:[%s10307_s0 + $0x17c] sm:$0xf0]  ;;  %v7753_v17 = vld [vmem:[%s10307_s0 + $0x184] sm:$0xf0]  ;;  %v5532_v2 = vld [vmem:[%s10307_s0 + $0x180] sm:$0xf0] }
  0xe6   :  { %4891 = vmatpush.bf16.msrb.mxu0 %v7998_v16  ;;  %v4647_v43 = vpop.f32.mrf.mxu2  ;;  %v9306_v9 = vpop.f32.mrf.mxu0  ;;  %v8046_v16 = vld [vmem:[%s10306_s1 + $0x8b0] sm:$0xff] }
  0xe7   :  { %4905 = vmatpush.bf16.msrb.mxu1 %v8006_v18  ;;  %v4648_v44 = vadd.f32 %v4647_v43, %v4634_v37  ;;  %v4661_v45 = vpop.f32.mrf.mxu3  ;;  %v9308_v13 = vpop.f32.mrf.mxu1  ;;  %v8054_v18 = vld [vmem:[%s10306_s1 + $0x8f0] sm:$0xff] }
  0xe8   :  { %4919 = vmatpush.bf16.msrb.mxu2 %v8014_v19  ;;  %v4538_v19 = vadd.f32 %v9057_v27, %v4524_v6  ;;  %v8045_v27 = vld [vmem:[%s10306_s1 + $0x8a8] sm:$0xff]  ;;  %v8087_v6 = vld [vmem:[%s10306_s1 + $0x9f8] sm:$0xff] }
  0xe9   :  { %4933 = vmatpush.bf16.msrb.mxu3 %v8022_v20  ;;  %v9229_v46 = vadd.f32 %v4661_v45, %v4648_v44  ;;  %v8029_v20 = vld [vmem:[%s10306_s1 + $0x828] sm:$0xff] }
  0xea   :  { %4892 = vmatpush.bf16.msrb.mxu0 %v7997_v21  ;;  %v8037_v21 = vld [vmem:[%s10306_s1 + $0x868] sm:$0xff] }
  0xeb   :  { %4906 = vmatpush.bf16.msrb.mxu1 %v8005_v23 }
  0xec   :  { %4920 = vmatpush.bf16.msrb.mxu2 %v8013_v25  ;;  %v8053_v25 = vld [vmem:[%s10306_s1 + $0x8e8] sm:$0xff] }
  0xed   :  { %4934 = vmatpush.bf16.msrb.mxu3 %v8021_v26  ;;  %v4552_v26 = vadd.f32 %v9071_v32, %v4538_v19  ;;  %v8044_v32 = vld [vmem:[%s10306_s1 + $0x8a0] sm:$0xff]  ;;  %v8086_v19 = vld [vmem:[%s10306_s1 + $0x9f0] sm:$0xff] }
  0xee   :  { %4893 = vmatpush.bf16.msrb.mxu0 %v7996_v31  ;;  %v9329_v23 = vpop.f32.mrf.mxu2 }
  0xef   :  { %4907 = vmatpush.bf16.msrb.mxu1 %v8004_v33  ;;  %v9338_v29 = vpop.f32.mrf.mxu3  ;;  %v8028_v33 = vld [vmem:[%s10306_s1 + $0x820] sm:$0xff]  ;;  %v4566_v37 = vadd.f32 %v9172_v12, %v4552_v26  ;;  %v8051_v12 = vld [vmem:[%s10306_s1 + $0x8d8] sm:$0xff]  ;;  %v8077_v26 = vld [vmem:[%s10306_s1 + $0x9a8] sm:$0xff] }
  0xf0   :  { %4921 = vmatpush.bf16.msrb.mxu2 %v8012_v35 }
  0xf1   :  { %4935 = vmatpush.bf16.msrb.mxu3 %v8020_v36  ;;  %v8052_v36 = vld [vmem:[%s10306_s1 + $0x8e0] sm:$0xff]  ;;  %v4580_v44 = vadd.f32 %v9174_v15, %v4566_v37  ;;  %v8042_v15 = vld [vmem:[%s10306_s1 + $0x890] sm:$0xff] }
  0xf2   :  { %4894 = vmatpush.bf16.msrb.mxu0 %v7995_v39  ;;  %v8076_v37 = vld [vmem:[%s10306_s1 + $0x9a0] sm:$0xff] }
  0xf3   :  { %4908 = vmatpush.bf16.msrb.mxu1 %v8003_v40  ;;  %v8027_v40 = vld [vmem:[%s10306_s1 + $0x818] sm:$0xff] }
  0xf4   :  { %4922 = vmatpush.bf16.msrb.mxu2 %v8011_v41  ;;  %v8035_v41 = vld [vmem:[%s10306_s1 + $0x858] sm:$0xff] }
  0xf5   :  { %4936 = vmatpush.bf16.msrb.mxu3 %v8019_v42  ;;  %v8043_v42 = vld [vmem:[%s10306_s1 + $0x898] sm:$0xff] }
  0xf6   :  { %4895 = vmatpush.bf16.msrb.mxu0 %v7994_v47  ;;  %v4594_v47 = vadd.f32 %v9194_v24, %v4580_v44  ;;  %v8050_v24 = vld [vmem:[%s10306_s1 + $0x8d0] sm:$0xff]  ;;  %v8083_v44 = vld [vmem:[%s10306_s1 + $0x9d8] sm:$0xff] }
  0xf7   :  { %4909 = vmatpush.bf16.msrb.mxu1 %v8002_v48 }
  0xf8   :  { %4923 = vmatpush.bf16.msrb.mxu2 %v8010_v49  ;;  %v8026_v49 = vld [vmem:[%s10306_s1 + $0x810] sm:$0xff] }
  0xf9   :  { %4937 = vmatpush.bf16.msrb.mxu3 %v8018_v50  ;;  %v8034_v50 = vld [vmem:[%s10306_s1 + $0x850] sm:$0xff] }
  0xfa   :  { %4896 = vmatpush.bf16.msrb.mxu0 %v7993_v51  ;;  %v4608_v51 = vadd.f32 %v9202_v28, %v4594_v47  ;;  %v8049_v28 = vld [vmem:[%s10306_s1 + $0x8c8] sm:$0xff] }
  0xfb   :  { %4910 = vmatpush.bf16.msrb.mxu1 %v8001_v52  ;;  %v8025_v52 = vld [vmem:[%s10306_s1 + $0x808] sm:$0xff] }
  0xfc   :  { %4924 = vmatpush.bf16.msrb.mxu2 %v8009_v53  ;;  %v8033_v53 = vld [vmem:[%s10306_s1 + $0x848] sm:$0xff] }
  0xfd   :  { %4938 = vmatpush.bf16.msrb.mxu3 %v8017_v54  ;;  %v8041_v54 = vld [vmem:[%s10306_s1 + $0x888] sm:$0xff] }
  0xfe   :  { %4897 = vmatpush.bf16.msrb.mxu0 %v7992_v55  ;;  %v4675_v30 = vpop.f32.mrf.mxu0  ;;  %v4622_v55 = vadd.f32 %v9306_v9, %v4608_v51  ;;  %v5539_v9 = vor.u32 %v7753_v17, %v5538_v38  ;;  %v8066_v51 = vld [vmem:[%s10306_s1 + $0x950] sm:$0xff]  ;;  %v8072_v38 = vld [vmem:[%s10306_s1 + $0x980] sm:$0xff] }
  0xff   :  { %4911 = vmatpush.bf16.msrb.mxu1 %v8000_v56  ;;  %v4676_v31 = vadd.f32 %v4675_v30, %v9229_v46  ;;  %v4689_v35 = vpop.f32.mrf.mxu1  ;;  %v8024_v56 = vld [vmem:[%s10306_s1 + $0x800] sm:$0xff] }
 0x100   :  { %4925 = vmatpush.bf16.msrb.mxu2 %v8008_v57  ;;  %v8032_v57 = vld [vmem:[%s10306_s1 + $0x840] sm:$0xff]  ;;  %v4636_v1 = vadd.f32 %v9308_v13, %v4622_v55  ;;  %v8057_v55 = vld [vmem:[%s10306_s1 + $0x908] sm:$0xff] }
 0x101   :  { %4939 = vmatpush.bf16.msrb.mxu3 %v8016_v58  ;;  %4898 = vmatmul.bf16.vlgmr.msrb.gmra.mxu0 %v5515_v7  ;;  %v4690_v39 = vadd.f32 %v4689_v35, %v4676_v31  ;;  %v8040_v58 = vld [vmem:[%s10306_s1 + $0x880] sm:$0xff] }
 0x102   :  { %4946 = vmatpush.bf16.msra.mxu0 %v8031_v60  ;;  %4912 = vmatmul.bf16.vlgmr.msrb.gmra.mxu1 %v5519_v10  ;;  %v8063_v60 = vld [vmem:[%s10306_s1 + $0x938] sm:$0xff]  ;;  %v4650_v7 = vadd.f32 %v9329_v23, %v4636_v1  ;;  %v8061_v23 = vld [vmem:[%s10306_s1 + $0x928] sm:$0xff]  ;;  %v8060_v35 = vld [vmem:[%s10306_s1 + $0x920] sm:$0xff] }
 0x103   :  { %4960 = vmatpush.bf16.msra.mxu1 %v8039_v61  ;;  %4926 = vmatmul.bf16.vlgmr.msrb.gmra.mxu2 %v5523_v8  ;;  %v8071_v61 = vld [vmem:[%s10306_s1 + $0x978] sm:$0xff]  ;;  %v5531_v8 = vor.u32 %v7752_v63, %v5530_v62  ;;  %v8056_v62 = vld [vmem:[%s10306_s1 + $0x900] sm:$0xff] }
 0x104   :  { %4974 = vmatpush.bf16.msra.mxu2 %v8047_v4  ;;  %4940 = vmatmul.bf16.vlgmr.msrb.gmra.mxu3 %v5527_v11  ;;  %v5540_v4 = vld [vmem:[%s10307_s0 + $0x188] sm:$0xf0]  ;;  %v5535_v11 = vor.u32 %v7720_v0, %v5532_v2  ;;  %v8064_v63 = vld [vmem:[%s10306_s1 + $0x940] sm:$0xff]  ;;  %v8095_v1 = vld [vmem:[%s10306_s1 + $0xa38] sm:$0xff] }
 0x105   :  { %4988 = vmatpush.bf16.msra.mxu3 %v8055_v5  ;;  %v8079_v5 = vld [vmem:[%s10306_s1 + $0x9b8] sm:$0xff]  ;;  %v5543_v13 = vor.u32 %v7721_v3, %v5540_v4  ;;  %v8080_v17 = vld [vmem:[%s10306_s1 + $0x9c0] sm:$0xff]  ;;  %v5546_v3 = vld [vmem:[%s10307_s0 + $0x90] sm:$0xf] }
 0x106   :  { %4947 = vmatpush.bf16.msra.mxu0 %v8030_v14  ;;  %v4703_v43 = vpop.f32.mrf.mxu2  ;;  %v4677_v10 = vpop.f32.mrf.mxu0  ;;  %v8103_v2 = vld [vmem:[%s10306_s1 + $0xa78] sm:$0xff]  ;;  %v7754_v4 = vld [vmem:[%s10307_s0 + $0x18c] sm:$0xf0] }
 0x107   :  { %4961 = vmatpush.bf16.msra.mxu1 %v8038_v22  ;;  %v4704_v45 = vadd.f32 %v4703_v43, %v4690_v39  ;;  %v4717_v46 = vpop.f32.mrf.mxu3  ;;  %v4691_v14 = vpop.f32.mrf.mxu1  ;;  %v8062_v22 = vld [vmem:[%s10306_s1 + $0x930] sm:$0xff]  ;;  %v8084_v39 = vld [vmem:[%s10306_s1 + $0x9e0] sm:$0xff]  ;;  %v8075_v43 = vld [vmem:[%s10306_s1 + $0x998] sm:$0xff] }
 0x108   :  { %4975 = vmatpush.bf16.msra.mxu2 %v8046_v16  ;;  %v8070_v16 = vld [vmem:[%s10306_s1 + $0x970] sm:$0xff] }
 0x109   :  { %4989 = vmatpush.bf16.msra.mxu3 %v8054_v18  ;;  %v9368_v48 = vadd.f32 %v4717_v46, %v4704_v45  ;;  %v8078_v18 = vld [vmem:[%s10306_s1 + $0x9b0] sm:$0xff] }
 0x10a   :  { %4948 = vmatpush.bf16.msra.mxu0 %v8029_v20  ;;  %v4664_v20 = vadd.f32 %v9338_v29, %v4650_v7  ;;  %v8085_v29 = vld [vmem:[%s10306_s1 + $0x9e8] sm:$0xff]  ;;  %v7722_v7 = vld [vmem:[%s10307_s0 + $0x94] sm:$0xf] }
 0x10b   :  { %4962 = vmatpush.bf16.msra.mxu1 %v8037_v21 }
 0x10c   :  { %4976 = vmatpush.bf16.msra.mxu2 %v8045_v27  ;;  %v4678_v21 = vadd.f32 %v4677_v10, %v4664_v20  ;;  %v8069_v27 = vld [vmem:[%s10306_s1 + $0x968] sm:$0xff]  ;;  %v5556_v10 = vld [vmem:[%s10307_s0 + $0x198] sm:$0xf0]  ;;  %v8102_v20 = vld [vmem:[%s10306_s1 + $0xa70] sm:$0xff] }
 0x10d   :  { %4990 = vmatpush.bf16.msra.mxu3 %v8053_v25 }
 0x10e   :  { %4949 = vmatpush.bf16.msra.mxu0 %v8028_v33  ;;  %v4705_v25 = vpop.f32.mrf.mxu2  ;;  %v4692_v33 = vadd.f32 %v4691_v14, %v4678_v21  ;;  %v5547_v14 = vor.u32 %v7754_v4, %v5546_v3  ;;  %v8110_v21 = vld [vmem:[%s10306_s1 + $0xab0] sm:$0xff]  ;;  %v7724_v3 = vld [vmem:[%s10307_s0 + $0xa4] sm:$0xf] }
 0x10f   :  { %4963 = vmatpush.bf16.msra.mxu1 %v8036_v34  ;;  %v4719_v30 = vpop.f32.mrf.mxu3  ;;  %v5564_v4 = vld [vmem:[%s10307_s0 + $0x1a0] sm:$0xf0] }
 0x110   :  { %4977 = vmatpush.bf16.msra.mxu2 %v8044_v32  ;;  %v8068_v32 = vld [vmem:[%s10306_s1 + $0x960] sm:$0xff] }
 0x111   :  { %4991 = vmatpush.bf16.msra.mxu3 %v8052_v36 }
 0x112   :  { %4950 = vmatpush.bf16.msra.mxu0 %v8027_v40  ;;  %v4706_v40 = vadd.f32 %v4705_v25, %v4692_v33  ;;  %v8101_v25 = vld [vmem:[%s10306_s1 + $0xa68] sm:$0xff]  ;;  %v8092_v33 = vld [vmem:[%s10306_s1 + $0xa20] sm:$0xff] }
 0x113   :  { %4964 = vmatpush.bf16.msra.mxu1 %v8035_v41 }
 0x114   :  { %4978 = vmatpush.bf16.msra.mxu2 %v8043_v42  ;;  %v8059_v42 = vld [vmem:[%s10306_s1 + $0x918] sm:$0xff]  ;;  %v4720_v46 = vadd.f32 %v4719_v30, %v4706_v40 }
 0x115   :  { %4992 = vmatpush.bf16.msra.mxu3 %v8051_v12  ;;  %v8067_v12 = vld [vmem:[%s10306_s1 + $0x958] sm:$0xff] }
 0x116   :  { %4951 = vmatpush.bf16.msra.mxu0 %v8026_v49  ;;  %v8099_v40 = vld [vmem:[%s10306_s1 + $0xa58] sm:$0xff] }
 0x117   :  { %4965 = vmatpush.bf16.msra.mxu1 %v8034_v50 }
 0x118   :  { %4979 = vmatpush.bf16.msra.mxu2 %v8042_v15 }
 0x119   :  { %4993 = vmatpush.bf16.msra.mxu3 %v8050_v24  ;;  %v8058_v24 = vld [vmem:[%s10306_s1 + $0x910] sm:$0xff] }
 0x11a   :  { %4952 = vmatpush.bf16.msra.mxu0 %v8025_v52 }
 0x11b   :  { %4966 = vmatpush.bf16.msra.mxu1 %v8033_v53  ;;  %v8074_v53 = vld [vmem:[%s10306_s1 + $0x990] sm:$0xff] }
 0x11c   :  { %4980 = vmatpush.bf16.msra.mxu2 %v8041_v54  ;;  %v8082_v54 = vld [vmem:[%s10306_s1 + $0x9d0] sm:$0xff] }
 0x11d   :  { %4994 = vmatpush.bf16.msra.mxu3 %v8049_v28 }
 0x11e   :  { %4953 = vmatpush.bf16.msra.mxu0 %v8024_v56  ;;  %v4731_v31 = vpop.f32.mrf.mxu0  ;;  %v8065_v56 = vld [vmem:[%s10306_s1 + $0x948] sm:$0xff] }
 0x11f   :  { %4967 = vmatpush.bf16.msra.mxu1 %v8032_v57  ;;  %v4732_v34 = vadd.f32 %v4731_v31, %v9368_v48  ;;  %v4745_v36 = vpop.f32.mrf.mxu1  ;;  %v8073_v57 = vld [vmem:[%s10306_s1 + $0x988] sm:$0xff] }
 0x120   :  { %4981 = vmatpush.bf16.msra.mxu2 %v8040_v58  ;;  %v8081_v58 = vld [vmem:[%s10306_s1 + $0x9c8] sm:$0xff] }
 0x121   :  { %4995 = vmatpush.bf16.msra.mxu3 %v8048_v59  ;;  %4954 = vmatmul.bf16.vlgmr.msra.gmra.mxu0 %v5531_v8  ;;  %v4746_v41 = vadd.f32 %v4745_v36, %v4732_v34  ;;  %v5548_v8 = vld [vmem:[%s10307_s0 + $0x190] sm:$0xf0]  ;;  %v8100_v34 = vld [vmem:[%s10306_s1 + $0xa60] sm:$0xff] }
 0x122   :  { %5002 = vmatpush.bf16.msrb.mxu0 %v8063_v60  ;;  %4968 = vmatmul.bf16.vlgmr.msra.gmra.mxu1 %v5535_v11  ;;  %v8111_v11 = vld [vmem:[%s10306_s1 + $0xab8] sm:$0xff]  ;;  %v8116_v36 = vld [vmem:[%s10306_s1 + $0xae0] sm:$0xff] }
 0x123   :  { %5016 = vmatpush.bf16.msrb.mxu1 %v8071_v61  ;;  %4982 = vmatmul.bf16.vlgmr.msra.gmra.mxu2 %v5539_v9  ;;  %v7723_v9 = vld [vmem:[%s10307_s0 + $0x9c] sm:$0xf] }
 0x124   :  { %5030 = vmatpush.bf16.msrb.mxu2 %v8079_v5  ;;  %4996 = vmatmul.bf16.vlgmr.msra.gmra.mxu3 %v5543_v13  ;;  %v5554_v5 = vld [vmem:[%s10307_s0 + $0x98] sm:$0xf] }
 0x125   :  { %5044 = vmatpush.bf16.msrb.mxu3 %v8087_v6  ;;  %v7755_v6 = vld [vmem:[%s10307_s0 + $0x194] sm:$0xf0] }
 0x126   :  { %5003 = vmatpush.bf16.msrb.mxu0 %v8062_v22  ;;  %v4759_v45 = vpop.f32.mrf.mxu2  ;;  %v4733_v49 = vpop.f32.mrf.mxu0  ;;  %v8119_v13 = vld [vmem:[%s10306_s1 + $0xaf8] sm:$0xff]  ;;  %v5555_v22 = vor.u32 %v7755_v6, %v5554_v5  ;;  %v7725_v5 = vld [vmem:[%s10307_s0 + $0xac] sm:$0xf] }
 0x127   :  { %5017 = vmatpush.bf16.msrb.mxu1 %v8070_v16  ;;  %v4760_v47 = vadd.f32 %v4759_v45, %v4746_v41  ;;  %v4773_v48 = vpop.f32.mrf.mxu3  ;;  %v4734_v50 = vadd.f32 %v4733_v49, %v4720_v46  ;;  %v4747_v52 = vpop.f32.mrf.mxu1  ;;  %v5551_v16 = vor.u32 %v7722_v7, %v5548_v8  ;;  %v8107_v41 = vld [vmem:[%s10306_s1 + $0xa98] sm:$0xff]  ;;  %v8098_v49 = vld [vmem:[%s10306_s1 + $0xa50] sm:$0xff]  ;;  %v5572_v6 = vld [vmem:[%s10307_s0 + $0x1a8] sm:$0xf0] }
 0x128   :  { %5031 = vmatpush.bf16.msrb.mxu2 %v8078_v18  ;;  %v5559_v18 = vor.u32 %v7723_v9, %v5556_v10  ;;  %v8143_v7 = vld [vmem:[%s10306_s1 + $0xbb8] sm:$0xff] }
 0x129   :  { %5045 = vmatpush.bf16.msrb.mxu3 %v8086_v19  ;;  %v9496_v15 = vadd.f32 %v4773_v48, %v4760_v47  ;;  %v4748_v28 = vadd.f32 %v4747_v52, %v4734_v50  ;;  %v8094_v19 = vld [vmem:[%s10306_s1 + $0xa30] sm:$0xff]  ;;  %v8089_v52 = vld [vmem:[%s10306_s1 + $0xa08] sm:$0xff]  ;;  %v8151_v8 = vld [vmem:[%s10306_s1 + $0xbf8] sm:$0xff] }
 0x12a   :  { %5004 = vmatpush.bf16.msrb.mxu0 %v8061_v23  ;;  %v8118_v23 = vld [vmem:[%s10306_s1 + $0xaf0] sm:$0xff] }
 0x12b   :  { %5018 = vmatpush.bf16.msrb.mxu1 %v8069_v27  ;;  %v8093_v27 = vld [vmem:[%s10306_s1 + $0xa28] sm:$0xff]  ;;  %v8090_v48 = vld [vmem:[%s10306_s1 + $0xa10] sm:$0xff] }
 0x12c   :  { %5032 = vmatpush.bf16.msrb.mxu2 %v8077_v26  ;;  %v8109_v26 = vld [vmem:[%s10306_s1 + $0xaa8] sm:$0xff] }
 0x12d   :  { %5046 = vmatpush.bf16.msrb.mxu3 %v8085_v29  ;;  %v8117_v29 = vld [vmem:[%s10306_s1 + $0xae8] sm:$0xff] }
 0x12e   :  { %5005 = vmatpush.bf16.msrb.mxu0 %v8060_v35  ;;  %v4761_v59 = vpop.f32.mrf.mxu2 }
 0x12f   :  { %5019 = vmatpush.bf16.msrb.mxu1 %v8068_v32  ;;  %v4762_v60 = vadd.f32 %v4761_v59, %v4748_v28  ;;  %v4775_v61 = vpop.f32.mrf.mxu3  ;;  %v8108_v32 = vld [vmem:[%s10306_s1 + $0xaa0] sm:$0xff]  ;;  %v8113_v28 = vld [vmem:[%s10306_s1 + $0xac8] sm:$0xff] }
 0x130   :  { %5033 = vmatpush.bf16.msrb.mxu2 %v8076_v37  ;;  %v8096_v59 = vld [vmem:[%s10306_s1 + $0xa40] sm:$0xff] }
 0x131   :  { %5047 = vmatpush.bf16.msrb.mxu3 %v8084_v39  ;;  %v9534_v0 = vadd.f32 %v4775_v61, %v4762_v60  ;;  %v8091_v39 = vld [vmem:[%s10306_s1 + $0xa18] sm:$0xff]  ;;  %v8104_v60 = vld [vmem:[%s10306_s1 + $0xa80] sm:$0xff] }
 0x132   :  { %5006 = vmatpush.bf16.msrb.mxu0 %v8059_v42  ;;  %v8115_v42 = vld [vmem:[%s10306_s1 + $0xad8] sm:$0xff]  ;;  %v8112_v61 = vld [vmem:[%s10306_s1 + $0xac0] sm:$0xff] }
 0x133   :  { %5020 = vmatpush.bf16.msrb.mxu1 %v8067_v12 }
 0x134   :  { %5034 = vmatpush.bf16.msrb.mxu2 %v8075_v43 }
 0x135   :  { %5048 = vmatpush.bf16.msrb.mxu3 %v8083_v44 }
 0x136   :  { %5007 = vmatpush.bf16.msrb.mxu0 %v8058_v24  ;;  %v8114_v24 = vld [vmem:[%s10306_s1 + $0xad0] sm:$0xff] }
 0x137   :  { %5021 = vmatpush.bf16.msrb.mxu1 %v8066_v51 }
 0x138   :  { %5035 = vmatpush.bf16.msrb.mxu2 %v8074_v53  ;;  %v8097_v53 = vld [vmem:[%s10306_s1 + $0xa48] sm:$0xff] }
 0x139   :  { %5049 = vmatpush.bf16.msrb.mxu3 %v8082_v54  ;;  %v8105_v54 = vld [vmem:[%s10306_s1 + $0xa88] sm:$0xff] }
 0x13a   :  { %5008 = vmatpush.bf16.msrb.mxu0 %v8057_v55 }
 0x13b   :  { %5022 = vmatpush.bf16.msrb.mxu1 %v8065_v56 }
 0x13c   :  { %5036 = vmatpush.bf16.msrb.mxu2 %v8073_v57 }
 0x13d   :  { %5050 = vmatpush.bf16.msrb.mxu3 %v8081_v58  ;;  %v8088_v58 = vld [vmem:[%s10306_s1 + $0xa00] sm:$0xff] }
 0x13e   :  { %5009 = vmatpush.bf16.msrb.mxu0 %v8056_v62  ;;  %v4787_v30 = vpop.f32.mrf.mxu0 }
 0x13f   :  { %5023 = vmatpush.bf16.msrb.mxu1 %v8064_v63  ;;  %v4788_v31 = vadd.f32 %v4787_v30, %v9496_v15  ;;  %v4801_v35 = vpop.f32.mrf.mxu1  ;;  %v8106_v15 = vld [vmem:[%s10306_s1 + $0xa90] sm:$0xff]  ;;  %v8127_v63 = vld [vmem:[%s10306_s1 + $0xb38] sm:$0xff] }
 0x140   :  { %5037 = vmatpush.bf16.msrb.mxu2 %v8072_v38  ;;  %v8135_v38 = vld [vmem:[%s10306_s1 + $0xb78] sm:$0xff] }
 0x141   :  { %5051 = vmatpush.bf16.msrb.mxu3 %v8080_v17  ;;  %5010 = vmatmul.bf16.vlgmr.msrb.gmra.mxu0 %v5547_v14  ;;  %v4802_v37 = vadd.f32 %v4801_v35, %v4788_v31  ;;  %v5562_v17 = vld [vmem:[%s10307_s0 + $0xa0] sm:$0xf]  ;;  %v8126_v14 = vld [vmem:[%s10306_s1 + $0xb30] sm:$0xff]  ;;  %v8123_v35 = vld [vmem:[%s10306_s1 + $0xb18] sm:$0xff] }
 0x142   :  { %5058 = vmatpush.bf16.msra.mxu0 %v8095_v1  ;;  %5024 = vmatmul.bf16.vlgmr.msrb.gmra.mxu1 %v5551_v16  ;;  %v5570_v1 = vld [vmem:[%s10307_s0 + $0xa8] sm:$0xf]  ;;  %v8142_v16 = vld [vmem:[%s10306_s1 + $0xbb0] sm:$0xff]  ;;  %v8140_v31 = vld [vmem:[%s10306_s1 + $0xba0] sm:$0xff] }
 0x143   :  { %5072 = vmatpush.bf16.msra.mxu1 %v8103_v2  ;;  %5038 = vmatmul.bf16.vlgmr.msrb.gmra.mxu2 %v5555_v22  ;;  %v7757_v2 = vld [vmem:[%s10307_s0 + $0x1a4] sm:$0xf0]  ;;  %v8134_v22 = vld [vmem:[%s10306_s1 + $0xb70] sm:$0xff] }
 0x144   :  { %5086 = vmatpush.bf16.msra.mxu2 %v8111_v11  ;;  %5052 = vmatmul.bf16.vlgmr.msrb.gmra.mxu3 %v5559_v18  ;;  %v5571_v10 = vor.u32 %v7757_v2, %v5570_v1  ;;  %v5567_v11 = vor.u32 %v7724_v3, %v5564_v4  ;;  %v8150_v18 = vld [vmem:[%s10306_s1 + $0xbf0] sm:$0xff]  ;;  %v7727_v1 = vld [vmem:[%s10307_s0 + $0xbc] sm:$0xf] }
 0x145   :  { %5100 = vmatpush.bf16.msra.mxu3 %v8119_v13  ;;  %v5575_v13 = vor.u32 %v7725_v5, %v5572_v6  ;;  %v5588_v2 = vld [vmem:[%s10307_s0 + $0x1b8] sm:$0xf0] }
 0x146   :  { %5059 = vmatpush.bf16.msra.mxu0 %v8094_v19  ;;  %v4815_v12 = vpop.f32.mrf.mxu2  ;;  %v4789_v45 = vpop.f32.mrf.mxu0  ;;  %v8125_v19 = vld [vmem:[%s10306_s1 + $0xb28] sm:$0xff]  ;;  %v8175_v3 = vld [vmem:[%s10306_s1 + $0xcb8] sm:$0xff] }
 0x147   :  { %5073 = vmatpush.bf16.msra.mxu1 %v8102_v20  ;;  %v4816_v43 = vadd.f32 %v4815_v12, %v4802_v37  ;;  %v4829_v44 = vpop.f32.mrf.mxu3  ;;  %v4790_v46 = vadd.f32 %v4789_v45, %v9534_v0  ;;  %v4803_v50 = vpop.f32.mrf.mxu1  ;;  %v7756_v0 = vld [vmem:[%s10307_s0 + $0x19c] sm:$0xf0]  ;;  %v8133_v20 = vld [vmem:[%s10306_s1 + $0xb68] sm:$0xff]  ;;  %v8147_v37 = vld [vmem:[%s10306_s1 + $0xbd8] sm:$0xff] }
 0x148   :  { %5087 = vmatpush.bf16.msra.mxu2 %v8110_v21  ;;  %v5563_v9 = vor.u32 %v7756_v0, %v5562_v17  ;;  %v8141_v21 = vld [vmem:[%s10306_s1 + $0xba8] sm:$0xff]  ;;  %v8130_v45 = vld [vmem:[%s10306_s1 + $0xb50] sm:$0xff]  ;;  %v8183_v4 = vld [vmem:[%s10306_s1 + $0xcf8] sm:$0xff] }
 0x149   :  { %5101 = vmatpush.bf16.msra.mxu3 %v8118_v23  ;;  %v9622_v47 = vadd.f32 %v4829_v44, %v4816_v43  ;;  %v4804_v51 = vadd.f32 %v4803_v50, %v4790_v46  ;;  %v8149_v23 = vld [vmem:[%s10306_s1 + $0xbe8] sm:$0xff]  ;;  %v8122_v44 = vld [vmem:[%s10306_s1 + $0xb10] sm:$0xff] }
 0x14a   :  { %5060 = vmatpush.bf16.msra.mxu0 %v8093_v27  ;;  %v8121_v50 = vld [vmem:[%s10306_s1 + $0xb08] sm:$0xff]  ;;  %v7726_v17 = vld [vmem:[%s10307_s0 + $0xb4] sm:$0xf] }
 0x14b   :  { %5074 = vmatpush.bf16.msra.mxu1 %v8101_v25  ;;  %v5580_v0 = vld [vmem:[%s10307_s0 + $0x1b0] sm:$0xf0] }
 0x14c   :  { %5088 = vmatpush.bf16.msra.mxu2 %v8109_v26  ;;  %v8124_v26 = vld [vmem:[%s10306_s1 + $0xb20] sm:$0xff] }
 0x14d   :  { %5102 = vmatpush.bf16.msra.mxu3 %v8117_v29  ;;  %v8132_v29 = vld [vmem:[%s10306_s1 + $0xb60] sm:$0xff] }
 0x14e   :  { %5061 = vmatpush.bf16.msra.mxu0 %v8092_v33  ;;  %v4817_v55 = vpop.f32.mrf.mxu2  ;;  %v8148_v33 = vld [vmem:[%s10306_s1 + $0xbe0] sm:$0xff] }
 0x14f   :  { %5075 = vmatpush.bf16.msra.mxu1 %v8100_v34  ;;  %v4818_v56 = vadd.f32 %v4817_v55, %v4804_v51  ;;  %v4831_v57 = vpop.f32.mrf.mxu3  ;;  %v8145_v51 = vld [vmem:[%s10306_s1 + $0xbc8] sm:$0xff]  ;;  %v8128_v55 = vld [vmem:[%s10306_s1 + $0xb40] sm:$0xff] }
 0x150   :  { %5089 = vmatpush.bf16.msra.mxu2 %v8108_v32  ;;  %v8131_v32 = vld [vmem:[%s10306_s1 + $0xb58] sm:$0xff] }
 0x151   :  { %5103 = vmatpush.bf16.msra.mxu3 %v8116_v36  ;;  %v9660_v62 = vadd.f32 %v4831_v57, %v4818_v56  ;;  %v8139_v36 = vld [vmem:[%s10306_s1 + $0xb98] sm:$0xff]  ;;  %v8136_v56 = vld [vmem:[%s10306_s1 + $0xb80] sm:$0xff] }
 0x152   :  { %5062 = vmatpush.bf16.msra.mxu0 %v8091_v39  ;;  %v8144_v57 = vld [vmem:[%s10306_s1 + $0xbc0] sm:$0xff] }
 0x153   :  { %5076 = vmatpush.bf16.msra.mxu1 %v8099_v40 }
 0x154   :  { %5090 = vmatpush.bf16.msra.mxu2 %v8107_v41 }
 0x155   :  { %5104 = vmatpush.bf16.msra.mxu3 %v8115_v42 }
 0x156   :  { %5063 = vmatpush.bf16.msra.mxu0 %v8090_v48  ;;  %v8146_v48 = vld [vmem:[%s10306_s1 + $0xbd0] sm:$0xff] }
 0x157   :  { %5077 = vmatpush.bf16.msra.mxu1 %v8098_v49 }
 0x158   :  { %5091 = vmatpush.bf16.msra.mxu2 %v8106_v15  ;;  %v8129_v15 = vld [vmem:[%s10306_s1 + $0xb48] sm:$0xff] }
 0x159   :  { %5105 = vmatpush.bf16.msra.mxu3 %v8114_v24  ;;  %v8137_v24 = vld [vmem:[%s10306_s1 + $0xb88] sm:$0xff] }
 0x15a   :  { %5064 = vmatpush.bf16.msra.mxu0 %v8089_v52 }
 0x15b   :  { %5078 = vmatpush.bf16.msra.mxu1 %v8097_v53 }
 0x15c   :  { %5092 = vmatpush.bf16.msra.mxu2 %v8105_v54 }
 0x15d   :  { %5106 = vmatpush.bf16.msra.mxu3 %v8113_v28  ;;  %v8120_v28 = vld [vmem:[%s10306_s1 + $0xb00] sm:$0xff] }
 0x15e   :  { %5065 = vmatpush.bf16.msra.mxu0 %v8088_v58  ;;  %v4843_v27 = vpop.f32.mrf.mxu0 }
 0x15f   :  { %5079 = vmatpush.bf16.msra.mxu1 %v8096_v59  ;;  %v4844_v25 = vadd.f32 %v4843_v27, %v9622_v47  ;;  %v4857_v30 = vpop.f32.mrf.mxu1  ;;  %v8138_v47 = vld [vmem:[%s10306_s1 + $0xb90] sm:$0xff]  ;;  %v8159_v59 = vld [vmem:[%s10306_s1 + $0xc38] sm:$0xff] }
 0x160   :  { %5093 = vmatpush.bf16.msra.mxu2 %v8104_v60  ;;  %v8167_v60 = vld [vmem:[%s10306_s1 + $0xc78] sm:$0xff] }
 0x161   :  { %5107 = vmatpush.bf16.msra.mxu3 %v8112_v61  ;;  %5066 = vmatmul.bf16.vlgmr.msra.gmra.mxu0 %v5563_v9  ;;  %v4858_v34 = vadd.f32 %v4857_v30, %v4844_v25  ;;  %v5578_v61 = vld [vmem:[%s10307_s0 + $0xb0] sm:$0xf]  ;;  %v8172_v25 = vld [vmem:[%s10306_s1 + $0xca0] sm:$0xff]  ;;  %v8155_v30 = vld [vmem:[%s10306_s1 + $0xc18] sm:$0xff] }
 0x162   :  { %5114 = vmatpush.bf16.msrb.mxu0 %v8127_v63  ;;  %5080 = vmatmul.bf16.vlgmr.msra.gmra.mxu1 %v5567_v11  ;;  %v5586_v63 = vld [vmem:[%s10307_s0 + $0xb8] sm:$0xf]  ;;  %v8158_v9 = vld [vmem:[%s10306_s1 + $0xc30] sm:$0xff] }
 0x163   :  { %5128 = vmatpush.bf16.msrb.mxu1 %v8135_v38  ;;  %5094 = vmatmul.bf16.vlgmr.msra.gmra.mxu2 %v5571_v10  ;;  %v7759_v38 = vld [vmem:[%s10307_s0 + $0x1b4] sm:$0xf0]  ;;  %v8166_v10 = vld [vmem:[%s10306_s1 + $0xc70] sm:$0xff] }
 0x164   :  { %5142 = vmatpush.bf16.msrb.mxu2 %v8143_v7  ;;  %5108 = vmatmul.bf16.vlgmr.msra.gmra.mxu3 %v5575_v13  ;;  %v5587_v6 = vor.u32 %v7759_v38, %v5586_v63  ;;  %v5583_v7 = vor.u32 %v7726_v17, %v5580_v0  ;;  %v8174_v11 = vld [vmem:[%s10306_s1 + $0xcb0] sm:$0xff]  ;;  %v7729_v63 = vld [vmem:[%s10307_s0 + $0xcc] sm:$0xf]  ;;  %v8207_v17 = vld [vmem:[%s10306_s1 + $0xdb8] sm:$0xff] }
 0x165   :  { %5156 = vmatpush.bf16.msrb.mxu3 %v8151_v8  ;;  %v5591_v8 = vor.u32 %v7727_v1, %v5588_v2  ;;  %v8182_v13 = vld [vmem:[%s10306_s1 + $0xcf0] sm:$0xff]  ;;  %v5604_v38 = vld [vmem:[%s10307_s0 + $0x1c8] sm:$0xf0]  ;;  %v8215_v0 = vld [vmem:[%s10306_s1 + $0xdf8] sm:$0xff] }
 0x166   :  { %5115 = vmatpush.bf16.msrb.mxu0 %v8126_v14  ;;  %v4871_v39 = vpop.f32.mrf.mxu2  ;;  %v4845_v42 = vpop.f32.mrf.mxu0  ;;  %v8157_v14 = vld [vmem:[%s10306_s1 + $0xc28] sm:$0xff] }
 0x167   :  { %5129 = vmatpush.bf16.msrb.mxu1 %v8134_v22  ;;  %v4872_v40 = vadd.f32 %v4871_v39, %v4858_v34  ;;  %v4885_v41 = vpop.f32.mrf.mxu3  ;;  %v4846_v12 = vadd.f32 %v4845_v42, %v9660_v62  ;;  %v4859_v46 = vpop.f32.mrf.mxu1  ;;  %v7758_v62 = vld [vmem:[%s10307_s0 + $0x1ac] sm:$0xf0]  ;;  %v8165_v22 = vld [vmem:[%s10306_s1 + $0xc68] sm:$0xff]  ;;  %v8179_v34 = vld [vmem:[%s10306_s1 + $0xcd8] sm:$0xff] }
 0x168   :  { %5143 = vmatpush.bf16.msrb.mxu2 %v8142_v16  ;;  %v5579_v5 = vor.u32 %v7758_v62, %v5578_v61  ;;  %v8173_v16 = vld [vmem:[%s10306_s1 + $0xca8] sm:$0xff]  ;;  %v8162_v42 = vld [vmem:[%s10306_s1 + $0xc50] sm:$0xff]  ;;  %v7728_v61 = vld [vmem:[%s10307_s0 + $0xc4] sm:$0xf] }
 0x169   :  { %5157 = vmatpush.bf16.msrb.mxu3 %v8150_v18  ;;  %v9748_v43 = vadd.f32 %v4885_v41, %v4872_v40  ;;  %v4860_v49 = vadd.f32 %v4859_v46, %v4846_v12  ;;  %v8181_v18 = vld [vmem:[%s10306_s1 + $0xce8] sm:$0xff]  ;;  %v8154_v41 = vld [vmem:[%s10306_s1 + $0xc10] sm:$0xff]  ;;  %v5596_v62 = vld [vmem:[%s10307_s0 + $0x1c0] sm:$0xf0] }
 0x16a   :  { %5116 = vmatpush.bf16.msrb.mxu0 %v8125_v19  ;;  %v8153_v46 = vld [vmem:[%s10306_s1 + $0xc08] sm:$0xff] }
 0x16b   :  { %5130 = vmatpush.bf16.msrb.mxu1 %v8133_v20 }
 0x16c   :  { %5144 = vmatpush.bf16.msrb.mxu2 %v8141_v21  ;;  %v8156_v21 = vld [vmem:[%s10306_s1 + $0xc20] sm:$0xff] }
 0x16d   :  { %5158 = vmatpush.bf16.msrb.mxu3 %v8149_v23  ;;  %v8164_v23 = vld [vmem:[%s10306_s1 + $0xc60] sm:$0xff] }
 0x16e   :  { %5117 = vmatpush.bf16.msrb.mxu0 %v8124_v26  ;;  %v4873_v52 = vpop.f32.mrf.mxu2  ;;  %v8180_v26 = vld [vmem:[%s10306_s1 + $0xce0] sm:$0xff] }
 0x16f   :  { %5131 = vmatpush.bf16.msrb.mxu1 %v8132_v29  ;;  %v4874_v53 = vadd.f32 %v4873_v52, %v4860_v49  ;;  %v4887_v54 = vpop.f32.mrf.mxu3  ;;  %v8177_v49 = vld [vmem:[%s10306_s1 + $0xcc8] sm:$0xff]  ;;  %v8160_v52 = vld [vmem:[%s10306_s1 + $0xc40] sm:$0xff] }
 0x170   :  { %5145 = vmatpush.bf16.msrb.mxu2 %v8140_v31  ;;  %v8163_v31 = vld [vmem:[%s10306_s1 + $0xc58] sm:$0xff] }
 0x171   :  { %5159 = vmatpush.bf16.msrb.mxu3 %v8148_v33  ;;  %v9786_v58 = vadd.f32 %v4887_v54, %v4874_v53  ;;  %v8171_v33 = vld [vmem:[%s10306_s1 + $0xc98] sm:$0xff]  ;;  %v8168_v53 = vld [vmem:[%s10306_s1 + $0xc80] sm:$0xff] }
 0x172   :  { %5118 = vmatpush.bf16.msrb.mxu0 %v8123_v35  ;;  %v8176_v54 = vld [vmem:[%s10306_s1 + $0xcc0] sm:$0xff] }
 0x173   :  { %5132 = vmatpush.bf16.msrb.mxu1 %v8131_v32 }
 0x174   :  { %5146 = vmatpush.bf16.msrb.mxu2 %v8139_v36 }
 0x175   :  { %5160 = vmatpush.bf16.msrb.mxu3 %v8147_v37 }
 0x176   :  { %5119 = vmatpush.bf16.msrb.mxu0 %v8122_v44  ;;  %v8178_v44 = vld [vmem:[%s10306_s1 + $0xcd0] sm:$0xff] }
 0x177   :  { %5133 = vmatpush.bf16.msrb.mxu1 %v8130_v45 }
 0x178   :  { %5147 = vmatpush.bf16.msrb.mxu2 %v8138_v47  ;;  %v8161_v47 = vld [vmem:[%s10306_s1 + $0xc48] sm:$0xff] }
 0x179   :  { %5161 = vmatpush.bf16.msrb.mxu3 %v8146_v48  ;;  %v8169_v48 = vld [vmem:[%s10306_s1 + $0xc88] sm:$0xff] }
 0x17a   :  { %5120 = vmatpush.bf16.msrb.mxu0 %v8121_v50 }
 0x17b   :  { %5134 = vmatpush.bf16.msrb.mxu1 %v8129_v15 }
 0x17c   :  { %5148 = vmatpush.bf16.msrb.mxu2 %v8137_v24 }
 0x17d   :  { %5162 = vmatpush.bf16.msrb.mxu3 %v8145_v51  ;;  %v8152_v51 = vld [vmem:[%s10306_s1 + $0xc00] sm:$0xff] }
 0x17e   :  { %5121 = vmatpush.bf16.msrb.mxu0 %v8120_v28  ;;  %v4899_v19 = vpop.f32.mrf.mxu0 }
 0x17f   :  { %5135 = vmatpush.bf16.msrb.mxu1 %v8128_v55  ;;  %v4900_v20 = vadd.f32 %v4899_v19, %v9748_v43  ;;  %v4913_v27 = vpop.f32.mrf.mxu1  ;;  %v8170_v43 = vld [vmem:[%s10306_s1 + $0xc90] sm:$0xff]  ;;  %v8191_v55 = vld [vmem:[%s10306_s1 + $0xd38] sm:$0xff] }
 0x180   :  { %5149 = vmatpush.bf16.msrb.mxu2 %v8136_v56  ;;  %v8199_v56 = vld [vmem:[%s10306_s1 + $0xd78] sm:$0xff] }
 0x181   :  { %5163 = vmatpush.bf16.msrb.mxu3 %v8144_v57  ;;  %5122 = vmatmul.bf16.vlgmr.msrb.gmra.mxu0 %v5579_v5  ;;  %v4914_v29 = vadd.f32 %v4913_v27, %v4900_v20  ;;  %v5594_v57 = vld [vmem:[%s10307_s0 + $0xc0] sm:$0xf]  ;;  %v8190_v5 = vld [vmem:[%s10306_s1 + $0xd30] sm:$0xff]  ;;  %v8187_v19 = vld [vmem:[%s10306_s1 + $0xd18] sm:$0xff] }
 0x182   :  { %5170 = vmatpush.bf16.msra.mxu0 %v8159_v59  ;;  %5136 = vmatmul.bf16.vlgmr.msrb.gmra.mxu1 %v5583_v7  ;;  %v5602_v59 = vld [vmem:[%s10307_s0 + $0xc8] sm:$0xf]  ;;  %v8206_v7 = vld [vmem:[%s10306_s1 + $0xdb0] sm:$0xff]  ;;  %v8195_v20 = vld [vmem:[%s10306_s1 + $0xd58] sm:$0xff] }
 0x183   :  { %5184 = vmatpush.bf16.msra.mxu1 %v8167_v60  ;;  %5150 = vmatmul.bf16.vlgmr.msrb.gmra.mxu2 %v5587_v6  ;;  %v7761_v60 = vld [vmem:[%s10307_s0 + $0x1c4] sm:$0xf0]  ;;  %v8198_v6 = vld [vmem:[%s10306_s1 + $0xd70] sm:$0xff] }
 0x184   :  { %5198 = vmatpush.bf16.msra.mxu2 %v8175_v3  ;;  %5164 = vmatmul.bf16.vlgmr.msrb.gmra.mxu3 %v5591_v8  ;;  %v5603_v2 = vor.u32 %v7761_v60, %v5602_v59  ;;  %v5599_v3 = vor.u32 %v7728_v61, %v5596_v62  ;;  %v8214_v8 = vld [vmem:[%s10306_s1 + $0xdf0] sm:$0xff]  ;;  %v8237_v59 = vld [vmem:[%s10306_s1 + $0xea8] sm:$0xff]  ;;  %v8220_v61 = vld [vmem:[%s10306_s1 + $0xe20] sm:$0xff] }
 0x185   :  { %5212 = vmatpush.bf16.msra.mxu3 %v8183_v4  ;;  %v5607_v4 = vor.u32 %v7729_v63, %v5604_v38  ;;  %v8186_v27 = vld [vmem:[%s10306_s1 + $0xd10] sm:$0xff]  ;;  %v8245_v60 = vld [vmem:[%s10306_s1 + $0xee8] sm:$0xff]  ;;  %v8228_v62 = vld [vmem:[%s10306_s1 + $0xe60] sm:$0xff] }
 0x186   :  { %5171 = vmatpush.bf16.msra.mxu0 %v8158_v9  ;;  %v4927_v35 = vpop.f32.mrf.mxu2  ;;  %v4901_v37 = vpop.f32.mrf.mxu0  ;;  %v8189_v9 = vld [vmem:[%s10306_s1 + $0xd28] sm:$0xff]  ;;  %v8236_v63 = vld [vmem:[%s10306_s1 + $0xea0] sm:$0xff] }
 0x187   :  { %5185 = vmatpush.bf16.msra.mxu1 %v8166_v10  ;;  %v4928_v32 = vadd.f32 %v4927_v35, %v4914_v29  ;;  %v4941_v36 = vpop.f32.mrf.mxu3  ;;  %v4902_v39 = vadd.f32 %v4901_v37, %v9786_v58  ;;  %v4915_v12 = vpop.f32.mrf.mxu1  ;;  %v7760_v58 = vld [vmem:[%s10307_s0 + $0x1bc] sm:$0xf0]  ;;  %v8197_v10 = vld [vmem:[%s10306_s1 + $0xd68] sm:$0xff]  ;;  %v8210_v29 = vld [vmem:[%s10306_s1 + $0xdd0] sm:$0xff] }
 0x188   :  { %5199 = vmatpush.bf16.msra.mxu2 %v8174_v11  ;;  %v5595_v1 = vor.u32 %v7760_v58, %v5594_v57  ;;  %v8205_v11 = vld [vmem:[%s10306_s1 + $0xda8] sm:$0xff]  ;;  %v8184_v35 = vld [vmem:[%s10306_s1 + $0xd00] sm:$0xff] }
 0x189   :  { %5213 = vmatpush.bf16.msra.mxu3 %v8182_v13  ;;  %v9874_v40 = vadd.f32 %v4941_v36, %v4928_v32  ;;  %v4916_v45 = vadd.f32 %v4915_v12, %v4902_v39  ;;  %v8213_v13 = vld [vmem:[%s10306_s1 + $0xde8] sm:$0xff]  ;;  %v8192_v32 = vld [vmem:[%s10306_s1 + $0xd40] sm:$0xff]  ;;  %v8223_v39 = vld [vmem:[%s10306_s1 + $0xe38] sm:$0xff] }
 0x18a   :  { %5172 = vmatpush.bf16.msra.mxu0 %v8157_v14  ;;  %v8188_v14 = vld [vmem:[%s10306_s1 + $0xd20] sm:$0xff]  ;;  %v7762_v12 = vld [vmem:[%s10307_s0 + $0x1cc] sm:$0xf0]  ;;  %v8221_v57 = vld [vmem:[%s10306_s1 + $0xe28] sm:$0xff] }
 0x18b   :  { %5186 = vmatpush.bf16.msra.mxu1 %v8165_v22  ;;  %v8196_v22 = vld [vmem:[%s10306_s1 + $0xd60] sm:$0xff]  ;;  %v8229_v58 = vld [vmem:[%s10306_s1 + $0xe68] sm:$0xff] }
 0x18c   :  { %5200 = vmatpush.bf16.msra.mxu2 %v8173_v16  ;;  %v8204_v16 = vld [vmem:[%s10306_s1 + $0xda0] sm:$0xff] }
 0x18d   :  { %5214 = vmatpush.bf16.msra.mxu3 %v8181_v18  ;;  %v8212_v18 = vld [vmem:[%s10306_s1 + $0xde0] sm:$0xff] }
 0x18e   :  { %5173 = vmatpush.bf16.msra.mxu0 %v8156_v21  ;;  %v4929_v50 = vpop.f32.mrf.mxu2  ;;  %v8203_v21 = vld [vmem:[%s10306_s1 + $0xd98] sm:$0xff]  ;;  %v8200_v36 = vld [vmem:[%s10306_s1 + $0xd80] sm:$0xff] }
 0x18f   :  { %5187 = vmatpush.bf16.msra.mxu1 %v8164_v23  ;;  %v4930_v15 = vadd.f32 %v4929_v50, %v4916_v45  ;;  %v4943_v24 = vpop.f32.mrf.mxu3  ;;  %v8211_v23 = vld [vmem:[%s10306_s1 + $0xdd8] sm:$0xff]  ;;  %v8208_v37 = vld [vmem:[%s10306_s1 + $0xdc0] sm:$0xff]  ;;  %v7730_v45 = vld [vmem:[%s10307_s0 + $0xd4] sm:$0xf] }
 0x190   :  { %5201 = vmatpush.bf16.msra.mxu2 %v8172_v25  ;;  %v8194_v25 = vld [vmem:[%s10306_s1 + $0xd50] sm:$0xff]  ;;  %v8247_v50 = vld [vmem:[%s10306_s1 + $0xef8] sm:$0xff]  ;;  %v8244_v38 = vld [vmem:[%s10306_s1 + $0xee0] sm:$0xff] }
 0x191   :  { %5215 = vmatpush.bf16.msra.mxu3 %v8180_v26  ;;  %v9912_v28 = vadd.f32 %v4943_v24, %v4930_v15  ;;  %v8202_v26 = vld [vmem:[%s10306_s1 + $0xd90] sm:$0xff] }
 0x192   :  { %5174 = vmatpush.bf16.msra.mxu0 %v8155_v30  ;;  %v8185_v30 = vld [vmem:[%s10306_s1 + $0xd08] sm:$0xff] }
 0x193   :  { %5188 = vmatpush.bf16.msra.mxu1 %v8163_v31  ;;  %v8193_v31 = vld [vmem:[%s10306_s1 + $0xd48] sm:$0xff] }
 0x194   :  { %5202 = vmatpush.bf16.msra.mxu2 %v8171_v33  ;;  %v8201_v33 = vld [vmem:[%s10306_s1 + $0xd88] sm:$0xff] }
 0x195   :  { %5216 = vmatpush.bf16.msra.mxu3 %v8179_v34  ;;  %v8209_v34 = vld [vmem:[%s10306_s1 + $0xdc8] sm:$0xff] }
 0x196   :  { %5175 = vmatpush.bf16.msra.mxu0 %v8154_v41  ;;  %v8231_v41 = vld [vmem:[%s10306_s1 + $0xe78] sm:$0xff] }
 0x197   :  { %5189 = vmatpush.bf16.msra.mxu1 %v8162_v42  ;;  %v5610_v42 = vld [vmem:[%s10307_s0 + $0xd0] sm:$0xf] }
 0x198   :  { %5203 = vmatpush.bf16.msra.mxu2 %v8170_v43  ;;  %v5618_v43 = vld [vmem:[%s10307_s0 + $0xd8] sm:$0xf]  ;;  %v5611_v15 = vor.u32 %v7762_v12, %v5610_v42  ;;  %v8253_v42 = vld [vmem:[%s10306_s1 + $0xf28] sm:$0xff] }
 0x199   :  { %5217 = vmatpush.bf16.msra.mxu3 %v8178_v44  ;;  %v7763_v44 = vld [vmem:[%s10307_s0 + $0x1d4] sm:$0xf0]  ;;  %v8261_v12 = vld [vmem:[%s10306_s1 + $0xf68] sm:$0xff] }
 0x19a   :  { %5176 = vmatpush.bf16.msra.mxu0 %v8153_v46  ;;  %v5612_v46 = vld [vmem:[%s10307_s0 + $0x1d0] sm:$0xf0]  ;;  %v5619_v24 = vor.u32 %v7763_v44, %v5618_v43  ;;  %v8269_v43 = vld [vmem:[%s10306_s1 + $0xfa8] sm:$0xff] }
 0x19b   :  { %5190 = vmatpush.bf16.msra.mxu1 %v8161_v47  ;;  %v7731_v47 = vld [vmem:[%s10307_s0 + $0xdc] sm:$0xf]  ;;  %v8277_v44 = vld [vmem:[%s10306_s1 + $0xfe8] sm:$0xff] }
 0x19c   :  { %5204 = vmatpush.bf16.msra.mxu2 %v8169_v48  ;;  %v5620_v48 = vld [vmem:[%s10307_s0 + $0x1d8] sm:$0xf0] }
 0x19d   :  { %5218 = vmatpush.bf16.msra.mxu3 %v8177_v49  ;;  %v8239_v49 = vld [vmem:[%s10306_s1 + $0xeb8] sm:$0xff] }
 0x19e   :  { %5177 = vmatpush.bf16.msra.mxu0 %v8152_v51  ;;  %v5615_v51 = vor.u32 %v7730_v45, %v5612_v46  ;;  %v8252_v45 = vld [vmem:[%s10306_s1 + $0xf20] sm:$0xff] }
 0x19f   :  { %5191 = vmatpush.bf16.msra.mxu1 %v8160_v52  ;;  %v5623_v52 = vor.u32 %v7731_v47, %v5620_v48  ;;  %v8260_v46 = vld [vmem:[%s10306_s1 + $0xf60] sm:$0xff] }
 0x1a0   :  { %5205 = vmatpush.bf16.msra.mxu2 %v8168_v53  ;;  %v8222_v53 = vld [vmem:[%s10306_s1 + $0xe30] sm:$0xff]  ;;  %v8268_v47 = vld [vmem:[%s10306_s1 + $0xfa0] sm:$0xff] }
 0x1a1   :  { %5219 = vmatpush.bf16.msra.mxu3 %v8176_v54  ;;  %5178 = vmatmul.bf16.vlgmr.msra.gmra.mxu0 %v5595_v1  ;;  %v8230_v54 = vld [vmem:[%s10306_s1 + $0xe70] sm:$0xff]  ;;  %v8235_v1 = vld [vmem:[%s10306_s1 + $0xe98] sm:$0xff]  ;;  %v8276_v48 = vld [vmem:[%s10306_s1 + $0xfe0] sm:$0xff] }
 0x1a2   :  { %5226 = vmatpush.bf16.msrb.mxu0 %v8191_v55  ;;  %5192 = vmatmul.bf16.vlgmr.msra.gmra.mxu1 %v5599_v3  ;;  %v8238_v55 = vld [vmem:[%s10306_s1 + $0xeb0] sm:$0xff] }
 0x1a3   :  { %5240 = vmatpush.bf16.msrb.mxu1 %v8199_v56  ;;  %5206 = vmatmul.bf16.vlgmr.msra.gmra.mxu2 %v5603_v2  ;;  %v8246_v56 = vld [vmem:[%s10306_s1 + $0xef0] sm:$0xff]  ;;  %v8243_v2 = vld [vmem:[%s10306_s1 + $0xed8] sm:$0xff] }
 0x1a4   :  { %5254 = vmatpush.bf16.msrb.mxu2 %v8207_v17  ;;  %5220 = vmatmul.bf16.vlgmr.msra.gmra.mxu3 %v5607_v4  ;;  %v8219_v17 = vld [vmem:[%s10306_s1 + $0xe18] sm:$0xff]  ;;  %v8218_v3 = vld [vmem:[%s10306_s1 + $0xe10] sm:$0xff] }
 0x1a5   :  { %5268 = vmatpush.bf16.msrb.mxu3 %v8215_v0  ;;  %v8227_v0 = vld [vmem:[%s10306_s1 + $0xe58] sm:$0xff]  ;;  %v8226_v4 = vld [vmem:[%s10306_s1 + $0xe50] sm:$0xff] }
 0x1a6   :  { %5227 = vmatpush.bf16.msrb.mxu0 %v8190_v5  ;;  %v8234_v5 = vld [vmem:[%s10306_s1 + $0xe90] sm:$0xff] }
 0x1a7   :  { %5241 = vmatpush.bf16.msrb.mxu1 %v8198_v6  ;;  %v8242_v6 = vld [vmem:[%s10306_s1 + $0xed0] sm:$0xff] }
 0x1a8   :  { %5255 = vmatpush.bf16.msrb.mxu2 %v8206_v7  ;;  %v8217_v7 = vld [vmem:[%s10306_s1 + $0xe08] sm:$0xff] }
 0x1a9   :  { %5269 = vmatpush.bf16.msrb.mxu3 %v8214_v8  ;;  %v8225_v8 = vld [vmem:[%s10306_s1 + $0xe48] sm:$0xff] }
 0x1aa   :  { %5228 = vmatpush.bf16.msrb.mxu0 %v8189_v9  ;;  %v8233_v9 = vld [vmem:[%s10306_s1 + $0xe88] sm:$0xff] }
 0x1ab   :  { %5242 = vmatpush.bf16.msrb.mxu1 %v8197_v10  ;;  %v8241_v10 = vld [vmem:[%s10306_s1 + $0xec8] sm:$0xff] }
 0x1ac   :  { %5256 = vmatpush.bf16.msrb.mxu2 %v8205_v11  ;;  %v8216_v11 = vld [vmem:[%s10306_s1 + $0xe00] sm:$0xff] }
 0x1ad   :  { %5270 = vmatpush.bf16.msrb.mxu3 %v8213_v13  ;;  %v8224_v13 = vld [vmem:[%s10306_s1 + $0xe40] sm:$0xff] }
 0x1ae   :  { %5229 = vmatpush.bf16.msrb.mxu0 %v8188_v14  ;;  %v8232_v14 = vld [vmem:[%s10306_s1 + $0xe80] sm:$0xff] }
 0x1af   :  { %5243 = vmatpush.bf16.msrb.mxu1 %v8196_v22  ;;  %v8240_v22 = vld [vmem:[%s10306_s1 + $0xec0] sm:$0xff] }
 0x1b0   :  { %5257 = vmatpush.bf16.msrb.mxu2 %v8204_v16  ;;  %v8255_v16 = vld [vmem:[%s10306_s1 + $0xf38] sm:$0xff] }
 0x1b1   :  { %5271 = vmatpush.bf16.msrb.mxu3 %v8212_v18  ;;  %v8263_v18 = vld [vmem:[%s10306_s1 + $0xf78] sm:$0xff] }
 0x1b2   :  { %5230 = vmatpush.bf16.msrb.mxu0 %v8187_v19  ;;  %v5626_v19 = vld [vmem:[%s10307_s0 + $0xe0] sm:$0xf] }
 0x1b3   :  { %5244 = vmatpush.bf16.msrb.mxu1 %v8195_v20  ;;  %v7764_v20 = vld [vmem:[%s10307_s0 + $0x1dc] sm:$0xf0] }
 0x1b4   :  { %5258 = vmatpush.bf16.msrb.mxu2 %v8203_v21  ;;  %v5634_v21 = vld [vmem:[%s10307_s0 + $0xe8] sm:$0xf] }
 0x1b5   :  { %5272 = vmatpush.bf16.msrb.mxu3 %v8211_v23  ;;  %v7765_v23 = vld [vmem:[%s10307_s0 + $0x1e4] sm:$0xf0] }
 0x1b6   :  { %5231 = vmatpush.bf16.msrb.mxu0 %v8186_v27  ;;  %v7732_v27 = vld [vmem:[%s10307_s0 + $0xe4] sm:$0xf] }
 0x1b7   :  { %5245 = vmatpush.bf16.msrb.mxu1 %v8194_v25  ;;  %v5628_v25 = vld [vmem:[%s10307_s0 + $0x1e0] sm:$0xf0] }
 0x1b8   :  { %5259 = vmatpush.bf16.msrb.mxu2 %v8202_v26  ;;  %v7733_v26 = vld [vmem:[%s10307_s0 + $0xec] sm:$0xf] }
 0x1b9   :  { %5273 = vmatpush.bf16.msrb.mxu3 %v8210_v29  ;;  %v5636_v29 = vld [vmem:[%s10307_s0 + $0x1e8] sm:$0xf0] }
 0x1ba   :  { %5232 = vmatpush.bf16.msrb.mxu0 %v8185_v30  ;;  %v8271_v30 = vld [vmem:[%s10306_s1 + $0xfb8] sm:$0xff] }
 0x1bb   :  { %5246 = vmatpush.bf16.msrb.mxu1 %v8193_v31  ;;  %v8279_v31 = vld [vmem:[%s10306_s1 + $0xff8] sm:$0xff] }
 0x1bc   :  { %5260 = vmatpush.bf16.msrb.mxu2 %v8201_v33  ;;  %v5627_v33 = vor.u32 %v7764_v20, %v5626_v19 }
 0x1bd   :  { %5274 = vmatpush.bf16.msrb.mxu3 %v8209_v34  ;;  %v5635_v34 = vor.u32 %v7765_v23, %v5634_v21 }
 0x1be   :  { %5233 = vmatpush.bf16.msrb.mxu0 %v8184_v35  ;;  %v5631_v35 = vor.u32 %v7732_v27, %v5628_v25 }
 0x1bf   :  { %5247 = vmatpush.bf16.msrb.mxu1 %v8192_v32  ;;  %v5639_v32 = vor.u32 %v7733_v26, %v5636_v29 }
 0x1c0   :  { %5261 = vmatpush.bf16.msrb.mxu2 %v8200_v36  ;;  %v8254_v36 = vld [vmem:[%s10306_s1 + $0xf30] sm:$0xff] }
 0x1c1   :  { %5275 = vmatpush.bf16.msrb.mxu3 %v8208_v37  ;;  %5234 = vmatmul.bf16.vlgmr.msrb.gmra.mxu0 %v5611_v15  ;;  %v8262_v37 = vld [vmem:[%s10306_s1 + $0xf70] sm:$0xff]  ;;  %v8267_v15 = vld [vmem:[%s10306_s1 + $0xf98] sm:$0xff] }
 0x1c2   :  { %5282 = vmatpush.bf16.msra.mxu0 %v8223_v39  ;;  %5248 = vmatmul.bf16.vlgmr.msrb.gmra.mxu1 %v5615_v51  ;;  %v8270_v39 = vld [vmem:[%s10306_s1 + $0xfb0] sm:$0xff] }
 0x1c3   :  { %5296 = vmatpush.bf16.msra.mxu1 %v8231_v41  ;;  %5262 = vmatmul.bf16.vlgmr.msrb.gmra.mxu2 %v5619_v24  ;;  %v8278_v41 = vld [vmem:[%s10306_s1 + $0xff0] sm:$0xff]  ;;  %v8275_v24 = vld [vmem:[%s10306_s1 + $0xfd8] sm:$0xff] }
 0x1c4   :  { %5310 = vmatpush.bf16.msra.mxu2 %v8239_v49  ;;  %5276 = vmatmul.bf16.vlgmr.msrb.gmra.mxu3 %v5623_v52  ;;  %v8251_v49 = vld [vmem:[%s10306_s1 + $0xf18] sm:$0xff]  ;;  %v8250_v51 = vld [vmem:[%s10306_s1 + $0xf10] sm:$0xff] }
 0x1c5   :  { %5324 = vmatpush.bf16.msra.mxu3 %v8247_v50  ;;  %v8259_v50 = vld [vmem:[%s10306_s1 + $0xf58] sm:$0xff]  ;;  %v8258_v52 = vld [vmem:[%s10306_s1 + $0xf50] sm:$0xff] }
 0x1c6   :  { %5283 = vmatpush.bf16.msra.mxu0 %v8222_v53  ;;  %v8266_v53 = vld [vmem:[%s10306_s1 + $0xf90] sm:$0xff] }
 0x1c7   :  { %5297 = vmatpush.bf16.msra.mxu1 %v8230_v54  ;;  %v8274_v54 = vld [vmem:[%s10306_s1 + $0xfd0] sm:$0xff] }
 0x1c8   :  { %5311 = vmatpush.bf16.msra.mxu2 %v8238_v55  ;;  %v8249_v55 = vld [vmem:[%s10306_s1 + $0xf08] sm:$0xff] }
 0x1c9   :  { %5325 = vmatpush.bf16.msra.mxu3 %v8246_v56  ;;  %v8257_v56 = vld [vmem:[%s10306_s1 + $0xf48] sm:$0xff] }
 0x1ca   :  { %5284 = vmatpush.bf16.msra.mxu0 %v8221_v57  ;;  %v8265_v57 = vld [vmem:[%s10306_s1 + $0xf88] sm:$0xff] }
 0x1cb   :  { %5298 = vmatpush.bf16.msra.mxu1 %v8229_v58  ;;  %v8273_v58 = vld [vmem:[%s10306_s1 + $0xfc8] sm:$0xff] }
 0x1cc   :  { %5312 = vmatpush.bf16.msra.mxu2 %v8237_v59  ;;  %v8248_v59 = vld [vmem:[%s10306_s1 + $0xf00] sm:$0xff] }
 0x1cd   :  { %5326 = vmatpush.bf16.msra.mxu3 %v8245_v60  ;;  %v8256_v60 = vld [vmem:[%s10306_s1 + $0xf40] sm:$0xff] }
 0x1ce   :  { %5285 = vmatpush.bf16.msra.mxu0 %v8220_v61  ;;  %v8264_v61 = vld [vmem:[%s10306_s1 + $0xf80] sm:$0xff] }
 0x1cf   :  { %5299 = vmatpush.bf16.msra.mxu1 %v8228_v62  ;;  %v8272_v62 = vld [vmem:[%s10306_s1 + $0xfc0] sm:$0xff] }
 0x1d0   :  { %5313 = vmatpush.bf16.msra.mxu2 %v8236_v63  ;;  %v5642_v63 = vld [vmem:[%s10307_s0 + $0xf0] sm:$0xf] }
 0x1d1   :  { %5327 = vmatpush.bf16.msra.mxu3 %v8244_v38  ;;  %v7766_v38 = vld [vmem:[%s10307_s0 + $0x1ec] sm:$0xf0] }
 0x1d2   :  { %5286 = vmatpush.bf16.msra.mxu0 %v8219_v17  ;;  %v7734_v17 = vld [vmem:[%s10307_s0 + $0xf4] sm:$0xf] }
 0x1d3   :  { %5300 = vmatpush.bf16.msra.mxu1 %v8227_v0  ;;  %v5644_v0 = vld [vmem:[%s10307_s0 + $0x1f0] sm:$0xf0] }
 0x1d4   :  { %5314 = vmatpush.bf16.msra.mxu2 %v8235_v1  ;;  %v5650_v1 = vld [vmem:[%s10307_s0 + $0xf8] sm:$0xf] }
 0x1d5   :  { %5328 = vmatpush.bf16.msra.mxu3 %v8243_v2  ;;  %v7767_v2 = vld [vmem:[%s10307_s0 + $0x1f4] sm:$0xf0] }
 0x1d6   :  { %5287 = vmatpush.bf16.msra.mxu0 %v8218_v3  ;;  %v7735_v3 = vld [vmem:[%s10307_s0 + $0xfc] sm:$0xf] }
 0x1d7   :  { %5301 = vmatpush.bf16.msra.mxu1 %v8226_v4  ;;  %v5652_v4 = vld [vmem:[%s10307_s0 + $0x1f8] sm:$0xf0] }
 0x1d8   :  { %5315 = vmatpush.bf16.msra.mxu2 %v8234_v5  ;;  %v5643_v5 = vor.u32 %v7766_v38, %v5642_v63 }
 0x1d9   :  { %5329 = vmatpush.bf16.msra.mxu3 %v8242_v6  ;;  %v5647_v6 = vor.u32 %v7734_v17, %v5644_v0 }
 0x1da   :  { %5288 = vmatpush.bf16.msra.mxu0 %v8217_v7  ;;  %v5651_v7 = vor.u32 %v7767_v2, %v5650_v1 }
 0x1db   :  { %5302 = vmatpush.bf16.msra.mxu1 %v8225_v8  ;;  %v5655_v8 = vor.u32 %v7735_v3, %v5652_v4 }
 0x1dc   :  { %5316 = vmatpush.bf16.msra.mxu2 %v8233_v9  ;;  %v4955_v9 = vpop.f32.mrf.mxu0 }
 0x1dd   :  { %5330 = vmatpush.bf16.msra.mxu3 %v8241_v10  ;;  %v4969_v10 = vpop.f32.mrf.mxu1 }
 0x1de   :  { %5289 = vmatpush.bf16.msra.mxu0 %v8216_v11  ;;  %v4983_v11 = vpop.f32.mrf.mxu2 }
 0x1df   :  { %5303 = vmatpush.bf16.msra.mxu1 %v8224_v13  ;;  %v4997_v13 = vpop.f32.mrf.mxu3 }
 0x1e0   :  { %5317 = vmatpush.bf16.msra.mxu2 %v8232_v14 }
 0x1e1   :  { %5331 = vmatpush.bf16.msra.mxu3 %v8240_v22  ;;  %5290 = vmatmul.bf16.vlgmr.msra.gmra.mxu0 %v5627_v33 }
 0x1e2   :  { %5338 = vmatpush.bf16.msrb.mxu0 %v8255_v16  ;;  %5304 = vmatmul.bf16.vlgmr.msra.gmra.mxu1 %v5631_v35  ;;  %v4956_v35 = vadd.f32 %v4955_v9, %v9874_v40 }
 0x1e3   :  { %5352 = vmatpush.bf16.msrb.mxu1 %v8263_v18  ;;  %5318 = vmatmul.bf16.vlgmr.msra.gmra.mxu2 %v5635_v34 }
 0x1e4   :  { %5366 = vmatpush.bf16.msrb.mxu2 %v8271_v30  ;;  %5332 = vmatmul.bf16.vlgmr.msra.gmra.mxu3 %v5639_v32  ;;  %v4957_v14 = vpop.f32.mrf.mxu0 }
 0x1e5   :  { %5380 = vmatpush.bf16.msrb.mxu3 %v8279_v31  ;;  %v4971_v22 = vpop.f32.mrf.mxu1 }
 0x1e6   :  { %5339 = vmatpush.bf16.msrb.mxu0 %v8254_v36  ;;  %v4985_v16 = vpop.f32.mrf.mxu2  ;;  %v4970_v36 = vadd.f32 %v4969_v10, %v4956_v35 }
 0x1e7   :  { %5353 = vmatpush.bf16.msrb.mxu1 %v8262_v37  ;;  %v4999_v18 = vpop.f32.mrf.mxu3 }
 0x1e8   :  { %5367 = vmatpush.bf16.msrb.mxu2 %v8270_v39  ;;  %v4984_v39 = vadd.f32 %v4983_v11, %v4970_v36 }
 0x1e9   :  { %5381 = vmatpush.bf16.msrb.mxu3 %v8278_v41  ;;  %v4958_v41 = vadd.f32 %v4957_v14, %v9912_v28 }
 0x1ea   :  { %5340 = vmatpush.bf16.msrb.mxu0 %v8253_v42 }
 0x1eb   :  { %5354 = vmatpush.bf16.msrb.mxu1 %v8261_v12 }
 0x1ec   :  { %5368 = vmatpush.bf16.msrb.mxu2 %v8269_v43  ;;  %v5011_v19 = vpop.f32.mrf.mxu0  ;;  %v4998_v43 = vadd.f32 %v4997_v13, %v4984_v39 }
 0x1ed   :  { %5382 = vmatpush.bf16.msrb.mxu3 %v8277_v44  ;;  %v5025_v20 = vpop.f32.mrf.mxu1 }
 0x1ee   :  { %5341 = vmatpush.bf16.msrb.mxu0 %v8252_v45  ;;  %v5039_v21 = vpop.f32.mrf.mxu2  ;;  %v4972_v45 = vadd.f32 %v4971_v22, %v4958_v41 }
 0x1ef   :  { %5355 = vmatpush.bf16.msrb.mxu1 %v8260_v46  ;;  %v5053_v23 = vpop.f32.mrf.mxu3  ;;  %v5012_v46 = vadd.f32 %v5011_v19, %v4998_v43 }
 0x1f0   :  { %5369 = vmatpush.bf16.msrb.mxu2 %v8268_v47 }
 0x1f1   :  { %5383 = vmatpush.bf16.msrb.mxu3 %v8276_v48  ;;  %v4986_v48 = vadd.f32 %v4985_v16, %v4972_v45 }
 0x1f2   :  { %5342 = vmatpush.bf16.msrb.mxu0 %v8251_v49  ;;  %v5026_v49 = vadd.f32 %v5025_v20, %v5012_v46 }
 0x1f3   :  { %5356 = vmatpush.bf16.msrb.mxu1 %v8259_v50 }
 0x1f4   :  { %5370 = vmatpush.bf16.msrb.mxu2 %v8267_v15  ;;  %v5013_v27 = vpop.f32.mrf.mxu0 }
 0x1f5   :  { %5384 = vmatpush.bf16.msrb.mxu3 %v8275_v24  ;;  %v5027_v25 = vpop.f32.mrf.mxu1  ;;  %v5000_v24 = vadd.f32 %v4999_v18, %v4986_v48 }
 0x1f6   :  { %5343 = vmatpush.bf16.msrb.mxu0 %v8250_v51  ;;  %v5041_v26 = vpop.f32.mrf.mxu2  ;;  %v5040_v51 = vadd.f32 %v5039_v21, %v5026_v49 }
 0x1f7   :  { %5357 = vmatpush.bf16.msrb.mxu1 %v8258_v52  ;;  %v5055_v29 = vpop.f32.mrf.mxu3  ;;  %v5014_v40 = vadd.f32 %v5013_v27, %v5000_v24 }
 0x1f8   :  { %5371 = vmatpush.bf16.msrb.mxu2 %v8266_v53  ;;  %v5054_v53 = vadd.f32 %v5053_v23, %v5040_v51 }
 0x1f9   :  { %5385 = vmatpush.bf16.msrb.mxu3 %v8274_v54 }
 0x1fa   :  { %5344 = vmatpush.bf16.msrb.mxu0 %v8249_v55  ;;  %v5028_v55 = vadd.f32 %v5027_v25, %v5014_v40 }
 0x1fb   :  { %5358 = vmatpush.bf16.msrb.mxu1 %v8257_v56 }
 0x1fc   :  { %5372 = vmatpush.bf16.msrb.mxu2 %v8265_v57  ;;  %v5067_v30 = vpop.f32.mrf.mxu0  ;;  %v5042_v28 = vadd.f32 %v5041_v26, %v5028_v55 }
 0x1fd   :  { %5386 = vmatpush.bf16.msrb.mxu3 %v8273_v58  ;;  %v5081_v31 = vpop.f32.mrf.mxu1  ;;  %v5068_v56 = vadd.f32 %v5067_v30, %v5054_v53 }
 0x1fe   :  { %5345 = vmatpush.bf16.msrb.mxu0 %v8248_v59  ;;  %v5095_v33 = vpop.f32.mrf.mxu2 }
 0x1ff   :  { %5359 = vmatpush.bf16.msrb.mxu1 %v8256_v60  ;;  %v5109_v34 = vpop.f32.mrf.mxu3  ;;  %v5082_v59 = vadd.f32 %v5081_v31, %v5068_v56 }
 0x200   :  { %5373 = vmatpush.bf16.msrb.mxu2 %v8264_v61  ;;  %v5056_v61 = vadd.f32 %v5055_v29, %v5042_v28 }
 0x201   :  { %5387 = vmatpush.bf16.msrb.mxu3 %v8272_v62  ;;  %5346 = vmatmul.bf16.vlgmr.msrb.gmra.mxu0 %v5643_v5  ;;  %v5096_v62 = vadd.f32 %v5095_v33, %v5082_v59 }
 0x202   :  { %5360 = vmatmul.bf16.vlgmr.msrb.gmra.mxu1 %v5647_v6 }
 0x203   :  { %5374 = vmatmul.bf16.vlgmr.msrb.gmra.mxu2 %v5651_v7  ;;  %v5110_v17 = vadd.f32 %v5109_v34, %v5096_v62 }
 0x204   :  { %5388 = vmatmul.bf16.vlgmr.msrb.gmra.mxu3 %v5655_v8  ;;  %v5069_v32 = vpop.f32.mrf.mxu0 }
 0x205   :  { %v5083_v37 = vpop.f32.mrf.mxu1  ;;  %v5070_v38 = vadd.f32 %v5069_v32, %v5056_v61 }
 0x206   :  { %v5097_v42 = vpop.f32.mrf.mxu2 }
 0x207   :  { %v5111_v12 = vpop.f32.mrf.mxu3  ;;  %v5084_v2 = vadd.f32 %v5083_v37, %v5070_v38 }
 0x209   :  { %v5098_v4 = vadd.f32 %v5097_v42, %v5084_v2 }
 0x20b   :  { %v5112_v8 = vadd.f32 %v5111_v12, %v5098_v4 }
 0x20c   :  { %v5123_v44 = vpop.f32.mrf.mxu0 }
 0x20d   :  { %v5137_v47 = vpop.f32.mrf.mxu1  ;;  %v5124_v3 = vadd.f32 %v5123_v44, %v5110_v17 }
 0x20e   :  { %v5151_v50 = vpop.f32.mrf.mxu2 }
 0x20f   :  { %v5165_v15 = vpop.f32.mrf.mxu3  ;;  %v5138_v6 = vadd.f32 %v5137_v47, %v5124_v3 }
 0x211   :  { %v5152_v9 = vadd.f32 %v5151_v50, %v5138_v6 }
 0x213   :  { %v5166_v14 = vadd.f32 %v5165_v15, %v5152_v9 }
 0x214   :  { %v5125_v52 = vpop.f32.mrf.mxu0 }
 0x215   :  { %v5139_v54 = vpop.f32.mrf.mxu1  ;;  %v5126_v10 = vadd.f32 %v5125_v52, %v5112_v8 }
 0x216   :  { %v5153_v57 = vpop.f32.mrf.mxu2 }
 0x217   :  { %v5167_v58 = vpop.f32.mrf.mxu3  ;;  %v5140_v16 = vadd.f32 %v5139_v54, %v5126_v10 }
 0x219   :  { %v5154_v20 = vadd.f32 %v5153_v57, %v5140_v16 }
 0x21b   :  { %v5168_v25 = vadd.f32 %v5167_v58, %v5154_v20 }
 0x21e   :  { %v5179_v60 = vpop.f32.mrf.mxu0 }
 0x21f   :  { %v5193_v63 = vpop.f32.mrf.mxu1  ;;  %v5180_v18 = vadd.f32 %v5179_v60, %v5166_v14 }
 0x221   :  { %v5194_v21 = vadd.f32 %v5193_v63, %v5180_v18 }
 0x226   :  { %v5207_v0 = vpop.f32.mrf.mxu2  ;;  %v5181_v5 = vpop.f32.mrf.mxu0 }
 0x227   :  { %v5221_v1 = vpop.f32.mrf.mxu3  ;;  %v5195_v7 = vpop.f32.mrf.mxu1  ;;  %v5208_v26 = vadd.f32 %v5207_v0, %v5194_v21  ;;  %v5182_v29 = vadd.f32 %v5181_v5, %v5168_v25 }
 0x229   :  { %v5222_v31 = vadd.f32 %v5221_v1, %v5208_v26  ;;  %v5196_v34 = vadd.f32 %v5195_v7, %v5182_v29 }
 0x22e   :  { %v5209_v11 = vpop.f32.mrf.mxu2 }
 0x22f   :  { %v5223_v13 = vpop.f32.mrf.mxu3  ;;  %v5210_v32 = vadd.f32 %v5209_v11, %v5196_v34 }
 0x231   :  { %v5224_v42 = vadd.f32 %v5223_v13, %v5210_v32 }
 0x23e   :  { %v5235_v22 = vpop.f32.mrf.mxu0 }
 0x23f   :  { %v5249_v19 = vpop.f32.mrf.mxu1  ;;  %v5236_v35 = vadd.f32 %v5235_v22, %v5222_v31 }
 0x241   :  { %v5250_v39 = vadd.f32 %v5249_v19, %v5236_v35 }
 0x246   :  { %v5263_v23 = vpop.f32.mrf.mxu2  ;;  %v5237_v30 = vpop.f32.mrf.mxu0 }
 0x247   :  { %v5277_v27 = vpop.f32.mrf.mxu3  ;;  %v5251_v33 = vpop.f32.mrf.mxu1  ;;  %v5264_v12 = vadd.f32 %v5263_v23, %v5250_v39  ;;  %v5238_v44 = vadd.f32 %v5237_v30, %v5224_v42 }
 0x249   :  { %v5278_v45 = vadd.f32 %v5277_v27, %v5264_v12  ;;  %v5252_v48 = vadd.f32 %v5251_v33, %v5238_v44 }
 0x24e   :  { %v5265_v36 = vpop.f32.mrf.mxu2 }
 0x24f   :  { %v5279_v37 = vpop.f32.mrf.mxu3  ;;  %v5266_v50 = vadd.f32 %v5265_v36, %v5252_v48 }
 0x251   :  { %v5280_v40 = vadd.f32 %v5279_v37, %v5266_v50 }
 0x25e   :  { %v5291_v41 = vpop.f32.mrf.mxu0 }
 0x25f   :  { %v5305_v43 = vpop.f32.mrf.mxu1  ;;  %v5292_v49 = vadd.f32 %v5291_v41, %v5278_v45 }
 0x261   :  { %v5306_v24 = vadd.f32 %v5305_v43, %v5292_v49 }
 0x266   :  { %v5319_v46 = vpop.f32.mrf.mxu2  ;;  %v5293_v15 = vpop.f32.mrf.mxu0 }
 0x267   :  { %v5333_v47 = vpop.f32.mrf.mxu3  ;;  %v5307_v51 = vpop.f32.mrf.mxu1  ;;  %v5320_v52 = vadd.f32 %v5319_v46, %v5306_v24  ;;  %v5294_v53 = vadd.f32 %v5293_v15, %v5280_v40 }
 0x269   :  { %v5334_v56 = vadd.f32 %v5333_v47, %v5320_v52  ;;  %v5308_v57 = vadd.f32 %v5307_v51, %v5294_v53 }
 0x26e   :  { %v5321_v54 = vpop.f32.mrf.mxu2 }
 0x26f   :  { %v5335_v55 = vpop.f32.mrf.mxu3  ;;  %v5322_v60 = vadd.f32 %v5321_v54, %v5308_v57 }
 0x271   :  { %v5336_v38 = vadd.f32 %v5335_v55, %v5322_v60 }
 0x27e   :  { %v5347_v28 = vpop.f32.mrf.mxu0 }
 0x27f   :  { %v5348_v58 = vadd.f32 %v5347_v28, %v5334_v56  ;;  %v5361_v59 = vpop.f32.mrf.mxu1 }
 0x281   :  { %v5362_v61 = vadd.f32 %v5361_v59, %v5348_v58 }
 0x286   :  { %v5375_v62 = vpop.f32.mrf.mxu2  ;;  %v5349_v0 = vpop.f32.mrf.mxu0 }
 0x287   :  { %v5389_v63 = vpop.f32.mrf.mxu3  ;;  %v5376_v17 = vadd.f32 %v5375_v62, %v5362_v61  ;;  %v5350_v2 = vadd.f32 %v5349_v0, %v5336_v38  ;;  %v5363_v3 = vpop.f32.mrf.mxu1 }
 0x289   :  { %v5390_v1 = vadd.f32 %v5389_v63, %v5376_v17  ;;  %v5364_v4 = vadd.f32 %v5363_v3, %v5350_v2 }
 0x28b   :  { %5394 = vst [vmem:[%s10309_s3] sm:$0xff] %v5390_v1 }
 0x28e   :  { %v5377_v5 = vpop.f32.mrf.mxu2 }
 0x28f   :  { %v5378_v6 = vadd.f32 %v5377_v5, %v5364_v4  ;;  %v5391_v7 = vpop.f32.mrf.mxu3 }
 0x291   :  { %v5392_v8 = vadd.f32 %v5391_v7, %v5378_v6 }
 0x293   :  { %5395 = vst [vmem:[%s10309_s3 + $0x8] sm:$0xff] %v5392_v8 }

</bundles_post_ra>
